<compile_context>
chip_gen: v5e
topology: v5e:2x2
jax: 0.10.0
libtpu: 0.0.40
codegen_flags: <defaults>
</compile_context>

<pallas_src>
import jax
import jax.numpy as jnp
from jax import lax
from jax.experimental import pallas as pl
from jax.experimental.pallas import tpu as pltpu


_BI_A = 8  # images per grid step for kernel A


def _batch_block_b(n):
    """Images per grid step for kernel B: a multiple of 8, capped at 64 (VMEM-safe on v5e/v7x)."""
    if n >= 64:
        return 64
    return ((n + 7) // 8) * 8


# ----------------------------- Pallas kernels ------------------------------

def _conv_pool_kernel(cols_ref, w_ref, b_ref, o_ref):
    """conv1-as-matmul + bias + ReLU + 2x2 max-pool for a block of 8 images.

    cols_ref: (4*8*144, 32) bf16 -- im2col rows ordered (pool-tap | image | oh | ow),
              features k = kh*5+kw zero-padded 25->32.
    w_ref:    (32, 128) bf16 (10 valid output channels), b_ref: (1, 128) f32.
    o_ref:    (8*144, 128) bf16.
    relu(maxpool(conv+b)) == maxpool(relu(conv+b)) since ReLU is monotone.
    """
    tm = cols_ref.shape[0] // 4                                   # pooled rows per block
    acc = jnp.dot(cols_ref[...], w_ref[...], preferred_element_type=jnp.float32)
    acc = jnp.maximum(acc + b_ref[...], 0.0).reshape(4, tm, 128)  # layout no-op (tm % 8 == 0)
    o_ref[...] = jnp.maximum(jnp.maximum(acc[0], acc[1]),
                             jnp.maximum(acc[2], acc[3])).astype(o_ref.dtype)


def _tail_kernel(cols_ref, w2_ref, b2_ref, w3_ref, b3_ref, w4_ref, b4_ref, o_ref):
    """conv2(+bias+relu+pool) -> fc1(+relu) -> fc2 -> log_softmax for a block of BB images.

    cols_ref: (4*16*BB, 256) bf16  conv2 im2col rows ordered (pool-tap | position p | image);
              features ci*25 + kh*5 + kw, K padded 250->256.
    w2_ref:   (256, 128) bf16, b2_ref: (1, 128) f32
    w3_ref:   (16, 128, 128) bf16  (fc1 weight per 4x4 spatial position p = h*4 + w)
    b3_ref:   (1, 128) f32
    w4_ref:   (128, 128) bf16, b4_ref: (1, 128) f32 (padded classes carry -1e30 bias)
    o_ref:    (BB, 128) f32        (wrapper slices [:, :10])
    """
    bb = cols_ref.shape[0] // 64

    # conv2: all 4 pool taps in one matmul, then max-reduce over the tap axis.
    acc = jnp.dot(cols_ref[...], w2_ref[...], preferred_element_type=jnp.float32)
    acc = jnp.maximum(acc + b2_ref[...], 0.0).reshape(4, 16, bb, 128)  # no-op (bb % 8 == 0)
    pooled = jnp.maximum(jnp.maximum(acc[0], acc[1]),
                         jnp.maximum(acc[2], acc[3]))                  # (16, BB, 128) f32

    # TODO(synk): Dropout2d / F.dropout are identity in eval mode; training-mode PRNG masking
    # (pltpu.prng_seed / pltpu.prng_random_bits) is not implemented.

    # fc1: contract over the 16 spatial positions with per-position (128,128) weight slabs.
    # 4 independent partial accumulators (tree-summed) -> no 16-deep serial MXU dependency chain;
    # pooled[p] is a contiguous leading-dim slice.
    def part(p0):
        a = jnp.dot(pooled[p0].astype(jnp.bfloat16), w3_ref[p0],
                    preferred_element_type=jnp.float32)
        for p in range(p0 + 1, p0 + 4):
            a = a + jnp.dot(pooled[p].astype(jnp.bfloat16), w3_ref[p],
                            preferred_element_type=jnp.float32)
        return a

    h = (part(0) + part(4)) + (part(8) + part(12))
    h = jnp.maximum(h + b3_ref[...], 0.0)

    # fc2 + log_softmax epilogue in f32 (padded classes have -1e30 bias -> vanish under exp).
    logits = jnp.dot(h.astype(jnp.bfloat16), w4_ref[...],
                     preferred_element_type=jnp.float32) + b4_ref[...]
    mx = jnp.max(logits, axis=-1, keepdims=True)
    s = logits - mx
    lse = jnp.log(jnp.sum(jnp.exp(s), axis=-1, keepdims=True))
    o_ref[...] = s - lse


# --------------------------- XLA glue (im2col) ------------------------------

def _conv1_cols(x, bi):
    """x: (N,1,28,28) f32 -> (N*4*144, 32) bf16.

    Row order (batch-block | pool-tap th*2+tw | image-in-block | oh | ow) so one (4*bi*144, 32)
    block per grid step carries all 4 pool taps of `bi` images; k = kh*5+kw, padded 25->32."""
    n = x.shape[0]
    p = jnp.stack([x[:, 0, i:i + 24, j:j + 24] for i in range(5) for j in range(5)],
                  axis=1)                                       # (N, 25, 24, 24)
    p = p.reshape(n // bi, bi, 25, 12, 2, 12, 2)                # (nb, nw, k, oh, th, ow, tw)
    p = jnp.transpose(p, (0, 4, 6, 1, 3, 5, 2))                 # (nb, th, tw, nw, oh, ow, k)
    p = p.reshape(n * 4 * 144, 25)
    p = jnp.pad(p, ((0, 0), (0, 7)))                            # K 25 -> 32 (NOT 128)
    return p.astype(jnp.bfloat16)


def _conv2_cols(y1, n, bb):
    """y1: (N*144, 128) bf16, rows (n, oh, ow), first 10 channels valid
    -> (N*4*16, 256) bf16 conv2 im2col; row order (batch-block | pool-tap | p=oh2*4+ow2 | image);
    feature = ci*25 + kh*5 + kw, padded 250->256."""
    y = y1.reshape(n, 12, 12, 128)[:, :, :, :10]                # (N, 12, 12, 10)
    p = jnp.stack([y[:, i:i + 8, j:j + 8, :] for i in range(5) for j in range(5)],
                  axis=3)                                       # (N, 8, 8, 25, 10)
    p = jnp.transpose(p, (0, 1, 2, 4, 3)).reshape(n, 8, 8, 250)  # feature = ci*25 + kh*5+kw
    p = p.reshape(n // bb, bb, 4, 2, 4, 2, 250)                 # (nb, nw, oh2, th, ow2, tw, k)
    p = jnp.transpose(p, (0, 3, 5, 2, 4, 1, 6))                 # (nb, th, tw, oh2, ow2, nw, k)
    p = p.reshape(n * 64, 250)
    p = jnp.pad(p, ((0, 0), (0, 6)))                            # K 250 -> 256
    return p


# -------------------------------- the model ---------------------------------

def init_params(key):
    def uniform(k, shape, fan_in):
        bound = 1.0 / float(fan_in) ** 0.5
        return jax.random.uniform(k, shape, jnp.float32, -bound, bound)

    ks = jax.random.split(key, 8)
    return {
        "conv1_w": uniform(ks[0], (10, 1, 5, 5), 1 * 5 * 5),
        "conv1_b": uniform(ks[1], (10,), 1 * 5 * 5),
        "conv2_w": uniform(ks[2], (20, 10, 5, 5), 10 * 5 * 5),
        "conv2_b": uniform(ks[3], (20,), 10 * 5 * 5),
        "fc1_w":   uniform(ks[4], (50, 320), 320),
        "fc1_b":   uniform(ks[5], (50,), 320),
        "fc2_w":   uniform(ks[6], (10, 50), 50),
        "fc2_b":   uniform(ks[7], (10,), 50),
    }


def pack_params(p):
    """One-time weight packing: transpose, zero-pad to lane/sublane-friendly shapes, bf16."""
    f32, bf16 = jnp.float32, jnp.bfloat16
    w1 = jnp.zeros((32, 128), f32).at[:25, :10].set(p["conv1_w"].reshape(10, 25).T)
    b1 = jnp.zeros((1, 128), f32).at[0, :10].set(p["conv1_b"])
    w2 = jnp.zeros((256, 128), f32).at[:250, :20].set(p["conv2_w"].reshape(20, 250).T)
    b2 = jnp.zeros((1, 128), f32).at[0, :20].set(p["conv2_b"])
    # PyTorch flatten order is c*16 + (h*4+w); kernel layout is [p=h*4+w, c, j].
    fc1 = p["fc1_w"].reshape(50, 20, 16)                        # (j, c, p)
    w3 = jnp.zeros((16, 128, 128), f32).at[:, :20, :50].set(jnp.transpose(fc1, (2, 1, 0)))
    b3 = jnp.zeros((1, 128), f32).at[0, :50].set(p["fc1_b"])
    w4 = jnp.zeros((128, 128), f32).at[:50, :10].set(p["fc2_w"].T)
    b4 = jnp.full((1, 128), -1e30, f32).at[0, :10].set(p["fc2_b"])
    return {
        "w1": w1.astype(bf16), "b1": b1,
        "w2": w2.astype(bf16), "b2": b2,
        "w3": w3.astype(bf16), "b3": b3,
        "w4": w4.astype(bf16), "b4": b4,
    }


def net_forward(packed, x):
    # x: (N, 1, 28, 28) NCHW f32 (28x28 implied by fc1 expecting 320 = 20*4*4)
    n = x.shape[0]
    bb = _batch_block_b(n)
    n_pad = -(-n // bb) * bb                                    # multiple of bb (and of 8)
    if n_pad != n:
        x = jnp.pad(x, ((0, n_pad - n), (0, 0), (0, 0), (0, 0)))

    # --- kernel A: conv1 + bias + ReLU + 2x2 max-pool, 8 images per grid step ---
    cols1 = _conv1_cols(x, _BI_A)                               # (n_pad*576, 32) bf16
    y1 = pl.pallas_call(
        _conv_pool_kernel,
        out_shape=jax.ShapeDtypeStruct((n_pad * 144, 128), jnp.bfloat16),
        grid=(n_pad // _BI_A,),
        in_specs=[
            pl.BlockSpec((4 * _BI_A * 144, 32), lambda i: (i, 0)),
            pl.BlockSpec((32, 128), lambda i: (0, 0)),
            pl.BlockSpec((1, 128), lambda i: (0, 0)),
        ],
        out_specs=pl.BlockSpec((_BI_A * 144, 128), lambda i: (i, 0)),
        compiler_params=pltpu.CompilerParams(
            dimension_semantics=("parallel",)),
    )(cols1, packed["w1"], packed["b1"])

    # --- kernel B: conv2+bias+ReLU+pool -> fc1+ReLU -> fc2 -> log_softmax, bb images/step ---
    cols2 = _conv2_cols(y1, n_pad, bb)                          # (n_pad*64, 256) bf16
    out = pl.pallas_call(
        _tail_kernel,
        out_shape=jax.ShapeDtypeStruct((n_pad, 128), jnp.float32),
        grid=(n_pad // bb,),
        in_specs=[
            pl.BlockSpec((64 * bb, 256), lambda i: (i, 0)),
            pl.BlockSpec((256, 128), lambda i: (0, 0)),
            pl.BlockSpec((1, 128), lambda i: (0, 0)),
            pl.BlockSpec((16, 128, 128), lambda i: (0, 0, 0)),
            pl.BlockSpec((1, 128), lambda i: (0, 0)),
            pl.BlockSpec((128, 128), lambda i: (0, 0)),
            pl.BlockSpec((1, 128), lambda i: (0, 0)),
        ],
        out_specs=pl.BlockSpec((bb, 128), lambda i: (i, 0)),
        compiler_params=pltpu.CompilerParams(
            dimension_semantics=("parallel",)),
    )(cols2, packed["w2"], packed["b2"], packed["w3"], packed["b3"],
      packed["w4"], packed["b4"])
    return out[:n, :10]                                         # drop batch + lane padding


# ------------------------- plain-JAX reference (check) ----------------------

def net_reference(params, x):
    dn = ("NCHW", "OIHW", "NCHW")
    y = lax.conv_general_dilated(x, params["conv1_w"], (1, 1), "VALID",
                                 dimension_numbers=dn)
    y = y + params["conv1_b"][None, :, None, None]
    y = lax.reduce_window(y, -jnp.inf, lax.max, (1, 1, 2, 2), (1, 1, 2, 2), "VALID")
    y = jnp.maximum(y, 0.0)
    y = lax.conv_general_dilated(y, params["conv2_w"], (1, 1), "VALID",
                                 dimension_numbers=dn)
    y = y + params["conv2_b"][None, :, None, None]
    y = lax.reduce_window(y, -jnp.inf, lax.max, (1, 1, 2, 2), (1, 1, 2, 2), "VALID")
    y = jnp.maximum(y, 0.0)
    y = y.reshape(y.shape[0], -1)
    y = jnp.maximum(y @ params["fc1_w"].T + params["fc1_b"], 0.0)
    y = y @ params["fc2_w"].T + params["fc2_b"]
    return jax.nn.log_softmax(y, axis=1)


if __name__ == "__main__":
    key = jax.random.PRNGKey(0)
    pkey, xkey = jax.random.split(key)
    params = init_params(pkey)
    packed = pack_params(params)
    x = jax.random.normal(xkey, (2, 1, 28, 28), dtype=jnp.float32)

    fwd = jax.jit(net_forward)
    out = jax.block_until_ready(fwd(packed, x))

    assert out.shape == (2, 10), out.shape
    # log_softmax rows must exponentiate-sum to ~1
    assert bool(jnp.all(jnp.abs(jnp.sum(jnp.exp(out), axis=1) - 1.0) < 1e-4))
    # loose check vs f32 reference (bf16 MXU operands)
    ref = jax.jit(net_reference)(params, x)
    err = float(jnp.max(jnp.abs(out - ref)))
    assert err < 0.1, err
    print("KERNEL_OK")
</pallas_src>

<mosaic_0001>
module attributes {stable_mosaic.version = 11 : i64} {
  func.func @_conv_pool_kernel(%arg0: i32, %arg1: memref<4608x32xbf16, #tpu.memory_space<vmem>>, %arg2: memref<32x128xbf16, #tpu.memory_space<vmem>>, %arg3: memref<1x128xf32, #tpu.memory_space<vmem>>, %arg4: memref<1152x128xbf16, #tpu.memory_space<vmem>>) attributes {dimension_semantics = [#tpu.dimension_semantics<parallel>], iteration_bounds = array<i64: 1>, scalar_prefetch = 0 : i64, scratch_operands = 0 : i64, tpu.core_type = #tpu.core_type<tc>, window_params = [{transform_indices = @transform_0, window_bounds = array<i64: 4608, 32>}, {pipeline_mode = #tpu.pipeline_mode<synchronous>, transform_indices = @transform_1, window_bounds = array<i64: 32, 128>}, {pipeline_mode = #tpu.pipeline_mode<synchronous>, transform_indices = @transform_2, window_bounds = array<i64: 1, 128>}, {transform_indices = @transform_3, window_bounds = array<i64: 1152, 128>}]} {
    %c0 = arith.constant 0 : index
    %c0_0 = arith.constant 0 : index
    %0 = vector.load %arg1[%c0, %c0_0] : memref<4608x32xbf16, #tpu.memory_space<vmem>>, vector<4608x32xbf16>
    %c0_1 = arith.constant 0 : index
    %c0_2 = arith.constant 0 : index
    %1 = vector.load %arg2[%c0_1, %c0_2] : memref<32x128xbf16, #tpu.memory_space<vmem>>, vector<32x128xbf16>
    %cst = arith.constant dense<0.000000e+00> : vector<4608x128xf32>
    %2 = tpu.matmul %0, %1, %cst {dimension_numbers = #tpu.dot_dimension_numbers<[1], [0], [0], [1], [0, 0, 1, 1], [], []>} : vector<4608x32xbf16>, vector<32x128xbf16>, vector<4608x128xf32> -> vector<4608x128xf32>
    %c0_3 = arith.constant 0 : index
    %c0_4 = arith.constant 0 : index
    %3 = vector.load %arg3[%c0_3, %c0_4] : memref<1x128xf32, #tpu.memory_space<vmem>>, vector<1x128xf32>
    %4 = vector.broadcast %3 : vector<1x128xf32> to vector<4608x128xf32>
    %5 = arith.addf %2, %4 : vector<4608x128xf32>
    %cst_5 = arith.constant 0.000000e+00 : f32
    %6 = vector.broadcast %cst_5 : f32 to vector<4608x128xf32>
    %7 = arith.maximumf %5, %6 : vector<4608x128xf32>
    %8 = vector.shape_cast %7 : vector<4608x128xf32> to vector<4x1152x128xf32>
    %9 = vector.extract_strided_slice %8 {offsets = [0, 0, 0], sizes = [1, 1152, 128], strides = [1, 1, 1]} : vector<4x1152x128xf32> to vector<1x1152x128xf32>
    %10 = vector.shape_cast %9 : vector<1x1152x128xf32> to vector<1152x128xf32>
    %11 = vector.extract_strided_slice %8 {offsets = [1, 0, 0], sizes = [1, 1152, 128], strides = [1, 1, 1]} : vector<4x1152x128xf32> to vector<1x1152x128xf32>
    %12 = vector.shape_cast %11 : vector<1x1152x128xf32> to vector<1152x128xf32>
    %13 = arith.maximumf %10, %12 : vector<1152x128xf32>
    %14 = vector.extract_strided_slice %8 {offsets = [2, 0, 0], sizes = [1, 1152, 128], strides = [1, 1, 1]} : vector<4x1152x128xf32> to vector<1x1152x128xf32>
    %15 = vector.shape_cast %14 : vector<1x1152x128xf32> to vector<1152x128xf32>
    %16 = vector.extract_strided_slice %8 {offsets = [3, 0, 0], sizes = [1, 1152, 128], strides = [1, 1, 1]} : vector<4x1152x128xf32> to vector<1x1152x128xf32>
    %17 = vector.shape_cast %16 : vector<1x1152x128xf32> to vector<1152x128xf32>
    %18 = arith.maximumf %15, %17 : vector<1152x128xf32>
    %19 = arith.maximumf %13, %18 : vector<1152x128xf32>
    %20 = arith.truncf %19 : vector<1152x128xf32> to vector<1152x128xbf16>
    %c0_6 = arith.constant 0 : index
    %c0_7 = arith.constant 0 : index
    %21 = vector.load %arg4[%c0_6, %c0_7] : memref<1152x128xbf16, #tpu.memory_space<vmem>>, vector<1152x128xbf16>
    tpu.vector_store %arg4[%c0_6, %c0_7], %20 {strides = array<i32>} : memref<1152x128xbf16, #tpu.memory_space<vmem>>, vector<1152x128xbf16>,
    return
  }
  func.func @transform_0(%arg0: i32) -> (i32, i32) {
    %c0_i32 = arith.constant 0 : i32
    %c0_i32_0 = arith.constant 0 : i32
    return %arg0, %c0_i32 : i32, i32
  }
  func.func @transform_1(%arg0: i32) -> (i32, i32) {
    %c0_i32 = arith.constant 0 : i32
    %c0_i32_0 = arith.constant 0 : i32
    %c0_i32_1 = arith.constant 0 : i32
    return %c0_i32, %c0_i32_0 : i32, i32
  }
  func.func @transform_2(%arg0: i32) -> (i32, i32) {
    %c0_i32 = arith.constant 0 : i32
    %c0_i32_0 = arith.constant 0 : i32
    %c0_i32_1 = arith.constant 0 : i32
    return %c0_i32, %c0_i32_0 : i32, i32
  }
  func.func @transform_3(%arg0: i32) -> (i32, i32) {
    %c0_i32 = arith.constant 0 : i32
    %c0_i32_0 = arith.constant 0 : i32
    return %arg0, %c0_i32 : i32, i32
  }
}

module attributes {stable_mosaic.version = 11 : i64} {
  func.func @_tail_kernel(%arg0: i32, %arg1: memref<512x256xbf16, #tpu.memory_space<vmem>>, %arg2: memref<256x128xbf16, #tpu.memory_space<vmem>>, %arg3: memref<1x128xf32, #tpu.memory_space<vmem>>, %arg4: memref<16x128x128xbf16, #tpu.memory_space<vmem>>, %arg5: memref<1x128xf32, #tpu.memory_space<vmem>>, %arg6: memref<128x128xbf16, #tpu.memory_space<vmem>>, %arg7: memref<1x128xf32, #tpu.memory_space<vmem>>, %arg8: memref<8x128xf32, #tpu.memory_space<vmem>>) attributes {dimension_semantics = [#tpu.dimension_semantics<parallel>], iteration_bounds = array<i64: 1>, scalar_prefetch = 0 : i64, scratch_operands = 0 : i64, tpu.core_type = #tpu.core_type<tc>, window_params = [{transform_indices = @transform_0, window_bounds = array<i64: 512, 256>}, {pipeline_mode = #tpu.pipeline_mode<synchronous>, transform_indices = @transform_1, window_bounds = array<i64: 256, 128>}, {pipeline_mode = #tpu.pipeline_mode<synchronous>, transform_indices = @transform_2, window_bounds = array<i64: 1, 128>}, {pipeline_mode = #tpu.pipeline_mode<synchronous>, transform_indices = @transform_3, window_bounds = array<i64: 16, 128, 128>}, {pipeline_mode = #tpu.pipeline_mode<synchronous>, transform_indices = @transform_4, window_bounds = array<i64: 1, 128>}, {pipeline_mode = #tpu.pipeline_mode<synchronous>, transform_indices = @transform_5, window_bounds = array<i64: 128, 128>}, {pipeline_mode = #tpu.pipeline_mode<synchronous>, transform_indices = @transform_6, window_bounds = array<i64: 1, 128>}, {transform_indices = @transform_7, window_bounds = array<i64: 8, 128>}]} {
    %c0 = arith.constant 0 : index
    %c0_0 = arith.constant 0 : index
    %0 = vector.load %arg1[%c0, %c0_0] : memref<512x256xbf16, #tpu.memory_space<vmem>>, vector<512x256xbf16>
    %c0_1 = arith.constant 0 : index
    %c0_2 = arith.constant 0 : index
    %1 = vector.load %arg2[%c0_1, %c0_2] : memref<256x128xbf16, #tpu.memory_space<vmem>>, vector<256x128xbf16>
    %cst = arith.constant dense<0.000000e+00> : vector<512x128xf32>
    %2 = tpu.matmul %0, %1, %cst {dimension_numbers = #tpu.dot_dimension_numbers<[1], [0], [0], [1], [0, 0, 1, 1], [], []>} : vector<512x256xbf16>, vector<256x128xbf16>, vector<512x128xf32> -> vector<512x128xf32>
    %c0_3 = arith.constant 0 : index
    %c0_4 = arith.constant 0 : index
    %3 = vector.load %arg3[%c0_3, %c0_4] : memref<1x128xf32, #tpu.memory_space<vmem>>, vector<1x128xf32>
    %4 = vector.broadcast %3 : vector<1x128xf32> to vector<512x128xf32>
    %5 = arith.addf %2, %4 : vector<512x128xf32>
    %cst_5 = arith.constant 0.000000e+00 : f32
    %6 = vector.broadcast %cst_5 : f32 to vector<512x128xf32>
    %7 = arith.maximumf %5, %6 : vector<512x128xf32>
    %8 = vector.shape_cast %7 : vector<512x128xf32> to vector<4x16x8x128xf32>
    %9 = vector.extract_strided_slice %8 {offsets = [0, 0, 0, 0], sizes = [1, 16, 8, 128], strides = [1, 1, 1, 1]} : vector<4x16x8x128xf32> to vector<1x16x8x128xf32>
    %10 = vector.shape_cast %9 : vector<1x16x8x128xf32> to vector<16x8x128xf32>
    %11 = vector.extract_strided_slice %8 {offsets = [1, 0, 0, 0], sizes = [1, 16, 8, 128], strides = [1, 1, 1, 1]} : vector<4x16x8x128xf32> to vector<1x16x8x128xf32>
    %12 = vector.shape_cast %11 : vector<1x16x8x128xf32> to vector<16x8x128xf32>
    %13 = arith.maximumf %10, %12 : vector<16x8x128xf32>
    %14 = vector.extract_strided_slice %8 {offsets = [2, 0, 0, 0], sizes = [1, 16, 8, 128], strides = [1, 1, 1, 1]} : vector<4x16x8x128xf32> to vector<1x16x8x128xf32>
    %15 = vector.shape_cast %14 : vector<1x16x8x128xf32> to vector<16x8x128xf32>
    %16 = vector.extract_strided_slice %8 {offsets = [3, 0, 0, 0], sizes = [1, 16, 8, 128], strides = [1, 1, 1, 1]} : vector<4x16x8x128xf32> to vector<1x16x8x128xf32>
    %17 = vector.shape_cast %16 : vector<1x16x8x128xf32> to vector<16x8x128xf32>
    %18 = arith.maximumf %15, %17 : vector<16x8x128xf32>
    %19 = arith.maximumf %13, %18 : vector<16x8x128xf32>
    %20 = vector.extract_strided_slice %19 {offsets = [0, 0, 0], sizes = [1, 8, 128], strides = [1, 1, 1]} : vector<16x8x128xf32> to vector<1x8x128xf32>
    %21 = vector.shape_cast %20 : vector<1x8x128xf32> to vector<8x128xf32>
    %22 = arith.truncf %21 : vector<8x128xf32> to vector<8x128xbf16>
    %c0_6 = arith.constant 0 : index
    %c0_7 = arith.constant 0 : index
    %c0_8 = arith.constant 0 : index
    %23 = vector.load %arg4[%c0_6, %c0_7, %c0_8] : memref<16x128x128xbf16, #tpu.memory_space<vmem>>, vector<1x128x128xbf16>
    %24 = vector.shape_cast %23 : vector<1x128x128xbf16> to vector<128x128xbf16>
    %cst_9 = arith.constant dense<0.000000e+00> : vector<8x128xf32>
    %25 = tpu.matmul %22, %24, %cst_9 {dimension_numbers = #tpu.dot_dimension_numbers<[1], [0], [0], [1], [0, 0, 1, 1], [], []>} : vector<8x128xbf16>, vector<128x128xbf16>, vector<8x128xf32> -> vector<8x128xf32>
    %26 = vector.extract_strided_slice %19 {offsets = [1, 0, 0], sizes = [1, 8, 128], strides = [1, 1, 1]} : vector<16x8x128xf32> to vector<1x8x128xf32>
    %27 = vector.shape_cast %26 : vector<1x8x128xf32> to vector<8x128xf32>
    %28 = arith.truncf %27 : vector<8x128xf32> to vector<8x128xbf16>
    %c1 = arith.constant 1 : index
    %c0_10 = arith.constant 0 : index
    %c0_11 = arith.constant 0 : index
    %29 = vector.load %arg4[%c1, %c0_10, %c0_11] : memref<16x128x128xbf16, #tpu.memory_space<vmem>>, vector<1x128x128xbf16>
    %30 = vector.shape_cast %29 : vector<1x128x128xbf16> to vector<128x128xbf16>
    %cst_12 = arith.constant dense<0.000000e+00> : vector<8x128xf32>
    %31 = tpu.matmul %28, %30, %cst_12 {dimension_numbers = #tpu.dot_dimension_numbers<[1], [0], [0], [1], [0, 0, 1, 1], [], []>} : vector<8x128xbf16>, vector<128x128xbf16>, vector<8x128xf32> -> vector<8x128xf32>
    %32 = arith.addf %25, %31 : vector<8x128xf32>
    %33 = vector.extract_strided_slice %19 {offsets = [2, 0, 0], sizes = [1, 8, 128], strides = [1, 1, 1]} : vector<16x8x128xf32> to vector<1x8x128xf32>
    %34 = vector.shape_cast %33 : vector<1x8x128xf32> to vector<8x128xf32>
    %35 = arith.truncf %34 : vector<8x128xf32> to vector<8x128xbf16>
    %c2 = arith.constant 2 : index
    %c0_13 = arith.constant 0 : index
    %c0_14 = arith.constant 0 : index
    %36 = vector.load %arg4[%c2, %c0_13, %c0_14] : memref<16x128x128xbf16, #tpu.memory_space<vmem>>, vector<1x128x128xbf16>
    %37 = vector.shape_cast %36 : vector<1x128x128xbf16> to vector<128x128xbf16>
    %cst_15 = arith.constant dense<0.000000e+00> : vector<8x128xf32>
    %38 = tpu.matmul %35, %37, %cst_15 {dimension_numbers = #tpu.dot_dimension_numbers<[1], [0], [0], [1], [0, 0, 1, 1], [], []>} : vector<8x128xbf16>, vector<128x128xbf16>, vector<8x128xf32> -> vector<8x128xf32>
    %39 = arith.addf %32, %38 : vector<8x128xf32>
    %40 = vector.extract_strided_slice %19 {offsets = [3, 0, 0], sizes = [1, 8, 128], strides = [1, 1, 1]} : vector<16x8x128xf32> to vector<1x8x128xf32>
    %41 = vector.shape_cast %40 : vector<1x8x128xf32> to vector<8x128xf32>
    %42 = arith.truncf %41 : vector<8x128xf32> to vector<8x128xbf16>
    %c3 = arith.constant 3 : index
    %c0_16 = arith.constant 0 : index
    %c0_17 = arith.constant 0 : index
    %43 = vector.load %arg4[%c3, %c0_16, %c0_17] : memref<16x128x128xbf16, #tpu.memory_space<vmem>>, vector<1x128x128xbf16>
    %44 = vector.shape_cast %43 : vector<1x128x128xbf16> to vector<128x128xbf16>
    %cst_18 = arith.constant dense<0.000000e+00> : vector<8x128xf32>
    %45 = tpu.matmul %42, %44, %cst_18 {dimension_numbers = #tpu.dot_dimension_numbers<[1], [0], [0], [1], [0, 0, 1, 1], [], []>} : vector<8x128xbf16>, vector<128x128xbf16>, vector<8x128xf32> -> vector<8x128xf32>
    %46 = arith.addf %39, %45 : vector<8x128xf32>
    %47 = vector.extract_strided_slice %19 {offsets = [4, 0, 0], sizes = [1, 8, 128], strides = [1, 1, 1]} : vector<16x8x128xf32> to vector<1x8x128xf32>
    %48 = vector.shape_cast %47 : vector<1x8x128xf32> to vector<8x128xf32>
    %49 = arith.truncf %48 : vector<8x128xf32> to vector<8x128xbf16>
    %c4 = arith.constant 4 : index
    %c0_19 = arith.constant 0 : index
    %c0_20 = arith.constant 0 : index
    %50 = vector.load %arg4[%c4, %c0_19, %c0_20] : memref<16x128x128xbf16, #tpu.memory_space<vmem>>, vector<1x128x128xbf16>
    %51 = vector.shape_cast %50 : vector<1x128x128xbf16> to vector<128x128xbf16>
    %cst_21 = arith.constant dense<0.000000e+00> : vector<8x128xf32>
    %52 = tpu.matmul %49, %51, %cst_21 {dimension_numbers = #tpu.dot_dimension_numbers<[1], [0], [0], [1], [0, 0, 1, 1], [], []>} : vector<8x128xbf16>, vector<128x128xbf16>, vector<8x128xf32> -> vector<8x128xf32>
    %53 = vector.extract_strided_slice %19 {offsets = [5, 0, 0], sizes = [1, 8, 128], strides = [1, 1, 1]} : vector<16x8x128xf32> to vector<1x8x128xf32>
    %54 = vector.shape_cast %53 : vector<1x8x128xf32> to vector<8x128xf32>
    %55 = arith.truncf %54 : vector<8x128xf32> to vector<8x128xbf16>
    %c5 = arith.constant 5 : index
    %c0_22 = arith.constant 0 : index
    %c0_23 = arith.constant 0 : index
    %56 = vector.load %arg4[%c5, %c0_22, %c0_23] : memref<16x128x128xbf16, #tpu.memory_space<vmem>>, vector<1x128x128xbf16>
    %57 = vector.shape_cast %56 : vector<1x128x128xbf16> to vector<128x128xbf16>
    %cst_24 = arith.constant dense<0.000000e+00> : vector<8x128xf32>
    %58 = tpu.matmul %55, %57, %cst_24 {dimension_numbers = #tpu.dot_dimension_numbers<[1], [0], [0], [1], [0, 0, 1, 1], [], []>} : vector<8x128xbf16>, vector<128x128xbf16>, vector<8x128xf32> -> vector<8x128xf32>
    %59 = arith.addf %52, %58 : vector<8x128xf32>
    %60 = vector.extract_strided_slice %19 {offsets = [6, 0, 0], sizes = [1, 8, 128], strides = [1, 1, 1]} : vector<16x8x128xf32> to vector<1x8x128xf32>
    %61 = vector.shape_cast %60 : vector<1x8x128xf32> to vector<8x128xf32>
    %62 = arith.truncf %61 : vector<8x128xf32> to vector<8x128xbf16>
    %c6 = arith.constant 6 : index
    %c0_25 = arith.constant 0 : index
    %c0_26 = arith.constant 0 : index
    %63 = vector.load %arg4[%c6, %c0_25, %c0_26] : memref<16x128x128xbf16, #tpu.memory_space<vmem>>, vector<1x128x128xbf16>
    %64 = vector.shape_cast %63 : vector<1x128x128xbf16> to vector<128x128xbf16>
    %cst_27 = arith.constant dense<0.000000e+00> : vector<8x128xf32>
    %65 = tpu.matmul %62, %64, %cst_27 {dimension_numbers = #tpu.dot_dimension_numbers<[1], [0], [0], [1], [0, 0, 1, 1], [], []>} : vector<8x128xbf16>, vector<128x128xbf16>, vector<8x128xf32> -> vector<8x128xf32>
    %66 = arith.addf %59, %65 : vector<8x128xf32>
    %67 = vector.extract_strided_slice %19 {offsets = [7, 0, 0], sizes = [1, 8, 128], strides = [1, 1, 1]} : vector<16x8x128xf32> to vector<1x8x128xf32>
    %68 = vector.shape_cast %67 : vector<1x8x128xf32> to vector<8x128xf32>
    %69 = arith.truncf %68 : vector<8x128xf32> to vector<8x128xbf16>
    %c7 = arith.constant 7 : index
    %c0_28 = arith.constant 0 : index
    %c0_29 = arith.constant 0 : index
    %70 = vector.load %arg4[%c7, %c0_28, %c0_29] : memref<16x128x128xbf16, #tpu.memory_space<vmem>>, vector<1x128x128xbf16>
    %71 = vector.shape_cast %70 : vector<1x128x128xbf16> to vector<128x128xbf16>
    %cst_30 = arith.constant dense<0.000000e+00> : vector<8x128xf32>
    %72 = tpu.matmul %69, %71, %cst_30 {dimension_numbers = #tpu.dot_dimension_numbers<[1], [0], [0], [1], [0, 0, 1, 1], [], []>} : vector<8x128xbf16>, vector<128x128xbf16>, vector<8x128xf32> -> vector<8x128xf32>
    %73 = arith.addf %66, %72 : vector<8x128xf32>
    %74 = arith.addf %46, %73 : vector<8x128xf32>
    %75 = vector.extract_strided_slice %19 {offsets = [8, 0, 0], sizes = [1, 8, 128], strides = [1, 1, 1]} : vector<16x8x128xf32> to vector<1x8x128xf32>
    %76 = vector.shape_cast %75 : vector<1x8x128xf32> to vector<8x128xf32>
    %77 = arith.truncf %76 : vector<8x128xf32> to vector<8x128xbf16>
    %c8 = arith.constant 8 : index
    %c0_31 = arith.constant 0 : index
    %c0_32 = arith.constant 0 : index
    %78 = vector.load %arg4[%c8, %c0_31, %c0_32] : memref<16x128x128xbf16, #tpu.memory_space<vmem>>, vector<1x128x128xbf16>
    %79 = vector.shape_cast %78 : vector<1x128x128xbf16> to vector<128x128xbf16>
    %cst_33 = arith.constant dense<0.000000e+00> : vector<8x128xf32>
    %80 = tpu.matmul %77, %79, %cst_33 {dimension_numbers = #tpu.dot_dimension_numbers<[1], [0], [0], [1], [0, 0, 1, 1], [], []>} : vector<8x128xbf16>, vector<128x128xbf16>, vector<8x128xf32> -> vector<8x128xf32>
    %81 = vector.extract_strided_slice %19 {offsets = [9, 0, 0], sizes = [1, 8, 128], strides = [1, 1, 1]} : vector<16x8x128xf32> to vector<1x8x128xf32>
    %82 = vector.shape_cast %81 : vector<1x8x128xf32> to vector<8x128xf32>
    %83 = arith.truncf %82 : vector<8x128xf32> to vector<8x128xbf16>
    %c9 = arith.constant 9 : index
    %c0_34 = arith.constant 0 : index
    %c0_35 = arith.constant 0 : index
    %84 = vector.load %arg4[%c9, %c0_34, %c0_35] : memref<16x128x128xbf16, #tpu.memory_space<vmem>>, vector<1x128x128xbf16>
    %85 = vector.shape_cast %84 : vector<1x128x128xbf16> to vector<128x128xbf16>
    %cst_36 = arith.constant dense<0.000000e+00> : vector<8x128xf32>
    %86 = tpu.matmul %83, %85, %cst_36 {dimension_numbers = #tpu.dot_dimension_numbers<[1], [0], [0], [1], [0, 0, 1, 1], [], []>} : vector<8x128xbf16>, vector<128x128xbf16>, vector<8x128xf32> -> vector<8x128xf32>
    %87 = arith.addf %80, %86 : vector<8x128xf32>
    %88 = vector.extract_strided_slice %19 {offsets = [10, 0, 0], sizes = [1, 8, 128], strides = [1, 1, 1]} : vector<16x8x128xf32> to vector<1x8x128xf32>
    %89 = vector.shape_cast %88 : vector<1x8x128xf32> to vector<8x128xf32>
    %90 = arith.truncf %89 : vector<8x128xf32> to vector<8x128xbf16>
    %c10 = arith.constant 10 : index
    %c0_37 = arith.constant 0 : index
    %c0_38 = arith.constant 0 : index
    %91 = vector.load %arg4[%c10, %c0_37, %c0_38] : memref<16x128x128xbf16, #tpu.memory_space<vmem>>, vector<1x128x128xbf16>
    %92 = vector.shape_cast %91 : vector<1x128x128xbf16> to vector<128x128xbf16>
    %cst_39 = arith.constant dense<0.000000e+00> : vector<8x128xf32>
    %93 = tpu.matmul %90, %92, %cst_39 {dimension_numbers = #tpu.dot_dimension_numbers<[1], [0], [0], [1], [0, 0, 1, 1], [], []>} : vector<8x128xbf16>, vector<128x128xbf16>, vector<8x128xf32> -> vector<8x128xf32>
    %94 = arith.addf %87, %93 : vector<8x128xf32>
    %95 = vector.extract_strided_slice %19 {offsets = [11, 0, 0], sizes = [1, 8, 128], strides = [1, 1, 1]} : vector<16x8x128xf32> to vector<1x8x128xf32>
    %96 = vector.shape_cast %95 : vector<1x8x128xf32> to vector<8x128xf32>
    %97 = arith.truncf %96 : vector<8x128xf32> to vector<8x128xbf16>
    %c11 = arith.constant 11 : index
    %c0_40 = arith.constant 0 : index
    %c0_41 = arith.constant 0 : index
    %98 = vector.load %arg4[%c11, %c0_40, %c0_41] : memref<16x128x128xbf16, #tpu.memory_space<vmem>>, vector<1x128x128xbf16>
    %99 = vector.shape_cast %98 : vector<1x128x128xbf16> to vector<128x128xbf16>
    %cst_42 = arith.constant dense<0.000000e+00> : vector<8x128xf32>
    %100 = tpu.matmul %97, %99, %cst_42 {dimension_numbers = #tpu.dot_dimension_numbers<[1], [0], [0], [1], [0, 0, 1, 1], [], []>} : vector<8x128xbf16>, vector<128x128xbf16>, vector<8x128xf32> -> vector<8x128xf32>
    %101 = arith.addf %94, %100 : vector<8x128xf32>
    %102 = vector.extract_strided_slice %19 {offsets = [12, 0, 0], sizes = [1, 8, 128], strides = [1, 1, 1]} : vector<16x8x128xf32> to vector<1x8x128xf32>
    %103 = vector.shape_cast %102 : vector<1x8x128xf32> to vector<8x128xf32>
    %104 = arith.truncf %103 : vector<8x128xf32> to vector<8x128xbf16>
    %c12 = arith.constant 12 : index
    %c0_43 = arith.constant 0 : index
    %c0_44 = arith.constant 0 : index
    %105 = vector.load %arg4[%c12, %c0_43, %c0_44] : memref<16x128x128xbf16, #tpu.memory_space<vmem>>, vector<1x128x128xbf16>
    %106 = vector.shape_cast %105 : vector<1x128x128xbf16> to vector<128x128xbf16>
    %cst_45 = arith.constant dense<0.000000e+00> : vector<8x128xf32>
    %107 = tpu.matmul %104, %106, %cst_45 {dimension_numbers = #tpu.dot_dimension_numbers<[1], [0], [0], [1], [0, 0, 1, 1], [], []>} : vector<8x128xbf16>, vector<128x128xbf16>, vector<8x128xf32> -> vector<8x128xf32>
    %108 = vector.extract_strided_slice %19 {offsets = [13, 0, 0], sizes = [1, 8, 128], strides = [1, 1, 1]} : vector<16x8x128xf32> to vector<1x8x128xf32>
    %109 = vector.shape_cast %108 : vector<1x8x128xf32> to vector<8x128xf32>
    %110 = arith.truncf %109 : vector<8x128xf32> to vector<8x128xbf16>
    %c13 = arith.constant 13 : index
    %c0_46 = arith.constant 0 : index
    %c0_47 = arith.constant 0 : index
    %111 = vector.load %arg4[%c13, %c0_46, %c0_47] : memref<16x128x128xbf16, #tpu.memory_space<vmem>>, vector<1x128x128xbf16>
    %112 = vector.shape_cast %111 : vector<1x128x128xbf16> to vector<128x128xbf16>
    %cst_48 = arith.constant dense<0.000000e+00> : vector<8x128xf32>
    %113 = tpu.matmul %110, %112, %cst_48 {dimension_numbers = #tpu.dot_dimension_numbers<[1], [0], [0], [1], [0, 0, 1, 1], [], []>} : vector<8x128xbf16>, vector<128x128xbf16>, vector<8x128xf32> -> vector<8x128xf32>
    %114 = arith.addf %107, %113 : vector<8x128xf32>
    %115 = vector.extract_strided_slice %19 {offsets = [14, 0, 0], sizes = [1, 8, 128], strides = [1, 1, 1]} : vector<16x8x128xf32> to vector<1x8x128xf32>
    %116 = vector.shape_cast %115 : vector<1x8x128xf32> to vector<8x128xf32>
    %117 = arith.truncf %116 : vector<8x128xf32> to vector<8x128xbf16>
    %c14 = arith.constant 14 : index
    %c0_49 = arith.constant 0 : index
    %c0_50 = arith.constant 0 : index
    %118 = vector.load %arg4[%c14, %c0_49, %c0_50] : memref<16x128x128xbf16, #tpu.memory_space<vmem>>, vector<1x128x128xbf16>
    %119 = vector.shape_cast %118 : vector<1x128x128xbf16> to vector<128x128xbf16>
    %cst_51 = arith.constant dense<0.000000e+00> : vector<8x128xf32>
    %120 = tpu.matmul %117, %119, %cst_51 {dimension_numbers = #tpu.dot_dimension_numbers<[1], [0], [0], [1], [0, 0, 1, 1], [], []>} : vector<8x128xbf16>, vector<128x128xbf16>, vector<8x128xf32> -> vector<8x128xf32>
    %121 = arith.addf %114, %120 : vector<8x128xf32>
    %122 = vector.extract_strided_slice %19 {offsets = [15, 0, 0], sizes = [1, 8, 128], strides = [1, 1, 1]} : vector<16x8x128xf32> to vector<1x8x128xf32>
    %123 = vector.shape_cast %122 : vector<1x8x128xf32> to vector<8x128xf32>
    %124 = arith.truncf %123 : vector<8x128xf32> to vector<8x128xbf16>
    %c15 = arith.constant 15 : index
    %c0_52 = arith.constant 0 : index
    %c0_53 = arith.constant 0 : index
    %125 = vector.load %arg4[%c15, %c0_52, %c0_53] : memref<16x128x128xbf16, #tpu.memory_space<vmem>>, vector<1x128x128xbf16>
    %126 = vector.shape_cast %125 : vector<1x128x128xbf16> to vector<128x128xbf16>
    %cst_54 = arith.constant dense<0.000000e+00> : vector<8x128xf32>
    %127 = tpu.matmul %124, %126, %cst_54 {dimension_numbers = #tpu.dot_dimension_numbers<[1], [0], [0], [1], [0, 0, 1, 1], [], []>} : vector<8x128xbf16>, vector<128x128xbf16>, vector<8x128xf32> -> vector<8x128xf32>
    %128 = arith.addf %121, %127 : vector<8x128xf32>
    %129 = arith.addf %101, %128 : vector<8x128xf32>
    %130 = arith.addf %74, %129 : vector<8x128xf32>
    %c0_55 = arith.constant 0 : index
    %c0_56 = arith.constant 0 : index
    %131 = vector.load %arg5[%c0_55, %c0_56] : memref<1x128xf32, #tpu.memory_space<vmem>>, vector<1x128xf32>
    %132 = vector.broadcast %131 : vector<1x128xf32> to vector<8x128xf32>
    %133 = arith.addf %130, %132 : vector<8x128xf32>
    %cst_57 = arith.constant 0.000000e+00 : f32
    %134 = vector.broadcast %cst_57 : f32 to vector<8x128xf32>
    %135 = arith.maximumf %133, %134 : vector<8x128xf32>
    %136 = arith.truncf %135 : vector<8x128xf32> to vector<8x128xbf16>
    %c0_58 = arith.constant 0 : index
    %c0_59 = arith.constant 0 : index
    %137 = vector.load %arg6[%c0_58, %c0_59] : memref<128x128xbf16, #tpu.memory_space<vmem>>, vector<128x128xbf16>
    %cst_60 = arith.constant dense<0.000000e+00> : vector<8x128xf32>
    %138 = tpu.matmul %136, %137, %cst_60 {dimension_numbers = #tpu.dot_dimension_numbers<[1], [0], [0], [1], [0, 0, 1, 1], [], []>} : vector<8x128xbf16>, vector<128x128xbf16>, vector<8x128xf32> -> vector<8x128xf32>
    %c0_61 = arith.constant 0 : index
    %c0_62 = arith.constant 0 : index
    %139 = vector.load %arg7[%c0_61, %c0_62] : memref<1x128xf32, #tpu.memory_space<vmem>>, vector<1x128xf32>
    %140 = vector.broadcast %139 : vector<1x128xf32> to vector<8x128xf32>
    %141 = arith.addf %138, %140 : vector<8x128xf32>
    %cst_63 = arith.constant dense<0xFF800000> : vector<8xf32>
    %142 = vector.multi_reduction <maximumf>, %141, %cst_63 [1] : vector<8x128xf32> to vector<8xf32>
    %143 = vector.shape_cast %142 : vector<8xf32> to vector<8x1xf32>
    %144 = vector.broadcast %143 : vector<8x1xf32> to vector<8x128xf32>
    %145 = arith.subf %141, %144 : vector<8x128xf32>
    %146 = math.exp %145 : vector<8x128xf32>
    %cst_64 = arith.constant dense<0.000000e+00> : vector<8xf32>
    %147 = vector.multi_reduction <add>, %146, %cst_64 [1] : vector<8x128xf32> to vector<8xf32>
    %148 = vector.shape_cast %147 : vector<8xf32> to vector<8x1xf32>
    %149 = math.log %148 : vector<8x1xf32>
    %150 = vector.broadcast %149 : vector<8x1xf32> to vector<8x128xf32>
    %151 = arith.subf %145, %150 : vector<8x128xf32>
    %c0_65 = arith.constant 0 : index
    %c0_66 = arith.constant 0 : index
    %152 = vector.load %arg8[%c0_65, %c0_66] : memref<8x128xf32, #tpu.memory_space<vmem>>, vector<8x128xf32>
    tpu.vector_store %arg8[%c0_65, %c0_66], %151 {strides = array<i32>} : memref<8x128xf32, #tpu.memory_space<vmem>>, vector<8x128xf32>,
    return
  }
  func.func @transform_0(%arg0: i32) -> (i32, i32) {
    %c0_i32 = arith.constant 0 : i32
    %c0_i32_0 = arith.constant 0 : i32
    return %arg0, %c0_i32 : i32, i32
  }
  func.func @transform_1(%arg0: i32) -> (i32, i32) {
    %c0_i32 = arith.constant 0 : i32
    %c0_i32_0 = arith.constant 0 : i32
    %c0_i32_1 = arith.constant 0 : i32
    return %c0_i32, %c0_i32_0 : i32, i32
  }
  func.func @transform_2(%arg0: i32) -> (i32, i32) {
    %c0_i32 = arith.constant 0 : i32
    %c0_i32_0 = arith.constant 0 : i32
    %c0_i32_1 = arith.constant 0 : i32
    return %c0_i32, %c0_i32_0 : i32, i32
  }
  func.func @transform_3(%arg0: i32) -> (i32, i32, i32) {
    %c0_i32 = arith.constant 0 : i32
    %c0_i32_0 = arith.constant 0 : i32
    %c0_i32_1 = arith.constant 0 : i32
    %c0_i32_2 = arith.constant 0 : i32
    return %c0_i32, %c0_i32_0, %c0_i32_1 : i32, i32, i32
  }
  func.func @transform_4(%arg0: i32) -> (i32, i32) {
    %c0_i32 = arith.constant 0 : i32
    %c0_i32_0 = arith.constant 0 : i32
    %c0_i32_1 = arith.constant 0 : i32
    return %c0_i32, %c0_i32_0 : i32, i32
  }
  func.func @transform_5(%arg0: i32) -> (i32, i32) {
    %c0_i32 = arith.constant 0 : i32
    %c0_i32_0 = arith.constant 0 : i32
    %c0_i32_1 = arith.constant 0 : i32
    return %c0_i32, %c0_i32_0 : i32, i32
  }
  func.func @transform_6(%arg0: i32) -> (i32, i32) {
    %c0_i32 = arith.constant 0 : i32
    %c0_i32_0 = arith.constant 0 : i32
    %c0_i32_1 = arith.constant 0 : i32
    return %c0_i32, %c0_i32_0 : i32, i32
  }
  func.func @transform_7(%arg0: i32) -> (i32, i32) {
    %c0_i32 = arith.constant 0 : i32
    %c0_i32_0 = arith.constant 0 : i32
    return %arg0, %c0_i32 : i32, i32
  }
}

</mosaic_0001>

<bundles_post_ra>
// kernel: net_forward.2
= control target key start
LH: loop header
LB: loop body
LE: loop exit
PB: predicated region body
PF: predicated region fallthrough
CT: control target
= control target key end

     0   :  { %vm2051_vm0 = vcmask 261120   ;;  %s9846_s1 = inlined_call_operand.vmem [shape: bf16[32,128], index: 1, kind: input, shape index: {}]   ;;  %s9847_s0 = inlined_call_operand.vmem [shape: bf16[4608,32], index: 0, kind: input, shape index: {}]   ;;  %s9848_s2 = inlined_call_operand.vmem [shape: f32[1,128], index: 2, kind: input, shape index: {}]   ;;  %s9849_s3 = inlined_call_operand.vmem [shape: bf16[1152,128], index: 3, kind: output, shape index: {}]  }
   0x1   :  { %v7402_v0 = vld [vmem:[%s9846_s1 + $0x8] sm:$0xff]  ;;  %v7401_v1 = vld [vmem:[%s9846_s1] sm:$0xff]  ;;  %v7115_v10 = vld [vmem:[%s9847_s0 + $0x10] sm:$0xff] }
   0x2   :  { %2922 = vmatpush.bf16.msra.mxu0 %v7402_v0  ;;  %7834 = vmatpush.bf16.msra.mxu1 %v7402_v0  ;;  %v7113_v2 = vld [vmem:[%s9847_s0] sm:$0xff]  ;;  %v7114_v6 = vld [vmem:[%s9847_s0 + $0x8] sm:$0xff]  ;;  %v7187_v11 = vld [vmem:[%s9847_s0 + $0x250] sm:$0xff] }
   0x3   :  { %7835 = vmatpush.bf16.msra.mxu2 %v7402_v0  ;;  %7836 = vmatpush.bf16.msra.mxu3 %v7402_v0  ;;  %v7185_v3 = vld [vmem:[%s9847_s0 + $0x240] sm:$0xff]  ;;  %v7186_v7 = vld [vmem:[%s9847_s0 + $0x248] sm:$0xff]  ;;  %v7259_v12 = vld [vmem:[%s9847_s0 + $0x490] sm:$0xff] }
   0x4   :  { %v7257_v4 = vld [vmem:[%s9847_s0 + $0x480] sm:$0xff]  ;;  %v7258_v8 = vld [vmem:[%s9847_s0 + $0x488] sm:$0xff]  ;;  %v7331_v13 = vld [vmem:[%s9847_s0 + $0x6d0] sm:$0xff] }
   0x5   :  { %v7329_v5 = vld [vmem:[%s9847_s0 + $0x6c0] sm:$0xff]  ;;  %v7330_v9 = vld [vmem:[%s9847_s0 + $0x6c8] sm:$0xff]  ;;  %v7116_v14 = vld [vmem:[%s9847_s0 + $0x18] sm:$0xff] }
   0x6   :  { %2923 = vmatpush.bf16.msra.mxu0 %v7401_v1  ;;  %7837 = vmatpush.bf16.msra.mxu1 %v7401_v1  ;;  %v7188_v15 = vld [vmem:[%s9847_s0 + $0x258] sm:$0xff]  ;;  %v7117_v18 = vld [vmem:[%s9847_s0 + $0x20] sm:$0xff]  ;;  %v7118_v22 = vld [vmem:[%s9847_s0 + $0x28] sm:$0xff] }
   0x7   :  { %7838 = vmatpush.bf16.msra.mxu2 %v7401_v1  ;;  %7839 = vmatpush.bf16.msra.mxu3 %v7401_v1  ;;  %v7260_v16 = vld [vmem:[%s9847_s0 + $0x498] sm:$0xff]  ;;  %v7189_v19 = vld [vmem:[%s9847_s0 + $0x260] sm:$0xff]  ;;  %v7190_v23 = vld [vmem:[%s9847_s0 + $0x268] sm:$0xff] }
   0x8   :  { %v7332_v17 = vld [vmem:[%s9847_s0 + $0x6d8] sm:$0xff]  ;;  %v7261_v20 = vld [vmem:[%s9847_s0 + $0x4a0] sm:$0xff]  ;;  %v7262_v24 = vld [vmem:[%s9847_s0 + $0x4a8] sm:$0xff] }
   0x9   :  { %6825 = vmatmul.msk.bf16.vlgmr.msra.gmra.mxu0 %vm2051_vm0, %v7113_v2  ;;  %6897 = vmatmul.msk.bf16.vlgmr.msra.gmra.mxu1 %vm2051_vm0, %v7185_v3  ;;  %v7333_v21 = vld [vmem:[%s9847_s0 + $0x6e0] sm:$0xff]  ;;  %v7334_v25 = vld [vmem:[%s9847_s0 + $0x6e8] sm:$0xff]  ;;  %v7119_v26 = vld [vmem:[%s9847_s0 + $0x30] sm:$0xff] }
   0xa   :  { %6969 = vmatmul.msk.bf16.vlgmr.msra.gmra.mxu2 %vm2051_vm0, %v7257_v4  ;;  %7041 = vmatmul.msk.bf16.vlgmr.msra.gmra.mxu3 %vm2051_vm0, %v7329_v5  ;;  %v7191_v27 = vld [vmem:[%s9847_s0 + $0x270] sm:$0xff]  ;;  %v7120_v30 = vld [vmem:[%s9847_s0 + $0x38] sm:$0xff]  ;;  %v7121_v34 = vld [vmem:[%s9847_s0 + $0x40] sm:$0xff] }
   0xb   :  { %v7263_v28 = vld [vmem:[%s9847_s0 + $0x4b0] sm:$0xff]  ;;  %v7192_v31 = vld [vmem:[%s9847_s0 + $0x278] sm:$0xff]  ;;  %v7193_v35 = vld [vmem:[%s9847_s0 + $0x280] sm:$0xff] }
   0xc   :  { %v7335_v29 = vld [vmem:[%s9847_s0 + $0x6f0] sm:$0xff]  ;;  %v7264_v32 = vld [vmem:[%s9847_s0 + $0x4b8] sm:$0xff]  ;;  %v7265_v38 = vld [vmem:[%s9847_s0 + $0x4c0] sm:$0xff] }
   0xd   :  { %v7336_v33 = vld [vmem:[%s9847_s0 + $0x6f8] sm:$0xff]  ;;  %v7337_v39 = vld [vmem:[%s9847_s0 + $0x700] sm:$0xff]  ;;  %v7122_v57 = vld [vmem:[%s9847_s0 + $0x48] sm:$0xff] }
   0xe   :  { %v8019_v40 = vld [vmem:[%s9848_s2] ss:$0 sm:$0xff]  ;;  %v7194_v58 = vld [vmem:[%s9847_s0 + $0x288] sm:$0xff] }
   0xf   :  { %v7266_v1 = vld [vmem:[%s9847_s0 + $0x4c8] sm:$0xff] }
  0x10   :  { %v7338_v2 = vld [vmem:[%s9847_s0 + $0x708] sm:$0xff] }
  0x19   :  { %6826 = vmatmul.msk.bf16.gmra.mxu0 %vm2051_vm0, %v7114_v6  ;;  %6898 = vmatmul.msk.bf16.gmra.mxu1 %vm2051_vm0, %v7186_v7 }
  0x1a   :  { %6970 = vmatmul.msk.bf16.gmra.mxu2 %vm2051_vm0, %v7258_v8  ;;  %7042 = vmatmul.msk.bf16.gmra.mxu3 %vm2051_vm0, %v7330_v9 }
  0x29   :  { %6827 = vmatmul.msk.bf16.gmra.mxu0 %vm2051_vm0, %v7115_v10  ;;  %6899 = vmatmul.msk.bf16.gmra.mxu1 %vm2051_vm0, %v7187_v11 }
  0x2a   :  { %6971 = vmatmul.msk.bf16.gmra.mxu2 %vm2051_vm0, %v7259_v12  ;;  %7043 = vmatmul.msk.bf16.gmra.mxu3 %vm2051_vm0, %v7331_v13 }
  0x39   :  { %6828 = vmatmul.msk.bf16.gmra.mxu0 %vm2051_vm0, %v7116_v14  ;;  %6900 = vmatmul.msk.bf16.gmra.mxu1 %vm2051_vm0, %v7188_v15 }
  0x3a   :  { %6972 = vmatmul.msk.bf16.gmra.mxu2 %vm2051_vm0, %v7260_v16  ;;  %7044 = vmatmul.msk.bf16.gmra.mxu3 %vm2051_vm0, %v7332_v17 }
  0x49   :  { %6829 = vmatmul.msk.bf16.gmra.mxu0 %vm2051_vm0, %v7117_v18  ;;  %6901 = vmatmul.msk.bf16.gmra.mxu1 %vm2051_vm0, %v7189_v19 }
  0x4a   :  { %6973 = vmatmul.msk.bf16.gmra.mxu2 %vm2051_vm0, %v7261_v20  ;;  %7045 = vmatmul.msk.bf16.gmra.mxu3 %vm2051_vm0, %v7333_v21 }
  0x59   :  { %6830 = vmatmul.msk.bf16.gmra.mxu0 %vm2051_vm0, %v7118_v22  ;;  %6902 = vmatmul.msk.bf16.gmra.mxu1 %vm2051_vm0, %v7190_v23 }
  0x5a   :  { %6974 = vmatmul.msk.bf16.gmra.mxu2 %vm2051_vm0, %v7262_v24  ;;  %7046 = vmatmul.msk.bf16.gmra.mxu3 %vm2051_vm0, %v7334_v25 }
  0x69   :  { %6831 = vmatmul.msk.bf16.gmra.mxu0 %vm2051_vm0, %v7119_v26  ;;  %6903 = vmatmul.msk.bf16.gmra.mxu1 %vm2051_vm0, %v7191_v27 }
  0x6a   :  { %6975 = vmatmul.msk.bf16.gmra.mxu2 %vm2051_vm0, %v7263_v28  ;;  %7047 = vmatmul.msk.bf16.gmra.mxu3 %vm2051_vm0, %v7335_v29  ;;  %v7123_v28 = vld [vmem:[%s9847_s0 + $0x50] sm:$0xff] }
  0x6b   :  { %v7195_v29 = vld [vmem:[%s9847_s0 + $0x290] sm:$0xff] }
  0x79   :  { %6832 = vmatmul.msk.bf16.gmra.mxu0 %vm2051_vm0, %v7120_v30  ;;  %6904 = vmatmul.msk.bf16.gmra.mxu1 %vm2051_vm0, %v7192_v31 }
  0x7a   :  { %6976 = vmatmul.msk.bf16.gmra.mxu2 %vm2051_vm0, %v7264_v32  ;;  %7048 = vmatmul.msk.bf16.gmra.mxu3 %vm2051_vm0, %v7336_v33 }
  0x86   :  { %v2925_v36 = vpop.f32.mrf.mxu0  ;;  %v3285_v37 = vpop.f32.mrf.mxu1 }
  0x87   :  { %v2926_v45 = vadd.f32 %v8019_v40, %v2925_v36  ;;  %v3286_v46 = vadd.f32 %v8019_v40, %v3285_v37  ;;  %v7267_v36 = vld [vmem:[%s9847_s0 + $0x4d0] sm:$0xff] }
  0x88   :  { %v7339_v37 = vld [vmem:[%s9847_s0 + $0x710] sm:$0xff] }
  0x89   :  { %6833 = vmatmul.msk.bf16.gmra.mxu0 %vm2051_vm0, %v7121_v34  ;;  %6905 = vmatmul.msk.bf16.gmra.mxu1 %vm2051_vm0, %v7193_v35  ;;  %v4365_v51 = vmax.f32 %v2926_v45, 0.0  ;;  %v4509_v52 = vmax.f32 %v3286_v46, 0.0 }
  0x8a   :  { %6977 = vmatmul.msk.bf16.gmra.mxu2 %vm2051_vm0, %v7265_v38  ;;  %7049 = vmatmul.msk.bf16.gmra.mxu3 %vm2051_vm0, %v7337_v39 }
  0x8b   :  { %v4941_v3 = vmax.f32 %v4365_v51, %v4509_v52 }
  0x8d   :  { %v3645_v41 = vpop.f32.mrf.mxu2  ;;  %v4005_v42 = vpop.f32.mrf.mxu3 }
  0x8e   :  { %v2927_v43 = vpop.f32.mrf.mxu0  ;;  %v3287_v44 = vpop.f32.mrf.mxu1  ;;  %v3646_v47 = vadd.f32 %v8019_v40, %v3645_v41  ;;  %v4006_v48 = vadd.f32 %v8019_v40, %v4005_v42 }
  0x8f   :  { %v2928_v49 = vadd.f32 %v8019_v40, %v2927_v43  ;;  %v3288_v50 = vadd.f32 %v8019_v40, %v3287_v44 }
  0x90   :  { %v4653_v53 = vmax.f32 %v3646_v47, 0.0  ;;  %v4797_v54 = vmax.f32 %v4006_v48, 0.0 }
  0x91   :  { %v4366_v59 = vmax.f32 %v2928_v49, 0.0  ;;  %v4510_v60 = vmax.f32 %v3288_v50, 0.0 }
  0x92   :  { %v5085_v4 = vmax.f32 %v4653_v53, %v4797_v54 }
  0x93   :  { %v4942_v7 = vmax.f32 %v4366_v59, %v4510_v60 }
  0x94   :  { %v5229_v9 = vmax.f32 %v4941_v3, %v5085_v4 }
  0x95   :  { %v3647_v55 = vpop.f32.mrf.mxu2  ;;  %v4007_v56 = vpop.f32.mrf.mxu3 }
  0x96   :  { %v3648_v61 = vadd.f32 %v8019_v40, %v3647_v55  ;;  %v4008_v62 = vadd.f32 %v8019_v40, %v4007_v56  ;;  %v2930_v63 = vpop.f32.mrf.mxu0  ;;  %v3290_v0 = vpop.f32.mrf.mxu1 }
  0x97   :  { %v2931_v16 = vadd.f32 %v8019_v40, %v2930_v63  ;;  %v3291_v17 = vadd.f32 %v8019_v40, %v3290_v0  ;;  %v7124_v0 = vld [vmem:[%s9847_s0 + $0x58] sm:$0xff] }
  0x98   :  { %v4654_v5 = vmax.f32 %v3648_v61, 0.0  ;;  %v4798_v6 = vmax.f32 %v4008_v62, 0.0 }
  0x99   :  { %6834 = vmatmul.msk.bf16.gmra.mxu0 %vm2051_vm0, %v7122_v57  ;;  %6906 = vmatmul.msk.bf16.gmra.mxu1 %vm2051_vm0, %v7194_v58  ;;  %v4367_v22 = vmax.f32 %v2931_v16, 0.0  ;;  %v4511_v23 = vmax.f32 %v3291_v17, 0.0 }
  0x9a   :  { %v5086_v8 = vmax.f32 %v4654_v5, %v4798_v6  ;;  %6978 = vmatmul.msk.bf16.gmra.mxu2 %vm2051_vm0, %v7266_v1  ;;  %7050 = vmatmul.msk.bf16.gmra.mxu3 %vm2051_vm0, %v7338_v2  ;;  %v7196_v1 = vld [vmem:[%s9847_s0 + $0x298] sm:$0xff] }
  0x9b   :  { %v4943_v38 = vmax.f32 %v4367_v22, %v4511_v23 }
  0x9c   :  { %v5230_v10 = vmax.f32 %v4942_v7, %v5086_v8  ;;  %v7268_v8 = vld [vmem:[%s9847_s0 + $0x4d8] sm:$0xff] }
  0x9d   :  { %v3650_v11 = vpop.f32.mrf.mxu2  ;;  %v4010_v12 = vpop.f32.mrf.mxu3 }
  0x9e   :  { %v7406_v13 = vpack.c.bf16 %v5230_v10, %v5229_v9  ;;  %v2932_v14 = vpop.f32.mrf.mxu0  ;;  %v3292_v15 = vpop.f32.mrf.mxu1  ;;  %v3651_v18 = vadd.f32 %v8019_v40, %v3650_v11  ;;  %v4011_v19 = vadd.f32 %v8019_v40, %v4010_v12  ;;  %v7340_v9 = vld [vmem:[%s9847_s0 + $0x718] sm:$0xff] }
  0x9f   :  { %v2933_v20 = vadd.f32 %v8019_v40, %v2932_v14  ;;  %v3293_v21 = vadd.f32 %v8019_v40, %v3292_v15 }
  0xa0   :  { %7407 = vst [vmem:[%s9849_s3] sm:$0xff] %v7406_v13   ;;  %v4655_v24 = vmax.f32 %v3651_v18, 0.0  ;;  %v4799_v25 = vmax.f32 %v4011_v19, 0.0 }
  0xa1   :  { %v4368_v30 = vmax.f32 %v2933_v20, 0.0  ;;  %v4512_v31 = vmax.f32 %v3293_v21, 0.0 }
  0xa2   :  { %v5087_v39 = vmax.f32 %v4655_v24, %v4799_v25 }
  0xa3   :  { %v4944_v43 = vmax.f32 %v4368_v30, %v4512_v31 }
  0xa4   :  { %v5231_v45 = vmax.f32 %v4943_v38, %v5087_v39 }
  0xa5   :  { %v3652_v26 = vpop.f32.mrf.mxu2  ;;  %v4012_v27 = vpop.f32.mrf.mxu3 }
  0xa6   :  { %v3653_v32 = vadd.f32 %v8019_v40, %v3652_v26  ;;  %v4013_v33 = vadd.f32 %v8019_v40, %v4012_v27  ;;  %v2935_v34 = vpop.f32.mrf.mxu0  ;;  %v3295_v35 = vpop.f32.mrf.mxu1 }
  0xa7   :  { %v2936_v52 = vadd.f32 %v8019_v40, %v2935_v34  ;;  %v3296_v53 = vadd.f32 %v8019_v40, %v3295_v35  ;;  %v7125_v35 = vld [vmem:[%s9847_s0 + $0x60] sm:$0xff] }
  0xa8   :  { %v4656_v41 = vmax.f32 %v3653_v32, 0.0  ;;  %v4800_v42 = vmax.f32 %v4013_v33, 0.0 }
  0xa9   :  { %6835 = vmatmul.msk.bf16.gmra.mxu0 %vm2051_vm0, %v7123_v28  ;;  %6907 = vmatmul.msk.bf16.gmra.mxu1 %vm2051_vm0, %v7195_v29  ;;  %v4369_v58 = vmax.f32 %v2936_v52, 0.0  ;;  %v4513_v59 = vmax.f32 %v3296_v53, 0.0 }
  0xaa   :  { %v5088_v44 = vmax.f32 %v4656_v41, %v4800_v42  ;;  %6979 = vmatmul.msk.bf16.gmra.mxu2 %vm2051_vm0, %v7267_v36  ;;  %7051 = vmatmul.msk.bf16.gmra.mxu3 %vm2051_vm0, %v7339_v37  ;;  %v7197_v36 = vld [vmem:[%s9847_s0 + $0x2a0] sm:$0xff] }
  0xab   :  { %v4945_v10 = vmax.f32 %v4369_v58, %v4513_v59 }
  0xac   :  { %v5232_v46 = vmax.f32 %v4944_v43, %v5088_v44  ;;  %v7269_v44 = vld [vmem:[%s9847_s0 + $0x4e0] sm:$0xff] }
  0xad   :  { %v3655_v47 = vpop.f32.mrf.mxu2  ;;  %v4015_v48 = vpop.f32.mrf.mxu3 }
  0xae   :  { %v7411_v49 = vpack.c.bf16 %v5232_v46, %v5231_v45  ;;  %v2937_v50 = vpop.f32.mrf.mxu0  ;;  %v3297_v51 = vpop.f32.mrf.mxu1  ;;  %v3656_v54 = vadd.f32 %v8019_v40, %v3655_v47  ;;  %v4016_v55 = vadd.f32 %v8019_v40, %v4015_v48  ;;  %v7341_v45 = vld [vmem:[%s9847_s0 + $0x720] sm:$0xff] }
  0xaf   :  { %v2938_v56 = vadd.f32 %v8019_v40, %v2937_v50  ;;  %v3298_v57 = vadd.f32 %v8019_v40, %v3297_v51 }
  0xb0   :  { %7763 = vst [vmem:[%s9849_s3 + $0x8] sm:$0xff] %v7411_v49   ;;  %v4657_v60 = vmax.f32 %v3656_v54, 0.0  ;;  %v4801_v61 = vmax.f32 %v4016_v55, 0.0 }
  0xb1   :  { %v4370_v2 = vmax.f32 %v2938_v56, 0.0  ;;  %v4514_v3 = vmax.f32 %v3298_v57, 0.0 }
  0xb2   :  { %v5089_v11 = vmax.f32 %v4657_v60, %v4801_v61 }
  0xb3   :  { %v4946_v14 = vmax.f32 %v4370_v2, %v4514_v3 }
  0xb4   :  { %v5233_v16 = vmax.f32 %v4945_v10, %v5089_v11 }
  0xb5   :  { %v3657_v62 = vpop.f32.mrf.mxu2  ;;  %v4017_v63 = vpop.f32.mrf.mxu3 }
  0xb6   :  { %v3658_v4 = vadd.f32 %v8019_v40, %v3657_v62  ;;  %v4018_v5 = vadd.f32 %v8019_v40, %v4017_v63  ;;  %v2940_v6 = vpop.f32.mrf.mxu0  ;;  %v3300_v7 = vpop.f32.mrf.mxu1 }
  0xb7   :  { %v2941_v23 = vadd.f32 %v8019_v40, %v2940_v6  ;;  %v3301_v24 = vadd.f32 %v8019_v40, %v3300_v7  ;;  %v7126_v7 = vld [vmem:[%s9847_s0 + $0x68] sm:$0xff] }
  0xb8   :  { %v4658_v12 = vmax.f32 %v3658_v4, 0.0  ;;  %v4802_v13 = vmax.f32 %v4018_v5, 0.0 }
  0xb9   :  { %6836 = vmatmul.msk.bf16.gmra.mxu0 %vm2051_vm0, %v7124_v0  ;;  %6908 = vmatmul.msk.bf16.gmra.mxu1 %vm2051_vm0, %v7196_v1  ;;  %v4371_v29 = vmax.f32 %v2941_v23, 0.0  ;;  %v4515_v30 = vmax.f32 %v3301_v24, 0.0 }
  0xba   :  { %v5090_v15 = vmax.f32 %v4658_v12, %v4802_v13  ;;  %6980 = vmatmul.msk.bf16.gmra.mxu2 %vm2051_vm0, %v7268_v8  ;;  %7052 = vmatmul.msk.bf16.gmra.mxu3 %vm2051_vm0, %v7340_v9  ;;  %v7198_v8 = vld [vmem:[%s9847_s0 + $0x2a8] sm:$0xff] }
  0xbb   :  { %v4947_v46 = vmax.f32 %v4371_v29, %v4515_v30 }
  0xbc   :  { %v5234_v17 = vmax.f32 %v4946_v14, %v5090_v15  ;;  %v7270_v15 = vld [vmem:[%s9847_s0 + $0x4e8] sm:$0xff] }
  0xbd   :  { %v3660_v18 = vpop.f32.mrf.mxu2  ;;  %v4020_v19 = vpop.f32.mrf.mxu3 }
  0xbe   :  { %v7416_v20 = vpack.c.bf16 %v5234_v17, %v5233_v16  ;;  %v2942_v21 = vpop.f32.mrf.mxu0  ;;  %v3302_v22 = vpop.f32.mrf.mxu1  ;;  %v3661_v25 = vadd.f32 %v8019_v40, %v3660_v18  ;;  %v4021_v26 = vadd.f32 %v8019_v40, %v4020_v19  ;;  %v7342_v16 = vld [vmem:[%s9847_s0 + $0x728] sm:$0xff] }
  0xbf   :  { %v2943_v27 = vadd.f32 %v8019_v40, %v2942_v21  ;;  %v3303_v28 = vadd.f32 %v8019_v40, %v3302_v22 }
  0xc0   :  { %7764 = vst [vmem:[%s9849_s3 + $0x10] sm:$0xff] %v7416_v20   ;;  %v4659_v31 = vmax.f32 %v3661_v25, 0.0  ;;  %v4803_v32 = vmax.f32 %v4021_v26, 0.0 }
  0xc1   :  { %v4372_v37 = vmax.f32 %v2943_v27, 0.0  ;;  %v4516_v38 = vmax.f32 %v3303_v28, 0.0 }
  0xc2   :  { %v5091_v47 = vmax.f32 %v4659_v31, %v4803_v32 }
  0xc3   :  { %v4948_v50 = vmax.f32 %v4372_v37, %v4516_v38 }
  0xc4   :  { %v5235_v52 = vmax.f32 %v4947_v46, %v5091_v47 }
  0xc5   :  { %v3662_v33 = vpop.f32.mrf.mxu2  ;;  %v4022_v34 = vpop.f32.mrf.mxu3 }
  0xc6   :  { %v3663_v39 = vadd.f32 %v8019_v40, %v3662_v33  ;;  %v4023_v41 = vadd.f32 %v8019_v40, %v4022_v34  ;;  %v2945_v42 = vpop.f32.mrf.mxu0  ;;  %v3305_v43 = vpop.f32.mrf.mxu1 }
  0xc7   :  { %v2946_v59 = vadd.f32 %v8019_v40, %v2945_v42  ;;  %v3306_v60 = vadd.f32 %v8019_v40, %v3305_v43  ;;  %v7127_v43 = vld [vmem:[%s9847_s0 + $0x70] sm:$0xff] }
  0xc8   :  { %v4660_v48 = vmax.f32 %v3663_v39, 0.0  ;;  %v4804_v49 = vmax.f32 %v4023_v41, 0.0 }
  0xc9   :  { %6837 = vmatmul.msk.bf16.gmra.mxu0 %vm2051_vm0, %v7125_v35  ;;  %6909 = vmatmul.msk.bf16.gmra.mxu1 %vm2051_vm0, %v7197_v36  ;;  %v4373_v1 = vmax.f32 %v2946_v59, 0.0  ;;  %v4517_v2 = vmax.f32 %v3306_v60, 0.0 }
  0xca   :  { %v5092_v51 = vmax.f32 %v4660_v48, %v4804_v49  ;;  %6981 = vmatmul.msk.bf16.gmra.mxu2 %vm2051_vm0, %v7269_v44  ;;  %7053 = vmatmul.msk.bf16.gmra.mxu3 %vm2051_vm0, %v7341_v45  ;;  %v7199_v44 = vld [vmem:[%s9847_s0 + $0x2b0] sm:$0xff] }
  0xcb   :  { %v4949_v17 = vmax.f32 %v4373_v1, %v4517_v2 }
  0xcc   :  { %v5236_v53 = vmax.f32 %v4948_v50, %v5092_v51  ;;  %v7271_v51 = vld [vmem:[%s9847_s0 + $0x4f0] sm:$0xff] }
  0xcd   :  { %v3665_v54 = vpop.f32.mrf.mxu2  ;;  %v4025_v55 = vpop.f32.mrf.mxu3 }
  0xce   :  { %v7421_v56 = vpack.c.bf16 %v5236_v53, %v5235_v52  ;;  %v2947_v57 = vpop.f32.mrf.mxu0  ;;  %v3307_v58 = vpop.f32.mrf.mxu1  ;;  %v3666_v61 = vadd.f32 %v8019_v40, %v3665_v54  ;;  %v4026_v62 = vadd.f32 %v8019_v40, %v4025_v55  ;;  %v7343_v52 = vld [vmem:[%s9847_s0 + $0x730] sm:$0xff] }
  0xcf   :  { %v2948_v63 = vadd.f32 %v8019_v40, %v2947_v57  ;;  %v3308_v0 = vadd.f32 %v8019_v40, %v3307_v58 }
  0xd0   :  { %7765 = vst [vmem:[%s9849_s3 + $0x18] sm:$0xff] %v7421_v56   ;;  %v4661_v3 = vmax.f32 %v3666_v61, 0.0  ;;  %v4805_v4 = vmax.f32 %v4026_v62, 0.0 }
  0xd1   :  { %v4374_v9 = vmax.f32 %v2948_v63, 0.0  ;;  %v4518_v10 = vmax.f32 %v3308_v0, 0.0 }
  0xd2   :  { %v5093_v18 = vmax.f32 %v4661_v3, %v4805_v4 }
  0xd3   :  { %v4950_v21 = vmax.f32 %v4374_v9, %v4518_v10 }
  0xd4   :  { %v5237_v23 = vmax.f32 %v4949_v17, %v5093_v18 }
  0xd5   :  { %v3667_v5 = vpop.f32.mrf.mxu2  ;;  %v4027_v6 = vpop.f32.mrf.mxu3 }
  0xd6   :  { %v3668_v11 = vadd.f32 %v8019_v40, %v3667_v5  ;;  %v4028_v12 = vadd.f32 %v8019_v40, %v4027_v6  ;;  %v2950_v13 = vpop.f32.mrf.mxu0  ;;  %v3310_v14 = vpop.f32.mrf.mxu1 }
  0xd7   :  { %v2951_v30 = vadd.f32 %v8019_v40, %v2950_v13  ;;  %v3311_v31 = vadd.f32 %v8019_v40, %v3310_v14  ;;  %v7128_v14 = vld [vmem:[%s9847_s0 + $0x78] sm:$0xff] }
  0xd8   :  { %v4662_v19 = vmax.f32 %v3668_v11, 0.0  ;;  %v4806_v20 = vmax.f32 %v4028_v12, 0.0 }
  0xd9   :  { %6838 = vmatmul.msk.bf16.gmra.mxu0 %vm2051_vm0, %v7126_v7  ;;  %6910 = vmatmul.msk.bf16.gmra.mxu1 %vm2051_vm0, %v7198_v8  ;;  %v4375_v36 = vmax.f32 %v2951_v30, 0.0  ;;  %v4519_v37 = vmax.f32 %v3311_v31, 0.0 }
  0xda   :  { %v5094_v22 = vmax.f32 %v4662_v19, %v4806_v20  ;;  %6982 = vmatmul.msk.bf16.gmra.mxu2 %vm2051_vm0, %v7270_v15  ;;  %7054 = vmatmul.msk.bf16.gmra.mxu3 %vm2051_vm0, %v7342_v16  ;;  %v7200_v15 = vld [vmem:[%s9847_s0 + $0x2b8] sm:$0xff] }
  0xdb   :  { %v4951_v53 = vmax.f32 %v4375_v36, %v4519_v37 }
  0xdc   :  { %v5238_v24 = vmax.f32 %v4950_v21, %v5094_v22  ;;  %v7272_v22 = vld [vmem:[%s9847_s0 + $0x4f8] sm:$0xff] }
  0xdd   :  { %v3670_v25 = vpop.f32.mrf.mxu2  ;;  %v4030_v26 = vpop.f32.mrf.mxu3 }
  0xde   :  { %v7426_v27 = vpack.c.bf16 %v5238_v24, %v5237_v23  ;;  %v2952_v28 = vpop.f32.mrf.mxu0  ;;  %v3312_v29 = vpop.f32.mrf.mxu1  ;;  %v3671_v32 = vadd.f32 %v8019_v40, %v3670_v25  ;;  %v4031_v33 = vadd.f32 %v8019_v40, %v4030_v26  ;;  %v7344_v23 = vld [vmem:[%s9847_s0 + $0x738] sm:$0xff] }
  0xdf   :  { %v2953_v34 = vadd.f32 %v8019_v40, %v2952_v28  ;;  %v3313_v35 = vadd.f32 %v8019_v40, %v3312_v29 }
  0xe0   :  { %7766 = vst [vmem:[%s9849_s3 + $0x20] sm:$0xff] %v7426_v27   ;;  %v4663_v38 = vmax.f32 %v3671_v32, 0.0  ;;  %v4807_v39 = vmax.f32 %v4031_v33, 0.0 }
  0xe1   :  { %v4376_v45 = vmax.f32 %v2953_v34, 0.0  ;;  %v4520_v46 = vmax.f32 %v3313_v35, 0.0 }
  0xe2   :  { %v5095_v54 = vmax.f32 %v4663_v38, %v4807_v39 }
  0xe3   :  { %v4952_v57 = vmax.f32 %v4376_v45, %v4520_v46 }
  0xe4   :  { %v5239_v59 = vmax.f32 %v4951_v53, %v5095_v54 }
  0xe5   :  { %v3672_v41 = vpop.f32.mrf.mxu2  ;;  %v4032_v42 = vpop.f32.mrf.mxu3 }
  0xe6   :  { %v3673_v47 = vadd.f32 %v8019_v40, %v3672_v41  ;;  %v4033_v48 = vadd.f32 %v8019_v40, %v4032_v42  ;;  %v2955_v49 = vpop.f32.mrf.mxu0  ;;  %v3315_v50 = vpop.f32.mrf.mxu1 }
  0xe7   :  { %v2956_v2 = vadd.f32 %v8019_v40, %v2955_v49  ;;  %v3316_v3 = vadd.f32 %v8019_v40, %v3315_v50  ;;  %v7129_v50 = vld [vmem:[%s9847_s0 + $0x80] sm:$0xff] }
  0xe8   :  { %v4664_v55 = vmax.f32 %v3673_v47, 0.0  ;;  %v4808_v56 = vmax.f32 %v4033_v48, 0.0 }
  0xe9   :  { %6839 = vmatmul.msk.bf16.gmra.mxu0 %vm2051_vm0, %v7127_v43  ;;  %6911 = vmatmul.msk.bf16.gmra.mxu1 %vm2051_vm0, %v7199_v44  ;;  %v4377_v8 = vmax.f32 %v2956_v2, 0.0  ;;  %v4521_v9 = vmax.f32 %v3316_v3, 0.0 }
  0xea   :  { %v5096_v58 = vmax.f32 %v4664_v55, %v4808_v56  ;;  %6983 = vmatmul.msk.bf16.gmra.mxu2 %vm2051_vm0, %v7271_v51  ;;  %7055 = vmatmul.msk.bf16.gmra.mxu3 %vm2051_vm0, %v7343_v52  ;;  %v7201_v51 = vld [vmem:[%s9847_s0 + $0x2c0] sm:$0xff] }
  0xeb   :  { %v4953_v24 = vmax.f32 %v4377_v8, %v4521_v9 }
  0xec   :  { %v5240_v60 = vmax.f32 %v4952_v57, %v5096_v58  ;;  %v7273_v58 = vld [vmem:[%s9847_s0 + $0x500] sm:$0xff] }
  0xed   :  { %v3675_v61 = vpop.f32.mrf.mxu2  ;;  %v4035_v62 = vpop.f32.mrf.mxu3 }
  0xee   :  { %v7431_v63 = vpack.c.bf16 %v5240_v60, %v5239_v59  ;;  %v2957_v0 = vpop.f32.mrf.mxu0  ;;  %v3317_v1 = vpop.f32.mrf.mxu1  ;;  %v3676_v4 = vadd.f32 %v8019_v40, %v3675_v61  ;;  %v4036_v5 = vadd.f32 %v8019_v40, %v4035_v62  ;;  %v7345_v59 = vld [vmem:[%s9847_s0 + $0x740] sm:$0xff] }
  0xef   :  { %v2958_v6 = vadd.f32 %v8019_v40, %v2957_v0  ;;  %v3318_v7 = vadd.f32 %v8019_v40, %v3317_v1 }
  0xf0   :  { %7767 = vst [vmem:[%s9849_s3 + $0x28] sm:$0xff] %v7431_v63   ;;  %v4665_v10 = vmax.f32 %v3676_v4, 0.0  ;;  %v4809_v11 = vmax.f32 %v4036_v5, 0.0 }
  0xf1   :  { %v4378_v16 = vmax.f32 %v2958_v6, 0.0  ;;  %v4522_v17 = vmax.f32 %v3318_v7, 0.0 }
  0xf2   :  { %v5097_v25 = vmax.f32 %v4665_v10, %v4809_v11 }
  0xf3   :  { %v4954_v28 = vmax.f32 %v4378_v16, %v4522_v17 }
  0xf4   :  { %v5241_v30 = vmax.f32 %v4953_v24, %v5097_v25 }
  0xf5   :  { %v3677_v12 = vpop.f32.mrf.mxu2  ;;  %v4037_v13 = vpop.f32.mrf.mxu3 }
  0xf6   :  { %v3678_v18 = vadd.f32 %v8019_v40, %v3677_v12  ;;  %v4038_v19 = vadd.f32 %v8019_v40, %v4037_v13  ;;  %v2960_v20 = vpop.f32.mrf.mxu0  ;;  %v3320_v21 = vpop.f32.mrf.mxu1 }
  0xf7   :  { %v2961_v37 = vadd.f32 %v8019_v40, %v2960_v20  ;;  %v3321_v38 = vadd.f32 %v8019_v40, %v3320_v21  ;;  %v7130_v21 = vld [vmem:[%s9847_s0 + $0x88] sm:$0xff] }
  0xf8   :  { %v4666_v26 = vmax.f32 %v3678_v18, 0.0  ;;  %v4810_v27 = vmax.f32 %v4038_v19, 0.0 }
  0xf9   :  { %6840 = vmatmul.msk.bf16.gmra.mxu0 %vm2051_vm0, %v7128_v14  ;;  %6912 = vmatmul.msk.bf16.gmra.mxu1 %vm2051_vm0, %v7200_v15  ;;  %v4379_v44 = vmax.f32 %v2961_v37, 0.0  ;;  %v4523_v45 = vmax.f32 %v3321_v38, 0.0 }
  0xfa   :  { %v5098_v29 = vmax.f32 %v4666_v26, %v4810_v27  ;;  %6984 = vmatmul.msk.bf16.gmra.mxu2 %vm2051_vm0, %v7272_v22  ;;  %7056 = vmatmul.msk.bf16.gmra.mxu3 %vm2051_vm0, %v7344_v23  ;;  %v7202_v22 = vld [vmem:[%s9847_s0 + $0x2c8] sm:$0xff] }
  0xfb   :  { %v4955_v60 = vmax.f32 %v4379_v44, %v4523_v45 }
  0xfc   :  { %v5242_v31 = vmax.f32 %v4954_v28, %v5098_v29  ;;  %v7274_v29 = vld [vmem:[%s9847_s0 + $0x508] sm:$0xff] }
  0xfd   :  { %v3680_v32 = vpop.f32.mrf.mxu2  ;;  %v4040_v33 = vpop.f32.mrf.mxu3 }
  0xfe   :  { %v7436_v34 = vpack.c.bf16 %v5242_v31, %v5241_v30  ;;  %v2962_v35 = vpop.f32.mrf.mxu0  ;;  %v3322_v36 = vpop.f32.mrf.mxu1  ;;  %v3681_v39 = vadd.f32 %v8019_v40, %v3680_v32  ;;  %v4041_v41 = vadd.f32 %v8019_v40, %v4040_v33  ;;  %v7346_v30 = vld [vmem:[%s9847_s0 + $0x748] sm:$0xff] }
  0xff   :  { %v2963_v42 = vadd.f32 %v8019_v40, %v2962_v35  ;;  %v3323_v43 = vadd.f32 %v8019_v40, %v3322_v36 }
 0x100   :  { %7768 = vst [vmem:[%s9849_s3 + $0x30] sm:$0xff] %v7436_v34   ;;  %v4667_v46 = vmax.f32 %v3681_v39, 0.0  ;;  %v4811_v47 = vmax.f32 %v4041_v41, 0.0 }
 0x101   :  { %v4380_v52 = vmax.f32 %v2963_v42, 0.0  ;;  %v4524_v53 = vmax.f32 %v3323_v43, 0.0 }
 0x102   :  { %v5099_v61 = vmax.f32 %v4667_v46, %v4811_v47 }
 0x103   :  { %v4956_v0 = vmax.f32 %v4380_v52, %v4524_v53 }
 0x104   :  { %v5243_v2 = vmax.f32 %v4955_v60, %v5099_v61 }
 0x105   :  { %v3682_v48 = vpop.f32.mrf.mxu2  ;;  %v4042_v49 = vpop.f32.mrf.mxu3 }
 0x106   :  { %v3683_v54 = vadd.f32 %v8019_v40, %v3682_v48  ;;  %v4043_v55 = vadd.f32 %v8019_v40, %v4042_v49  ;;  %v2965_v56 = vpop.f32.mrf.mxu0  ;;  %v3325_v57 = vpop.f32.mrf.mxu1 }
 0x107   :  { %v2966_v9 = vadd.f32 %v8019_v40, %v2965_v56  ;;  %v3326_v10 = vadd.f32 %v8019_v40, %v3325_v57  ;;  %v7131_v57 = vld [vmem:[%s9847_s0 + $0x90] sm:$0xff] }
 0x108   :  { %v4668_v62 = vmax.f32 %v3683_v54, 0.0  ;;  %v4812_v63 = vmax.f32 %v4043_v55, 0.0 }
 0x109   :  { %6841 = vmatmul.msk.bf16.gmra.mxu0 %vm2051_vm0, %v7129_v50  ;;  %6913 = vmatmul.msk.bf16.gmra.mxu1 %vm2051_vm0, %v7201_v51  ;;  %v4381_v15 = vmax.f32 %v2966_v9, 0.0  ;;  %v4525_v16 = vmax.f32 %v3326_v10, 0.0 }
 0x10a   :  { %v5100_v1 = vmax.f32 %v4668_v62, %v4812_v63  ;;  %6985 = vmatmul.msk.bf16.gmra.mxu2 %vm2051_vm0, %v7273_v58  ;;  %7057 = vmatmul.msk.bf16.gmra.mxu3 %vm2051_vm0, %v7345_v59  ;;  %v7203_v58 = vld [vmem:[%s9847_s0 + $0x2d0] sm:$0xff] }
 0x10b   :  { %v4957_v31 = vmax.f32 %v4381_v15, %v4525_v16 }
 0x10c   :  { %v5244_v3 = vmax.f32 %v4956_v0, %v5100_v1  ;;  %v7275_v1 = vld [vmem:[%s9847_s0 + $0x510] sm:$0xff] }
 0x10d   :  { %v3685_v4 = vpop.f32.mrf.mxu2  ;;  %v4045_v5 = vpop.f32.mrf.mxu3 }
 0x10e   :  { %v7441_v6 = vpack.c.bf16 %v5244_v3, %v5243_v2  ;;  %v2967_v7 = vpop.f32.mrf.mxu0  ;;  %v3327_v8 = vpop.f32.mrf.mxu1  ;;  %v3686_v11 = vadd.f32 %v8019_v40, %v3685_v4  ;;  %v4046_v12 = vadd.f32 %v8019_v40, %v4045_v5  ;;  %v7347_v2 = vld [vmem:[%s9847_s0 + $0x750] sm:$0xff] }
 0x10f   :  { %v2968_v13 = vadd.f32 %v8019_v40, %v2967_v7  ;;  %v3328_v14 = vadd.f32 %v8019_v40, %v3327_v8 }
 0x110   :  { %7769 = vst [vmem:[%s9849_s3 + $0x38] sm:$0xff] %v7441_v6   ;;  %v4669_v17 = vmax.f32 %v3686_v11, 0.0  ;;  %v4813_v18 = vmax.f32 %v4046_v12, 0.0 }
 0x111   :  { %v4382_v23 = vmax.f32 %v2968_v13, 0.0  ;;  %v4526_v24 = vmax.f32 %v3328_v14, 0.0 }
 0x112   :  { %v5101_v32 = vmax.f32 %v4669_v17, %v4813_v18 }
 0x113   :  { %v4958_v35 = vmax.f32 %v4382_v23, %v4526_v24 }
 0x114   :  { %v5245_v37 = vmax.f32 %v4957_v31, %v5101_v32 }
 0x115   :  { %v3687_v19 = vpop.f32.mrf.mxu2  ;;  %v4047_v20 = vpop.f32.mrf.mxu3 }
 0x116   :  { %v3688_v25 = vadd.f32 %v8019_v40, %v3687_v19  ;;  %v4048_v26 = vadd.f32 %v8019_v40, %v4047_v20  ;;  %v2970_v27 = vpop.f32.mrf.mxu0  ;;  %v3330_v28 = vpop.f32.mrf.mxu1 }
 0x117   :  { %v2971_v45 = vadd.f32 %v8019_v40, %v2970_v27  ;;  %v3331_v46 = vadd.f32 %v8019_v40, %v3330_v28  ;;  %v7132_v28 = vld [vmem:[%s9847_s0 + $0x98] sm:$0xff] }
 0x118   :  { %v4670_v33 = vmax.f32 %v3688_v25, 0.0  ;;  %v4814_v34 = vmax.f32 %v4048_v26, 0.0 }
 0x119   :  { %6842 = vmatmul.msk.bf16.gmra.mxu0 %vm2051_vm0, %v7130_v21  ;;  %6914 = vmatmul.msk.bf16.gmra.mxu1 %vm2051_vm0, %v7202_v22  ;;  %v4383_v51 = vmax.f32 %v2971_v45, 0.0  ;;  %v4527_v52 = vmax.f32 %v3331_v46, 0.0 }
 0x11a   :  { %v5102_v36 = vmax.f32 %v4670_v33, %v4814_v34  ;;  %6986 = vmatmul.msk.bf16.gmra.mxu2 %vm2051_vm0, %v7274_v29  ;;  %7058 = vmatmul.msk.bf16.gmra.mxu3 %vm2051_vm0, %v7346_v30  ;;  %v7204_v29 = vld [vmem:[%s9847_s0 + $0x2d8] sm:$0xff] }
 0x11b   :  { %v4959_v3 = vmax.f32 %v4383_v51, %v4527_v52 }
 0x11c   :  { %v5246_v38 = vmax.f32 %v4958_v35, %v5102_v36  ;;  %v7276_v36 = vld [vmem:[%s9847_s0 + $0x518] sm:$0xff] }
 0x11d   :  { %v3690_v39 = vpop.f32.mrf.mxu2  ;;  %v4050_v41 = vpop.f32.mrf.mxu3 }
 0x11e   :  { %v7446_v42 = vpack.c.bf16 %v5246_v38, %v5245_v37  ;;  %v2972_v43 = vpop.f32.mrf.mxu0  ;;  %v3332_v44 = vpop.f32.mrf.mxu1  ;;  %v3691_v47 = vadd.f32 %v8019_v40, %v3690_v39  ;;  %v4051_v48 = vadd.f32 %v8019_v40, %v4050_v41  ;;  %v7348_v37 = vld [vmem:[%s9847_s0 + $0x758] sm:$0xff] }
 0x11f   :  { %v2973_v49 = vadd.f32 %v8019_v40, %v2972_v43  ;;  %v3333_v50 = vadd.f32 %v8019_v40, %v3332_v44 }
 0x120   :  { %7770 = vst [vmem:[%s9849_s3 + $0x40] sm:$0xff] %v7446_v42   ;;  %v4671_v53 = vmax.f32 %v3691_v47, 0.0  ;;  %v4815_v54 = vmax.f32 %v4051_v48, 0.0 }
 0x121   :  { %v4384_v59 = vmax.f32 %v2973_v49, 0.0  ;;  %v4528_v60 = vmax.f32 %v3333_v50, 0.0 }
 0x122   :  { %v5103_v4 = vmax.f32 %v4671_v53, %v4815_v54 }
 0x123   :  { %v4960_v7 = vmax.f32 %v4384_v59, %v4528_v60 }
 0x124   :  { %v5247_v9 = vmax.f32 %v4959_v3, %v5103_v4 }
 0x125   :  { %v3692_v55 = vpop.f32.mrf.mxu2  ;;  %v4052_v56 = vpop.f32.mrf.mxu3 }
 0x126   :  { %v3693_v61 = vadd.f32 %v8019_v40, %v3692_v55  ;;  %v4053_v62 = vadd.f32 %v8019_v40, %v4052_v56  ;;  %v2975_v63 = vpop.f32.mrf.mxu0  ;;  %v3335_v0 = vpop.f32.mrf.mxu1 }
 0x127   :  { %v2976_v16 = vadd.f32 %v8019_v40, %v2975_v63  ;;  %v3336_v17 = vadd.f32 %v8019_v40, %v3335_v0  ;;  %v7133_v0 = vld [vmem:[%s9847_s0 + $0xa0] sm:$0xff] }
 0x128   :  { %v4672_v5 = vmax.f32 %v3693_v61, 0.0  ;;  %v4816_v6 = vmax.f32 %v4053_v62, 0.0 }
 0x129   :  { %6843 = vmatmul.msk.bf16.gmra.mxu0 %vm2051_vm0, %v7131_v57  ;;  %6915 = vmatmul.msk.bf16.gmra.mxu1 %vm2051_vm0, %v7203_v58  ;;  %v4385_v22 = vmax.f32 %v2976_v16, 0.0  ;;  %v4529_v23 = vmax.f32 %v3336_v17, 0.0 }
 0x12a   :  { %v5104_v8 = vmax.f32 %v4672_v5, %v4816_v6  ;;  %6987 = vmatmul.msk.bf16.gmra.mxu2 %vm2051_vm0, %v7275_v1  ;;  %7059 = vmatmul.msk.bf16.gmra.mxu3 %vm2051_vm0, %v7347_v2  ;;  %v7205_v1 = vld [vmem:[%s9847_s0 + $0x2e0] sm:$0xff] }
 0x12b   :  { %v4961_v38 = vmax.f32 %v4385_v22, %v4529_v23 }
 0x12c   :  { %v5248_v10 = vmax.f32 %v4960_v7, %v5104_v8  ;;  %v7277_v8 = vld [vmem:[%s9847_s0 + $0x520] sm:$0xff] }
 0x12d   :  { %v3695_v11 = vpop.f32.mrf.mxu2  ;;  %v4055_v12 = vpop.f32.mrf.mxu3 }
 0x12e   :  { %v7451_v13 = vpack.c.bf16 %v5248_v10, %v5247_v9  ;;  %v2977_v14 = vpop.f32.mrf.mxu0  ;;  %v3337_v15 = vpop.f32.mrf.mxu1  ;;  %v3696_v18 = vadd.f32 %v8019_v40, %v3695_v11  ;;  %v4056_v19 = vadd.f32 %v8019_v40, %v4055_v12  ;;  %v7349_v9 = vld [vmem:[%s9847_s0 + $0x760] sm:$0xff] }
 0x12f   :  { %v2978_v20 = vadd.f32 %v8019_v40, %v2977_v14  ;;  %v3338_v21 = vadd.f32 %v8019_v40, %v3337_v15 }
 0x130   :  { %7771 = vst [vmem:[%s9849_s3 + $0x48] sm:$0xff] %v7451_v13   ;;  %v4673_v24 = vmax.f32 %v3696_v18, 0.0  ;;  %v4817_v25 = vmax.f32 %v4056_v19, 0.0 }
 0x131   :  { %v4386_v30 = vmax.f32 %v2978_v20, 0.0  ;;  %v4530_v31 = vmax.f32 %v3338_v21, 0.0 }
 0x132   :  { %v5105_v39 = vmax.f32 %v4673_v24, %v4817_v25 }
 0x133   :  { %v4962_v43 = vmax.f32 %v4386_v30, %v4530_v31 }
 0x134   :  { %v5249_v45 = vmax.f32 %v4961_v38, %v5105_v39 }
 0x135   :  { %v3697_v26 = vpop.f32.mrf.mxu2  ;;  %v4057_v27 = vpop.f32.mrf.mxu3 }
 0x136   :  { %v3698_v32 = vadd.f32 %v8019_v40, %v3697_v26  ;;  %v4058_v33 = vadd.f32 %v8019_v40, %v4057_v27  ;;  %v2980_v34 = vpop.f32.mrf.mxu0  ;;  %v3340_v35 = vpop.f32.mrf.mxu1 }
 0x137   :  { %v2981_v52 = vadd.f32 %v8019_v40, %v2980_v34  ;;  %v3341_v53 = vadd.f32 %v8019_v40, %v3340_v35  ;;  %v7134_v35 = vld [vmem:[%s9847_s0 + $0xa8] sm:$0xff] }
 0x138   :  { %v4674_v41 = vmax.f32 %v3698_v32, 0.0  ;;  %v4818_v42 = vmax.f32 %v4058_v33, 0.0 }
 0x139   :  { %6844 = vmatmul.msk.bf16.gmra.mxu0 %vm2051_vm0, %v7132_v28  ;;  %6916 = vmatmul.msk.bf16.gmra.mxu1 %vm2051_vm0, %v7204_v29  ;;  %v4387_v58 = vmax.f32 %v2981_v52, 0.0  ;;  %v4531_v59 = vmax.f32 %v3341_v53, 0.0 }
 0x13a   :  { %v5106_v44 = vmax.f32 %v4674_v41, %v4818_v42  ;;  %6988 = vmatmul.msk.bf16.gmra.mxu2 %vm2051_vm0, %v7276_v36  ;;  %7060 = vmatmul.msk.bf16.gmra.mxu3 %vm2051_vm0, %v7348_v37  ;;  %v7206_v36 = vld [vmem:[%s9847_s0 + $0x2e8] sm:$0xff] }
 0x13b   :  { %v4963_v10 = vmax.f32 %v4387_v58, %v4531_v59  ;;  %v8375_v58 = vld [vmem:[%s9848_s2] ss:$0 sm:$0xff] }
 0x13c   :  { %v5250_v46 = vmax.f32 %v4962_v43, %v5106_v44  ;;  %v7278_v44 = vld [vmem:[%s9847_s0 + $0x528] sm:$0xff] }
 0x13d   :  { %v3700_v47 = vpop.f32.mrf.mxu2  ;;  %v4060_v48 = vpop.f32.mrf.mxu3 }
 0x13e   :  { %v7456_v49 = vpack.c.bf16 %v5250_v46, %v5249_v45  ;;  %v2982_v50 = vpop.f32.mrf.mxu0  ;;  %v3342_v51 = vpop.f32.mrf.mxu1  ;;  %v3701_v54 = vadd.f32 %v8019_v40, %v3700_v47  ;;  %v4061_v55 = vadd.f32 %v8019_v40, %v4060_v48  ;;  %v7350_v45 = vld [vmem:[%s9847_s0 + $0x768] sm:$0xff] }
 0x13f   :  { %v2983_v56 = vadd.f32 %v8019_v40, %v2982_v50  ;;  %v3343_v57 = vadd.f32 %v8019_v40, %v3342_v51 }
 0x140   :  { %7772 = vst [vmem:[%s9849_s3 + $0x50] sm:$0xff] %v7456_v49   ;;  %v4675_v60 = vmax.f32 %v3701_v54, 0.0  ;;  %v4819_v61 = vmax.f32 %v4061_v55, 0.0 }
 0x141   :  { %v4388_v2 = vmax.f32 %v2983_v56, 0.0  ;;  %v4532_v3 = vmax.f32 %v3343_v57, 0.0 }
 0x142   :  { %v5107_v11 = vmax.f32 %v4675_v60, %v4819_v61 }
 0x143   :  { %v4964_v14 = vmax.f32 %v4388_v2, %v4532_v3 }
 0x144   :  { %v5251_v16 = vmax.f32 %v4963_v10, %v5107_v11 }
 0x145   :  { %v3702_v62 = vpop.f32.mrf.mxu2  ;;  %v4062_v63 = vpop.f32.mrf.mxu3 }
 0x146   :  { %v3703_v4 = vadd.f32 %v8019_v40, %v3702_v62  ;;  %v4063_v5 = vadd.f32 %v8019_v40, %v4062_v63  ;;  %v2985_v6 = vpop.f32.mrf.mxu0  ;;  %v3345_v7 = vpop.f32.mrf.mxu1 }
 0x147   :  { %v2986_v23 = vadd.f32 %v8019_v40, %v2985_v6  ;;  %v3346_v24 = vadd.f32 %v8019_v40, %v3345_v7  ;;  %v7135_v7 = vld [vmem:[%s9847_s0 + $0xb0] sm:$0xff] }
 0x148   :  { %v4676_v12 = vmax.f32 %v3703_v4, 0.0  ;;  %v4820_v13 = vmax.f32 %v4063_v5, 0.0 }
 0x149   :  { %6845 = vmatmul.msk.bf16.gmra.mxu0 %vm2051_vm0, %v7133_v0  ;;  %6917 = vmatmul.msk.bf16.gmra.mxu1 %vm2051_vm0, %v7205_v1  ;;  %v4389_v29 = vmax.f32 %v2986_v23, 0.0  ;;  %v4533_v30 = vmax.f32 %v3346_v24, 0.0 }
 0x14a   :  { %v5108_v15 = vmax.f32 %v4676_v12, %v4820_v13  ;;  %6989 = vmatmul.msk.bf16.gmra.mxu2 %vm2051_vm0, %v7277_v8  ;;  %7061 = vmatmul.msk.bf16.gmra.mxu3 %vm2051_vm0, %v7349_v9  ;;  %v7207_v8 = vld [vmem:[%s9847_s0 + $0x2f0] sm:$0xff] }
 0x14b   :  { %v4965_v46 = vmax.f32 %v4389_v29, %v4533_v30 }
 0x14c   :  { %v5252_v17 = vmax.f32 %v4964_v14, %v5108_v15  ;;  %v7279_v15 = vld [vmem:[%s9847_s0 + $0x530] sm:$0xff] }
 0x14d   :  { %v3705_v18 = vpop.f32.mrf.mxu2  ;;  %v4065_v19 = vpop.f32.mrf.mxu3 }
 0x14e   :  { %v7461_v20 = vpack.c.bf16 %v5252_v17, %v5251_v16  ;;  %v2987_v21 = vpop.f32.mrf.mxu0  ;;  %v3347_v22 = vpop.f32.mrf.mxu1  ;;  %v3706_v25 = vadd.f32 %v8019_v40, %v3705_v18  ;;  %v4066_v26 = vadd.f32 %v8019_v40, %v4065_v19  ;;  %v7351_v16 = vld [vmem:[%s9847_s0 + $0x770] sm:$0xff] }
 0x14f   :  { %v2988_v27 = vadd.f32 %v8019_v40, %v2987_v21  ;;  %v3348_v28 = vadd.f32 %v8019_v40, %v3347_v22 }
 0x150   :  { %7773 = vst [vmem:[%s9849_s3 + $0x58] sm:$0xff] %v7461_v20   ;;  %v4677_v31 = vmax.f32 %v3706_v25, 0.0  ;;  %v4821_v32 = vmax.f32 %v4066_v26, 0.0 }
 0x151   :  { %v4390_v37 = vmax.f32 %v2988_v27, 0.0  ;;  %v4534_v38 = vmax.f32 %v3348_v28, 0.0 }
 0x152   :  { %v5109_v47 = vmax.f32 %v4677_v31, %v4821_v32 }
 0x153   :  { %v4966_v50 = vmax.f32 %v4390_v37, %v4534_v38 }
 0x154   :  { %v5253_v51 = vmax.f32 %v4965_v46, %v5109_v47 }
 0x155   :  { %v3707_v33 = vpop.f32.mrf.mxu2  ;;  %v4067_v34 = vpop.f32.mrf.mxu3 }
 0x156   :  { %v3708_v39 = vadd.f32 %v8019_v40, %v3707_v33  ;;  %v4068_v41 = vadd.f32 %v8019_v40, %v4067_v34  ;;  %v2990_v42 = vpop.f32.mrf.mxu0  ;;  %v3350_v43 = vpop.f32.mrf.mxu1 }
 0x157   :  { %v2991_v59 = vadd.f32 %v8375_v58, %v2990_v42  ;;  %v3351_v60 = vadd.f32 %v8375_v58, %v3350_v43  ;;  %v7136_v43 = vld [vmem:[%s9847_s0 + $0xb8] sm:$0xff] }
 0x158   :  { %v4678_v48 = vmax.f32 %v3708_v39, 0.0  ;;  %v4822_v49 = vmax.f32 %v4068_v41, 0.0 }
 0x159   :  { %6846 = vmatmul.msk.bf16.gmra.mxu0 %vm2051_vm0, %v7134_v35  ;;  %6918 = vmatmul.msk.bf16.gmra.mxu1 %vm2051_vm0, %v7206_v36  ;;  %v4391_v1 = vmax.f32 %v2991_v59, 0.0  ;;  %v4535_v2 = vmax.f32 %v3351_v60, 0.0 }
 0x15a   :  { %v5110_v40 = vmax.f32 %v4678_v48, %v4822_v49  ;;  %6990 = vmatmul.msk.bf16.gmra.mxu2 %vm2051_vm0, %v7278_v44  ;;  %7062 = vmatmul.msk.bf16.gmra.mxu3 %vm2051_vm0, %v7350_v45  ;;  %v7208_v44 = vld [vmem:[%s9847_s0 + $0x2f8] sm:$0xff] }
 0x15b   :  { %v4967_v17 = vmax.f32 %v4391_v1, %v4535_v2 }
 0x15c   :  { %v5254_v52 = vmax.f32 %v4966_v50, %v5110_v40  ;;  %v7280_v40 = vld [vmem:[%s9847_s0 + $0x538] sm:$0xff] }
 0x15d   :  { %v3710_v53 = vpop.f32.mrf.mxu2  ;;  %v4070_v54 = vpop.f32.mrf.mxu3 }
 0x15e   :  { %v7466_v55 = vpack.c.bf16 %v5254_v52, %v5253_v51  ;;  %v2992_v56 = vpop.f32.mrf.mxu0  ;;  %v3352_v57 = vpop.f32.mrf.mxu1  ;;  %v3711_v61 = vadd.f32 %v8375_v58, %v3710_v53  ;;  %v4071_v62 = vadd.f32 %v8375_v58, %v4070_v54  ;;  %v7352_v51 = vld [vmem:[%s9847_s0 + $0x778] sm:$0xff] }
 0x15f   :  { %v2993_v63 = vadd.f32 %v8375_v58, %v2992_v56  ;;  %v3353_v0 = vadd.f32 %v8375_v58, %v3352_v57 }
 0x160   :  { %7774 = vst [vmem:[%s9849_s3 + $0x60] sm:$0xff] %v7466_v55   ;;  %v4679_v3 = vmax.f32 %v3711_v61, 0.0  ;;  %v4823_v4 = vmax.f32 %v4071_v62, 0.0 }
 0x161   :  { %v4392_v9 = vmax.f32 %v2993_v63, 0.0  ;;  %v4536_v10 = vmax.f32 %v3353_v0, 0.0 }
 0x162   :  { %v5111_v18 = vmax.f32 %v4679_v3, %v4823_v4 }
 0x163   :  { %v4968_v21 = vmax.f32 %v4392_v9, %v4536_v10 }
 0x164   :  { %v5255_v23 = vmax.f32 %v4967_v17, %v5111_v18 }
 0x165   :  { %v3712_v5 = vpop.f32.mrf.mxu2  ;;  %v4072_v6 = vpop.f32.mrf.mxu3 }
 0x166   :  { %v3713_v11 = vadd.f32 %v8375_v58, %v3712_v5  ;;  %v4073_v12 = vadd.f32 %v8375_v58, %v4072_v6  ;;  %v2995_v13 = vpop.f32.mrf.mxu0  ;;  %v3355_v14 = vpop.f32.mrf.mxu1 }
 0x167   :  { %v2996_v30 = vadd.f32 %v8375_v58, %v2995_v13  ;;  %v3356_v31 = vadd.f32 %v8375_v58, %v3355_v14  ;;  %v7137_v14 = vld [vmem:[%s9847_s0 + $0xc0] sm:$0xff] }
 0x168   :  { %v4680_v19 = vmax.f32 %v3713_v11, 0.0  ;;  %v4824_v20 = vmax.f32 %v4073_v12, 0.0 }
 0x169   :  { %6847 = vmatmul.msk.bf16.gmra.mxu0 %vm2051_vm0, %v7135_v7  ;;  %6919 = vmatmul.msk.bf16.gmra.mxu1 %vm2051_vm0, %v7207_v8  ;;  %v4393_v36 = vmax.f32 %v2996_v30, 0.0  ;;  %v4537_v37 = vmax.f32 %v3356_v31, 0.0 }
 0x16a   :  { %v5112_v22 = vmax.f32 %v4680_v19, %v4824_v20  ;;  %6991 = vmatmul.msk.bf16.gmra.mxu2 %vm2051_vm0, %v7279_v15  ;;  %7063 = vmatmul.msk.bf16.gmra.mxu3 %vm2051_vm0, %v7351_v16  ;;  %v7209_v15 = vld [vmem:[%s9847_s0 + $0x300] sm:$0xff] }
 0x16b   :  { %v4969_v52 = vmax.f32 %v4393_v36, %v4537_v37 }
 0x16c   :  { %v5256_v24 = vmax.f32 %v4968_v21, %v5112_v22  ;;  %v7281_v22 = vld [vmem:[%s9847_s0 + $0x540] sm:$0xff] }
 0x16d   :  { %v3715_v25 = vpop.f32.mrf.mxu2  ;;  %v4075_v26 = vpop.f32.mrf.mxu3 }
 0x16e   :  { %v7471_v27 = vpack.c.bf16 %v5256_v24, %v5255_v23  ;;  %v2997_v28 = vpop.f32.mrf.mxu0  ;;  %v3357_v29 = vpop.f32.mrf.mxu1  ;;  %v3716_v32 = vadd.f32 %v8375_v58, %v3715_v25  ;;  %v4076_v33 = vadd.f32 %v8375_v58, %v4075_v26  ;;  %v7353_v23 = vld [vmem:[%s9847_s0 + $0x780] sm:$0xff] }
 0x16f   :  { %v2998_v34 = vadd.f32 %v8375_v58, %v2997_v28  ;;  %v3358_v35 = vadd.f32 %v8375_v58, %v3357_v29 }
 0x170   :  { %7775 = vst [vmem:[%s9849_s3 + $0x68] sm:$0xff] %v7471_v27   ;;  %v4681_v38 = vmax.f32 %v3716_v32, 0.0  ;;  %v4825_v39 = vmax.f32 %v4076_v33, 0.0 }
 0x171   :  { %v4394_v45 = vmax.f32 %v2998_v34, 0.0  ;;  %v4538_v46 = vmax.f32 %v3358_v35, 0.0 }
 0x172   :  { %v5113_v53 = vmax.f32 %v4681_v38, %v4825_v39 }
 0x173   :  { %v4970_v56 = vmax.f32 %v4394_v45, %v4538_v46 }
 0x174   :  { %v5257_v59 = vmax.f32 %v4969_v52, %v5113_v53 }
 0x175   :  { %v3717_v41 = vpop.f32.mrf.mxu2  ;;  %v4077_v42 = vpop.f32.mrf.mxu3 }
 0x176   :  { %v3718_v47 = vadd.f32 %v8375_v58, %v3717_v41  ;;  %v4078_v48 = vadd.f32 %v8375_v58, %v4077_v42  ;;  %v3000_v49 = vpop.f32.mrf.mxu0  ;;  %v3360_v50 = vpop.f32.mrf.mxu1 }
 0x177   :  { %v3001_v2 = vadd.f32 %v8375_v58, %v3000_v49  ;;  %v3361_v3 = vadd.f32 %v8375_v58, %v3360_v50  ;;  %v7138_v50 = vld [vmem:[%s9847_s0 + $0xc8] sm:$0xff] }
 0x178   :  { %v4682_v54 = vmax.f32 %v3718_v47, 0.0  ;;  %v4826_v55 = vmax.f32 %v4078_v48, 0.0 }
 0x179   :  { %6848 = vmatmul.msk.bf16.gmra.mxu0 %vm2051_vm0, %v7136_v43  ;;  %6920 = vmatmul.msk.bf16.gmra.mxu1 %vm2051_vm0, %v7208_v44  ;;  %v4395_v8 = vmax.f32 %v3001_v2, 0.0  ;;  %v4539_v9 = vmax.f32 %v3361_v3, 0.0 }
 0x17a   :  { %v5114_v57 = vmax.f32 %v4682_v54, %v4826_v55  ;;  %6992 = vmatmul.msk.bf16.gmra.mxu2 %vm2051_vm0, %v7280_v40  ;;  %7064 = vmatmul.msk.bf16.gmra.mxu3 %vm2051_vm0, %v7352_v51  ;;  %v7210_v40 = vld [vmem:[%s9847_s0 + $0x308] sm:$0xff] }
 0x17b   :  { %v4971_v24 = vmax.f32 %v4395_v8, %v4539_v9 }
 0x17c   :  { %v5258_v60 = vmax.f32 %v4970_v56, %v5114_v57  ;;  %v7282_v57 = vld [vmem:[%s9847_s0 + $0x548] sm:$0xff] }
 0x17d   :  { %v3720_v61 = vpop.f32.mrf.mxu2  ;;  %v4080_v62 = vpop.f32.mrf.mxu3 }
 0x17e   :  { %v7476_v63 = vpack.c.bf16 %v5258_v60, %v5257_v59  ;;  %v3002_v0 = vpop.f32.mrf.mxu0  ;;  %v3362_v1 = vpop.f32.mrf.mxu1  ;;  %v3721_v4 = vadd.f32 %v8375_v58, %v3720_v61  ;;  %v4081_v5 = vadd.f32 %v8375_v58, %v4080_v62  ;;  %v7354_v59 = vld [vmem:[%s9847_s0 + $0x788] sm:$0xff] }
 0x17f   :  { %v3003_v6 = vadd.f32 %v8375_v58, %v3002_v0  ;;  %v3363_v7 = vadd.f32 %v8375_v58, %v3362_v1 }
 0x180   :  { %7776 = vst [vmem:[%s9849_s3 + $0x70] sm:$0xff] %v7476_v63   ;;  %v4683_v10 = vmax.f32 %v3721_v4, 0.0  ;;  %v4827_v11 = vmax.f32 %v4081_v5, 0.0 }
 0x181   :  { %v4396_v16 = vmax.f32 %v3003_v6, 0.0  ;;  %v4540_v17 = vmax.f32 %v3363_v7, 0.0 }
 0x182   :  { %v5115_v25 = vmax.f32 %v4683_v10, %v4827_v11 }
 0x183   :  { %v4972_v28 = vmax.f32 %v4396_v16, %v4540_v17 }
 0x184   :  { %v5259_v30 = vmax.f32 %v4971_v24, %v5115_v25 }
 0x185   :  { %v3722_v12 = vpop.f32.mrf.mxu2  ;;  %v4082_v13 = vpop.f32.mrf.mxu3 }
 0x186   :  { %v3723_v18 = vadd.f32 %v8375_v58, %v3722_v12  ;;  %v4083_v19 = vadd.f32 %v8375_v58, %v4082_v13  ;;  %v3005_v20 = vpop.f32.mrf.mxu0  ;;  %v3365_v21 = vpop.f32.mrf.mxu1 }
 0x187   :  { %v3006_v37 = vadd.f32 %v8375_v58, %v3005_v20  ;;  %v3366_v38 = vadd.f32 %v8375_v58, %v3365_v21  ;;  %v7139_v21 = vld [vmem:[%s9847_s0 + $0xd0] sm:$0xff] }
 0x188   :  { %v4684_v26 = vmax.f32 %v3723_v18, 0.0  ;;  %v4828_v27 = vmax.f32 %v4083_v19, 0.0 }
 0x189   :  { %6849 = vmatmul.msk.bf16.gmra.mxu0 %vm2051_vm0, %v7137_v14  ;;  %6921 = vmatmul.msk.bf16.gmra.mxu1 %vm2051_vm0, %v7209_v15  ;;  %v4397_v44 = vmax.f32 %v3006_v37, 0.0  ;;  %v4541_v45 = vmax.f32 %v3366_v38, 0.0 }
 0x18a   :  { %v5116_v29 = vmax.f32 %v4684_v26, %v4828_v27  ;;  %6993 = vmatmul.msk.bf16.gmra.mxu2 %vm2051_vm0, %v7281_v22  ;;  %7065 = vmatmul.msk.bf16.gmra.mxu3 %vm2051_vm0, %v7353_v23  ;;  %v7211_v22 = vld [vmem:[%s9847_s0 + $0x310] sm:$0xff] }
 0x18b   :  { %v4973_v60 = vmax.f32 %v4397_v44, %v4541_v45 }
 0x18c   :  { %v5260_v31 = vmax.f32 %v4972_v28, %v5116_v29  ;;  %v7283_v29 = vld [vmem:[%s9847_s0 + $0x550] sm:$0xff] }
 0x18d   :  { %v3725_v32 = vpop.f32.mrf.mxu2  ;;  %v4085_v33 = vpop.f32.mrf.mxu3 }
 0x18e   :  { %v7481_v34 = vpack.c.bf16 %v5260_v31, %v5259_v30  ;;  %v3007_v35 = vpop.f32.mrf.mxu0  ;;  %v3367_v36 = vpop.f32.mrf.mxu1  ;;  %v3726_v39 = vadd.f32 %v8375_v58, %v3725_v32  ;;  %v4086_v41 = vadd.f32 %v8375_v58, %v4085_v33  ;;  %v7355_v30 = vld [vmem:[%s9847_s0 + $0x790] sm:$0xff] }
 0x18f   :  { %v3008_v42 = vadd.f32 %v8375_v58, %v3007_v35  ;;  %v3368_v43 = vadd.f32 %v8375_v58, %v3367_v36 }
 0x190   :  { %7777 = vst [vmem:[%s9849_s3 + $0x78] sm:$0xff] %v7481_v34   ;;  %v4685_v46 = vmax.f32 %v3726_v39, 0.0  ;;  %v4829_v47 = vmax.f32 %v4086_v41, 0.0 }
 0x191   :  { %v4398_v51 = vmax.f32 %v3008_v42, 0.0  ;;  %v4542_v52 = vmax.f32 %v3368_v43, 0.0 }
 0x192   :  { %v5117_v61 = vmax.f32 %v4685_v46, %v4829_v47 }
 0x193   :  { %v4974_v0 = vmax.f32 %v4398_v51, %v4542_v52 }
 0x194   :  { %v5261_v2 = vmax.f32 %v4973_v60, %v5117_v61 }
 0x195   :  { %v3727_v48 = vpop.f32.mrf.mxu2  ;;  %v4087_v49 = vpop.f32.mrf.mxu3 }
 0x196   :  { %v3728_v53 = vadd.f32 %v8375_v58, %v3727_v48  ;;  %v4088_v54 = vadd.f32 %v8375_v58, %v4087_v49  ;;  %v3010_v55 = vpop.f32.mrf.mxu0  ;;  %v3370_v56 = vpop.f32.mrf.mxu1 }
 0x197   :  { %v3011_v9 = vadd.f32 %v8375_v58, %v3010_v55  ;;  %v3371_v10 = vadd.f32 %v8375_v58, %v3370_v56  ;;  %v7140_v56 = vld [vmem:[%s9847_s0 + $0xd8] sm:$0xff] }
 0x198   :  { %v4686_v62 = vmax.f32 %v3728_v53, 0.0  ;;  %v4830_v63 = vmax.f32 %v4088_v54, 0.0 }
 0x199   :  { %6850 = vmatmul.msk.bf16.gmra.mxu0 %vm2051_vm0, %v7138_v50  ;;  %6922 = vmatmul.msk.bf16.gmra.mxu1 %vm2051_vm0, %v7210_v40  ;;  %v4399_v15 = vmax.f32 %v3011_v9, 0.0  ;;  %v4543_v16 = vmax.f32 %v3371_v10, 0.0 }
 0x19a   :  { %v5118_v1 = vmax.f32 %v4686_v62, %v4830_v63  ;;  %6994 = vmatmul.msk.bf16.gmra.mxu2 %vm2051_vm0, %v7282_v57  ;;  %7066 = vmatmul.msk.bf16.gmra.mxu3 %vm2051_vm0, %v7354_v59  ;;  %v7212_v57 = vld [vmem:[%s9847_s0 + $0x318] sm:$0xff] }
 0x19b   :  { %v4975_v31 = vmax.f32 %v4399_v15, %v4543_v16 }
 0x19c   :  { %v5262_v3 = vmax.f32 %v4974_v0, %v5118_v1  ;;  %v7284_v1 = vld [vmem:[%s9847_s0 + $0x558] sm:$0xff] }
 0x19d   :  { %v3730_v4 = vpop.f32.mrf.mxu2  ;;  %v4090_v5 = vpop.f32.mrf.mxu3 }
 0x19e   :  { %v7486_v6 = vpack.c.bf16 %v5262_v3, %v5261_v2  ;;  %v3012_v7 = vpop.f32.mrf.mxu0  ;;  %v3372_v8 = vpop.f32.mrf.mxu1  ;;  %v3731_v11 = vadd.f32 %v8375_v58, %v3730_v4  ;;  %v4091_v12 = vadd.f32 %v8375_v58, %v4090_v5  ;;  %v7356_v2 = vld [vmem:[%s9847_s0 + $0x798] sm:$0xff] }
 0x19f   :  { %v3013_v13 = vadd.f32 %v8375_v58, %v3012_v7  ;;  %v3373_v14 = vadd.f32 %v8375_v58, %v3372_v8 }
 0x1a0   :  { %7778 = vst [vmem:[%s9849_s3 + $0x80] sm:$0xff] %v7486_v6   ;;  %v4687_v17 = vmax.f32 %v3731_v11, 0.0  ;;  %v4831_v18 = vmax.f32 %v4091_v12, 0.0 }
 0x1a1   :  { %v4400_v23 = vmax.f32 %v3013_v13, 0.0  ;;  %v4544_v24 = vmax.f32 %v3373_v14, 0.0 }
 0x1a2   :  { %v5119_v32 = vmax.f32 %v4687_v17, %v4831_v18 }
 0x1a3   :  { %v4976_v35 = vmax.f32 %v4400_v23, %v4544_v24 }
 0x1a4   :  { %v5263_v37 = vmax.f32 %v4975_v31, %v5119_v32 }
 0x1a5   :  { %v3732_v19 = vpop.f32.mrf.mxu2  ;;  %v4092_v20 = vpop.f32.mrf.mxu3 }
 0x1a6   :  { %v3733_v25 = vadd.f32 %v8375_v58, %v3732_v19  ;;  %v4093_v26 = vadd.f32 %v8375_v58, %v4092_v20  ;;  %v3015_v27 = vpop.f32.mrf.mxu0  ;;  %v3375_v28 = vpop.f32.mrf.mxu1 }
 0x1a7   :  { %v3016_v45 = vadd.f32 %v8375_v58, %v3015_v27  ;;  %v3376_v46 = vadd.f32 %v8375_v58, %v3375_v28  ;;  %v7141_v28 = vld [vmem:[%s9847_s0 + $0xe0] sm:$0xff] }
 0x1a8   :  { %v4688_v33 = vmax.f32 %v3733_v25, 0.0  ;;  %v4832_v34 = vmax.f32 %v4093_v26, 0.0 }
 0x1a9   :  { %6851 = vmatmul.msk.bf16.gmra.mxu0 %vm2051_vm0, %v7139_v21  ;;  %6923 = vmatmul.msk.bf16.gmra.mxu1 %vm2051_vm0, %v7211_v22  ;;  %v4401_v40 = vmax.f32 %v3016_v45, 0.0  ;;  %v4545_v51 = vmax.f32 %v3376_v46, 0.0 }
 0x1aa   :  { %v5120_v36 = vmax.f32 %v4688_v33, %v4832_v34  ;;  %6995 = vmatmul.msk.bf16.gmra.mxu2 %vm2051_vm0, %v7283_v29  ;;  %7067 = vmatmul.msk.bf16.gmra.mxu3 %vm2051_vm0, %v7355_v30  ;;  %v7213_v29 = vld [vmem:[%s9847_s0 + $0x320] sm:$0xff] }
 0x1ab   :  { %v4977_v3 = vmax.f32 %v4401_v40, %v4545_v51 }
 0x1ac   :  { %v5264_v38 = vmax.f32 %v4976_v35, %v5120_v36  ;;  %v7285_v36 = vld [vmem:[%s9847_s0 + $0x560] sm:$0xff] }
 0x1ad   :  { %v3735_v39 = vpop.f32.mrf.mxu2  ;;  %v4095_v41 = vpop.f32.mrf.mxu3 }
 0x1ae   :  { %v7491_v42 = vpack.c.bf16 %v5264_v38, %v5263_v37  ;;  %v3017_v43 = vpop.f32.mrf.mxu0  ;;  %v3377_v44 = vpop.f32.mrf.mxu1  ;;  %v3736_v47 = vadd.f32 %v8375_v58, %v3735_v39  ;;  %v4096_v48 = vadd.f32 %v8375_v58, %v4095_v41  ;;  %v7357_v37 = vld [vmem:[%s9847_s0 + $0x7a0] sm:$0xff] }
 0x1af   :  { %v3018_v49 = vadd.f32 %v8375_v58, %v3017_v43  ;;  %v3378_v50 = vadd.f32 %v8375_v58, %v3377_v44 }
 0x1b0   :  { %7779 = vst [vmem:[%s9849_s3 + $0x88] sm:$0xff] %v7491_v42   ;;  %v4689_v52 = vmax.f32 %v3736_v47, 0.0  ;;  %v4833_v53 = vmax.f32 %v4096_v48, 0.0 }
 0x1b1   :  { %v4402_v59 = vmax.f32 %v3018_v49, 0.0  ;;  %v4546_v60 = vmax.f32 %v3378_v50, 0.0 }
 0x1b2   :  { %v5121_v4 = vmax.f32 %v4689_v52, %v4833_v53 }
 0x1b3   :  { %v4978_v7 = vmax.f32 %v4402_v59, %v4546_v60 }
 0x1b4   :  { %v5265_v9 = vmax.f32 %v4977_v3, %v5121_v4 }
 0x1b5   :  { %v3737_v54 = vpop.f32.mrf.mxu2  ;;  %v4097_v55 = vpop.f32.mrf.mxu3 }
 0x1b6   :  { %v3738_v61 = vadd.f32 %v8375_v58, %v3737_v54  ;;  %v4098_v62 = vadd.f32 %v8375_v58, %v4097_v55  ;;  %v3020_v63 = vpop.f32.mrf.mxu0  ;;  %v3380_v0 = vpop.f32.mrf.mxu1 }
 0x1b7   :  { %v3021_v16 = vadd.f32 %v8375_v58, %v3020_v63  ;;  %v3381_v17 = vadd.f32 %v8375_v58, %v3380_v0  ;;  %v7142_v0 = vld [vmem:[%s9847_s0 + $0xe8] sm:$0xff] }
 0x1b8   :  { %v4690_v5 = vmax.f32 %v3738_v61, 0.0  ;;  %v4834_v6 = vmax.f32 %v4098_v62, 0.0 }
 0x1b9   :  { %6852 = vmatmul.msk.bf16.gmra.mxu0 %vm2051_vm0, %v7140_v56  ;;  %6924 = vmatmul.msk.bf16.gmra.mxu1 %vm2051_vm0, %v7212_v57  ;;  %v4403_v22 = vmax.f32 %v3021_v16, 0.0  ;;  %v4547_v23 = vmax.f32 %v3381_v17, 0.0 }
 0x1ba   :  { %v5122_v8 = vmax.f32 %v4690_v5, %v4834_v6  ;;  %6996 = vmatmul.msk.bf16.gmra.mxu2 %vm2051_vm0, %v7284_v1  ;;  %7068 = vmatmul.msk.bf16.gmra.mxu3 %vm2051_vm0, %v7356_v2  ;;  %v7214_v1 = vld [vmem:[%s9847_s0 + $0x328] sm:$0xff] }
 0x1bb   :  { %v4979_v38 = vmax.f32 %v4403_v22, %v4547_v23 }
 0x1bc   :  { %v5266_v10 = vmax.f32 %v4978_v7, %v5122_v8  ;;  %v7286_v8 = vld [vmem:[%s9847_s0 + $0x568] sm:$0xff] }
 0x1bd   :  { %v3740_v11 = vpop.f32.mrf.mxu2  ;;  %v4100_v12 = vpop.f32.mrf.mxu3 }
 0x1be   :  { %v7496_v13 = vpack.c.bf16 %v5266_v10, %v5265_v9  ;;  %v3022_v14 = vpop.f32.mrf.mxu0  ;;  %v3382_v15 = vpop.f32.mrf.mxu1  ;;  %v3741_v18 = vadd.f32 %v8375_v58, %v3740_v11  ;;  %v4101_v19 = vadd.f32 %v8375_v58, %v4100_v12  ;;  %v7358_v9 = vld [vmem:[%s9847_s0 + $0x7a8] sm:$0xff] }
 0x1bf   :  { %v3023_v20 = vadd.f32 %v8375_v58, %v3022_v14  ;;  %v3383_v21 = vadd.f32 %v8375_v58, %v3382_v15 }
 0x1c0   :  { %7780 = vst [vmem:[%s9849_s3 + $0x90] sm:$0xff] %v7496_v13   ;;  %v4691_v24 = vmax.f32 %v3741_v18, 0.0  ;;  %v4835_v25 = vmax.f32 %v4101_v19, 0.0 }
 0x1c1   :  { %v4404_v30 = vmax.f32 %v3023_v20, 0.0  ;;  %v4548_v31 = vmax.f32 %v3383_v21, 0.0 }
 0x1c2   :  { %v5123_v39 = vmax.f32 %v4691_v24, %v4835_v25 }
 0x1c3   :  { %v4980_v43 = vmax.f32 %v4404_v30, %v4548_v31 }
 0x1c4   :  { %v5267_v45 = vmax.f32 %v4979_v38, %v5123_v39 }
 0x1c5   :  { %v3742_v26 = vpop.f32.mrf.mxu2  ;;  %v4102_v27 = vpop.f32.mrf.mxu3 }
 0x1c6   :  { %v3743_v32 = vadd.f32 %v8375_v58, %v3742_v26  ;;  %v4103_v33 = vadd.f32 %v8375_v58, %v4102_v27  ;;  %v3025_v34 = vpop.f32.mrf.mxu0  ;;  %v3385_v35 = vpop.f32.mrf.mxu1 }
 0x1c7   :  { %v3026_v51 = vadd.f32 %v8375_v58, %v3025_v34  ;;  %v3386_v52 = vadd.f32 %v8375_v58, %v3385_v35  ;;  %v7143_v35 = vld [vmem:[%s9847_s0 + $0xf0] sm:$0xff] }
 0x1c8   :  { %v4692_v41 = vmax.f32 %v3743_v32, 0.0  ;;  %v4836_v42 = vmax.f32 %v4103_v33, 0.0 }
 0x1c9   :  { %6853 = vmatmul.msk.bf16.gmra.mxu0 %vm2051_vm0, %v7141_v28  ;;  %6925 = vmatmul.msk.bf16.gmra.mxu1 %vm2051_vm0, %v7213_v29  ;;  %v4405_v57 = vmax.f32 %v3026_v51, 0.0  ;;  %v4549_v59 = vmax.f32 %v3386_v52, 0.0 }
 0x1ca   :  { %v5124_v44 = vmax.f32 %v4692_v41, %v4836_v42  ;;  %6997 = vmatmul.msk.bf16.gmra.mxu2 %vm2051_vm0, %v7285_v36  ;;  %7069 = vmatmul.msk.bf16.gmra.mxu3 %vm2051_vm0, %v7357_v37  ;;  %v7215_v36 = vld [vmem:[%s9847_s0 + $0x330] sm:$0xff] }
 0x1cb   :  { %v4981_v10 = vmax.f32 %v4405_v57, %v4549_v59 }
 0x1cc   :  { %v5268_v46 = vmax.f32 %v4980_v43, %v5124_v44  ;;  %v7287_v44 = vld [vmem:[%s9847_s0 + $0x570] sm:$0xff] }
 0x1cd   :  { %v3745_v47 = vpop.f32.mrf.mxu2  ;;  %v4105_v48 = vpop.f32.mrf.mxu3 }
 0x1ce   :  { %v7501_v49 = vpack.c.bf16 %v5268_v46, %v5267_v45  ;;  %v3027_v50 = vpop.f32.mrf.mxu0  ;;  %v3387_v40 = vpop.f32.mrf.mxu1  ;;  %v3746_v53 = vadd.f32 %v8375_v58, %v3745_v47  ;;  %v4106_v54 = vadd.f32 %v8375_v58, %v4105_v48  ;;  %v7359_v45 = vld [vmem:[%s9847_s0 + $0x7b0] sm:$0xff] }
 0x1cf   :  { %v3028_v55 = vadd.f32 %v8375_v58, %v3027_v50  ;;  %v3388_v56 = vadd.f32 %v8375_v58, %v3387_v40 }
 0x1d0   :  { %7781 = vst [vmem:[%s9849_s3 + $0x98] sm:$0xff] %v7501_v49   ;;  %v4693_v60 = vmax.f32 %v3746_v53, 0.0  ;;  %v4837_v61 = vmax.f32 %v4106_v54, 0.0 }
 0x1d1   :  { %v4406_v2 = vmax.f32 %v3028_v55, 0.0  ;;  %v4550_v3 = vmax.f32 %v3388_v56, 0.0 }
 0x1d2   :  { %v5125_v11 = vmax.f32 %v4693_v60, %v4837_v61 }
 0x1d3   :  { %v4982_v14 = vmax.f32 %v4406_v2, %v4550_v3 }
 0x1d4   :  { %v5269_v16 = vmax.f32 %v4981_v10, %v5125_v11 }
 0x1d5   :  { %v3747_v62 = vpop.f32.mrf.mxu2  ;;  %v4107_v63 = vpop.f32.mrf.mxu3 }
 0x1d6   :  { %v3748_v4 = vadd.f32 %v8375_v58, %v3747_v62  ;;  %v4108_v5 = vadd.f32 %v8375_v58, %v4107_v63  ;;  %v3030_v6 = vpop.f32.mrf.mxu0  ;;  %v3390_v7 = vpop.f32.mrf.mxu1 }
 0x1d7   :  { %v3031_v23 = vadd.f32 %v8375_v58, %v3030_v6  ;;  %v3391_v24 = vadd.f32 %v8375_v58, %v3390_v7  ;;  %v7144_v7 = vld [vmem:[%s9847_s0 + $0xf8] sm:$0xff] }
 0x1d8   :  { %v4694_v12 = vmax.f32 %v3748_v4, 0.0  ;;  %v4838_v13 = vmax.f32 %v4108_v5, 0.0 }
 0x1d9   :  { %6854 = vmatmul.msk.bf16.gmra.mxu0 %vm2051_vm0, %v7142_v0  ;;  %6926 = vmatmul.msk.bf16.gmra.mxu1 %vm2051_vm0, %v7214_v1  ;;  %v4407_v29 = vmax.f32 %v3031_v23, 0.0  ;;  %v4551_v30 = vmax.f32 %v3391_v24, 0.0 }
 0x1da   :  { %v5126_v15 = vmax.f32 %v4694_v12, %v4838_v13  ;;  %6998 = vmatmul.msk.bf16.gmra.mxu2 %vm2051_vm0, %v7286_v8  ;;  %7070 = vmatmul.msk.bf16.gmra.mxu3 %vm2051_vm0, %v7358_v9  ;;  %v7216_v8 = vld [vmem:[%s9847_s0 + $0x338] sm:$0xff] }
 0x1db   :  { %v4983_v46 = vmax.f32 %v4407_v29, %v4551_v30 }
 0x1dc   :  { %v5270_v17 = vmax.f32 %v4982_v14, %v5126_v15  ;;  %v7288_v15 = vld [vmem:[%s9847_s0 + $0x578] sm:$0xff] }
 0x1dd   :  { %v3750_v18 = vpop.f32.mrf.mxu2  ;;  %v4110_v19 = vpop.f32.mrf.mxu3 }
 0x1de   :  { %v7506_v20 = vpack.c.bf16 %v5270_v17, %v5269_v16  ;;  %v3032_v21 = vpop.f32.mrf.mxu0  ;;  %v3392_v22 = vpop.f32.mrf.mxu1  ;;  %v3751_v25 = vadd.f32 %v8375_v58, %v3750_v18  ;;  %v4111_v26 = vadd.f32 %v8375_v58, %v4110_v19  ;;  %v7360_v16 = vld [vmem:[%s9847_s0 + $0x7b8] sm:$0xff] }
 0x1df   :  { %v3033_v27 = vadd.f32 %v8375_v58, %v3032_v21  ;;  %v3393_v28 = vadd.f32 %v8375_v58, %v3392_v22 }
 0x1e0   :  { %7782 = vst [vmem:[%s9849_s3 + $0xa0] sm:$0xff] %v7506_v20   ;;  %v4695_v31 = vmax.f32 %v3751_v25, 0.0  ;;  %v4839_v32 = vmax.f32 %v4111_v26, 0.0 }
 0x1e1   :  { %v4408_v37 = vmax.f32 %v3033_v27, 0.0  ;;  %v4552_v38 = vmax.f32 %v3393_v28, 0.0 }
 0x1e2   :  { %v5127_v47 = vmax.f32 %v4695_v31, %v4839_v32 }
 0x1e3   :  { %v4984_v50 = vmax.f32 %v4408_v37, %v4552_v38 }
 0x1e4   :  { %v5271_v51 = vmax.f32 %v4983_v46, %v5127_v47 }
 0x1e5   :  { %v3752_v33 = vpop.f32.mrf.mxu2  ;;  %v4112_v34 = vpop.f32.mrf.mxu3 }
 0x1e6   :  { %v3753_v39 = vadd.f32 %v8375_v58, %v3752_v33  ;;  %v4113_v41 = vadd.f32 %v8375_v58, %v4112_v34  ;;  %v3035_v42 = vpop.f32.mrf.mxu0  ;;  %v3395_v43 = vpop.f32.mrf.mxu1 }
 0x1e7   :  { %v3036_v59 = vadd.f32 %v8375_v58, %v3035_v42  ;;  %v3396_v60 = vadd.f32 %v8375_v58, %v3395_v43  ;;  %v7145_v43 = vld [vmem:[%s9847_s0 + $0x100] sm:$0xff] }
 0x1e8   :  { %v4696_v48 = vmax.f32 %v3753_v39, 0.0  ;;  %v4840_v49 = vmax.f32 %v4113_v41, 0.0 }
 0x1e9   :  { %6855 = vmatmul.msk.bf16.gmra.mxu0 %vm2051_vm0, %v7143_v35  ;;  %6927 = vmatmul.msk.bf16.gmra.mxu1 %vm2051_vm0, %v7215_v36  ;;  %v4409_v1 = vmax.f32 %v3036_v59, 0.0  ;;  %v4553_v2 = vmax.f32 %v3396_v60, 0.0 }
 0x1ea   :  { %v5128_v40 = vmax.f32 %v4696_v48, %v4840_v49  ;;  %6999 = vmatmul.msk.bf16.gmra.mxu2 %vm2051_vm0, %v7287_v44  ;;  %7071 = vmatmul.msk.bf16.gmra.mxu3 %vm2051_vm0, %v7359_v45  ;;  %v7217_v44 = vld [vmem:[%s9847_s0 + $0x340] sm:$0xff] }
 0x1eb   :  { %v4985_v17 = vmax.f32 %v4409_v1, %v4553_v2 }
 0x1ec   :  { %v5272_v52 = vmax.f32 %v4984_v50, %v5128_v40  ;;  %v7289_v40 = vld [vmem:[%s9847_s0 + $0x580] sm:$0xff] }
 0x1ed   :  { %v3755_v53 = vpop.f32.mrf.mxu2  ;;  %v4115_v54 = vpop.f32.mrf.mxu3 }
 0x1ee   :  { %v7511_v55 = vpack.c.bf16 %v5272_v52, %v5271_v51  ;;  %v3037_v56 = vpop.f32.mrf.mxu0  ;;  %v3397_v57 = vpop.f32.mrf.mxu1  ;;  %v3756_v61 = vadd.f32 %v8375_v58, %v3755_v53  ;;  %v4116_v62 = vadd.f32 %v8375_v58, %v4115_v54  ;;  %v7361_v51 = vld [vmem:[%s9847_s0 + $0x7c0] sm:$0xff] }
 0x1ef   :  { %v3038_v63 = vadd.f32 %v8375_v58, %v3037_v56  ;;  %v3398_v0 = vadd.f32 %v8375_v58, %v3397_v57 }
 0x1f0   :  { %7783 = vst [vmem:[%s9849_s3 + $0xa8] sm:$0xff] %v7511_v55   ;;  %v4697_v3 = vmax.f32 %v3756_v61, 0.0  ;;  %v4841_v4 = vmax.f32 %v4116_v62, 0.0 }
 0x1f1   :  { %v4410_v9 = vmax.f32 %v3038_v63, 0.0  ;;  %v4554_v10 = vmax.f32 %v3398_v0, 0.0 }
 0x1f2   :  { %v5129_v18 = vmax.f32 %v4697_v3, %v4841_v4 }
 0x1f3   :  { %v4986_v21 = vmax.f32 %v4410_v9, %v4554_v10 }
 0x1f4   :  { %v5273_v23 = vmax.f32 %v4985_v17, %v5129_v18 }
 0x1f5   :  { %v3757_v5 = vpop.f32.mrf.mxu2  ;;  %v4117_v6 = vpop.f32.mrf.mxu3 }
 0x1f6   :  { %v3758_v11 = vadd.f32 %v8375_v58, %v3757_v5  ;;  %v4118_v12 = vadd.f32 %v8375_v58, %v4117_v6  ;;  %v3040_v13 = vpop.f32.mrf.mxu0  ;;  %v3400_v14 = vpop.f32.mrf.mxu1 }
 0x1f7   :  { %v3041_v30 = vadd.f32 %v8375_v58, %v3040_v13  ;;  %v3401_v31 = vadd.f32 %v8375_v58, %v3400_v14  ;;  %v7146_v14 = vld [vmem:[%s9847_s0 + $0x108] sm:$0xff] }
 0x1f8   :  { %v4698_v19 = vmax.f32 %v3758_v11, 0.0  ;;  %v4842_v20 = vmax.f32 %v4118_v12, 0.0 }
 0x1f9   :  { %6856 = vmatmul.msk.bf16.gmra.mxu0 %vm2051_vm0, %v7144_v7  ;;  %6928 = vmatmul.msk.bf16.gmra.mxu1 %vm2051_vm0, %v7216_v8  ;;  %v4411_v36 = vmax.f32 %v3041_v30, 0.0  ;;  %v4555_v37 = vmax.f32 %v3401_v31, 0.0 }
 0x1fa   :  { %v5130_v22 = vmax.f32 %v4698_v19, %v4842_v20  ;;  %7000 = vmatmul.msk.bf16.gmra.mxu2 %vm2051_vm0, %v7288_v15  ;;  %7072 = vmatmul.msk.bf16.gmra.mxu3 %vm2051_vm0, %v7360_v16  ;;  %v7218_v15 = vld [vmem:[%s9847_s0 + $0x348] sm:$0xff] }
 0x1fb   :  { %v4987_v52 = vmax.f32 %v4411_v36, %v4555_v37 }
 0x1fc   :  { %v5274_v24 = vmax.f32 %v4986_v21, %v5130_v22  ;;  %v7290_v22 = vld [vmem:[%s9847_s0 + $0x588] sm:$0xff] }
 0x1fd   :  { %v3760_v25 = vpop.f32.mrf.mxu2  ;;  %v4120_v26 = vpop.f32.mrf.mxu3 }
 0x1fe   :  { %v7516_v27 = vpack.c.bf16 %v5274_v24, %v5273_v23  ;;  %v3042_v28 = vpop.f32.mrf.mxu0  ;;  %v3402_v29 = vpop.f32.mrf.mxu1  ;;  %v3761_v32 = vadd.f32 %v8375_v58, %v3760_v25  ;;  %v4121_v33 = vadd.f32 %v8375_v58, %v4120_v26  ;;  %v7362_v23 = vld [vmem:[%s9847_s0 + $0x7c8] sm:$0xff] }
 0x1ff   :  { %v3043_v34 = vadd.f32 %v8375_v58, %v3042_v28  ;;  %v3403_v35 = vadd.f32 %v8375_v58, %v3402_v29 }
 0x200   :  { %7784 = vst [vmem:[%s9849_s3 + $0xb0] sm:$0xff] %v7516_v27   ;;  %v4699_v38 = vmax.f32 %v3761_v32, 0.0  ;;  %v4843_v39 = vmax.f32 %v4121_v33, 0.0 }
 0x201   :  { %v4412_v45 = vmax.f32 %v3043_v34, 0.0  ;;  %v4556_v46 = vmax.f32 %v3403_v35, 0.0 }
 0x202   :  { %v5131_v53 = vmax.f32 %v4699_v38, %v4843_v39 }
 0x203   :  { %v4988_v56 = vmax.f32 %v4412_v45, %v4556_v46 }
 0x204   :  { %v5275_v59 = vmax.f32 %v4987_v52, %v5131_v53 }
 0x205   :  { %v3762_v41 = vpop.f32.mrf.mxu2  ;;  %v4122_v42 = vpop.f32.mrf.mxu3 }
 0x206   :  { %v3763_v47 = vadd.f32 %v8375_v58, %v3762_v41  ;;  %v4123_v48 = vadd.f32 %v8375_v58, %v4122_v42  ;;  %v3045_v49 = vpop.f32.mrf.mxu0  ;;  %v3405_v50 = vpop.f32.mrf.mxu1 }
 0x207   :  { %v3046_v2 = vadd.f32 %v8375_v58, %v3045_v49  ;;  %v3406_v3 = vadd.f32 %v8375_v58, %v3405_v50  ;;  %v7147_v50 = vld [vmem:[%s9847_s0 + $0x110] sm:$0xff] }
 0x208   :  { %v4700_v54 = vmax.f32 %v3763_v47, 0.0  ;;  %v4844_v55 = vmax.f32 %v4123_v48, 0.0 }
 0x209   :  { %6857 = vmatmul.msk.bf16.gmra.mxu0 %vm2051_vm0, %v7145_v43  ;;  %6929 = vmatmul.msk.bf16.gmra.mxu1 %vm2051_vm0, %v7217_v44  ;;  %v4413_v8 = vmax.f32 %v3046_v2, 0.0  ;;  %v4557_v9 = vmax.f32 %v3406_v3, 0.0 }
 0x20a   :  { %v5132_v57 = vmax.f32 %v4700_v54, %v4844_v55  ;;  %7001 = vmatmul.msk.bf16.gmra.mxu2 %vm2051_vm0, %v7289_v40  ;;  %7073 = vmatmul.msk.bf16.gmra.mxu3 %vm2051_vm0, %v7361_v51  ;;  %v7219_v40 = vld [vmem:[%s9847_s0 + $0x350] sm:$0xff] }
 0x20b   :  { %v4989_v24 = vmax.f32 %v4413_v8, %v4557_v9  ;;  %v8731_v8 = vld [vmem:[%s9848_s2] ss:$0 sm:$0xff] }
 0x20c   :  { %v5276_v60 = vmax.f32 %v4988_v56, %v5132_v57  ;;  %v7291_v57 = vld [vmem:[%s9847_s0 + $0x590] sm:$0xff] }
 0x20d   :  { %v3765_v61 = vpop.f32.mrf.mxu2  ;;  %v4125_v62 = vpop.f32.mrf.mxu3 }
 0x20e   :  { %v7521_v63 = vpack.c.bf16 %v5276_v60, %v5275_v59  ;;  %v3047_v0 = vpop.f32.mrf.mxu0  ;;  %v3407_v1 = vpop.f32.mrf.mxu1  ;;  %v3766_v4 = vadd.f32 %v8375_v58, %v3765_v61  ;;  %v4126_v5 = vadd.f32 %v8375_v58, %v4125_v62  ;;  %v7363_v59 = vld [vmem:[%s9847_s0 + $0x7d0] sm:$0xff] }
 0x20f   :  { %v3048_v6 = vadd.f32 %v8375_v58, %v3047_v0  ;;  %v3408_v7 = vadd.f32 %v8375_v58, %v3407_v1 }
 0x210   :  { %7785 = vst [vmem:[%s9849_s3 + $0xb8] sm:$0xff] %v7521_v63   ;;  %v4701_v10 = vmax.f32 %v3766_v4, 0.0  ;;  %v4845_v11 = vmax.f32 %v4126_v5, 0.0 }
 0x211   :  { %v4414_v16 = vmax.f32 %v3048_v6, 0.0  ;;  %v4558_v17 = vmax.f32 %v3408_v7, 0.0 }
 0x212   :  { %v5133_v25 = vmax.f32 %v4701_v10, %v4845_v11 }
 0x213   :  { %v4990_v28 = vmax.f32 %v4414_v16, %v4558_v17 }
 0x214   :  { %v5277_v30 = vmax.f32 %v4989_v24, %v5133_v25 }
 0x215   :  { %v3767_v12 = vpop.f32.mrf.mxu2  ;;  %v4127_v13 = vpop.f32.mrf.mxu3 }
 0x216   :  { %v3768_v18 = vadd.f32 %v8375_v58, %v3767_v12  ;;  %v4128_v19 = vadd.f32 %v8375_v58, %v4127_v13  ;;  %v3050_v20 = vpop.f32.mrf.mxu0  ;;  %v3410_v21 = vpop.f32.mrf.mxu1 }
 0x217   :  { %v3051_v37 = vadd.f32 %v8375_v58, %v3050_v20  ;;  %v3411_v38 = vadd.f32 %v8375_v58, %v3410_v21  ;;  %v7148_v21 = vld [vmem:[%s9847_s0 + $0x118] sm:$0xff] }
 0x218   :  { %v4702_v26 = vmax.f32 %v3768_v18, 0.0  ;;  %v4846_v27 = vmax.f32 %v4128_v19, 0.0 }
 0x219   :  { %6858 = vmatmul.msk.bf16.gmra.mxu0 %vm2051_vm0, %v7146_v14  ;;  %6930 = vmatmul.msk.bf16.gmra.mxu1 %vm2051_vm0, %v7218_v15  ;;  %v4415_v44 = vmax.f32 %v3051_v37, 0.0  ;;  %v4559_v45 = vmax.f32 %v3411_v38, 0.0 }
 0x21a   :  { %v5134_v29 = vmax.f32 %v4702_v26, %v4846_v27  ;;  %7002 = vmatmul.msk.bf16.gmra.mxu2 %vm2051_vm0, %v7290_v22  ;;  %7074 = vmatmul.msk.bf16.gmra.mxu3 %vm2051_vm0, %v7362_v23  ;;  %v7220_v22 = vld [vmem:[%s9847_s0 + $0x358] sm:$0xff] }
 0x21b   :  { %v4991_v60 = vmax.f32 %v4415_v44, %v4559_v45 }
 0x21c   :  { %v5278_v31 = vmax.f32 %v4990_v28, %v5134_v29  ;;  %v7292_v29 = vld [vmem:[%s9847_s0 + $0x598] sm:$0xff] }
 0x21d   :  { %v3770_v32 = vpop.f32.mrf.mxu2  ;;  %v4130_v33 = vpop.f32.mrf.mxu3 }
 0x21e   :  { %v7526_v34 = vpack.c.bf16 %v5278_v31, %v5277_v30  ;;  %v3052_v35 = vpop.f32.mrf.mxu0  ;;  %v3412_v36 = vpop.f32.mrf.mxu1  ;;  %v3771_v39 = vadd.f32 %v8375_v58, %v3770_v32  ;;  %v4131_v41 = vadd.f32 %v8375_v58, %v4130_v33  ;;  %v7364_v30 = vld [vmem:[%s9847_s0 + $0x7d8] sm:$0xff] }
 0x21f   :  { %v3053_v42 = vadd.f32 %v8375_v58, %v3052_v35  ;;  %v3413_v43 = vadd.f32 %v8375_v58, %v3412_v36 }
 0x220   :  { %7786 = vst [vmem:[%s9849_s3 + $0xc0] sm:$0xff] %v7526_v34   ;;  %v4703_v46 = vmax.f32 %v3771_v39, 0.0  ;;  %v4847_v47 = vmax.f32 %v4131_v41, 0.0 }
 0x221   :  { %v4416_v51 = vmax.f32 %v3053_v42, 0.0  ;;  %v4560_v52 = vmax.f32 %v3413_v43, 0.0 }
 0x222   :  { %v5135_v61 = vmax.f32 %v4703_v46, %v4847_v47 }
 0x223   :  { %v4992_v0 = vmax.f32 %v4416_v51, %v4560_v52 }
 0x224   :  { %v5279_v1 = vmax.f32 %v4991_v60, %v5135_v61 }
 0x225   :  { %v3772_v48 = vpop.f32.mrf.mxu2  ;;  %v4132_v49 = vpop.f32.mrf.mxu3 }
 0x226   :  { %v3773_v53 = vadd.f32 %v8375_v58, %v3772_v48  ;;  %v4133_v54 = vadd.f32 %v8375_v58, %v4132_v49  ;;  %v3055_v55 = vpop.f32.mrf.mxu0  ;;  %v3415_v56 = vpop.f32.mrf.mxu1 }
 0x227   :  { %v3056_v9 = vadd.f32 %v8731_v8, %v3055_v55  ;;  %v3416_v10 = vadd.f32 %v8731_v8, %v3415_v56  ;;  %v7149_v56 = vld [vmem:[%s9847_s0 + $0x120] sm:$0xff] }
 0x228   :  { %v4704_v62 = vmax.f32 %v3773_v53, 0.0  ;;  %v4848_v63 = vmax.f32 %v4133_v54, 0.0 }
 0x229   :  { %6859 = vmatmul.msk.bf16.gmra.mxu0 %vm2051_vm0, %v7147_v50  ;;  %6931 = vmatmul.msk.bf16.gmra.mxu1 %vm2051_vm0, %v7219_v40  ;;  %v4417_v15 = vmax.f32 %v3056_v9, 0.0  ;;  %v4561_v16 = vmax.f32 %v3416_v10, 0.0 }
 0x22a   :  { %v5136_v58 = vmax.f32 %v4704_v62, %v4848_v63  ;;  %7003 = vmatmul.msk.bf16.gmra.mxu2 %vm2051_vm0, %v7291_v57  ;;  %7075 = vmatmul.msk.bf16.gmra.mxu3 %vm2051_vm0, %v7363_v59  ;;  %v7221_v57 = vld [vmem:[%s9847_s0 + $0x360] sm:$0xff] }
 0x22b   :  { %v4993_v31 = vmax.f32 %v4417_v15, %v4561_v16 }
 0x22c   :  { %v5280_v2 = vmax.f32 %v4992_v0, %v5136_v58  ;;  %v7293_v58 = vld [vmem:[%s9847_s0 + $0x5a0] sm:$0xff] }
 0x22d   :  { %v3775_v3 = vpop.f32.mrf.mxu2  ;;  %v4135_v4 = vpop.f32.mrf.mxu3 }
 0x22e   :  { %v7531_v5 = vpack.c.bf16 %v5280_v2, %v5279_v1  ;;  %v3057_v6 = vpop.f32.mrf.mxu0  ;;  %v3417_v7 = vpop.f32.mrf.mxu1  ;;  %v3776_v11 = vadd.f32 %v8731_v8, %v3775_v3  ;;  %v4136_v12 = vadd.f32 %v8731_v8, %v4135_v4  ;;  %v7365_v1 = vld [vmem:[%s9847_s0 + $0x7e0] sm:$0xff] }
 0x22f   :  { %v3058_v13 = vadd.f32 %v8731_v8, %v3057_v6  ;;  %v3418_v14 = vadd.f32 %v8731_v8, %v3417_v7 }
 0x230   :  { %7787 = vst [vmem:[%s9849_s3 + $0xc8] sm:$0xff] %v7531_v5   ;;  %v4705_v17 = vmax.f32 %v3776_v11, 0.0  ;;  %v4849_v18 = vmax.f32 %v4136_v12, 0.0 }
 0x231   :  { %v4418_v23 = vmax.f32 %v3058_v13, 0.0  ;;  %v4562_v24 = vmax.f32 %v3418_v14, 0.0 }
 0x232   :  { %v5137_v32 = vmax.f32 %v4705_v17, %v4849_v18 }
 0x233   :  { %v4994_v35 = vmax.f32 %v4418_v23, %v4562_v24 }
 0x234   :  { %v5281_v37 = vmax.f32 %v4993_v31, %v5137_v32 }
 0x235   :  { %v3777_v19 = vpop.f32.mrf.mxu2  ;;  %v4137_v20 = vpop.f32.mrf.mxu3 }
 0x236   :  { %v3778_v25 = vadd.f32 %v8731_v8, %v3777_v19  ;;  %v4138_v26 = vadd.f32 %v8731_v8, %v4137_v20  ;;  %v3060_v27 = vpop.f32.mrf.mxu0  ;;  %v3420_v28 = vpop.f32.mrf.mxu1 }
 0x237   :  { %v3061_v45 = vadd.f32 %v8731_v8, %v3060_v27  ;;  %v3421_v46 = vadd.f32 %v8731_v8, %v3420_v28  ;;  %v7150_v28 = vld [vmem:[%s9847_s0 + $0x128] sm:$0xff] }
 0x238   :  { %v4706_v33 = vmax.f32 %v3778_v25, 0.0  ;;  %v4850_v34 = vmax.f32 %v4138_v26, 0.0 }
 0x239   :  { %6860 = vmatmul.msk.bf16.gmra.mxu0 %vm2051_vm0, %v7148_v21  ;;  %6932 = vmatmul.msk.bf16.gmra.mxu1 %vm2051_vm0, %v7220_v22  ;;  %v4419_v40 = vmax.f32 %v3061_v45, 0.0  ;;  %v4563_v51 = vmax.f32 %v3421_v46, 0.0 }
 0x23a   :  { %v5138_v36 = vmax.f32 %v4706_v33, %v4850_v34  ;;  %7004 = vmatmul.msk.bf16.gmra.mxu2 %vm2051_vm0, %v7292_v29  ;;  %7076 = vmatmul.msk.bf16.gmra.mxu3 %vm2051_vm0, %v7364_v30  ;;  %v7222_v29 = vld [vmem:[%s9847_s0 + $0x368] sm:$0xff] }
 0x23b   :  { %v4995_v2 = vmax.f32 %v4419_v40, %v4563_v51 }
 0x23c   :  { %v5282_v38 = vmax.f32 %v4994_v35, %v5138_v36  ;;  %v7294_v36 = vld [vmem:[%s9847_s0 + $0x5a8] sm:$0xff] }
 0x23d   :  { %v3780_v39 = vpop.f32.mrf.mxu2  ;;  %v4140_v41 = vpop.f32.mrf.mxu3 }
 0x23e   :  { %v7536_v42 = vpack.c.bf16 %v5282_v38, %v5281_v37  ;;  %v3062_v43 = vpop.f32.mrf.mxu0  ;;  %v3422_v44 = vpop.f32.mrf.mxu1  ;;  %v3781_v47 = vadd.f32 %v8731_v8, %v3780_v39  ;;  %v4141_v48 = vadd.f32 %v8731_v8, %v4140_v41  ;;  %v7366_v37 = vld [vmem:[%s9847_s0 + $0x7e8] sm:$0xff] }
 0x23f   :  { %v3063_v49 = vadd.f32 %v8731_v8, %v3062_v43  ;;  %v3423_v50 = vadd.f32 %v8731_v8, %v3422_v44 }
 0x240   :  { %7788 = vst [vmem:[%s9849_s3 + $0xd0] sm:$0xff] %v7536_v42   ;;  %v4707_v52 = vmax.f32 %v3781_v47, 0.0  ;;  %v4851_v53 = vmax.f32 %v4141_v48, 0.0 }
 0x241   :  { %v4420_v59 = vmax.f32 %v3063_v49, 0.0  ;;  %v4564_v60 = vmax.f32 %v3423_v50, 0.0 }
 0x242   :  { %v5139_v3 = vmax.f32 %v4707_v52, %v4851_v53 }
 0x243   :  { %v4996_v6 = vmax.f32 %v4420_v59, %v4564_v60 }
 0x244   :  { %v5283_v9 = vmax.f32 %v4995_v2, %v5139_v3 }
 0x245   :  { %v3782_v54 = vpop.f32.mrf.mxu2  ;;  %v4142_v55 = vpop.f32.mrf.mxu3 }
 0x246   :  { %v3783_v61 = vadd.f32 %v8731_v8, %v3782_v54  ;;  %v4143_v62 = vadd.f32 %v8731_v8, %v4142_v55  ;;  %v3065_v63 = vpop.f32.mrf.mxu0  ;;  %v3425_v0 = vpop.f32.mrf.mxu1 }
 0x247   :  { %v3066_v16 = vadd.f32 %v8731_v8, %v3065_v63  ;;  %v3426_v17 = vadd.f32 %v8731_v8, %v3425_v0  ;;  %v7151_v0 = vld [vmem:[%s9847_s0 + $0x130] sm:$0xff] }
 0x248   :  { %v4708_v4 = vmax.f32 %v3783_v61, 0.0  ;;  %v4852_v5 = vmax.f32 %v4143_v62, 0.0 }
 0x249   :  { %6861 = vmatmul.msk.bf16.gmra.mxu0 %vm2051_vm0, %v7149_v56  ;;  %6933 = vmatmul.msk.bf16.gmra.mxu1 %vm2051_vm0, %v7221_v57  ;;  %v4421_v22 = vmax.f32 %v3066_v16, 0.0  ;;  %v4565_v23 = vmax.f32 %v3426_v17, 0.0 }
 0x24a   :  { %v5140_v7 = vmax.f32 %v4708_v4, %v4852_v5  ;;  %7005 = vmatmul.msk.bf16.gmra.mxu2 %vm2051_vm0, %v7293_v58  ;;  %7077 = vmatmul.msk.bf16.gmra.mxu3 %vm2051_vm0, %v7365_v1  ;;  %v7223_v58 = vld [vmem:[%s9847_s0 + $0x370] sm:$0xff] }
 0x24b   :  { %v4997_v38 = vmax.f32 %v4421_v22, %v4565_v23 }
 0x24c   :  { %v5284_v10 = vmax.f32 %v4996_v6, %v5140_v7  ;;  %v7295_v7 = vld [vmem:[%s9847_s0 + $0x5b0] sm:$0xff] }
 0x24d   :  { %v3785_v11 = vpop.f32.mrf.mxu2  ;;  %v4145_v12 = vpop.f32.mrf.mxu3 }
 0x24e   :  { %v7541_v13 = vpack.c.bf16 %v5284_v10, %v5283_v9  ;;  %v3067_v14 = vpop.f32.mrf.mxu0  ;;  %v3427_v15 = vpop.f32.mrf.mxu1  ;;  %v3786_v18 = vadd.f32 %v8731_v8, %v3785_v11  ;;  %v4146_v19 = vadd.f32 %v8731_v8, %v4145_v12  ;;  %v7367_v9 = vld [vmem:[%s9847_s0 + $0x7f0] sm:$0xff] }
 0x24f   :  { %v3068_v20 = vadd.f32 %v8731_v8, %v3067_v14  ;;  %v3428_v21 = vadd.f32 %v8731_v8, %v3427_v15 }
 0x250   :  { %7789 = vst [vmem:[%s9849_s3 + $0xd8] sm:$0xff] %v7541_v13   ;;  %v4709_v24 = vmax.f32 %v3786_v18, 0.0  ;;  %v4853_v25 = vmax.f32 %v4146_v19, 0.0 }
 0x251   :  { %v4422_v30 = vmax.f32 %v3068_v20, 0.0  ;;  %v4566_v31 = vmax.f32 %v3428_v21, 0.0 }
 0x252   :  { %v5141_v39 = vmax.f32 %v4709_v24, %v4853_v25 }
 0x253   :  { %v4998_v43 = vmax.f32 %v4422_v30, %v4566_v31 }
 0x254   :  { %v5285_v45 = vmax.f32 %v4997_v38, %v5141_v39 }
 0x255   :  { %v3787_v26 = vpop.f32.mrf.mxu2  ;;  %v4147_v27 = vpop.f32.mrf.mxu3 }
 0x256   :  { %v3788_v32 = vadd.f32 %v8731_v8, %v3787_v26  ;;  %v4148_v33 = vadd.f32 %v8731_v8, %v4147_v27  ;;  %v3070_v34 = vpop.f32.mrf.mxu0  ;;  %v3430_v35 = vpop.f32.mrf.mxu1 }
 0x257   :  { %v3071_v51 = vadd.f32 %v8731_v8, %v3070_v34  ;;  %v3431_v52 = vadd.f32 %v8731_v8, %v3430_v35  ;;  %v7152_v35 = vld [vmem:[%s9847_s0 + $0x138] sm:$0xff] }
 0x258   :  { %v4710_v41 = vmax.f32 %v3788_v32, 0.0  ;;  %v4854_v42 = vmax.f32 %v4148_v33, 0.0 }
 0x259   :  { %6862 = vmatmul.msk.bf16.gmra.mxu0 %vm2051_vm0, %v7150_v28  ;;  %6934 = vmatmul.msk.bf16.gmra.mxu1 %vm2051_vm0, %v7222_v29  ;;  %v4423_v57 = vmax.f32 %v3071_v51, 0.0  ;;  %v4567_v59 = vmax.f32 %v3431_v52, 0.0 }
 0x25a   :  { %v5142_v44 = vmax.f32 %v4710_v41, %v4854_v42  ;;  %7006 = vmatmul.msk.bf16.gmra.mxu2 %vm2051_vm0, %v7294_v36  ;;  %7078 = vmatmul.msk.bf16.gmra.mxu3 %vm2051_vm0, %v7366_v37  ;;  %v7224_v36 = vld [vmem:[%s9847_s0 + $0x378] sm:$0xff] }
 0x25b   :  { %v4999_v10 = vmax.f32 %v4423_v57, %v4567_v59 }
 0x25c   :  { %v5286_v46 = vmax.f32 %v4998_v43, %v5142_v44  ;;  %v7296_v44 = vld [vmem:[%s9847_s0 + $0x5b8] sm:$0xff] }
 0x25d   :  { %v3790_v47 = vpop.f32.mrf.mxu2  ;;  %v4150_v48 = vpop.f32.mrf.mxu3 }
 0x25e   :  { %v7546_v49 = vpack.c.bf16 %v5286_v46, %v5285_v45  ;;  %v3072_v50 = vpop.f32.mrf.mxu0  ;;  %v3432_v40 = vpop.f32.mrf.mxu1  ;;  %v3791_v53 = vadd.f32 %v8731_v8, %v3790_v47  ;;  %v4151_v54 = vadd.f32 %v8731_v8, %v4150_v48  ;;  %v7368_v45 = vld [vmem:[%s9847_s0 + $0x7f8] sm:$0xff] }
 0x25f   :  { %v3073_v55 = vadd.f32 %v8731_v8, %v3072_v50  ;;  %v3433_v56 = vadd.f32 %v8731_v8, %v3432_v40 }
 0x260   :  { %7790 = vst [vmem:[%s9849_s3 + $0xe0] sm:$0xff] %v7546_v49   ;;  %v4711_v60 = vmax.f32 %v3791_v53, 0.0  ;;  %v4855_v61 = vmax.f32 %v4151_v54, 0.0 }
 0x261   :  { %v4424_v1 = vmax.f32 %v3073_v55, 0.0  ;;  %v4568_v2 = vmax.f32 %v3433_v56, 0.0 }
 0x262   :  { %v5143_v11 = vmax.f32 %v4711_v60, %v4855_v61 }
 0x263   :  { %v5000_v14 = vmax.f32 %v4424_v1, %v4568_v2 }
 0x264   :  { %v5287_v16 = vmax.f32 %v4999_v10, %v5143_v11 }
 0x265   :  { %v3792_v62 = vpop.f32.mrf.mxu2  ;;  %v4152_v63 = vpop.f32.mrf.mxu3 }
 0x266   :  { %v3793_v3 = vadd.f32 %v8731_v8, %v3792_v62  ;;  %v4153_v4 = vadd.f32 %v8731_v8, %v4152_v63  ;;  %v3075_v5 = vpop.f32.mrf.mxu0  ;;  %v3435_v6 = vpop.f32.mrf.mxu1 }
 0x267   :  { %v3076_v23 = vadd.f32 %v8731_v8, %v3075_v5  ;;  %v3436_v24 = vadd.f32 %v8731_v8, %v3435_v6  ;;  %v7153_v6 = vld [vmem:[%s9847_s0 + $0x140] sm:$0xff] }
 0x268   :  { %v4712_v12 = vmax.f32 %v3793_v3, 0.0  ;;  %v4856_v13 = vmax.f32 %v4153_v4, 0.0 }
 0x269   :  { %6863 = vmatmul.msk.bf16.gmra.mxu0 %vm2051_vm0, %v7151_v0  ;;  %6935 = vmatmul.msk.bf16.gmra.mxu1 %vm2051_vm0, %v7223_v58  ;;  %v4425_v29 = vmax.f32 %v3076_v23, 0.0  ;;  %v4569_v30 = vmax.f32 %v3436_v24, 0.0 }
 0x26a   :  { %v5144_v15 = vmax.f32 %v4712_v12, %v4856_v13  ;;  %7007 = vmatmul.msk.bf16.gmra.mxu2 %vm2051_vm0, %v7295_v7  ;;  %7079 = vmatmul.msk.bf16.gmra.mxu3 %vm2051_vm0, %v7367_v9  ;;  %v7225_v7 = vld [vmem:[%s9847_s0 + $0x380] sm:$0xff] }
 0x26b   :  { %v5001_v46 = vmax.f32 %v4425_v29, %v4569_v30 }
 0x26c   :  { %v5288_v17 = vmax.f32 %v5000_v14, %v5144_v15  ;;  %v7297_v15 = vld [vmem:[%s9847_s0 + $0x5c0] sm:$0xff] }
 0x26d   :  { %v3795_v18 = vpop.f32.mrf.mxu2  ;;  %v4155_v19 = vpop.f32.mrf.mxu3 }
 0x26e   :  { %v7551_v20 = vpack.c.bf16 %v5288_v17, %v5287_v16  ;;  %v3077_v21 = vpop.f32.mrf.mxu0  ;;  %v3437_v22 = vpop.f32.mrf.mxu1  ;;  %v3796_v25 = vadd.f32 %v8731_v8, %v3795_v18  ;;  %v4156_v26 = vadd.f32 %v8731_v8, %v4155_v19  ;;  %v7369_v16 = vld [vmem:[%s9847_s0 + $0x800] sm:$0xff] }
 0x26f   :  { %v3078_v27 = vadd.f32 %v8731_v8, %v3077_v21  ;;  %v3438_v28 = vadd.f32 %v8731_v8, %v3437_v22 }
 0x270   :  { %7791 = vst [vmem:[%s9849_s3 + $0xe8] sm:$0xff] %v7551_v20   ;;  %v4713_v31 = vmax.f32 %v3796_v25, 0.0  ;;  %v4857_v32 = vmax.f32 %v4156_v26, 0.0 }
 0x271   :  { %v4426_v37 = vmax.f32 %v3078_v27, 0.0  ;;  %v4570_v38 = vmax.f32 %v3438_v28, 0.0 }
 0x272   :  { %v5145_v47 = vmax.f32 %v4713_v31, %v4857_v32 }
 0x273   :  { %v5002_v50 = vmax.f32 %v4426_v37, %v4570_v38 }
 0x274   :  { %v5289_v51 = vmax.f32 %v5001_v46, %v5145_v47 }
 0x275   :  { %v3797_v33 = vpop.f32.mrf.mxu2  ;;  %v4157_v34 = vpop.f32.mrf.mxu3 }
 0x276   :  { %v3798_v39 = vadd.f32 %v8731_v8, %v3797_v33  ;;  %v4158_v41 = vadd.f32 %v8731_v8, %v4157_v34  ;;  %v3080_v42 = vpop.f32.mrf.mxu0  ;;  %v3440_v43 = vpop.f32.mrf.mxu1 }
 0x277   :  { %v3081_v59 = vadd.f32 %v8731_v8, %v3080_v42  ;;  %v3441_v60 = vadd.f32 %v8731_v8, %v3440_v43  ;;  %v7154_v43 = vld [vmem:[%s9847_s0 + $0x148] sm:$0xff] }
 0x278   :  { %v4714_v48 = vmax.f32 %v3798_v39, 0.0  ;;  %v4858_v49 = vmax.f32 %v4158_v41, 0.0 }
 0x279   :  { %6864 = vmatmul.msk.bf16.gmra.mxu0 %vm2051_vm0, %v7152_v35  ;;  %6936 = vmatmul.msk.bf16.gmra.mxu1 %vm2051_vm0, %v7224_v36  ;;  %v4427_v58 = vmax.f32 %v3081_v59, 0.0  ;;  %v4571_v1 = vmax.f32 %v3441_v60, 0.0 }
 0x27a   :  { %v5146_v40 = vmax.f32 %v4714_v48, %v4858_v49  ;;  %7008 = vmatmul.msk.bf16.gmra.mxu2 %vm2051_vm0, %v7296_v44  ;;  %7080 = vmatmul.msk.bf16.gmra.mxu3 %vm2051_vm0, %v7368_v45  ;;  %v7226_v44 = vld [vmem:[%s9847_s0 + $0x388] sm:$0xff] }
 0x27b   :  { %v5003_v17 = vmax.f32 %v4427_v58, %v4571_v1 }
 0x27c   :  { %v5290_v52 = vmax.f32 %v5002_v50, %v5146_v40  ;;  %v7298_v40 = vld [vmem:[%s9847_s0 + $0x5c8] sm:$0xff] }
 0x27d   :  { %v3800_v53 = vpop.f32.mrf.mxu2  ;;  %v4160_v54 = vpop.f32.mrf.mxu3 }
 0x27e   :  { %v7556_v55 = vpack.c.bf16 %v5290_v52, %v5289_v51  ;;  %v3082_v56 = vpop.f32.mrf.mxu0  ;;  %v3442_v57 = vpop.f32.mrf.mxu1  ;;  %v3801_v61 = vadd.f32 %v8731_v8, %v3800_v53  ;;  %v4161_v62 = vadd.f32 %v8731_v8, %v4160_v54  ;;  %v7370_v51 = vld [vmem:[%s9847_s0 + $0x808] sm:$0xff] }
 0x27f   :  { %v3083_v63 = vadd.f32 %v8731_v8, %v3082_v56  ;;  %v3443_v0 = vadd.f32 %v8731_v8, %v3442_v57 }
 0x280   :  { %7792 = vst [vmem:[%s9849_s3 + $0xf0] sm:$0xff] %v7556_v55   ;;  %v4715_v2 = vmax.f32 %v3801_v61, 0.0  ;;  %v4859_v3 = vmax.f32 %v4161_v62, 0.0 }
 0x281   :  { %v4428_v9 = vmax.f32 %v3083_v63, 0.0  ;;  %v4572_v10 = vmax.f32 %v3443_v0, 0.0 }
 0x282   :  { %v5147_v18 = vmax.f32 %v4715_v2, %v4859_v3 }
 0x283   :  { %v5004_v21 = vmax.f32 %v4428_v9, %v4572_v10 }
 0x284   :  { %v5291_v23 = vmax.f32 %v5003_v17, %v5147_v18 }
 0x285   :  { %v3802_v4 = vpop.f32.mrf.mxu2  ;;  %v4162_v5 = vpop.f32.mrf.mxu3 }
 0x286   :  { %v3803_v11 = vadd.f32 %v8731_v8, %v3802_v4  ;;  %v4163_v12 = vadd.f32 %v8731_v8, %v4162_v5  ;;  %v3085_v13 = vpop.f32.mrf.mxu0  ;;  %v3445_v14 = vpop.f32.mrf.mxu1 }
 0x287   :  { %v3086_v30 = vadd.f32 %v8731_v8, %v3085_v13  ;;  %v3446_v31 = vadd.f32 %v8731_v8, %v3445_v14  ;;  %v7155_v14 = vld [vmem:[%s9847_s0 + $0x150] sm:$0xff] }
 0x288   :  { %v4716_v19 = vmax.f32 %v3803_v11, 0.0  ;;  %v4860_v20 = vmax.f32 %v4163_v12, 0.0 }
 0x289   :  { %6865 = vmatmul.msk.bf16.gmra.mxu0 %vm2051_vm0, %v7153_v6  ;;  %6937 = vmatmul.msk.bf16.gmra.mxu1 %vm2051_vm0, %v7225_v7  ;;  %v4429_v36 = vmax.f32 %v3086_v30, 0.0  ;;  %v4573_v37 = vmax.f32 %v3446_v31, 0.0 }
 0x28a   :  { %v5148_v22 = vmax.f32 %v4716_v19, %v4860_v20  ;;  %7009 = vmatmul.msk.bf16.gmra.mxu2 %vm2051_vm0, %v7297_v15  ;;  %7081 = vmatmul.msk.bf16.gmra.mxu3 %vm2051_vm0, %v7369_v16  ;;  %v7227_v15 = vld [vmem:[%s9847_s0 + $0x390] sm:$0xff] }
 0x28b   :  { %v5005_v52 = vmax.f32 %v4429_v36, %v4573_v37 }
 0x28c   :  { %v5292_v24 = vmax.f32 %v5004_v21, %v5148_v22  ;;  %v7299_v22 = vld [vmem:[%s9847_s0 + $0x5d0] sm:$0xff] }
 0x28d   :  { %v3805_v25 = vpop.f32.mrf.mxu2  ;;  %v4165_v26 = vpop.f32.mrf.mxu3 }
 0x28e   :  { %v7561_v27 = vpack.c.bf16 %v5292_v24, %v5291_v23  ;;  %v3087_v28 = vpop.f32.mrf.mxu0  ;;  %v3447_v29 = vpop.f32.mrf.mxu1  ;;  %v3806_v32 = vadd.f32 %v8731_v8, %v3805_v25  ;;  %v4166_v33 = vadd.f32 %v8731_v8, %v4165_v26  ;;  %v7371_v23 = vld [vmem:[%s9847_s0 + $0x810] sm:$0xff] }
 0x28f   :  { %v3088_v34 = vadd.f32 %v8731_v8, %v3087_v28  ;;  %v3448_v35 = vadd.f32 %v8731_v8, %v3447_v29 }
 0x290   :  { %7793 = vst [vmem:[%s9849_s3 + $0xf8] sm:$0xff] %v7561_v27   ;;  %v4717_v38 = vmax.f32 %v3806_v32, 0.0  ;;  %v4861_v39 = vmax.f32 %v4166_v33, 0.0 }
 0x291   :  { %v4430_v45 = vmax.f32 %v3088_v34, 0.0  ;;  %v4574_v46 = vmax.f32 %v3448_v35, 0.0 }
 0x292   :  { %v5149_v53 = vmax.f32 %v4717_v38, %v4861_v39 }
 0x293   :  { %v5006_v56 = vmax.f32 %v4430_v45, %v4574_v46 }
 0x294   :  { %v5293_v59 = vmax.f32 %v5005_v52, %v5149_v53 }
 0x295   :  { %v3807_v41 = vpop.f32.mrf.mxu2  ;;  %v4167_v42 = vpop.f32.mrf.mxu3 }
 0x296   :  { %v3808_v47 = vadd.f32 %v8731_v8, %v3807_v41  ;;  %v4168_v48 = vadd.f32 %v8731_v8, %v4167_v42  ;;  %v3090_v49 = vpop.f32.mrf.mxu0  ;;  %v3450_v50 = vpop.f32.mrf.mxu1 }
 0x297   :  { %v3091_v1 = vadd.f32 %v8731_v8, %v3090_v49  ;;  %v3451_v2 = vadd.f32 %v8731_v8, %v3450_v50  ;;  %v7156_v50 = vld [vmem:[%s9847_s0 + $0x158] sm:$0xff] }
 0x298   :  { %v4718_v54 = vmax.f32 %v3808_v47, 0.0  ;;  %v4862_v55 = vmax.f32 %v4168_v48, 0.0 }
 0x299   :  { %6866 = vmatmul.msk.bf16.gmra.mxu0 %vm2051_vm0, %v7154_v43  ;;  %6938 = vmatmul.msk.bf16.gmra.mxu1 %vm2051_vm0, %v7226_v44  ;;  %v4431_v7 = vmax.f32 %v3091_v1, 0.0  ;;  %v4575_v9 = vmax.f32 %v3451_v2, 0.0 }
 0x29a   :  { %v5150_v57 = vmax.f32 %v4718_v54, %v4862_v55  ;;  %7010 = vmatmul.msk.bf16.gmra.mxu2 %vm2051_vm0, %v7298_v40  ;;  %7082 = vmatmul.msk.bf16.gmra.mxu3 %vm2051_vm0, %v7370_v51  ;;  %v7228_v40 = vld [vmem:[%s9847_s0 + $0x398] sm:$0xff] }
 0x29b   :  { %v5007_v24 = vmax.f32 %v4431_v7, %v4575_v9 }
 0x29c   :  { %v5294_v60 = vmax.f32 %v5006_v56, %v5150_v57  ;;  %v7300_v57 = vld [vmem:[%s9847_s0 + $0x5d8] sm:$0xff] }
 0x29d   :  { %v3810_v61 = vpop.f32.mrf.mxu2  ;;  %v4170_v62 = vpop.f32.mrf.mxu3 }
 0x29e   :  { %v7566_v63 = vpack.c.bf16 %v5294_v60, %v5293_v59  ;;  %v3092_v0 = vpop.f32.mrf.mxu0  ;;  %v3452_v58 = vpop.f32.mrf.mxu1  ;;  %v3811_v3 = vadd.f32 %v8731_v8, %v3810_v61  ;;  %v4171_v4 = vadd.f32 %v8731_v8, %v4170_v62  ;;  %v7372_v59 = vld [vmem:[%s9847_s0 + $0x818] sm:$0xff] }
 0x29f   :  { %v3093_v5 = vadd.f32 %v8731_v8, %v3092_v0  ;;  %v3453_v6 = vadd.f32 %v8731_v8, %v3452_v58 }
 0x2a0   :  { %7794 = vst [vmem:[%s9849_s3 + $0x100] sm:$0xff] %v7566_v63   ;;  %v4719_v10 = vmax.f32 %v3811_v3, 0.0  ;;  %v4863_v11 = vmax.f32 %v4171_v4, 0.0 }
 0x2a1   :  { %v4432_v16 = vmax.f32 %v3093_v5, 0.0  ;;  %v4576_v17 = vmax.f32 %v3453_v6, 0.0 }
 0x2a2   :  { %v5151_v25 = vmax.f32 %v4719_v10, %v4863_v11 }
 0x2a3   :  { %v5008_v28 = vmax.f32 %v4432_v16, %v4576_v17 }
 0x2a4   :  { %v5295_v30 = vmax.f32 %v5007_v24, %v5151_v25 }
 0x2a5   :  { %v3812_v12 = vpop.f32.mrf.mxu2  ;;  %v4172_v13 = vpop.f32.mrf.mxu3 }
 0x2a6   :  { %v3813_v18 = vadd.f32 %v8731_v8, %v3812_v12  ;;  %v4173_v19 = vadd.f32 %v8731_v8, %v4172_v13  ;;  %v3095_v20 = vpop.f32.mrf.mxu0  ;;  %v3455_v21 = vpop.f32.mrf.mxu1 }
 0x2a7   :  { %v3096_v37 = vadd.f32 %v8731_v8, %v3095_v20  ;;  %v3456_v38 = vadd.f32 %v8731_v8, %v3455_v21  ;;  %v7157_v21 = vld [vmem:[%s9847_s0 + $0x160] sm:$0xff] }
 0x2a8   :  { %v4720_v26 = vmax.f32 %v3813_v18, 0.0  ;;  %v4864_v27 = vmax.f32 %v4173_v19, 0.0 }
 0x2a9   :  { %6867 = vmatmul.msk.bf16.gmra.mxu0 %vm2051_vm0, %v7155_v14  ;;  %6939 = vmatmul.msk.bf16.gmra.mxu1 %vm2051_vm0, %v7227_v15  ;;  %v4433_v44 = vmax.f32 %v3096_v37, 0.0  ;;  %v4577_v45 = vmax.f32 %v3456_v38, 0.0 }
 0x2aa   :  { %v5152_v29 = vmax.f32 %v4720_v26, %v4864_v27  ;;  %7011 = vmatmul.msk.bf16.gmra.mxu2 %vm2051_vm0, %v7299_v22  ;;  %7083 = vmatmul.msk.bf16.gmra.mxu3 %vm2051_vm0, %v7371_v23  ;;  %v7229_v22 = vld [vmem:[%s9847_s0 + $0x3a0] sm:$0xff] }
 0x2ab   :  { %v5009_v60 = vmax.f32 %v4433_v44, %v4577_v45 }
 0x2ac   :  { %v5296_v31 = vmax.f32 %v5008_v28, %v5152_v29  ;;  %v7301_v29 = vld [vmem:[%s9847_s0 + $0x5e0] sm:$0xff] }
 0x2ad   :  { %v3815_v32 = vpop.f32.mrf.mxu2  ;;  %v4175_v33 = vpop.f32.mrf.mxu3 }
 0x2ae   :  { %v7571_v34 = vpack.c.bf16 %v5296_v31, %v5295_v30  ;;  %v3097_v35 = vpop.f32.mrf.mxu0  ;;  %v3457_v36 = vpop.f32.mrf.mxu1  ;;  %v3816_v39 = vadd.f32 %v8731_v8, %v3815_v32  ;;  %v4176_v41 = vadd.f32 %v8731_v8, %v4175_v33  ;;  %v7373_v30 = vld [vmem:[%s9847_s0 + $0x820] sm:$0xff] }
 0x2af   :  { %v3098_v42 = vadd.f32 %v8731_v8, %v3097_v35  ;;  %v3458_v43 = vadd.f32 %v8731_v8, %v3457_v36 }
 0x2b0   :  { %7795 = vst [vmem:[%s9849_s3 + $0x108] sm:$0xff] %v7571_v34   ;;  %v4721_v46 = vmax.f32 %v3816_v39, 0.0  ;;  %v4865_v47 = vmax.f32 %v4176_v41, 0.0 }
 0x2b1   :  { %v4434_v51 = vmax.f32 %v3098_v42, 0.0  ;;  %v4578_v52 = vmax.f32 %v3458_v43, 0.0 }
 0x2b2   :  { %v5153_v61 = vmax.f32 %v4721_v46, %v4865_v47 }
 0x2b3   :  { %v5010_v0 = vmax.f32 %v4434_v51, %v4578_v52 }
 0x2b4   :  { %v5297_v1 = vmax.f32 %v5009_v60, %v5153_v61 }
 0x2b5   :  { %v3817_v48 = vpop.f32.mrf.mxu2  ;;  %v4177_v49 = vpop.f32.mrf.mxu3 }
 0x2b6   :  { %v3818_v53 = vadd.f32 %v8731_v8, %v3817_v48  ;;  %v4178_v54 = vadd.f32 %v8731_v8, %v4177_v49  ;;  %v3100_v55 = vpop.f32.mrf.mxu0  ;;  %v3460_v56 = vpop.f32.mrf.mxu1 }
 0x2b7   :  { %v3101_v9 = vadd.f32 %v8731_v8, %v3100_v55  ;;  %v3461_v10 = vadd.f32 %v8731_v8, %v3460_v56  ;;  %v7158_v56 = vld [vmem:[%s9847_s0 + $0x168] sm:$0xff] }
 0x2b8   :  { %v4722_v62 = vmax.f32 %v3818_v53, 0.0  ;;  %v4866_v63 = vmax.f32 %v4178_v54, 0.0 }
 0x2b9   :  { %6868 = vmatmul.msk.bf16.gmra.mxu0 %vm2051_vm0, %v7156_v50  ;;  %6940 = vmatmul.msk.bf16.gmra.mxu1 %vm2051_vm0, %v7228_v40  ;;  %v4435_v15 = vmax.f32 %v3101_v9, 0.0  ;;  %v4579_v16 = vmax.f32 %v3461_v10, 0.0 }
 0x2ba   :  { %v5154_v58 = vmax.f32 %v4722_v62, %v4866_v63  ;;  %7012 = vmatmul.msk.bf16.gmra.mxu2 %vm2051_vm0, %v7300_v57  ;;  %7084 = vmatmul.msk.bf16.gmra.mxu3 %vm2051_vm0, %v7372_v59  ;;  %v7230_v57 = vld [vmem:[%s9847_s0 + $0x3a8] sm:$0xff] }
 0x2bb   :  { %v5011_v31 = vmax.f32 %v4435_v15, %v4579_v16 }
 0x2bc   :  { %v5298_v2 = vmax.f32 %v5010_v0, %v5154_v58  ;;  %v7302_v58 = vld [vmem:[%s9847_s0 + $0x5e8] sm:$0xff] }
 0x2bd   :  { %v3820_v3 = vpop.f32.mrf.mxu2  ;;  %v4180_v4 = vpop.f32.mrf.mxu3 }
 0x2be   :  { %v7576_v5 = vpack.c.bf16 %v5298_v2, %v5297_v1  ;;  %v3102_v6 = vpop.f32.mrf.mxu0  ;;  %v3462_v7 = vpop.f32.mrf.mxu1  ;;  %v3821_v11 = vadd.f32 %v8731_v8, %v3820_v3  ;;  %v4181_v12 = vadd.f32 %v8731_v8, %v4180_v4  ;;  %v7374_v1 = vld [vmem:[%s9847_s0 + $0x828] sm:$0xff] }
 0x2bf   :  { %v3103_v13 = vadd.f32 %v8731_v8, %v3102_v6  ;;  %v3463_v14 = vadd.f32 %v8731_v8, %v3462_v7 }
 0x2c0   :  { %7796 = vst [vmem:[%s9849_s3 + $0x110] sm:$0xff] %v7576_v5   ;;  %v4723_v17 = vmax.f32 %v3821_v11, 0.0  ;;  %v4867_v18 = vmax.f32 %v4181_v12, 0.0 }
 0x2c1   :  { %v4436_v23 = vmax.f32 %v3103_v13, 0.0  ;;  %v4580_v24 = vmax.f32 %v3463_v14, 0.0 }
 0x2c2   :  { %v5155_v32 = vmax.f32 %v4723_v17, %v4867_v18 }
 0x2c3   :  { %v5012_v35 = vmax.f32 %v4436_v23, %v4580_v24 }
 0x2c4   :  { %v5299_v37 = vmax.f32 %v5011_v31, %v5155_v32 }
 0x2c5   :  { %v3822_v19 = vpop.f32.mrf.mxu2  ;;  %v4182_v20 = vpop.f32.mrf.mxu3 }
 0x2c6   :  { %v3823_v25 = vadd.f32 %v8731_v8, %v3822_v19  ;;  %v4183_v26 = vadd.f32 %v8731_v8, %v4182_v20  ;;  %v3105_v27 = vpop.f32.mrf.mxu0  ;;  %v3465_v28 = vpop.f32.mrf.mxu1 }
 0x2c7   :  { %v3106_v45 = vadd.f32 %v8731_v8, %v3105_v27  ;;  %v3466_v46 = vadd.f32 %v8731_v8, %v3465_v28  ;;  %v7159_v28 = vld [vmem:[%s9847_s0 + $0x170] sm:$0xff] }
 0x2c8   :  { %v4724_v33 = vmax.f32 %v3823_v25, 0.0  ;;  %v4868_v34 = vmax.f32 %v4183_v26, 0.0 }
 0x2c9   :  { %6869 = vmatmul.msk.bf16.gmra.mxu0 %vm2051_vm0, %v7157_v21  ;;  %6941 = vmatmul.msk.bf16.gmra.mxu1 %vm2051_vm0, %v7229_v22  ;;  %v4437_v40 = vmax.f32 %v3106_v45, 0.0  ;;  %v4581_v51 = vmax.f32 %v3466_v46, 0.0 }
 0x2ca   :  { %v5156_v36 = vmax.f32 %v4724_v33, %v4868_v34  ;;  %7013 = vmatmul.msk.bf16.gmra.mxu2 %vm2051_vm0, %v7301_v29  ;;  %7085 = vmatmul.msk.bf16.gmra.mxu3 %vm2051_vm0, %v7373_v30  ;;  %v7231_v29 = vld [vmem:[%s9847_s0 + $0x3b0] sm:$0xff] }
 0x2cb   :  { %v5013_v2 = vmax.f32 %v4437_v40, %v4581_v51 }
 0x2cc   :  { %v5300_v38 = vmax.f32 %v5012_v35, %v5156_v36  ;;  %v7303_v36 = vld [vmem:[%s9847_s0 + $0x5f0] sm:$0xff] }
 0x2cd   :  { %v3825_v39 = vpop.f32.mrf.mxu2  ;;  %v4185_v41 = vpop.f32.mrf.mxu3 }
 0x2ce   :  { %v7581_v42 = vpack.c.bf16 %v5300_v38, %v5299_v37  ;;  %v3107_v43 = vpop.f32.mrf.mxu0  ;;  %v3467_v44 = vpop.f32.mrf.mxu1  ;;  %v3826_v47 = vadd.f32 %v8731_v8, %v3825_v39  ;;  %v4186_v48 = vadd.f32 %v8731_v8, %v4185_v41  ;;  %v7375_v37 = vld [vmem:[%s9847_s0 + $0x830] sm:$0xff] }
 0x2cf   :  { %v3108_v49 = vadd.f32 %v8731_v8, %v3107_v43  ;;  %v3468_v50 = vadd.f32 %v8731_v8, %v3467_v44 }
 0x2d0   :  { %7797 = vst [vmem:[%s9849_s3 + $0x118] sm:$0xff] %v7581_v42   ;;  %v4725_v52 = vmax.f32 %v3826_v47, 0.0  ;;  %v4869_v53 = vmax.f32 %v4186_v48, 0.0 }
 0x2d1   :  { %v4438_v59 = vmax.f32 %v3108_v49, 0.0  ;;  %v4582_v60 = vmax.f32 %v3468_v50, 0.0 }
 0x2d2   :  { %v5157_v3 = vmax.f32 %v4725_v52, %v4869_v53 }
 0x2d3   :  { %v5014_v6 = vmax.f32 %v4438_v59, %v4582_v60 }
 0x2d4   :  { %v5301_v9 = vmax.f32 %v5013_v2, %v5157_v3 }
 0x2d5   :  { %v3827_v54 = vpop.f32.mrf.mxu2  ;;  %v4187_v55 = vpop.f32.mrf.mxu3 }
 0x2d6   :  { %v3828_v61 = vadd.f32 %v8731_v8, %v3827_v54  ;;  %v4188_v62 = vadd.f32 %v8731_v8, %v4187_v55  ;;  %v3110_v63 = vpop.f32.mrf.mxu0  ;;  %v3470_v0 = vpop.f32.mrf.mxu1 }
 0x2d7   :  { %v3111_v16 = vadd.f32 %v8731_v8, %v3110_v63  ;;  %v3471_v17 = vadd.f32 %v8731_v8, %v3470_v0  ;;  %v7160_v0 = vld [vmem:[%s9847_s0 + $0x178] sm:$0xff] }
 0x2d8   :  { %v4726_v4 = vmax.f32 %v3828_v61, 0.0  ;;  %v4870_v5 = vmax.f32 %v4188_v62, 0.0 }
 0x2d9   :  { %6870 = vmatmul.msk.bf16.gmra.mxu0 %vm2051_vm0, %v7158_v56  ;;  %6942 = vmatmul.msk.bf16.gmra.mxu1 %vm2051_vm0, %v7230_v57  ;;  %v4439_v22 = vmax.f32 %v3111_v16, 0.0  ;;  %v4583_v23 = vmax.f32 %v3471_v17, 0.0 }
 0x2da   :  { %v5158_v7 = vmax.f32 %v4726_v4, %v4870_v5  ;;  %7014 = vmatmul.msk.bf16.gmra.mxu2 %vm2051_vm0, %v7302_v58  ;;  %7086 = vmatmul.msk.bf16.gmra.mxu3 %vm2051_vm0, %v7374_v1  ;;  %v7232_v58 = vld [vmem:[%s9847_s0 + $0x3b8] sm:$0xff] }
 0x2db   :  { %v5015_v38 = vmax.f32 %v4439_v22, %v4583_v23  ;;  %v9087_v22 = vld [vmem:[%s9848_s2] ss:$0 sm:$0xff] }
 0x2dc   :  { %v5302_v10 = vmax.f32 %v5014_v6, %v5158_v7  ;;  %v7304_v7 = vld [vmem:[%s9847_s0 + $0x5f8] sm:$0xff] }
 0x2dd   :  { %v3830_v11 = vpop.f32.mrf.mxu2  ;;  %v4190_v12 = vpop.f32.mrf.mxu3 }
 0x2de   :  { %v7586_v13 = vpack.c.bf16 %v5302_v10, %v5301_v9  ;;  %v3112_v14 = vpop.f32.mrf.mxu0  ;;  %v3472_v15 = vpop.f32.mrf.mxu1  ;;  %v3831_v18 = vadd.f32 %v8731_v8, %v3830_v11  ;;  %v4191_v19 = vadd.f32 %v8731_v8, %v4190_v12  ;;  %v7376_v9 = vld [vmem:[%s9847_s0 + $0x838] sm:$0xff] }
 0x2df   :  { %v3113_v20 = vadd.f32 %v8731_v8, %v3112_v14  ;;  %v3473_v21 = vadd.f32 %v8731_v8, %v3472_v15 }
 0x2e0   :  { %7798 = vst [vmem:[%s9849_s3 + $0x120] sm:$0xff] %v7586_v13   ;;  %v4727_v24 = vmax.f32 %v3831_v18, 0.0  ;;  %v4871_v25 = vmax.f32 %v4191_v19, 0.0 }
 0x2e1   :  { %v4440_v30 = vmax.f32 %v3113_v20, 0.0  ;;  %v4584_v31 = vmax.f32 %v3473_v21, 0.0 }
 0x2e2   :  { %v5159_v39 = vmax.f32 %v4727_v24, %v4871_v25 }
 0x2e3   :  { %v5016_v43 = vmax.f32 %v4440_v30, %v4584_v31 }
 0x2e4   :  { %v5303_v45 = vmax.f32 %v5015_v38, %v5159_v39 }
 0x2e5   :  { %v3832_v26 = vpop.f32.mrf.mxu2  ;;  %v4192_v27 = vpop.f32.mrf.mxu3 }
 0x2e6   :  { %v3833_v32 = vadd.f32 %v8731_v8, %v3832_v26  ;;  %v4193_v33 = vadd.f32 %v8731_v8, %v4192_v27  ;;  %v3115_v34 = vpop.f32.mrf.mxu0  ;;  %v3475_v35 = vpop.f32.mrf.mxu1 }
 0x2e7   :  { %v3116_v51 = vadd.f32 %v8731_v8, %v3115_v34  ;;  %v3476_v52 = vadd.f32 %v8731_v8, %v3475_v35  ;;  %v7161_v35 = vld [vmem:[%s9847_s0 + $0x180] sm:$0xff] }
 0x2e8   :  { %v4728_v41 = vmax.f32 %v3833_v32, 0.0  ;;  %v4872_v42 = vmax.f32 %v4193_v33, 0.0 }
 0x2e9   :  { %6871 = vmatmul.msk.bf16.gmra.mxu0 %vm2051_vm0, %v7159_v28  ;;  %6943 = vmatmul.msk.bf16.gmra.mxu1 %vm2051_vm0, %v7231_v29  ;;  %v4441_v57 = vmax.f32 %v3116_v51, 0.0  ;;  %v4585_v59 = vmax.f32 %v3476_v52, 0.0 }
 0x2ea   :  { %v5160_v44 = vmax.f32 %v4728_v41, %v4872_v42  ;;  %7015 = vmatmul.msk.bf16.gmra.mxu2 %vm2051_vm0, %v7303_v36  ;;  %7087 = vmatmul.msk.bf16.gmra.mxu3 %vm2051_vm0, %v7375_v37  ;;  %v7233_v36 = vld [vmem:[%s9847_s0 + $0x3c0] sm:$0xff] }
 0x2eb   :  { %v5017_v10 = vmax.f32 %v4441_v57, %v4585_v59 }
 0x2ec   :  { %v5304_v46 = vmax.f32 %v5016_v43, %v5160_v44  ;;  %v7305_v44 = vld [vmem:[%s9847_s0 + $0x600] sm:$0xff] }
 0x2ed   :  { %v3835_v47 = vpop.f32.mrf.mxu2  ;;  %v4195_v48 = vpop.f32.mrf.mxu3 }
 0x2ee   :  { %v7591_v49 = vpack.c.bf16 %v5304_v46, %v5303_v45  ;;  %v3117_v50 = vpop.f32.mrf.mxu0  ;;  %v3477_v40 = vpop.f32.mrf.mxu1  ;;  %v3836_v53 = vadd.f32 %v8731_v8, %v3835_v47  ;;  %v4196_v54 = vadd.f32 %v8731_v8, %v4195_v48  ;;  %v7377_v45 = vld [vmem:[%s9847_s0 + $0x840] sm:$0xff] }
 0x2ef   :  { %v3118_v55 = vadd.f32 %v8731_v8, %v3117_v50  ;;  %v3478_v56 = vadd.f32 %v8731_v8, %v3477_v40 }
 0x2f0   :  { %7799 = vst [vmem:[%s9849_s3 + $0x128] sm:$0xff] %v7591_v49   ;;  %v4729_v60 = vmax.f32 %v3836_v53, 0.0  ;;  %v4873_v61 = vmax.f32 %v4196_v54, 0.0 }
 0x2f1   :  { %v4442_v1 = vmax.f32 %v3118_v55, 0.0  ;;  %v4586_v2 = vmax.f32 %v3478_v56, 0.0 }
 0x2f2   :  { %v5161_v11 = vmax.f32 %v4729_v60, %v4873_v61 }
 0x2f3   :  { %v5018_v14 = vmax.f32 %v4442_v1, %v4586_v2 }
 0x2f4   :  { %v5305_v15 = vmax.f32 %v5017_v10, %v5161_v11 }
 0x2f5   :  { %v3837_v62 = vpop.f32.mrf.mxu2  ;;  %v4197_v63 = vpop.f32.mrf.mxu3 }
 0x2f6   :  { %v3838_v3 = vadd.f32 %v8731_v8, %v3837_v62  ;;  %v4198_v4 = vadd.f32 %v8731_v8, %v4197_v63  ;;  %v3120_v5 = vpop.f32.mrf.mxu0  ;;  %v3480_v6 = vpop.f32.mrf.mxu1 }
 0x2f7   :  { %v3121_v23 = vadd.f32 %v9087_v22, %v3120_v5  ;;  %v3481_v24 = vadd.f32 %v9087_v22, %v3480_v6  ;;  %v7162_v6 = vld [vmem:[%s9847_s0 + $0x188] sm:$0xff] }
 0x2f8   :  { %v4730_v12 = vmax.f32 %v3838_v3, 0.0  ;;  %v4874_v13 = vmax.f32 %v4198_v4, 0.0 }
 0x2f9   :  { %6872 = vmatmul.msk.bf16.gmra.mxu0 %vm2051_vm0, %v7160_v0  ;;  %6944 = vmatmul.msk.bf16.gmra.mxu1 %vm2051_vm0, %v7232_v58  ;;  %v4443_v29 = vmax.f32 %v3121_v23, 0.0  ;;  %v4587_v30 = vmax.f32 %v3481_v24, 0.0 }
 0x2fa   :  { %v5162_v8 = vmax.f32 %v4730_v12, %v4874_v13  ;;  %7016 = vmatmul.msk.bf16.gmra.mxu2 %vm2051_vm0, %v7304_v7  ;;  %7088 = vmatmul.msk.bf16.gmra.mxu3 %vm2051_vm0, %v7376_v9  ;;  %v7234_v7 = vld [vmem:[%s9847_s0 + $0x3c8] sm:$0xff] }
 0x2fb   :  { %v5019_v46 = vmax.f32 %v4443_v29, %v4587_v30 }
 0x2fc   :  { %v5306_v16 = vmax.f32 %v5018_v14, %v5162_v8  ;;  %v7306_v8 = vld [vmem:[%s9847_s0 + $0x608] sm:$0xff] }
 0x2fd   :  { %v3840_v17 = vpop.f32.mrf.mxu2  ;;  %v4200_v18 = vpop.f32.mrf.mxu3 }
 0x2fe   :  { %v7596_v19 = vpack.c.bf16 %v5306_v16, %v5305_v15  ;;  %v3122_v20 = vpop.f32.mrf.mxu0  ;;  %v3482_v21 = vpop.f32.mrf.mxu1  ;;  %v3841_v25 = vadd.f32 %v9087_v22, %v3840_v17  ;;  %v4201_v26 = vadd.f32 %v9087_v22, %v4200_v18  ;;  %v7378_v15 = vld [vmem:[%s9847_s0 + $0x848] sm:$0xff] }
 0x2ff   :  { %v3123_v27 = vadd.f32 %v9087_v22, %v3122_v20  ;;  %v3483_v28 = vadd.f32 %v9087_v22, %v3482_v21 }
 0x300   :  { %7800 = vst [vmem:[%s9849_s3 + $0x130] sm:$0xff] %v7596_v19   ;;  %v4731_v31 = vmax.f32 %v3841_v25, 0.0  ;;  %v4875_v32 = vmax.f32 %v4201_v26, 0.0 }
 0x301   :  { %v4444_v37 = vmax.f32 %v3123_v27, 0.0  ;;  %v4588_v38 = vmax.f32 %v3483_v28, 0.0 }
 0x302   :  { %v5163_v47 = vmax.f32 %v4731_v31, %v4875_v32 }
 0x303   :  { %v5020_v50 = vmax.f32 %v4444_v37, %v4588_v38 }
 0x304   :  { %v5307_v51 = vmax.f32 %v5019_v46, %v5163_v47 }
 0x305   :  { %v3842_v33 = vpop.f32.mrf.mxu2  ;;  %v4202_v34 = vpop.f32.mrf.mxu3 }
 0x306   :  { %v3843_v39 = vadd.f32 %v9087_v22, %v3842_v33  ;;  %v4203_v41 = vadd.f32 %v9087_v22, %v4202_v34  ;;  %v3125_v42 = vpop.f32.mrf.mxu0  ;;  %v3485_v43 = vpop.f32.mrf.mxu1 }
 0x307   :  { %v3126_v59 = vadd.f32 %v9087_v22, %v3125_v42  ;;  %v3486_v60 = vadd.f32 %v9087_v22, %v3485_v43  ;;  %v7163_v43 = vld [vmem:[%s9847_s0 + $0x190] sm:$0xff] }
 0x308   :  { %v4732_v48 = vmax.f32 %v3843_v39, 0.0  ;;  %v4876_v49 = vmax.f32 %v4203_v41, 0.0 }
 0x309   :  { %6873 = vmatmul.msk.bf16.gmra.mxu0 %vm2051_vm0, %v7161_v35  ;;  %6945 = vmatmul.msk.bf16.gmra.mxu1 %vm2051_vm0, %v7233_v36  ;;  %v4445_v58 = vmax.f32 %v3126_v59, 0.0  ;;  %v4589_v1 = vmax.f32 %v3486_v60, 0.0 }
 0x30a   :  { %v5164_v40 = vmax.f32 %v4732_v48, %v4876_v49  ;;  %7017 = vmatmul.msk.bf16.gmra.mxu2 %vm2051_vm0, %v7305_v44  ;;  %7089 = vmatmul.msk.bf16.gmra.mxu3 %vm2051_vm0, %v7377_v45  ;;  %v7235_v44 = vld [vmem:[%s9847_s0 + $0x3d0] sm:$0xff] }
 0x30b   :  { %v5021_v16 = vmax.f32 %v4445_v58, %v4589_v1 }
 0x30c   :  { %v5308_v52 = vmax.f32 %v5020_v50, %v5164_v40  ;;  %v7307_v40 = vld [vmem:[%s9847_s0 + $0x610] sm:$0xff] }
 0x30d   :  { %v3845_v53 = vpop.f32.mrf.mxu2  ;;  %v4205_v54 = vpop.f32.mrf.mxu3 }
 0x30e   :  { %v7601_v55 = vpack.c.bf16 %v5308_v52, %v5307_v51  ;;  %v3127_v56 = vpop.f32.mrf.mxu0  ;;  %v3487_v57 = vpop.f32.mrf.mxu1  ;;  %v3846_v61 = vadd.f32 %v9087_v22, %v3845_v53  ;;  %v4206_v62 = vadd.f32 %v9087_v22, %v4205_v54  ;;  %v7379_v51 = vld [vmem:[%s9847_s0 + $0x850] sm:$0xff] }
 0x30f   :  { %v3128_v63 = vadd.f32 %v9087_v22, %v3127_v56  ;;  %v3488_v0 = vadd.f32 %v9087_v22, %v3487_v57 }
 0x310   :  { %7801 = vst [vmem:[%s9849_s3 + $0x138] sm:$0xff] %v7601_v55   ;;  %v4733_v2 = vmax.f32 %v3846_v61, 0.0  ;;  %v4877_v3 = vmax.f32 %v4206_v62, 0.0 }
 0x311   :  { %v4446_v9 = vmax.f32 %v3128_v63, 0.0  ;;  %v4590_v10 = vmax.f32 %v3488_v0, 0.0 }
 0x312   :  { %v5165_v17 = vmax.f32 %v4733_v2, %v4877_v3 }
 0x313   :  { %v5022_v20 = vmax.f32 %v4446_v9, %v4590_v10 }
 0x314   :  { %v5309_v23 = vmax.f32 %v5021_v16, %v5165_v17 }
 0x315   :  { %v3847_v4 = vpop.f32.mrf.mxu2  ;;  %v4207_v5 = vpop.f32.mrf.mxu3 }
 0x316   :  { %v3848_v11 = vadd.f32 %v9087_v22, %v3847_v4  ;;  %v4208_v12 = vadd.f32 %v9087_v22, %v4207_v5  ;;  %v3130_v13 = vpop.f32.mrf.mxu0  ;;  %v3490_v14 = vpop.f32.mrf.mxu1 }
 0x317   :  { %v3131_v30 = vadd.f32 %v9087_v22, %v3130_v13  ;;  %v3491_v31 = vadd.f32 %v9087_v22, %v3490_v14  ;;  %v7164_v14 = vld [vmem:[%s9847_s0 + $0x198] sm:$0xff] }
 0x318   :  { %v4734_v18 = vmax.f32 %v3848_v11, 0.0  ;;  %v4878_v19 = vmax.f32 %v4208_v12, 0.0 }
 0x319   :  { %6874 = vmatmul.msk.bf16.gmra.mxu0 %vm2051_vm0, %v7162_v6  ;;  %6946 = vmatmul.msk.bf16.gmra.mxu1 %vm2051_vm0, %v7234_v7  ;;  %v4447_v36 = vmax.f32 %v3131_v30, 0.0  ;;  %v4591_v37 = vmax.f32 %v3491_v31, 0.0 }
 0x31a   :  { %v5166_v21 = vmax.f32 %v4734_v18, %v4878_v19  ;;  %7018 = vmatmul.msk.bf16.gmra.mxu2 %vm2051_vm0, %v7306_v8  ;;  %7090 = vmatmul.msk.bf16.gmra.mxu3 %vm2051_vm0, %v7378_v15  ;;  %v7236_v8 = vld [vmem:[%s9847_s0 + $0x3d8] sm:$0xff] }
 0x31b   :  { %v5023_v52 = vmax.f32 %v4447_v36, %v4591_v37 }
 0x31c   :  { %v5310_v24 = vmax.f32 %v5022_v20, %v5166_v21  ;;  %v7308_v21 = vld [vmem:[%s9847_s0 + $0x618] sm:$0xff] }
 0x31d   :  { %v3850_v25 = vpop.f32.mrf.mxu2  ;;  %v4210_v26 = vpop.f32.mrf.mxu3 }
 0x31e   :  { %v7606_v27 = vpack.c.bf16 %v5310_v24, %v5309_v23  ;;  %v3132_v28 = vpop.f32.mrf.mxu0  ;;  %v3492_v29 = vpop.f32.mrf.mxu1  ;;  %v3851_v32 = vadd.f32 %v9087_v22, %v3850_v25  ;;  %v4211_v33 = vadd.f32 %v9087_v22, %v4210_v26  ;;  %v7380_v23 = vld [vmem:[%s9847_s0 + $0x858] sm:$0xff] }
 0x31f   :  { %v3133_v34 = vadd.f32 %v9087_v22, %v3132_v28  ;;  %v3493_v35 = vadd.f32 %v9087_v22, %v3492_v29 }
 0x320   :  { %7802 = vst [vmem:[%s9849_s3 + $0x140] sm:$0xff] %v7606_v27   ;;  %v4735_v38 = vmax.f32 %v3851_v32, 0.0  ;;  %v4879_v39 = vmax.f32 %v4211_v33, 0.0 }
 0x321   :  { %v4448_v45 = vmax.f32 %v3133_v34, 0.0  ;;  %v4592_v46 = vmax.f32 %v3493_v35, 0.0 }
 0x322   :  { %v5167_v53 = vmax.f32 %v4735_v38, %v4879_v39 }
 0x323   :  { %v5024_v56 = vmax.f32 %v4448_v45, %v4592_v46 }
 0x324   :  { %v5311_v59 = vmax.f32 %v5023_v52, %v5167_v53 }
 0x325   :  { %v3852_v41 = vpop.f32.mrf.mxu2  ;;  %v4212_v42 = vpop.f32.mrf.mxu3 }
 0x326   :  { %v3853_v47 = vadd.f32 %v9087_v22, %v3852_v41  ;;  %v4213_v48 = vadd.f32 %v9087_v22, %v4212_v42  ;;  %v3135_v49 = vpop.f32.mrf.mxu0  ;;  %v3495_v50 = vpop.f32.mrf.mxu1 }
 0x327   :  { %v3136_v1 = vadd.f32 %v9087_v22, %v3135_v49  ;;  %v3496_v2 = vadd.f32 %v9087_v22, %v3495_v50  ;;  %v7165_v50 = vld [vmem:[%s9847_s0 + $0x1a0] sm:$0xff] }
 0x328   :  { %v4736_v54 = vmax.f32 %v3853_v47, 0.0  ;;  %v4880_v55 = vmax.f32 %v4213_v48, 0.0 }
 0x329   :  { %6875 = vmatmul.msk.bf16.gmra.mxu0 %vm2051_vm0, %v7163_v43  ;;  %6947 = vmatmul.msk.bf16.gmra.mxu1 %vm2051_vm0, %v7235_v44  ;;  %v4449_v7 = vmax.f32 %v3136_v1, 0.0  ;;  %v4593_v9 = vmax.f32 %v3496_v2, 0.0 }
 0x32a   :  { %v5168_v57 = vmax.f32 %v4736_v54, %v4880_v55  ;;  %7019 = vmatmul.msk.bf16.gmra.mxu2 %vm2051_vm0, %v7307_v40  ;;  %7091 = vmatmul.msk.bf16.gmra.mxu3 %vm2051_vm0, %v7379_v51  ;;  %v7237_v40 = vld [vmem:[%s9847_s0 + $0x3e0] sm:$0xff] }
 0x32b   :  { %v5025_v24 = vmax.f32 %v4449_v7, %v4593_v9 }
 0x32c   :  { %v5312_v60 = vmax.f32 %v5024_v56, %v5168_v57  ;;  %v7309_v57 = vld [vmem:[%s9847_s0 + $0x620] sm:$0xff] }
 0x32d   :  { %v3855_v61 = vpop.f32.mrf.mxu2  ;;  %v4215_v62 = vpop.f32.mrf.mxu3 }
 0x32e   :  { %v7611_v63 = vpack.c.bf16 %v5312_v60, %v5311_v59  ;;  %v3137_v0 = vpop.f32.mrf.mxu0  ;;  %v3497_v58 = vpop.f32.mrf.mxu1  ;;  %v3856_v3 = vadd.f32 %v9087_v22, %v3855_v61  ;;  %v4216_v4 = vadd.f32 %v9087_v22, %v4215_v62  ;;  %v7381_v59 = vld [vmem:[%s9847_s0 + $0x860] sm:$0xff] }
 0x32f   :  { %v3138_v5 = vadd.f32 %v9087_v22, %v3137_v0  ;;  %v3498_v6 = vadd.f32 %v9087_v22, %v3497_v58 }
 0x330   :  { %7803 = vst [vmem:[%s9849_s3 + $0x148] sm:$0xff] %v7611_v63   ;;  %v4737_v10 = vmax.f32 %v3856_v3, 0.0  ;;  %v4881_v11 = vmax.f32 %v4216_v4, 0.0 }
 0x331   :  { %v4450_v15 = vmax.f32 %v3138_v5, 0.0  ;;  %v4594_v16 = vmax.f32 %v3498_v6, 0.0 }
 0x332   :  { %v5169_v25 = vmax.f32 %v4737_v10, %v4881_v11 }
 0x333   :  { %v5026_v28 = vmax.f32 %v4450_v15, %v4594_v16 }
 0x334   :  { %v5313_v30 = vmax.f32 %v5025_v24, %v5169_v25 }
 0x335   :  { %v3857_v12 = vpop.f32.mrf.mxu2  ;;  %v4217_v13 = vpop.f32.mrf.mxu3 }
 0x336   :  { %v3858_v17 = vadd.f32 %v9087_v22, %v3857_v12  ;;  %v4218_v18 = vadd.f32 %v9087_v22, %v4217_v13  ;;  %v3140_v19 = vpop.f32.mrf.mxu0  ;;  %v3500_v20 = vpop.f32.mrf.mxu1 }
 0x337   :  { %v3141_v37 = vadd.f32 %v9087_v22, %v3140_v19  ;;  %v3501_v38 = vadd.f32 %v9087_v22, %v3500_v20  ;;  %v7166_v20 = vld [vmem:[%s9847_s0 + $0x1a8] sm:$0xff] }
 0x338   :  { %v4738_v26 = vmax.f32 %v3858_v17, 0.0  ;;  %v4882_v27 = vmax.f32 %v4218_v18, 0.0 }
 0x339   :  { %6876 = vmatmul.msk.bf16.gmra.mxu0 %vm2051_vm0, %v7164_v14  ;;  %6948 = vmatmul.msk.bf16.gmra.mxu1 %vm2051_vm0, %v7236_v8  ;;  %v4451_v44 = vmax.f32 %v3141_v37, 0.0  ;;  %v4595_v45 = vmax.f32 %v3501_v38, 0.0 }
 0x33a   :  { %v5170_v29 = vmax.f32 %v4738_v26, %v4882_v27  ;;  %7020 = vmatmul.msk.bf16.gmra.mxu2 %vm2051_vm0, %v7308_v21  ;;  %7092 = vmatmul.msk.bf16.gmra.mxu3 %vm2051_vm0, %v7380_v23  ;;  %v7238_v21 = vld [vmem:[%s9847_s0 + $0x3e8] sm:$0xff] }
 0x33b   :  { %v5027_v60 = vmax.f32 %v4451_v44, %v4595_v45 }
 0x33c   :  { %v5314_v31 = vmax.f32 %v5026_v28, %v5170_v29  ;;  %v7310_v29 = vld [vmem:[%s9847_s0 + $0x628] sm:$0xff] }
 0x33d   :  { %v3860_v32 = vpop.f32.mrf.mxu2  ;;  %v4220_v33 = vpop.f32.mrf.mxu3 }
 0x33e   :  { %v7616_v34 = vpack.c.bf16 %v5314_v31, %v5313_v30  ;;  %v3142_v35 = vpop.f32.mrf.mxu0  ;;  %v3502_v36 = vpop.f32.mrf.mxu1  ;;  %v3861_v39 = vadd.f32 %v9087_v22, %v3860_v32  ;;  %v4221_v41 = vadd.f32 %v9087_v22, %v4220_v33  ;;  %v7382_v30 = vld [vmem:[%s9847_s0 + $0x868] sm:$0xff] }
 0x33f   :  { %v3143_v42 = vadd.f32 %v9087_v22, %v3142_v35  ;;  %v3503_v43 = vadd.f32 %v9087_v22, %v3502_v36 }
 0x340   :  { %7804 = vst [vmem:[%s9849_s3 + $0x150] sm:$0xff] %v7616_v34   ;;  %v4739_v46 = vmax.f32 %v3861_v39, 0.0  ;;  %v4883_v47 = vmax.f32 %v4221_v41, 0.0 }
 0x341   :  { %v4452_v51 = vmax.f32 %v3143_v42, 0.0  ;;  %v4596_v52 = vmax.f32 %v3503_v43, 0.0 }
 0x342   :  { %v5171_v61 = vmax.f32 %v4739_v46, %v4883_v47 }
 0x343   :  { %v5028_v0 = vmax.f32 %v4452_v51, %v4596_v52 }
 0x344   :  { %v5315_v1 = vmax.f32 %v5027_v60, %v5171_v61 }
 0x345   :  { %v3862_v48 = vpop.f32.mrf.mxu2  ;;  %v4222_v49 = vpop.f32.mrf.mxu3 }
 0x346   :  { %v3863_v53 = vadd.f32 %v9087_v22, %v3862_v48  ;;  %v4223_v54 = vadd.f32 %v9087_v22, %v4222_v49  ;;  %v3145_v55 = vpop.f32.mrf.mxu0  ;;  %v3505_v56 = vpop.f32.mrf.mxu1 }
 0x347   :  { %v3146_v9 = vadd.f32 %v9087_v22, %v3145_v55  ;;  %v3506_v10 = vadd.f32 %v9087_v22, %v3505_v56  ;;  %v7167_v56 = vld [vmem:[%s9847_s0 + $0x1b0] sm:$0xff] }
 0x348   :  { %v4740_v62 = vmax.f32 %v3863_v53, 0.0  ;;  %v4884_v63 = vmax.f32 %v4223_v54, 0.0 }
 0x349   :  { %6877 = vmatmul.msk.bf16.gmra.mxu0 %vm2051_vm0, %v7165_v50  ;;  %6949 = vmatmul.msk.bf16.gmra.mxu1 %vm2051_vm0, %v7237_v40  ;;  %v4453_v8 = vmax.f32 %v3146_v9, 0.0  ;;  %v4597_v15 = vmax.f32 %v3506_v10, 0.0 }
 0x34a   :  { %v5172_v58 = vmax.f32 %v4740_v62, %v4884_v63  ;;  %7021 = vmatmul.msk.bf16.gmra.mxu2 %vm2051_vm0, %v7309_v57  ;;  %7093 = vmatmul.msk.bf16.gmra.mxu3 %vm2051_vm0, %v7381_v59  ;;  %v7239_v57 = vld [vmem:[%s9847_s0 + $0x3f0] sm:$0xff] }
 0x34b   :  { %v5029_v31 = vmax.f32 %v4453_v8, %v4597_v15 }
 0x34c   :  { %v5316_v2 = vmax.f32 %v5028_v0, %v5172_v58  ;;  %v7311_v58 = vld [vmem:[%s9847_s0 + $0x630] sm:$0xff] }
 0x34d   :  { %v3865_v3 = vpop.f32.mrf.mxu2  ;;  %v4225_v4 = vpop.f32.mrf.mxu3 }
 0x34e   :  { %v7621_v5 = vpack.c.bf16 %v5316_v2, %v5315_v1  ;;  %v3147_v6 = vpop.f32.mrf.mxu0  ;;  %v3507_v7 = vpop.f32.mrf.mxu1  ;;  %v3866_v11 = vadd.f32 %v9087_v22, %v3865_v3  ;;  %v4226_v12 = vadd.f32 %v9087_v22, %v4225_v4  ;;  %v7383_v1 = vld [vmem:[%s9847_s0 + $0x870] sm:$0xff] }
 0x34f   :  { %v3148_v13 = vadd.f32 %v9087_v22, %v3147_v6  ;;  %v3508_v14 = vadd.f32 %v9087_v22, %v3507_v7 }
 0x350   :  { %7805 = vst [vmem:[%s9849_s3 + $0x158] sm:$0xff] %v7621_v5   ;;  %v4741_v16 = vmax.f32 %v3866_v11, 0.0  ;;  %v4885_v17 = vmax.f32 %v4226_v12, 0.0 }
 0x351   :  { %v4454_v23 = vmax.f32 %v3148_v13, 0.0  ;;  %v4598_v24 = vmax.f32 %v3508_v14, 0.0 }
 0x352   :  { %v5173_v32 = vmax.f32 %v4741_v16, %v4885_v17 }
 0x353   :  { %v5030_v35 = vmax.f32 %v4454_v23, %v4598_v24 }
 0x354   :  { %v5317_v37 = vmax.f32 %v5029_v31, %v5173_v32 }
 0x355   :  { %v3867_v18 = vpop.f32.mrf.mxu2  ;;  %v4227_v19 = vpop.f32.mrf.mxu3 }
 0x356   :  { %v3868_v25 = vadd.f32 %v9087_v22, %v3867_v18  ;;  %v4228_v26 = vadd.f32 %v9087_v22, %v4227_v19  ;;  %v3150_v27 = vpop.f32.mrf.mxu0  ;;  %v3510_v28 = vpop.f32.mrf.mxu1 }
 0x357   :  { %v3151_v45 = vadd.f32 %v9087_v22, %v3150_v27  ;;  %v3511_v46 = vadd.f32 %v9087_v22, %v3510_v28  ;;  %v7168_v28 = vld [vmem:[%s9847_s0 + $0x1b8] sm:$0xff] }
 0x358   :  { %v4742_v33 = vmax.f32 %v3868_v25, 0.0  ;;  %v4886_v34 = vmax.f32 %v4228_v26, 0.0 }
 0x359   :  { %6878 = vmatmul.msk.bf16.gmra.mxu0 %vm2051_vm0, %v7166_v20  ;;  %6950 = vmatmul.msk.bf16.gmra.mxu1 %vm2051_vm0, %v7238_v21  ;;  %v4455_v40 = vmax.f32 %v3151_v45, 0.0  ;;  %v4599_v51 = vmax.f32 %v3511_v46, 0.0 }
 0x35a   :  { %v5174_v36 = vmax.f32 %v4742_v33, %v4886_v34  ;;  %7022 = vmatmul.msk.bf16.gmra.mxu2 %vm2051_vm0, %v7310_v29  ;;  %7094 = vmatmul.msk.bf16.gmra.mxu3 %vm2051_vm0, %v7382_v30  ;;  %v7240_v29 = vld [vmem:[%s9847_s0 + $0x3f8] sm:$0xff] }
 0x35b   :  { %v5031_v2 = vmax.f32 %v4455_v40, %v4599_v51 }
 0x35c   :  { %v5318_v38 = vmax.f32 %v5030_v35, %v5174_v36  ;;  %v7312_v36 = vld [vmem:[%s9847_s0 + $0x638] sm:$0xff] }
 0x35d   :  { %v3870_v39 = vpop.f32.mrf.mxu2  ;;  %v4230_v41 = vpop.f32.mrf.mxu3 }
 0x35e   :  { %v7626_v42 = vpack.c.bf16 %v5318_v38, %v5317_v37  ;;  %v3152_v43 = vpop.f32.mrf.mxu0  ;;  %v3512_v44 = vpop.f32.mrf.mxu1  ;;  %v3871_v47 = vadd.f32 %v9087_v22, %v3870_v39  ;;  %v4231_v48 = vadd.f32 %v9087_v22, %v4230_v41  ;;  %v7384_v37 = vld [vmem:[%s9847_s0 + $0x878] sm:$0xff] }
 0x35f   :  { %v3153_v49 = vadd.f32 %v9087_v22, %v3152_v43  ;;  %v3513_v50 = vadd.f32 %v9087_v22, %v3512_v44 }
 0x360   :  { %7806 = vst [vmem:[%s9849_s3 + $0x160] sm:$0xff] %v7626_v42   ;;  %v4743_v52 = vmax.f32 %v3871_v47, 0.0  ;;  %v4887_v53 = vmax.f32 %v4231_v48, 0.0 }
 0x361   :  { %v4456_v59 = vmax.f32 %v3153_v49, 0.0  ;;  %v4600_v60 = vmax.f32 %v3513_v50, 0.0 }
 0x362   :  { %v5175_v3 = vmax.f32 %v4743_v52, %v4887_v53 }
 0x363   :  { %v5032_v6 = vmax.f32 %v4456_v59, %v4600_v60 }
 0x364   :  { %v5319_v9 = vmax.f32 %v5031_v2, %v5175_v3 }
 0x365   :  { %v3872_v54 = vpop.f32.mrf.mxu2  ;;  %v4232_v55 = vpop.f32.mrf.mxu3 }
 0x366   :  { %v3873_v61 = vadd.f32 %v9087_v22, %v3872_v54  ;;  %v4233_v62 = vadd.f32 %v9087_v22, %v4232_v55  ;;  %v3155_v63 = vpop.f32.mrf.mxu0  ;;  %v3515_v0 = vpop.f32.mrf.mxu1 }
 0x367   :  { %v3156_v15 = vadd.f32 %v9087_v22, %v3155_v63  ;;  %v3516_v16 = vadd.f32 %v9087_v22, %v3515_v0  ;;  %v7169_v0 = vld [vmem:[%s9847_s0 + $0x1c0] sm:$0xff] }
 0x368   :  { %v4744_v4 = vmax.f32 %v3873_v61, 0.0  ;;  %v4888_v5 = vmax.f32 %v4233_v62, 0.0 }
 0x369   :  { %6879 = vmatmul.msk.bf16.gmra.mxu0 %vm2051_vm0, %v7167_v56  ;;  %6951 = vmatmul.msk.bf16.gmra.mxu1 %vm2051_vm0, %v7239_v57  ;;  %v4457_v21 = vmax.f32 %v3156_v15, 0.0  ;;  %v4601_v23 = vmax.f32 %v3516_v16, 0.0 }
 0x36a   :  { %v5176_v7 = vmax.f32 %v4744_v4, %v4888_v5  ;;  %7023 = vmatmul.msk.bf16.gmra.mxu2 %vm2051_vm0, %v7311_v58  ;;  %7095 = vmatmul.msk.bf16.gmra.mxu3 %vm2051_vm0, %v7383_v1  ;;  %v7241_v58 = vld [vmem:[%s9847_s0 + $0x400] sm:$0xff] }
 0x36b   :  { %v5033_v38 = vmax.f32 %v4457_v21, %v4601_v23 }
 0x36c   :  { %v5320_v10 = vmax.f32 %v5032_v6, %v5176_v7  ;;  %v7313_v7 = vld [vmem:[%s9847_s0 + $0x640] sm:$0xff] }
 0x36d   :  { %v3875_v11 = vpop.f32.mrf.mxu2  ;;  %v4235_v12 = vpop.f32.mrf.mxu3 }
 0x36e   :  { %v7631_v13 = vpack.c.bf16 %v5320_v10, %v5319_v9  ;;  %v3157_v14 = vpop.f32.mrf.mxu0  ;;  %v3517_v8 = vpop.f32.mrf.mxu1  ;;  %v3876_v17 = vadd.f32 %v9087_v22, %v3875_v11  ;;  %v4236_v18 = vadd.f32 %v9087_v22, %v4235_v12  ;;  %v7385_v9 = vld [vmem:[%s9847_s0 + $0x880] sm:$0xff] }
 0x36f   :  { %v3158_v19 = vadd.f32 %v9087_v22, %v3157_v14  ;;  %v3518_v20 = vadd.f32 %v9087_v22, %v3517_v8 }
 0x370   :  { %7807 = vst [vmem:[%s9849_s3 + $0x168] sm:$0xff] %v7631_v13   ;;  %v4745_v24 = vmax.f32 %v3876_v17, 0.0  ;;  %v4889_v25 = vmax.f32 %v4236_v18, 0.0 }
 0x371   :  { %v4458_v30 = vmax.f32 %v3158_v19, 0.0  ;;  %v4602_v31 = vmax.f32 %v3518_v20, 0.0 }
 0x372   :  { %v5177_v39 = vmax.f32 %v4745_v24, %v4889_v25 }
 0x373   :  { %v5034_v43 = vmax.f32 %v4458_v30, %v4602_v31 }
 0x374   :  { %v5321_v45 = vmax.f32 %v5033_v38, %v5177_v39 }
 0x375   :  { %v3877_v26 = vpop.f32.mrf.mxu2  ;;  %v4237_v27 = vpop.f32.mrf.mxu3 }
 0x376   :  { %v3878_v32 = vadd.f32 %v9087_v22, %v3877_v26  ;;  %v4238_v33 = vadd.f32 %v9087_v22, %v4237_v27  ;;  %v3160_v34 = vpop.f32.mrf.mxu0  ;;  %v3520_v35 = vpop.f32.mrf.mxu1 }
 0x377   :  { %v3161_v51 = vadd.f32 %v9087_v22, %v3160_v34  ;;  %v3521_v52 = vadd.f32 %v9087_v22, %v3520_v35  ;;  %v7170_v35 = vld [vmem:[%s9847_s0 + $0x1c8] sm:$0xff] }
 0x378   :  { %v4746_v41 = vmax.f32 %v3878_v32, 0.0  ;;  %v4890_v42 = vmax.f32 %v4238_v33, 0.0 }
 0x379   :  { %6880 = vmatmul.msk.bf16.gmra.mxu0 %vm2051_vm0, %v7168_v28  ;;  %6952 = vmatmul.msk.bf16.gmra.mxu1 %vm2051_vm0, %v7240_v29  ;;  %v4459_v57 = vmax.f32 %v3161_v51, 0.0  ;;  %v4603_v59 = vmax.f32 %v3521_v52, 0.0 }
 0x37a   :  { %v5178_v44 = vmax.f32 %v4746_v41, %v4890_v42  ;;  %7024 = vmatmul.msk.bf16.gmra.mxu2 %vm2051_vm0, %v7312_v36  ;;  %7096 = vmatmul.msk.bf16.gmra.mxu3 %vm2051_vm0, %v7384_v37  ;;  %v7242_v36 = vld [vmem:[%s9847_s0 + $0x408] sm:$0xff] }
 0x37b   :  { %v5035_v10 = vmax.f32 %v4459_v57, %v4603_v59 }
 0x37c   :  { %v5322_v46 = vmax.f32 %v5034_v43, %v5178_v44  ;;  %v7314_v44 = vld [vmem:[%s9847_s0 + $0x648] sm:$0xff] }
 0x37d   :  { %v3880_v47 = vpop.f32.mrf.mxu2  ;;  %v4240_v48 = vpop.f32.mrf.mxu3 }
 0x37e   :  { %v7636_v49 = vpack.c.bf16 %v5322_v46, %v5321_v45  ;;  %v3162_v50 = vpop.f32.mrf.mxu0  ;;  %v3522_v40 = vpop.f32.mrf.mxu1  ;;  %v3881_v53 = vadd.f32 %v9087_v22, %v3880_v47  ;;  %v4241_v54 = vadd.f32 %v9087_v22, %v4240_v48  ;;  %v7386_v45 = vld [vmem:[%s9847_s0 + $0x888] sm:$0xff] }
 0x37f   :  { %v3163_v55 = vadd.f32 %v9087_v22, %v3162_v50  ;;  %v3523_v56 = vadd.f32 %v9087_v22, %v3522_v40 }
 0x380   :  { %7808 = vst [vmem:[%s9849_s3 + $0x170] sm:$0xff] %v7636_v49   ;;  %v4747_v60 = vmax.f32 %v3881_v53, 0.0  ;;  %v4891_v61 = vmax.f32 %v4241_v54, 0.0 }
 0x381   :  { %v4460_v1 = vmax.f32 %v3163_v55, 0.0  ;;  %v4604_v2 = vmax.f32 %v3523_v56, 0.0 }
 0x382   :  { %v5179_v11 = vmax.f32 %v4747_v60, %v4891_v61 }
 0x383   :  { %v5036_v14 = vmax.f32 %v4460_v1, %v4604_v2 }
 0x384   :  { %v5323_v15 = vmax.f32 %v5035_v10, %v5179_v11 }
 0x385   :  { %v3882_v62 = vpop.f32.mrf.mxu2  ;;  %v4242_v63 = vpop.f32.mrf.mxu3 }
 0x386   :  { %v3883_v3 = vadd.f32 %v9087_v22, %v3882_v62  ;;  %v4243_v4 = vadd.f32 %v9087_v22, %v4242_v63  ;;  %v3165_v5 = vpop.f32.mrf.mxu0  ;;  %v3525_v6 = vpop.f32.mrf.mxu1 }
 0x387   :  { %v3166_v23 = vadd.f32 %v9087_v22, %v3165_v5  ;;  %v3526_v24 = vadd.f32 %v9087_v22, %v3525_v6  ;;  %v7171_v6 = vld [vmem:[%s9847_s0 + $0x1d0] sm:$0xff] }
 0x388   :  { %v4748_v12 = vmax.f32 %v3883_v3, 0.0  ;;  %v4892_v13 = vmax.f32 %v4243_v4, 0.0 }
 0x389   :  { %6881 = vmatmul.msk.bf16.gmra.mxu0 %vm2051_vm0, %v7169_v0  ;;  %6953 = vmatmul.msk.bf16.gmra.mxu1 %vm2051_vm0, %v7241_v58  ;;  %v4461_v29 = vmax.f32 %v3166_v23, 0.0  ;;  %v4605_v30 = vmax.f32 %v3526_v24, 0.0 }
 0x38a   :  { %v5180_v8 = vmax.f32 %v4748_v12, %v4892_v13  ;;  %7025 = vmatmul.msk.bf16.gmra.mxu2 %vm2051_vm0, %v7313_v7  ;;  %7097 = vmatmul.msk.bf16.gmra.mxu3 %vm2051_vm0, %v7385_v9  ;;  %v7243_v7 = vld [vmem:[%s9847_s0 + $0x410] sm:$0xff] }
 0x38b   :  { %v5037_v46 = vmax.f32 %v4461_v29, %v4605_v30 }
 0x38c   :  { %v5324_v16 = vmax.f32 %v5036_v14, %v5180_v8  ;;  %v7315_v8 = vld [vmem:[%s9847_s0 + $0x650] sm:$0xff] }
 0x38d   :  { %v3885_v17 = vpop.f32.mrf.mxu2  ;;  %v4245_v18 = vpop.f32.mrf.mxu3 }
 0x38e   :  { %v7641_v19 = vpack.c.bf16 %v5324_v16, %v5323_v15  ;;  %v3167_v20 = vpop.f32.mrf.mxu0  ;;  %v3527_v21 = vpop.f32.mrf.mxu1  ;;  %v3886_v25 = vadd.f32 %v9087_v22, %v3885_v17  ;;  %v4246_v26 = vadd.f32 %v9087_v22, %v4245_v18  ;;  %v7387_v15 = vld [vmem:[%s9847_s0 + $0x890] sm:$0xff] }
 0x38f   :  { %v3168_v27 = vadd.f32 %v9087_v22, %v3167_v20  ;;  %v3528_v28 = vadd.f32 %v9087_v22, %v3527_v21 }
 0x390   :  { %7809 = vst [vmem:[%s9849_s3 + $0x178] sm:$0xff] %v7641_v19   ;;  %v4749_v31 = vmax.f32 %v3886_v25, 0.0  ;;  %v4893_v32 = vmax.f32 %v4246_v26, 0.0 }
 0x391   :  { %v4462_v37 = vmax.f32 %v3168_v27, 0.0  ;;  %v4606_v38 = vmax.f32 %v3528_v28, 0.0 }
 0x392   :  { %v5181_v47 = vmax.f32 %v4749_v31, %v4893_v32 }
 0x393   :  { %v5038_v50 = vmax.f32 %v4462_v37, %v4606_v38 }
 0x394   :  { %v5325_v51 = vmax.f32 %v5037_v46, %v5181_v47 }
 0x395   :  { %v3887_v33 = vpop.f32.mrf.mxu2  ;;  %v4247_v34 = vpop.f32.mrf.mxu3 }
 0x396   :  { %v3888_v39 = vadd.f32 %v9087_v22, %v3887_v33  ;;  %v4248_v41 = vadd.f32 %v9087_v22, %v4247_v34  ;;  %v3170_v42 = vpop.f32.mrf.mxu0  ;;  %v3530_v43 = vpop.f32.mrf.mxu1 }
 0x397   :  { %v3171_v59 = vadd.f32 %v9087_v22, %v3170_v42  ;;  %v3531_v60 = vadd.f32 %v9087_v22, %v3530_v43  ;;  %v7172_v43 = vld [vmem:[%s9847_s0 + $0x1d8] sm:$0xff] }
 0x398   :  { %v4750_v48 = vmax.f32 %v3888_v39, 0.0  ;;  %v4894_v49 = vmax.f32 %v4248_v41, 0.0 }
 0x399   :  { %6882 = vmatmul.msk.bf16.gmra.mxu0 %vm2051_vm0, %v7170_v35  ;;  %6954 = vmatmul.msk.bf16.gmra.mxu1 %vm2051_vm0, %v7242_v36  ;;  %v4463_v58 = vmax.f32 %v3171_v59, 0.0  ;;  %v4607_v1 = vmax.f32 %v3531_v60, 0.0 }
 0x39a   :  { %v5182_v40 = vmax.f32 %v4750_v48, %v4894_v49  ;;  %7026 = vmatmul.msk.bf16.gmra.mxu2 %vm2051_vm0, %v7314_v44  ;;  %7098 = vmatmul.msk.bf16.gmra.mxu3 %vm2051_vm0, %v7386_v45  ;;  %v7244_v44 = vld [vmem:[%s9847_s0 + $0x418] sm:$0xff] }
 0x39b   :  { %v5039_v16 = vmax.f32 %v4463_v58, %v4607_v1 }
 0x39c   :  { %v5326_v52 = vmax.f32 %v5038_v50, %v5182_v40  ;;  %v7316_v40 = vld [vmem:[%s9847_s0 + $0x658] sm:$0xff] }
 0x39d   :  { %v3890_v53 = vpop.f32.mrf.mxu2  ;;  %v4250_v54 = vpop.f32.mrf.mxu3 }
 0x39e   :  { %v7646_v55 = vpack.c.bf16 %v5326_v52, %v5325_v51  ;;  %v3172_v56 = vpop.f32.mrf.mxu0  ;;  %v3532_v57 = vpop.f32.mrf.mxu1  ;;  %v3891_v61 = vadd.f32 %v9087_v22, %v3890_v53  ;;  %v4251_v62 = vadd.f32 %v9087_v22, %v4250_v54  ;;  %v7388_v51 = vld [vmem:[%s9847_s0 + $0x898] sm:$0xff] }
 0x39f   :  { %v3173_v63 = vadd.f32 %v9087_v22, %v3172_v56  ;;  %v3533_v0 = vadd.f32 %v9087_v22, %v3532_v57 }
 0x3a0   :  { %7810 = vst [vmem:[%s9849_s3 + $0x180] sm:$0xff] %v7646_v55   ;;  %v4751_v2 = vmax.f32 %v3891_v61, 0.0  ;;  %v4895_v3 = vmax.f32 %v4251_v62, 0.0 }
 0x3a1   :  { %v4464_v9 = vmax.f32 %v3173_v63, 0.0  ;;  %v4608_v10 = vmax.f32 %v3533_v0, 0.0 }
 0x3a2   :  { %v5183_v17 = vmax.f32 %v4751_v2, %v4895_v3 }
 0x3a3   :  { %v5040_v20 = vmax.f32 %v4464_v9, %v4608_v10 }
 0x3a4   :  { %v5327_v23 = vmax.f32 %v5039_v16, %v5183_v17 }
 0x3a5   :  { %v3892_v4 = vpop.f32.mrf.mxu2  ;;  %v4252_v5 = vpop.f32.mrf.mxu3 }
 0x3a6   :  { %v3893_v11 = vadd.f32 %v9087_v22, %v3892_v4  ;;  %v4253_v12 = vadd.f32 %v9087_v22, %v4252_v5  ;;  %v3175_v13 = vpop.f32.mrf.mxu0  ;;  %v3535_v14 = vpop.f32.mrf.mxu1 }
 0x3a7   :  { %v3176_v30 = vadd.f32 %v9087_v22, %v3175_v13  ;;  %v3536_v31 = vadd.f32 %v9087_v22, %v3535_v14  ;;  %v7173_v14 = vld [vmem:[%s9847_s0 + $0x1e0] sm:$0xff] }
 0x3a8   :  { %v4752_v18 = vmax.f32 %v3893_v11, 0.0  ;;  %v4896_v19 = vmax.f32 %v4253_v12, 0.0 }
 0x3a9   :  { %6883 = vmatmul.msk.bf16.gmra.mxu0 %vm2051_vm0, %v7171_v6  ;;  %6955 = vmatmul.msk.bf16.gmra.mxu1 %vm2051_vm0, %v7243_v7  ;;  %v4465_v36 = vmax.f32 %v3176_v30, 0.0  ;;  %v4609_v37 = vmax.f32 %v3536_v31, 0.0 }
 0x3aa   :  { %v5184_v21 = vmax.f32 %v4752_v18, %v4896_v19  ;;  %7027 = vmatmul.msk.bf16.gmra.mxu2 %vm2051_vm0, %v7315_v8  ;;  %7099 = vmatmul.msk.bf16.gmra.mxu3 %vm2051_vm0, %v7387_v15  ;;  %v7245_v8 = vld [vmem:[%s9847_s0 + $0x420] sm:$0xff] }
 0x3ab   :  { %v5041_v52 = vmax.f32 %v4465_v36, %v4609_v37  ;;  %v9443_v36 = vld [vmem:[%s9848_s2] ss:$0 sm:$0xff] }
 0x3ac   :  { %v5328_v24 = vmax.f32 %v5040_v20, %v5184_v21  ;;  %v7317_v21 = vld [vmem:[%s9847_s0 + $0x660] sm:$0xff] }
 0x3ad   :  { %v3895_v25 = vpop.f32.mrf.mxu2  ;;  %v4255_v26 = vpop.f32.mrf.mxu3 }
 0x3ae   :  { %v7651_v27 = vpack.c.bf16 %v5328_v24, %v5327_v23  ;;  %v3177_v28 = vpop.f32.mrf.mxu0  ;;  %v3537_v29 = vpop.f32.mrf.mxu1  ;;  %v3896_v32 = vadd.f32 %v9087_v22, %v3895_v25  ;;  %v4256_v33 = vadd.f32 %v9087_v22, %v4255_v26  ;;  %v7389_v23 = vld [vmem:[%s9847_s0 + $0x8a0] sm:$0xff] }
 0x3af   :  { %v3178_v34 = vadd.f32 %v9087_v22, %v3177_v28  ;;  %v3538_v35 = vadd.f32 %v9087_v22, %v3537_v29 }
 0x3b0   :  { %7811 = vst [vmem:[%s9849_s3 + $0x188] sm:$0xff] %v7651_v27   ;;  %v4753_v38 = vmax.f32 %v3896_v32, 0.0  ;;  %v4897_v39 = vmax.f32 %v4256_v33, 0.0 }
 0x3b1   :  { %v4466_v45 = vmax.f32 %v3178_v34, 0.0  ;;  %v4610_v46 = vmax.f32 %v3538_v35, 0.0 }
 0x3b2   :  { %v5185_v53 = vmax.f32 %v4753_v38, %v4897_v39 }
 0x3b3   :  { %v5042_v56 = vmax.f32 %v4466_v45, %v4610_v46 }
 0x3b4   :  { %v5329_v59 = vmax.f32 %v5041_v52, %v5185_v53 }
 0x3b5   :  { %v3897_v41 = vpop.f32.mrf.mxu2  ;;  %v4257_v42 = vpop.f32.mrf.mxu3 }
 0x3b6   :  { %v3898_v47 = vadd.f32 %v9087_v22, %v3897_v41  ;;  %v4258_v48 = vadd.f32 %v9087_v22, %v4257_v42  ;;  %v3180_v49 = vpop.f32.mrf.mxu0  ;;  %v3540_v50 = vpop.f32.mrf.mxu1 }
 0x3b7   :  { %v3181_v1 = vadd.f32 %v9087_v22, %v3180_v49  ;;  %v3541_v2 = vadd.f32 %v9087_v22, %v3540_v50  ;;  %v7174_v50 = vld [vmem:[%s9847_s0 + $0x1e8] sm:$0xff] }
 0x3b8   :  { %v4754_v54 = vmax.f32 %v3898_v47, 0.0  ;;  %v4898_v55 = vmax.f32 %v4258_v48, 0.0 }
 0x3b9   :  { %6884 = vmatmul.msk.bf16.gmra.mxu0 %vm2051_vm0, %v7172_v43  ;;  %6956 = vmatmul.msk.bf16.gmra.mxu1 %vm2051_vm0, %v7244_v44  ;;  %v4467_v7 = vmax.f32 %v3181_v1, 0.0  ;;  %v4611_v9 = vmax.f32 %v3541_v2, 0.0 }
 0x3ba   :  { %v5186_v57 = vmax.f32 %v4754_v54, %v4898_v55  ;;  %7028 = vmatmul.msk.bf16.gmra.mxu2 %vm2051_vm0, %v7316_v40  ;;  %7100 = vmatmul.msk.bf16.gmra.mxu3 %vm2051_vm0, %v7388_v51  ;;  %v7246_v40 = vld [vmem:[%s9847_s0 + $0x428] sm:$0xff] }
 0x3bb   :  { %v5043_v24 = vmax.f32 %v4467_v7, %v4611_v9 }
 0x3bc   :  { %v5330_v60 = vmax.f32 %v5042_v56, %v5186_v57  ;;  %v7318_v57 = vld [vmem:[%s9847_s0 + $0x668] sm:$0xff] }
 0x3bd   :  { %v3900_v61 = vpop.f32.mrf.mxu2  ;;  %v4260_v62 = vpop.f32.mrf.mxu3 }
 0x3be   :  { %v7656_v63 = vpack.c.bf16 %v5330_v60, %v5329_v59  ;;  %v3182_v0 = vpop.f32.mrf.mxu0  ;;  %v3542_v58 = vpop.f32.mrf.mxu1  ;;  %v3901_v3 = vadd.f32 %v9087_v22, %v3900_v61  ;;  %v4261_v4 = vadd.f32 %v9087_v22, %v4260_v62  ;;  %v7390_v59 = vld [vmem:[%s9847_s0 + $0x8a8] sm:$0xff] }
 0x3bf   :  { %v3183_v5 = vadd.f32 %v9087_v22, %v3182_v0  ;;  %v3543_v6 = vadd.f32 %v9087_v22, %v3542_v58 }
 0x3c0   :  { %7812 = vst [vmem:[%s9849_s3 + $0x190] sm:$0xff] %v7656_v63   ;;  %v4755_v10 = vmax.f32 %v3901_v3, 0.0  ;;  %v4899_v11 = vmax.f32 %v4261_v4, 0.0 }
 0x3c1   :  { %v4468_v15 = vmax.f32 %v3183_v5, 0.0  ;;  %v4612_v16 = vmax.f32 %v3543_v6, 0.0 }
 0x3c2   :  { %v5187_v25 = vmax.f32 %v4755_v10, %v4899_v11 }
 0x3c3   :  { %v5044_v28 = vmax.f32 %v4468_v15, %v4612_v16 }
 0x3c4   :  { %v5331_v29 = vmax.f32 %v5043_v24, %v5187_v25 }
 0x3c5   :  { %v3902_v12 = vpop.f32.mrf.mxu2  ;;  %v4262_v13 = vpop.f32.mrf.mxu3 }
 0x3c6   :  { %v3903_v17 = vadd.f32 %v9087_v22, %v3902_v12  ;;  %v4263_v18 = vadd.f32 %v9087_v22, %v4262_v13  ;;  %v3185_v19 = vpop.f32.mrf.mxu0  ;;  %v3545_v20 = vpop.f32.mrf.mxu1 }
 0x3c7   :  { %v3186_v37 = vadd.f32 %v9443_v36, %v3185_v19  ;;  %v3546_v38 = vadd.f32 %v9443_v36, %v3545_v20  ;;  %v7175_v20 = vld [vmem:[%s9847_s0 + $0x1f0] sm:$0xff] }
 0x3c8   :  { %v4756_v26 = vmax.f32 %v3903_v17, 0.0  ;;  %v4900_v27 = vmax.f32 %v4263_v18, 0.0 }
 0x3c9   :  { %6885 = vmatmul.msk.bf16.gmra.mxu0 %vm2051_vm0, %v7173_v14  ;;  %6957 = vmatmul.msk.bf16.gmra.mxu1 %vm2051_vm0, %v7245_v8  ;;  %v4469_v44 = vmax.f32 %v3186_v37, 0.0  ;;  %v4613_v45 = vmax.f32 %v3546_v38, 0.0 }
 0x3ca   :  { %v5188_v22 = vmax.f32 %v4756_v26, %v4900_v27  ;;  %7029 = vmatmul.msk.bf16.gmra.mxu2 %vm2051_vm0, %v7317_v21  ;;  %7101 = vmatmul.msk.bf16.gmra.mxu3 %vm2051_vm0, %v7389_v23  ;;  %v7247_v21 = vld [vmem:[%s9847_s0 + $0x430] sm:$0xff] }
 0x3cb   :  { %v5045_v60 = vmax.f32 %v4469_v44, %v4613_v45 }
 0x3cc   :  { %v5332_v30 = vmax.f32 %v5044_v28, %v5188_v22  ;;  %v7319_v22 = vld [vmem:[%s9847_s0 + $0x670] sm:$0xff] }
 0x3cd   :  { %v3905_v31 = vpop.f32.mrf.mxu2  ;;  %v4265_v32 = vpop.f32.mrf.mxu3 }
 0x3ce   :  { %v7661_v33 = vpack.c.bf16 %v5332_v30, %v5331_v29  ;;  %v3187_v34 = vpop.f32.mrf.mxu0  ;;  %v3547_v35 = vpop.f32.mrf.mxu1  ;;  %v3906_v39 = vadd.f32 %v9443_v36, %v3905_v31  ;;  %v4266_v41 = vadd.f32 %v9443_v36, %v4265_v32  ;;  %v7391_v29 = vld [vmem:[%s9847_s0 + $0x8b0] sm:$0xff] }
 0x3cf   :  { %v3188_v42 = vadd.f32 %v9443_v36, %v3187_v34  ;;  %v3548_v43 = vadd.f32 %v9443_v36, %v3547_v35 }
 0x3d0   :  { %7813 = vst [vmem:[%s9849_s3 + $0x198] sm:$0xff] %v7661_v33   ;;  %v4757_v46 = vmax.f32 %v3906_v39, 0.0  ;;  %v4901_v47 = vmax.f32 %v4266_v41, 0.0 }
 0x3d1   :  { %v4470_v51 = vmax.f32 %v3188_v42, 0.0  ;;  %v4614_v52 = vmax.f32 %v3548_v43, 0.0 }
 0x3d2   :  { %v5189_v61 = vmax.f32 %v4757_v46, %v4901_v47 }
 0x3d3   :  { %v5046_v0 = vmax.f32 %v4470_v51, %v4614_v52 }
 0x3d4   :  { %v5333_v1 = vmax.f32 %v5045_v60, %v5189_v61 }
 0x3d5   :  { %v3907_v48 = vpop.f32.mrf.mxu2  ;;  %v4267_v49 = vpop.f32.mrf.mxu3 }
 0x3d6   :  { %v3908_v53 = vadd.f32 %v9443_v36, %v3907_v48  ;;  %v4268_v54 = vadd.f32 %v9443_v36, %v4267_v49  ;;  %v3190_v55 = vpop.f32.mrf.mxu0  ;;  %v3550_v56 = vpop.f32.mrf.mxu1 }
 0x3d7   :  { %v3191_v9 = vadd.f32 %v9443_v36, %v3190_v55  ;;  %v3551_v10 = vadd.f32 %v9443_v36, %v3550_v56  ;;  %v7176_v56 = vld [vmem:[%s9847_s0 + $0x1f8] sm:$0xff] }
 0x3d8   :  { %v4758_v62 = vmax.f32 %v3908_v53, 0.0  ;;  %v4902_v63 = vmax.f32 %v4268_v54, 0.0 }
 0x3d9   :  { %6886 = vmatmul.msk.bf16.gmra.mxu0 %vm2051_vm0, %v7174_v50  ;;  %6958 = vmatmul.msk.bf16.gmra.mxu1 %vm2051_vm0, %v7246_v40  ;;  %v4471_v8 = vmax.f32 %v3191_v9, 0.0  ;;  %v4615_v15 = vmax.f32 %v3551_v10, 0.0 }
 0x3da   :  { %v5190_v58 = vmax.f32 %v4758_v62, %v4902_v63  ;;  %7030 = vmatmul.msk.bf16.gmra.mxu2 %vm2051_vm0, %v7318_v57  ;;  %7102 = vmatmul.msk.bf16.gmra.mxu3 %vm2051_vm0, %v7390_v59  ;;  %v7248_v57 = vld [vmem:[%s9847_s0 + $0x438] sm:$0xff] }
 0x3db   :  { %v5047_v30 = vmax.f32 %v4471_v8, %v4615_v15 }
 0x3dc   :  { %v5334_v2 = vmax.f32 %v5046_v0, %v5190_v58  ;;  %v7320_v58 = vld [vmem:[%s9847_s0 + $0x678] sm:$0xff] }
 0x3dd   :  { %v3910_v3 = vpop.f32.mrf.mxu2  ;;  %v4270_v4 = vpop.f32.mrf.mxu3 }
 0x3de   :  { %v7666_v5 = vpack.c.bf16 %v5334_v2, %v5333_v1  ;;  %v3192_v6 = vpop.f32.mrf.mxu0  ;;  %v3552_v7 = vpop.f32.mrf.mxu1  ;;  %v3911_v11 = vadd.f32 %v9443_v36, %v3910_v3  ;;  %v4271_v12 = vadd.f32 %v9443_v36, %v4270_v4  ;;  %v7392_v1 = vld [vmem:[%s9847_s0 + $0x8b8] sm:$0xff] }
 0x3df   :  { %v3193_v13 = vadd.f32 %v9443_v36, %v3192_v6  ;;  %v3553_v14 = vadd.f32 %v9443_v36, %v3552_v7 }
 0x3e0   :  { %7814 = vst [vmem:[%s9849_s3 + $0x1a0] sm:$0xff] %v7666_v5   ;;  %v4759_v16 = vmax.f32 %v3911_v11, 0.0  ;;  %v4903_v17 = vmax.f32 %v4271_v12, 0.0 }
 0x3e1   :  { %v4472_v23 = vmax.f32 %v3193_v13, 0.0  ;;  %v4616_v24 = vmax.f32 %v3553_v14, 0.0 }
 0x3e2   :  { %v5191_v31 = vmax.f32 %v4759_v16, %v4903_v17 }
 0x3e3   :  { %v5048_v34 = vmax.f32 %v4472_v23, %v4616_v24 }
 0x3e4   :  { %v5335_v37 = vmax.f32 %v5047_v30, %v5191_v31 }
 0x3e5   :  { %v3912_v18 = vpop.f32.mrf.mxu2  ;;  %v4272_v19 = vpop.f32.mrf.mxu3 }
 0x3e6   :  { %v3913_v25 = vadd.f32 %v9443_v36, %v3912_v18  ;;  %v4273_v26 = vadd.f32 %v9443_v36, %v4272_v19  ;;  %v3195_v27 = vpop.f32.mrf.mxu0  ;;  %v3555_v28 = vpop.f32.mrf.mxu1 }
 0x3e7   :  { %v3196_v45 = vadd.f32 %v9443_v36, %v3195_v27  ;;  %v3556_v46 = vadd.f32 %v9443_v36, %v3555_v28  ;;  %v7177_v28 = vld [vmem:[%s9847_s0 + $0x200] sm:$0xff] }
 0x3e8   :  { %v4760_v32 = vmax.f32 %v3913_v25, 0.0  ;;  %v4904_v33 = vmax.f32 %v4273_v26, 0.0 }
 0x3e9   :  { %6887 = vmatmul.msk.bf16.gmra.mxu0 %vm2051_vm0, %v7175_v20  ;;  %6959 = vmatmul.msk.bf16.gmra.mxu1 %vm2051_vm0, %v7247_v21  ;;  %v4473_v40 = vmax.f32 %v3196_v45, 0.0  ;;  %v4617_v51 = vmax.f32 %v3556_v46, 0.0 }
 0x3ea   :  { %v5192_v35 = vmax.f32 %v4760_v32, %v4904_v33  ;;  %7031 = vmatmul.msk.bf16.gmra.mxu2 %vm2051_vm0, %v7319_v22  ;;  %7103 = vmatmul.msk.bf16.gmra.mxu3 %vm2051_vm0, %v7391_v29  ;;  %v7249_v22 = vld [vmem:[%s9847_s0 + $0x440] sm:$0xff] }
 0x3eb   :  { %v5049_v2 = vmax.f32 %v4473_v40, %v4617_v51 }
 0x3ec   :  { %v5336_v38 = vmax.f32 %v5048_v34, %v5192_v35  ;;  %v7321_v35 = vld [vmem:[%s9847_s0 + $0x680] sm:$0xff] }
 0x3ed   :  { %v3915_v39 = vpop.f32.mrf.mxu2  ;;  %v4275_v41 = vpop.f32.mrf.mxu3 }
 0x3ee   :  { %v7671_v42 = vpack.c.bf16 %v5336_v38, %v5335_v37  ;;  %v3197_v43 = vpop.f32.mrf.mxu0  ;;  %v3557_v44 = vpop.f32.mrf.mxu1  ;;  %v3916_v47 = vadd.f32 %v9443_v36, %v3915_v39  ;;  %v4276_v48 = vadd.f32 %v9443_v36, %v4275_v41  ;;  %v7393_v37 = vld [vmem:[%s9847_s0 + $0x8c0] sm:$0xff] }
 0x3ef   :  { %v3198_v49 = vadd.f32 %v9443_v36, %v3197_v43  ;;  %v3558_v50 = vadd.f32 %v9443_v36, %v3557_v44 }
 0x3f0   :  { %7815 = vst [vmem:[%s9849_s3 + $0x1a8] sm:$0xff] %v7671_v42   ;;  %v4761_v52 = vmax.f32 %v3916_v47, 0.0  ;;  %v4905_v53 = vmax.f32 %v4276_v48, 0.0 }
 0x3f1   :  { %v4474_v59 = vmax.f32 %v3198_v49, 0.0  ;;  %v4618_v60 = vmax.f32 %v3558_v50, 0.0 }
 0x3f2   :  { %v5193_v3 = vmax.f32 %v4761_v52, %v4905_v53 }
 0x3f3   :  { %v5050_v6 = vmax.f32 %v4474_v59, %v4618_v60 }
 0x3f4   :  { %v5337_v9 = vmax.f32 %v5049_v2, %v5193_v3 }
 0x3f5   :  { %v3917_v54 = vpop.f32.mrf.mxu2  ;;  %v4277_v55 = vpop.f32.mrf.mxu3 }
 0x3f6   :  { %v3918_v61 = vadd.f32 %v9443_v36, %v3917_v54  ;;  %v4278_v62 = vadd.f32 %v9443_v36, %v4277_v55  ;;  %v3200_v63 = vpop.f32.mrf.mxu0  ;;  %v3560_v0 = vpop.f32.mrf.mxu1 }
 0x3f7   :  { %v3201_v15 = vadd.f32 %v9443_v36, %v3200_v63  ;;  %v3561_v16 = vadd.f32 %v9443_v36, %v3560_v0  ;;  %v7178_v0 = vld [vmem:[%s9847_s0 + $0x208] sm:$0xff] }
 0x3f8   :  { %v4762_v4 = vmax.f32 %v3918_v61, 0.0  ;;  %v4906_v5 = vmax.f32 %v4278_v62, 0.0 }
 0x3f9   :  { %6888 = vmatmul.msk.bf16.gmra.mxu0 %vm2051_vm0, %v7176_v56  ;;  %6960 = vmatmul.msk.bf16.gmra.mxu1 %vm2051_vm0, %v7248_v57  ;;  %v4475_v21 = vmax.f32 %v3201_v15, 0.0  ;;  %v4619_v23 = vmax.f32 %v3561_v16, 0.0 }
 0x3fa   :  { %v5194_v7 = vmax.f32 %v4762_v4, %v4906_v5  ;;  %7032 = vmatmul.msk.bf16.gmra.mxu2 %vm2051_vm0, %v7320_v58  ;;  %7104 = vmatmul.msk.bf16.gmra.mxu3 %vm2051_vm0, %v7392_v1  ;;  %v7250_v58 = vld [vmem:[%s9847_s0 + $0x448] sm:$0xff] }
 0x3fb   :  { %v5051_v38 = vmax.f32 %v4475_v21, %v4619_v23 }
 0x3fc   :  { %v5338_v10 = vmax.f32 %v5050_v6, %v5194_v7  ;;  %v7322_v7 = vld [vmem:[%s9847_s0 + $0x688] sm:$0xff] }
 0x3fd   :  { %v3920_v11 = vpop.f32.mrf.mxu2  ;;  %v4280_v12 = vpop.f32.mrf.mxu3 }
 0x3fe   :  { %v7676_v13 = vpack.c.bf16 %v5338_v10, %v5337_v9  ;;  %v3202_v14 = vpop.f32.mrf.mxu0  ;;  %v3562_v8 = vpop.f32.mrf.mxu1  ;;  %v3921_v17 = vadd.f32 %v9443_v36, %v3920_v11  ;;  %v4281_v18 = vadd.f32 %v9443_v36, %v4280_v12  ;;  %v7394_v9 = vld [vmem:[%s9847_s0 + $0x8c8] sm:$0xff] }
 0x3ff   :  { %v3203_v19 = vadd.f32 %v9443_v36, %v3202_v14  ;;  %v3563_v20 = vadd.f32 %v9443_v36, %v3562_v8 }
 0x400   :  { %7816 = vst [vmem:[%s9849_s3 + $0x1b0] sm:$0xff] %v7676_v13   ;;  %v4763_v24 = vmax.f32 %v3921_v17, 0.0  ;;  %v4907_v25 = vmax.f32 %v4281_v18, 0.0 }
 0x401   :  { %v4476_v29 = vmax.f32 %v3203_v19, 0.0  ;;  %v4620_v30 = vmax.f32 %v3563_v20, 0.0 }
 0x402   :  { %v5195_v39 = vmax.f32 %v4763_v24, %v4907_v25 }
 0x403   :  { %v5052_v43 = vmax.f32 %v4476_v29, %v4620_v30 }
 0x404   :  { %v5339_v45 = vmax.f32 %v5051_v38, %v5195_v39 }
 0x405   :  { %v3922_v26 = vpop.f32.mrf.mxu2  ;;  %v4282_v27 = vpop.f32.mrf.mxu3 }
 0x406   :  { %v3923_v31 = vadd.f32 %v9443_v36, %v3922_v26  ;;  %v4283_v32 = vadd.f32 %v9443_v36, %v4282_v27  ;;  %v3205_v33 = vpop.f32.mrf.mxu0  ;;  %v3565_v34 = vpop.f32.mrf.mxu1 }
 0x407   :  { %v3206_v51 = vadd.f32 %v9443_v36, %v3205_v33  ;;  %v3566_v52 = vadd.f32 %v9443_v36, %v3565_v34  ;;  %v7179_v34 = vld [vmem:[%s9847_s0 + $0x210] sm:$0xff] }
 0x408   :  { %v4764_v41 = vmax.f32 %v3923_v31, 0.0  ;;  %v4908_v42 = vmax.f32 %v4283_v32, 0.0 }
 0x409   :  { %6889 = vmatmul.msk.bf16.gmra.mxu0 %vm2051_vm0, %v7177_v28  ;;  %6961 = vmatmul.msk.bf16.gmra.mxu1 %vm2051_vm0, %v7249_v22  ;;  %v4477_v57 = vmax.f32 %v3206_v51, 0.0  ;;  %v4621_v59 = vmax.f32 %v3566_v52, 0.0 }
 0x40a   :  { %v5196_v44 = vmax.f32 %v4764_v41, %v4908_v42  ;;  %7033 = vmatmul.msk.bf16.gmra.mxu2 %vm2051_vm0, %v7321_v35  ;;  %7105 = vmatmul.msk.bf16.gmra.mxu3 %vm2051_vm0, %v7393_v37  ;;  %v7251_v35 = vld [vmem:[%s9847_s0 + $0x450] sm:$0xff] }
 0x40b   :  { %v5053_v10 = vmax.f32 %v4477_v57, %v4621_v59 }
 0x40c   :  { %v5340_v46 = vmax.f32 %v5052_v43, %v5196_v44  ;;  %v7323_v44 = vld [vmem:[%s9847_s0 + $0x690] sm:$0xff] }
 0x40d   :  { %v3925_v47 = vpop.f32.mrf.mxu2  ;;  %v4285_v48 = vpop.f32.mrf.mxu3 }
 0x40e   :  { %v7681_v49 = vpack.c.bf16 %v5340_v46, %v5339_v45  ;;  %v3207_v50 = vpop.f32.mrf.mxu0  ;;  %v3567_v40 = vpop.f32.mrf.mxu1  ;;  %v3926_v53 = vadd.f32 %v9443_v36, %v3925_v47  ;;  %v4286_v54 = vadd.f32 %v9443_v36, %v4285_v48  ;;  %v7395_v45 = vld [vmem:[%s9847_s0 + $0x8d0] sm:$0xff] }
 0x40f   :  { %v3208_v55 = vadd.f32 %v9443_v36, %v3207_v50  ;;  %v3568_v56 = vadd.f32 %v9443_v36, %v3567_v40 }
 0x410   :  { %7817 = vst [vmem:[%s9849_s3 + $0x1b8] sm:$0xff] %v7681_v49   ;;  %v4765_v60 = vmax.f32 %v3926_v53, 0.0  ;;  %v4909_v61 = vmax.f32 %v4286_v54, 0.0 }
 0x411   :  { %v4478_v1 = vmax.f32 %v3208_v55, 0.0  ;;  %v4622_v2 = vmax.f32 %v3568_v56, 0.0 }
 0x412   :  { %v5197_v11 = vmax.f32 %v4765_v60, %v4909_v61 }
 0x413   :  { %v5054_v14 = vmax.f32 %v4478_v1, %v4622_v2 }
 0x414   :  { %v5341_v15 = vmax.f32 %v5053_v10, %v5197_v11 }
 0x415   :  { %v3927_v62 = vpop.f32.mrf.mxu2  ;;  %v4287_v63 = vpop.f32.mrf.mxu3 }
 0x416   :  { %v3928_v3 = vadd.f32 %v9443_v36, %v3927_v62  ;;  %v4288_v4 = vadd.f32 %v9443_v36, %v4287_v63  ;;  %v3210_v5 = vpop.f32.mrf.mxu0  ;;  %v3570_v6 = vpop.f32.mrf.mxu1 }
 0x417   :  { %v3211_v23 = vadd.f32 %v9443_v36, %v3210_v5  ;;  %v3571_v24 = vadd.f32 %v9443_v36, %v3570_v6  ;;  %v7180_v6 = vld [vmem:[%s9847_s0 + $0x218] sm:$0xff] }
 0x418   :  { %v4766_v12 = vmax.f32 %v3928_v3, 0.0  ;;  %v4910_v13 = vmax.f32 %v4288_v4, 0.0 }
 0x419   :  { %6890 = vmatmul.msk.bf16.gmra.mxu0 %vm2051_vm0, %v7178_v0  ;;  %6962 = vmatmul.msk.bf16.gmra.mxu1 %vm2051_vm0, %v7250_v58  ;;  %v4479_v22 = vmax.f32 %v3211_v23, 0.0  ;;  %v4623_v29 = vmax.f32 %v3571_v24, 0.0 }
 0x41a   :  { %v5198_v8 = vmax.f32 %v4766_v12, %v4910_v13  ;;  %7034 = vmatmul.msk.bf16.gmra.mxu2 %vm2051_vm0, %v7322_v7  ;;  %7106 = vmatmul.msk.bf16.gmra.mxu3 %vm2051_vm0, %v7394_v9  ;;  %v7252_v7 = vld [vmem:[%s9847_s0 + $0x458] sm:$0xff] }
 0x41b   :  { %v5055_v46 = vmax.f32 %v4479_v22, %v4623_v29 }
 0x41c   :  { %v5342_v16 = vmax.f32 %v5054_v14, %v5198_v8  ;;  %v7324_v8 = vld [vmem:[%s9847_s0 + $0x698] sm:$0xff] }
 0x41d   :  { %v3930_v17 = vpop.f32.mrf.mxu2  ;;  %v4290_v18 = vpop.f32.mrf.mxu3 }
 0x41e   :  { %v7686_v19 = vpack.c.bf16 %v5342_v16, %v5341_v15  ;;  %v3212_v20 = vpop.f32.mrf.mxu0  ;;  %v3572_v21 = vpop.f32.mrf.mxu1  ;;  %v3931_v25 = vadd.f32 %v9443_v36, %v3930_v17  ;;  %v4291_v26 = vadd.f32 %v9443_v36, %v4290_v18  ;;  %v7396_v15 = vld [vmem:[%s9847_s0 + $0x8d8] sm:$0xff] }
 0x41f   :  { %v3213_v27 = vadd.f32 %v9443_v36, %v3212_v20  ;;  %v3573_v28 = vadd.f32 %v9443_v36, %v3572_v21 }
 0x420   :  { %7818 = vst [vmem:[%s9849_s3 + $0x1c0] sm:$0xff] %v7686_v19   ;;  %v4767_v30 = vmax.f32 %v3931_v25, 0.0  ;;  %v4911_v31 = vmax.f32 %v4291_v26, 0.0 }
 0x421   :  { %v4480_v37 = vmax.f32 %v3213_v27, 0.0  ;;  %v4624_v38 = vmax.f32 %v3573_v28, 0.0 }
 0x422   :  { %v5199_v47 = vmax.f32 %v4767_v30, %v4911_v31 }
 0x423   :  { %v5056_v50 = vmax.f32 %v4480_v37, %v4624_v38 }
 0x424   :  { %v5343_v51 = vmax.f32 %v5055_v46, %v5199_v47 }
 0x425   :  { %v3932_v32 = vpop.f32.mrf.mxu2  ;;  %v4292_v33 = vpop.f32.mrf.mxu3 }
 0x426   :  { %v3933_v39 = vadd.f32 %v9443_v36, %v3932_v32  ;;  %v4293_v41 = vadd.f32 %v9443_v36, %v4292_v33  ;;  %v3215_v42 = vpop.f32.mrf.mxu0  ;;  %v3575_v43 = vpop.f32.mrf.mxu1 }
 0x427   :  { %v3216_v59 = vadd.f32 %v9443_v36, %v3215_v42  ;;  %v3576_v60 = vadd.f32 %v9443_v36, %v3575_v43  ;;  %v7181_v43 = vld [vmem:[%s9847_s0 + $0x220] sm:$0xff] }
 0x428   :  { %v4768_v48 = vmax.f32 %v3933_v39, 0.0  ;;  %v4912_v49 = vmax.f32 %v4293_v41, 0.0 }
 0x429   :  { %6891 = vmatmul.msk.bf16.gmra.mxu0 %vm2051_vm0, %v7179_v34  ;;  %6963 = vmatmul.msk.bf16.gmra.mxu1 %vm2051_vm0, %v7251_v35  ;;  %v4481_v58 = vmax.f32 %v3216_v59, 0.0  ;;  %v4625_v1 = vmax.f32 %v3576_v60, 0.0 }
 0x42a   :  { %v5200_v40 = vmax.f32 %v4768_v48, %v4912_v49  ;;  %7035 = vmatmul.msk.bf16.gmra.mxu2 %vm2051_vm0, %v7323_v44  ;;  %7107 = vmatmul.msk.bf16.gmra.mxu3 %vm2051_vm0, %v7395_v45  ;;  %v7253_v44 = vld [vmem:[%s9847_s0 + $0x460] sm:$0xff] }
 0x42b   :  { %v5057_v16 = vmax.f32 %v4481_v58, %v4625_v1 }
 0x42c   :  { %v5344_v52 = vmax.f32 %v5056_v50, %v5200_v40  ;;  %v7325_v40 = vld [vmem:[%s9847_s0 + $0x6a0] sm:$0xff] }
 0x42d   :  { %v3935_v53 = vpop.f32.mrf.mxu2  ;;  %v4295_v54 = vpop.f32.mrf.mxu3 }
 0x42e   :  { %v7691_v55 = vpack.c.bf16 %v5344_v52, %v5343_v51  ;;  %v3217_v56 = vpop.f32.mrf.mxu0  ;;  %v3577_v57 = vpop.f32.mrf.mxu1  ;;  %v3936_v61 = vadd.f32 %v9443_v36, %v3935_v53  ;;  %v4296_v62 = vadd.f32 %v9443_v36, %v4295_v54  ;;  %v7397_v51 = vld [vmem:[%s9847_s0 + $0x8e0] sm:$0xff] }
 0x42f   :  { %v3218_v63 = vadd.f32 %v9443_v36, %v3217_v56  ;;  %v3578_v0 = vadd.f32 %v9443_v36, %v3577_v57 }
 0x430   :  { %7819 = vst [vmem:[%s9849_s3 + $0x1c8] sm:$0xff] %v7691_v55   ;;  %v4769_v2 = vmax.f32 %v3936_v61, 0.0  ;;  %v4913_v3 = vmax.f32 %v4296_v62, 0.0 }
 0x431   :  { %v4482_v9 = vmax.f32 %v3218_v63, 0.0  ;;  %v4626_v10 = vmax.f32 %v3578_v0, 0.0 }
 0x432   :  { %v5201_v17 = vmax.f32 %v4769_v2, %v4913_v3 }
 0x433   :  { %v5058_v20 = vmax.f32 %v4482_v9, %v4626_v10 }
 0x434   :  { %v5345_v23 = vmax.f32 %v5057_v16, %v5201_v17 }
 0x435   :  { %v3937_v4 = vpop.f32.mrf.mxu2  ;;  %v4297_v5 = vpop.f32.mrf.mxu3 }
 0x436   :  { %v3938_v11 = vadd.f32 %v9443_v36, %v3937_v4  ;;  %v4298_v12 = vadd.f32 %v9443_v36, %v4297_v5  ;;  %v3220_v13 = vpop.f32.mrf.mxu0  ;;  %v3580_v14 = vpop.f32.mrf.mxu1 }
 0x437   :  { %v3221_v29 = vadd.f32 %v9443_v36, %v3220_v13  ;;  %v3581_v30 = vadd.f32 %v9443_v36, %v3580_v14  ;;  %v7182_v14 = vld [vmem:[%s9847_s0 + $0x228] sm:$0xff] }
 0x438   :  { %v4770_v18 = vmax.f32 %v3938_v11, 0.0  ;;  %v4914_v19 = vmax.f32 %v4298_v12, 0.0 }
 0x439   :  { %6892 = vmatmul.msk.bf16.gmra.mxu0 %vm2051_vm0, %v7180_v6  ;;  %6964 = vmatmul.msk.bf16.gmra.mxu1 %vm2051_vm0, %v7252_v7  ;;  %v4483_v35 = vmax.f32 %v3221_v29, 0.0  ;;  %v4627_v37 = vmax.f32 %v3581_v30, 0.0 }
 0x43a   :  { %v5202_v21 = vmax.f32 %v4770_v18, %v4914_v19  ;;  %7036 = vmatmul.msk.bf16.gmra.mxu2 %vm2051_vm0, %v7324_v8  ;;  %7108 = vmatmul.msk.bf16.gmra.mxu3 %vm2051_vm0, %v7396_v15  ;;  %v7254_v8 = vld [vmem:[%s9847_s0 + $0x468] sm:$0xff] }
 0x43b   :  { %v5059_v52 = vmax.f32 %v4483_v35, %v4627_v37 }
 0x43c   :  { %v5346_v24 = vmax.f32 %v5058_v20, %v5202_v21  ;;  %v7326_v21 = vld [vmem:[%s9847_s0 + $0x6a8] sm:$0xff] }
 0x43d   :  { %v3940_v25 = vpop.f32.mrf.mxu2  ;;  %v4300_v26 = vpop.f32.mrf.mxu3 }
 0x43e   :  { %v7696_v27 = vpack.c.bf16 %v5346_v24, %v5345_v23  ;;  %v3222_v28 = vpop.f32.mrf.mxu0  ;;  %v3582_v22 = vpop.f32.mrf.mxu1  ;;  %v3941_v31 = vadd.f32 %v9443_v36, %v3940_v25  ;;  %v4301_v32 = vadd.f32 %v9443_v36, %v4300_v26  ;;  %v7398_v23 = vld [vmem:[%s9847_s0 + $0x8e8] sm:$0xff] }
 0x43f   :  { %v3223_v33 = vadd.f32 %v9443_v36, %v3222_v28  ;;  %v3583_v34 = vadd.f32 %v9443_v36, %v3582_v22 }
 0x440   :  { %7820 = vst [vmem:[%s9849_s3 + $0x1d0] sm:$0xff] %v7696_v27   ;;  %v4771_v38 = vmax.f32 %v3941_v31, 0.0  ;;  %v4915_v39 = vmax.f32 %v4301_v32, 0.0 }
 0x441   :  { %v4484_v45 = vmax.f32 %v3223_v33, 0.0  ;;  %v4628_v46 = vmax.f32 %v3583_v34, 0.0 }
 0x442   :  { %v5203_v53 = vmax.f32 %v4771_v38, %v4915_v39 }
 0x443   :  { %v5060_v56 = vmax.f32 %v4484_v45, %v4628_v46 }
 0x444   :  { %v5347_v59 = vmax.f32 %v5059_v52, %v5203_v53 }
 0x445   :  { %v3942_v41 = vpop.f32.mrf.mxu2  ;;  %v4302_v42 = vpop.f32.mrf.mxu3 }
 0x446   :  { %v3943_v47 = vadd.f32 %v9443_v36, %v3942_v41  ;;  %v4303_v48 = vadd.f32 %v9443_v36, %v4302_v42  ;;  %v3225_v49 = vpop.f32.mrf.mxu0  ;;  %v3585_v50 = vpop.f32.mrf.mxu1 }
 0x447   :  { %v3226_v1 = vadd.f32 %v9443_v36, %v3225_v49  ;;  %v3586_v2 = vadd.f32 %v9443_v36, %v3585_v50  ;;  %v7183_v50 = vld [vmem:[%s9847_s0 + $0x230] sm:$0xff] }
 0x448   :  { %v4772_v54 = vmax.f32 %v3943_v47, 0.0  ;;  %v4916_v55 = vmax.f32 %v4303_v48, 0.0 }
 0x449   :  { %6893 = vmatmul.msk.bf16.gmra.mxu0 %vm2051_vm0, %v7181_v43  ;;  %6965 = vmatmul.msk.bf16.gmra.mxu1 %vm2051_vm0, %v7253_v44  ;;  %v4485_v7 = vmax.f32 %v3226_v1, 0.0  ;;  %v4629_v9 = vmax.f32 %v3586_v2, 0.0 }
 0x44a   :  { %v5204_v57 = vmax.f32 %v4772_v54, %v4916_v55  ;;  %7037 = vmatmul.msk.bf16.gmra.mxu2 %vm2051_vm0, %v7325_v40  ;;  %7109 = vmatmul.msk.bf16.gmra.mxu3 %vm2051_vm0, %v7397_v51  ;;  %v7255_v40 = vld [vmem:[%s9847_s0 + $0x470] sm:$0xff] }
 0x44b   :  { %v5061_v24 = vmax.f32 %v4485_v7, %v4629_v9 }
 0x44c   :  { %v5348_v60 = vmax.f32 %v5060_v56, %v5204_v57  ;;  %v7327_v57 = vld [vmem:[%s9847_s0 + $0x6b0] sm:$0xff] }
 0x44d   :  { %v3945_v61 = vpop.f32.mrf.mxu2  ;;  %v4305_v62 = vpop.f32.mrf.mxu3 }
 0x44e   :  { %v7701_v63 = vpack.c.bf16 %v5348_v60, %v5347_v59  ;;  %v3227_v0 = vpop.f32.mrf.mxu0  ;;  %v3587_v58 = vpop.f32.mrf.mxu1  ;;  %v3946_v3 = vadd.f32 %v9443_v36, %v3945_v61  ;;  %v4306_v4 = vadd.f32 %v9443_v36, %v4305_v62  ;;  %v7399_v59 = vld [vmem:[%s9847_s0 + $0x8f0] sm:$0xff] }
 0x44f   :  { %v3228_v5 = vadd.f32 %v9443_v36, %v3227_v0  ;;  %v3588_v6 = vadd.f32 %v9443_v36, %v3587_v58 }
 0x450   :  { %7821 = vst [vmem:[%s9849_s3 + $0x1d8] sm:$0xff] %v7701_v63   ;;  %v4773_v10 = vmax.f32 %v3946_v3, 0.0  ;;  %v4917_v11 = vmax.f32 %v4306_v4, 0.0 }
 0x451   :  { %v4486_v15 = vmax.f32 %v3228_v5, 0.0  ;;  %v4630_v16 = vmax.f32 %v3588_v6, 0.0 }
 0x452   :  { %v5205_v25 = vmax.f32 %v4773_v10, %v4917_v11 }
 0x453   :  { %v5062_v28 = vmax.f32 %v4486_v15, %v4630_v16 }
 0x454   :  { %v5349_v29 = vmax.f32 %v5061_v24, %v5205_v25 }
 0x455   :  { %v3947_v12 = vpop.f32.mrf.mxu2  ;;  %v4307_v13 = vpop.f32.mrf.mxu3 }
 0x456   :  { %v3948_v17 = vadd.f32 %v9443_v36, %v3947_v12  ;;  %v4308_v18 = vadd.f32 %v9443_v36, %v4307_v13  ;;  %v3230_v19 = vpop.f32.mrf.mxu0  ;;  %v3590_v20 = vpop.f32.mrf.mxu1 }
 0x457   :  { %v3231_v37 = vadd.f32 %v9443_v36, %v3230_v19  ;;  %v3591_v38 = vadd.f32 %v9443_v36, %v3590_v20  ;;  %v7184_v20 = vld [vmem:[%s9847_s0 + $0x238] sm:$0xff] }
 0x458   :  { %v4774_v26 = vmax.f32 %v3948_v17, 0.0  ;;  %v4918_v27 = vmax.f32 %v4308_v18, 0.0 }
 0x459   :  { %6894 = vmatmul.msk.bf16.gmra.mxu0 %vm2051_vm0, %v7182_v14  ;;  %6966 = vmatmul.msk.bf16.gmra.mxu1 %vm2051_vm0, %v7254_v8  ;;  %v4487_v44 = vmax.f32 %v3231_v37, 0.0  ;;  %v4631_v45 = vmax.f32 %v3591_v38, 0.0 }
 0x45a   :  { %v5206_v22 = vmax.f32 %v4774_v26, %v4918_v27  ;;  %7038 = vmatmul.msk.bf16.gmra.mxu2 %vm2051_vm0, %v7326_v21  ;;  %7110 = vmatmul.msk.bf16.gmra.mxu3 %vm2051_vm0, %v7398_v23  ;;  %v7256_v21 = vld [vmem:[%s9847_s0 + $0x478] sm:$0xff] }
 0x45b   :  { %v5063_v60 = vmax.f32 %v4487_v44, %v4631_v45 }
 0x45c   :  { %v5350_v30 = vmax.f32 %v5062_v28, %v5206_v22  ;;  %v7328_v22 = vld [vmem:[%s9847_s0 + $0x6b8] sm:$0xff] }
 0x45d   :  { %v3950_v31 = vpop.f32.mrf.mxu2  ;;  %v4310_v32 = vpop.f32.mrf.mxu3 }
 0x45e   :  { %v7706_v33 = vpack.c.bf16 %v5350_v30, %v5349_v29  ;;  %v3232_v34 = vpop.f32.mrf.mxu0  ;;  %v3592_v35 = vpop.f32.mrf.mxu1  ;;  %v3951_v39 = vadd.f32 %v9443_v36, %v3950_v31  ;;  %v4311_v41 = vadd.f32 %v9443_v36, %v4310_v32  ;;  %v7400_v29 = vld [vmem:[%s9847_s0 + $0x8f8] sm:$0xff] }
 0x45f   :  { %v3233_v42 = vadd.f32 %v9443_v36, %v3232_v34  ;;  %v3593_v43 = vadd.f32 %v9443_v36, %v3592_v35 }
 0x460   :  { %7822 = vst [vmem:[%s9849_s3 + $0x1e0] sm:$0xff] %v7706_v33   ;;  %v4775_v46 = vmax.f32 %v3951_v39, 0.0  ;;  %v4919_v47 = vmax.f32 %v4311_v41, 0.0 }
 0x461   :  { %v4488_v51 = vmax.f32 %v3233_v42, 0.0  ;;  %v4632_v52 = vmax.f32 %v3593_v43, 0.0 }
 0x462   :  { %v5207_v61 = vmax.f32 %v4775_v46, %v4919_v47 }
 0x463   :  { %v5064_v0 = vmax.f32 %v4488_v51, %v4632_v52 }
 0x464   :  { %v5351_v1 = vmax.f32 %v5063_v60, %v5207_v61 }
 0x465   :  { %v3952_v48 = vpop.f32.mrf.mxu2  ;;  %v4312_v49 = vpop.f32.mrf.mxu3 }
 0x466   :  { %v3953_v53 = vadd.f32 %v9443_v36, %v3952_v48  ;;  %v4313_v54 = vadd.f32 %v9443_v36, %v4312_v49  ;;  %v3235_v55 = vpop.f32.mrf.mxu0  ;;  %v3595_v56 = vpop.f32.mrf.mxu1 }
 0x467   :  { %v3236_v9 = vadd.f32 %v9443_v36, %v3235_v55  ;;  %v3596_v10 = vadd.f32 %v9443_v36, %v3595_v56 }
 0x468   :  { %v4776_v62 = vmax.f32 %v3953_v53, 0.0  ;;  %v4920_v63 = vmax.f32 %v4313_v54, 0.0 }
 0x469   :  { %6895 = vmatmul.msk.bf16.gmra.mxu0 %vm2051_vm0, %v7183_v50  ;;  %6967 = vmatmul.msk.bf16.gmra.mxu1 %vm2051_vm0, %v7255_v40  ;;  %v4489_v8 = vmax.f32 %v3236_v9, 0.0  ;;  %v4633_v15 = vmax.f32 %v3596_v10, 0.0 }
 0x46a   :  { %v5208_v58 = vmax.f32 %v4776_v62, %v4920_v63  ;;  %7039 = vmatmul.msk.bf16.gmra.mxu2 %vm2051_vm0, %v7327_v57  ;;  %7111 = vmatmul.msk.bf16.gmra.mxu3 %vm2051_vm0, %v7399_v59 }
 0x46b   :  { %v5065_v30 = vmax.f32 %v4489_v8, %v4633_v15 }
 0x46c   :  { %v5352_v2 = vmax.f32 %v5064_v0, %v5208_v58 }
 0x46d   :  { %v3955_v3 = vpop.f32.mrf.mxu2  ;;  %v4315_v4 = vpop.f32.mrf.mxu3 }
 0x46e   :  { %v7711_v5 = vpack.c.bf16 %v5352_v2, %v5351_v1  ;;  %v3237_v6 = vpop.f32.mrf.mxu0  ;;  %v3597_v7 = vpop.f32.mrf.mxu1  ;;  %v3956_v11 = vadd.f32 %v9443_v36, %v3955_v3  ;;  %v4316_v12 = vadd.f32 %v9443_v36, %v4315_v4 }
 0x46f   :  { %v3238_v13 = vadd.f32 %v9443_v36, %v3237_v6  ;;  %v3598_v14 = vadd.f32 %v9443_v36, %v3597_v7 }
 0x470   :  { %7823 = vst [vmem:[%s9849_s3 + $0x1e8] sm:$0xff] %v7711_v5   ;;  %v4777_v16 = vmax.f32 %v3956_v11, 0.0  ;;  %v4921_v17 = vmax.f32 %v4316_v12, 0.0 }
 0x471   :  { %v4490_v23 = vmax.f32 %v3238_v13, 0.0  ;;  %v4634_v24 = vmax.f32 %v3598_v14, 0.0 }
 0x472   :  { %v5209_v31 = vmax.f32 %v4777_v16, %v4921_v17 }
 0x473   :  { %v5066_v34 = vmax.f32 %v4490_v23, %v4634_v24 }
 0x474   :  { %v5353_v37 = vmax.f32 %v5065_v30, %v5209_v31 }
 0x475   :  { %v3957_v18 = vpop.f32.mrf.mxu2  ;;  %v4317_v19 = vpop.f32.mrf.mxu3 }
 0x476   :  { %v3958_v25 = vadd.f32 %v9443_v36, %v3957_v18  ;;  %v4318_v26 = vadd.f32 %v9443_v36, %v4317_v19  ;;  %v3240_v27 = vpop.f32.mrf.mxu0  ;;  %v3600_v28 = vpop.f32.mrf.mxu1 }
 0x477   :  { %v3241_v45 = vadd.f32 %v9443_v36, %v3240_v27  ;;  %v3601_v46 = vadd.f32 %v9443_v36, %v3600_v28 }
 0x478   :  { %v4778_v32 = vmax.f32 %v3958_v25, 0.0  ;;  %v4922_v33 = vmax.f32 %v4318_v26, 0.0 }
 0x479   :  { %6896 = vmatmul.msk.bf16.gmra.mxu0 %vm2051_vm0, %v7184_v20  ;;  %6968 = vmatmul.msk.bf16.gmra.mxu1 %vm2051_vm0, %v7256_v21  ;;  %v4491_v40 = vmax.f32 %v3241_v45, 0.0  ;;  %v4635_v51 = vmax.f32 %v3601_v46, 0.0 }
 0x47a   :  { %v5210_v35 = vmax.f32 %v4778_v32, %v4922_v33  ;;  %7040 = vmatmul.msk.bf16.gmra.mxu2 %vm2051_vm0, %v7328_v22  ;;  %7112 = vmatmul.msk.bf16.gmra.mxu3 %vm2051_vm0, %v7400_v29 }
 0x47b   :  { %v5067_v63 = vmax.f32 %v4491_v40, %v4635_v51 }
 0x47c   :  { %v5354_v38 = vmax.f32 %v5066_v34, %v5210_v35 }
 0x47d   :  { %v3960_v39 = vpop.f32.mrf.mxu2  ;;  %v4320_v41 = vpop.f32.mrf.mxu3 }
 0x47e   :  { %v7716_v42 = vpack.c.bf16 %v5354_v38, %v5353_v37  ;;  %v3242_v43 = vpop.f32.mrf.mxu0  ;;  %v3602_v44 = vpop.f32.mrf.mxu1  ;;  %v3961_v47 = vadd.f32 %v9443_v36, %v3960_v39  ;;  %v4321_v48 = vadd.f32 %v9443_v36, %v4320_v41 }
 0x47f   :  { %v3243_v49 = vadd.f32 %v9443_v36, %v3242_v43  ;;  %v3603_v50 = vadd.f32 %v9443_v36, %v3602_v44 }
 0x480   :  { %7824 = vst [vmem:[%s9849_s3 + $0x1f0] sm:$0xff] %v7716_v42   ;;  %v4779_v52 = vmax.f32 %v3961_v47, 0.0  ;;  %v4923_v53 = vmax.f32 %v4321_v48, 0.0 }
 0x481   :  { %v4492_v56 = vmax.f32 %v3243_v49, 0.0  ;;  %v4636_v57 = vmax.f32 %v3603_v50, 0.0 }
 0x482   :  { %v5211_v0 = vmax.f32 %v4779_v52, %v4923_v53 }
 0x483   :  { %v5068_v2 = vmax.f32 %v4492_v56, %v4636_v57  ;;  %v9773_v57 = vld [vmem:[%s9848_s2] ss:$0 sm:$0xff] }
 0x484   :  { %v5355_v4 = vmax.f32 %v5067_v63, %v5211_v0 }
 0x485   :  { %v3962_v54 = vpop.f32.mrf.mxu2  ;;  %v4322_v55 = vpop.f32.mrf.mxu3 }
 0x486   :  { %v3963_v59 = vadd.f32 %v9443_v36, %v3962_v54  ;;  %v4323_v60 = vadd.f32 %v9443_v36, %v4322_v55  ;;  %v3245_v61 = vpop.f32.mrf.mxu0  ;;  %v3605_v62 = vpop.f32.mrf.mxu1 }
 0x487   :  { %v3246_v12 = vadd.f32 %v9443_v36, %v3245_v61  ;;  %v3606_v13 = vadd.f32 %v9443_v36, %v3605_v62 }
 0x488   :  { %v4780_v58 = vmax.f32 %v3963_v59, 0.0  ;;  %v4924_v1 = vmax.f32 %v4323_v60, 0.0 }
 0x489   :  { %v4493_v17 = vmax.f32 %v3246_v12, 0.0  ;;  %v4637_v18 = vmax.f32 %v3606_v13, 0.0 }
 0x48a   :  { %v5212_v3 = vmax.f32 %v4780_v58, %v4924_v1 }
 0x48b   :  { %v5069_v29 = vmax.f32 %v4493_v17, %v4637_v18 }
 0x48c   :  { %v5356_v5 = vmax.f32 %v5068_v2, %v5212_v3 }
 0x48d   :  { %v3965_v6 = vpop.f32.mrf.mxu2  ;;  %v4325_v7 = vpop.f32.mrf.mxu3 }
 0x48e   :  { %v7721_v9 = vpack.c.bf16 %v5356_v5, %v5355_v4  ;;  %v3247_v10 = vpop.f32.mrf.mxu0  ;;  %v3607_v11 = vpop.f32.mrf.mxu1  ;;  %v3966_v14 = vadd.f32 %v9443_v36, %v3965_v6  ;;  %v4326_v8 = vadd.f32 %v9443_v36, %v4325_v7 }
 0x48f   :  { %v3248_v15 = vadd.f32 %v9443_v36, %v3247_v10  ;;  %v3608_v16 = vadd.f32 %v9443_v36, %v3607_v11 }
 0x490   :  { %7825 = vst [vmem:[%s9849_s3 + $0x1f8] sm:$0xff] %v7721_v9   ;;  %v4781_v19 = vmax.f32 %v3966_v14, 0.0  ;;  %v4925_v20 = vmax.f32 %v4326_v8, 0.0 }
 0x491   :  { %v4494_v24 = vmax.f32 %v3248_v15, 0.0  ;;  %v4638_v25 = vmax.f32 %v3608_v16, 0.0 }
 0x492   :  { %v5213_v30 = vmax.f32 %v4781_v19, %v4925_v20 }
 0x493   :  { %v5070_v33 = vmax.f32 %v4494_v24, %v4638_v25 }
 0x494   :  { %v5357_v35 = vmax.f32 %v5069_v29, %v5213_v30 }
 0x495   :  { %v3967_v21 = vpop.f32.mrf.mxu2  ;;  %v4327_v23 = vpop.f32.mrf.mxu3 }
 0x496   :  { %v3968_v26 = vadd.f32 %v9443_v36, %v3967_v21  ;;  %v4328_v27 = vadd.f32 %v9443_v36, %v4327_v23  ;;  %v3250_v28 = vpop.f32.mrf.mxu0  ;;  %v3610_v22 = vpop.f32.mrf.mxu1 }
 0x497   :  { %v3251_v44 = vadd.f32 %v9443_v36, %v3250_v28  ;;  %v3611_v45 = vadd.f32 %v9443_v36, %v3610_v22 }
 0x498   :  { %v4782_v31 = vmax.f32 %v3968_v26, 0.0  ;;  %v4926_v32 = vmax.f32 %v4328_v27, 0.0 }
 0x499   :  { %v4495_v50 = vmax.f32 %v3251_v44, 0.0  ;;  %v4639_v40 = vmax.f32 %v3611_v45, 0.0 }
 0x49a   :  { %v5214_v34 = vmax.f32 %v4782_v31, %v4926_v32 }
 0x49c   :  { %v5358_v37 = vmax.f32 %v5070_v33, %v5214_v34 }
 0x49d   :  { %v3970_v38 = vpop.f32.mrf.mxu2  ;;  %v4330_v39 = vpop.f32.mrf.mxu3 }
 0x49e   :  { %v7726_v41 = vpack.c.bf16 %v5358_v37, %v5357_v35  ;;  %v3252_v42 = vpop.f32.mrf.mxu0  ;;  %v3612_v43 = vpop.f32.mrf.mxu1  ;;  %v3971_v46 = vadd.f32 %v9443_v36, %v3970_v38  ;;  %v4331_v47 = vadd.f32 %v9443_v36, %v4330_v39 }
 0x49f   :  { %v3253_v48 = vadd.f32 %v9443_v36, %v3252_v42  ;;  %v3613_v49 = vadd.f32 %v9443_v36, %v3612_v43  ;;  %v5071_v36 = vmax.f32 %v4495_v50, %v4639_v40 }
 0x4a0   :  { %7826 = vst [vmem:[%s9849_s3 + $0x200] sm:$0xff] %v7726_v41   ;;  %v4783_v51 = vmax.f32 %v3971_v46, 0.0  ;;  %v4927_v52 = vmax.f32 %v4331_v47, 0.0 }
 0x4a1   :  { %v4496_v55 = vmax.f32 %v3253_v48, 0.0  ;;  %v4640_v56 = vmax.f32 %v3613_v49, 0.0 }
 0x4a2   :  { %v5215_v63 = vmax.f32 %v4783_v51, %v4927_v52 }
 0x4a3   :  { %v5072_v1 = vmax.f32 %v4496_v55, %v4640_v56 }
 0x4a4   :  { %v5359_v3 = vmax.f32 %v5071_v36, %v5215_v63 }
 0x4a5   :  { %v3972_v53 = vpop.f32.mrf.mxu2  ;;  %v4332_v54 = vpop.f32.mrf.mxu3 }
 0x4a6   :  { %v3973_v59 = vadd.f32 %v9773_v57, %v3972_v53  ;;  %v4333_v60 = vadd.f32 %v9773_v57, %v4332_v54  ;;  %v3255_v61 = vpop.f32.mrf.mxu0  ;;  %v3615_v62 = vpop.f32.mrf.mxu1 }
 0x4a7   :  { %v3256_v11 = vadd.f32 %v9773_v57, %v3255_v61  ;;  %v3616_v12 = vadd.f32 %v9773_v57, %v3615_v62 }
 0x4a8   :  { %v4784_v0 = vmax.f32 %v3973_v59, 0.0  ;;  %v4928_v58 = vmax.f32 %v4333_v60, 0.0 }
 0x4a9   :  { %v4497_v16 = vmax.f32 %v3256_v11, 0.0  ;;  %v4641_v17 = vmax.f32 %v3616_v12, 0.0 }
 0x4aa   :  { %v5216_v2 = vmax.f32 %v4784_v0, %v4928_v58 }
 0x4ab   :  { %v5073_v22 = vmax.f32 %v4497_v16, %v4641_v17 }
 0x4ac   :  { %v5360_v4 = vmax.f32 %v5072_v1, %v5216_v2 }
 0x4ad   :  { %v3975_v5 = vpop.f32.mrf.mxu2  ;;  %v4335_v6 = vpop.f32.mrf.mxu3 }
 0x4ae   :  { %v7731_v7 = vpack.c.bf16 %v5360_v4, %v5359_v3  ;;  %v3257_v9 = vpop.f32.mrf.mxu0  ;;  %v3617_v10 = vpop.f32.mrf.mxu1  ;;  %v3976_v13 = vadd.f32 %v9773_v57, %v3975_v5  ;;  %v4336_v14 = vadd.f32 %v9773_v57, %v4335_v6 }
 0x4af   :  { %v3258_v8 = vadd.f32 %v9773_v57, %v3257_v9  ;;  %v3618_v15 = vadd.f32 %v9773_v57, %v3617_v10 }
 0x4b0   :  { %7827 = vst [vmem:[%s9849_s3 + $0x208] sm:$0xff] %v7731_v7   ;;  %v4785_v18 = vmax.f32 %v3976_v13, 0.0  ;;  %v4929_v19 = vmax.f32 %v4336_v14, 0.0 }
 0x4b1   :  { %v4498_v23 = vmax.f32 %v3258_v8, 0.0  ;;  %v4642_v24 = vmax.f32 %v3618_v15, 0.0 }
 0x4b2   :  { %v5217_v29 = vmax.f32 %v4785_v18, %v4929_v19 }
 0x4b3   :  { %v5074_v32 = vmax.f32 %v4498_v23, %v4642_v24 }
 0x4b4   :  { %v5361_v34 = vmax.f32 %v5073_v22, %v5217_v29 }
 0x4b5   :  { %v3977_v20 = vpop.f32.mrf.mxu2  ;;  %v4337_v21 = vpop.f32.mrf.mxu3 }
 0x4b6   :  { %v3978_v25 = vadd.f32 %v9773_v57, %v3977_v20  ;;  %v4338_v26 = vadd.f32 %v9773_v57, %v4337_v21  ;;  %v3260_v27 = vpop.f32.mrf.mxu0  ;;  %v3620_v28 = vpop.f32.mrf.mxu1 }
 0x4b7   :  { %v3261_v43 = vadd.f32 %v9773_v57, %v3260_v27  ;;  %v3621_v44 = vadd.f32 %v9773_v57, %v3620_v28 }
 0x4b8   :  { %v4786_v30 = vmax.f32 %v3978_v25, 0.0  ;;  %v4930_v31 = vmax.f32 %v4338_v26, 0.0 }
 0x4b9   :  { %v4499_v49 = vmax.f32 %v3261_v43, 0.0  ;;  %v4643_v50 = vmax.f32 %v3621_v44, 0.0 }
 0x4ba   :  { %v5218_v33 = vmax.f32 %v4786_v30, %v4930_v31 }
 0x4bb   :  { %v5075_v62 = vmax.f32 %v4499_v49, %v4643_v50 }
 0x4bc   :  { %v5362_v35 = vmax.f32 %v5074_v32, %v5218_v33 }
 0x4bd   :  { %v3980_v37 = vpop.f32.mrf.mxu2  ;;  %v4340_v38 = vpop.f32.mrf.mxu3 }
 0x4be   :  { %v7736_v39 = vpack.c.bf16 %v5362_v35, %v5361_v34  ;;  %v3262_v41 = vpop.f32.mrf.mxu0  ;;  %v3622_v42 = vpop.f32.mrf.mxu1  ;;  %v3981_v45 = vadd.f32 %v9773_v57, %v3980_v37  ;;  %v4341_v46 = vadd.f32 %v9773_v57, %v4340_v38 }
 0x4bf   :  { %v3263_v47 = vadd.f32 %v9773_v57, %v3262_v41  ;;  %v3623_v48 = vadd.f32 %v9773_v57, %v3622_v42 }
 0x4c0   :  { %7828 = vst [vmem:[%s9849_s3 + $0x210] sm:$0xff] %v7736_v39   ;;  %v4787_v40 = vmax.f32 %v3981_v45, 0.0  ;;  %v4931_v51 = vmax.f32 %v4341_v46, 0.0 }
 0x4c1   :  { %v4500_v54 = vmax.f32 %v3263_v47, 0.0  ;;  %v4644_v55 = vmax.f32 %v3623_v48, 0.0 }
 0x4c2   :  { %v5219_v36 = vmax.f32 %v4787_v40, %v4931_v51 }
 0x4c3   :  { %v5076_v58 = vmax.f32 %v4500_v54, %v4644_v55 }
 0x4c4   :  { %v5363_v2 = vmax.f32 %v5075_v62, %v5219_v36 }
 0x4c5   :  { %v3982_v52 = vpop.f32.mrf.mxu2  ;;  %v4342_v53 = vpop.f32.mrf.mxu3 }
 0x4c6   :  { %v3983_v56 = vadd.f32 %v9773_v57, %v3982_v52  ;;  %v4343_v59 = vadd.f32 %v9773_v57, %v4342_v53  ;;  %v3265_v60 = vpop.f32.mrf.mxu0  ;;  %v3625_v61 = vpop.f32.mrf.mxu1 }
 0x4c7   :  { %v3266_v10 = vadd.f32 %v9773_v57, %v3265_v60  ;;  %v3626_v11 = vadd.f32 %v9773_v57, %v3625_v61 }
 0x4c8   :  { %v4788_v63 = vmax.f32 %v3983_v56, 0.0  ;;  %v4932_v0 = vmax.f32 %v4343_v59, 0.0 }
 0x4c9   :  { %v4501_v15 = vmax.f32 %v3266_v10, 0.0  ;;  %v4645_v16 = vmax.f32 %v3626_v11, 0.0 }
 0x4ca   :  { %v5220_v1 = vmax.f32 %v4788_v63, %v4932_v0 }
 0x4cb   :  { %v5077_v28 = vmax.f32 %v4501_v15, %v4645_v16 }
 0x4cc   :  { %v5364_v3 = vmax.f32 %v5076_v58, %v5220_v1 }
 0x4cd   :  { %v3985_v4 = vpop.f32.mrf.mxu2  ;;  %v4345_v5 = vpop.f32.mrf.mxu3 }
 0x4ce   :  { %v7741_v6 = vpack.c.bf16 %v5364_v3, %v5363_v2  ;;  %v3267_v7 = vpop.f32.mrf.mxu0  ;;  %v3627_v9 = vpop.f32.mrf.mxu1  ;;  %v3986_v12 = vadd.f32 %v9773_v57, %v3985_v4  ;;  %v4346_v13 = vadd.f32 %v9773_v57, %v4345_v5 }
 0x4cf   :  { %v3268_v14 = vadd.f32 %v9773_v57, %v3267_v7  ;;  %v3628_v8 = vadd.f32 %v9773_v57, %v3627_v9 }
 0x4d0   :  { %7829 = vst [vmem:[%s9849_s3 + $0x218] sm:$0xff] %v7741_v6   ;;  %v4789_v17 = vmax.f32 %v3986_v12, 0.0  ;;  %v4933_v18 = vmax.f32 %v4346_v13, 0.0 }
 0x4d1   :  { %v4502_v21 = vmax.f32 %v3268_v14, 0.0  ;;  %v4646_v23 = vmax.f32 %v3628_v8, 0.0 }
 0x4d2   :  { %v5221_v22 = vmax.f32 %v4789_v17, %v4933_v18 }
 0x4d3   :  { %v5078_v31 = vmax.f32 %v4502_v21, %v4646_v23 }
 0x4d4   :  { %v5365_v33 = vmax.f32 %v5077_v28, %v5221_v22 }
 0x4d5   :  { %v3987_v19 = vpop.f32.mrf.mxu2  ;;  %v4347_v20 = vpop.f32.mrf.mxu3 }
 0x4d6   :  { %v3988_v24 = vadd.f32 %v9773_v57, %v3987_v19  ;;  %v4348_v25 = vadd.f32 %v9773_v57, %v4347_v20  ;;  %v3270_v26 = vpop.f32.mrf.mxu0  ;;  %v3630_v27 = vpop.f32.mrf.mxu1 }
 0x4d7   :  { %v3271_v42 = vadd.f32 %v9773_v57, %v3270_v26  ;;  %v3631_v43 = vadd.f32 %v9773_v57, %v3630_v27 }
 0x4d8   :  { %v4790_v29 = vmax.f32 %v3988_v24, 0.0  ;;  %v4934_v30 = vmax.f32 %v4348_v25, 0.0 }
 0x4d9   :  { %v4503_v48 = vmax.f32 %v3271_v42, 0.0  ;;  %v4647_v49 = vmax.f32 %v3631_v43, 0.0 }
 0x4da   :  { %v5222_v32 = vmax.f32 %v4790_v29, %v4934_v30 }
 0x4db   :  { %v5079_v61 = vmax.f32 %v4503_v48, %v4647_v49 }
 0x4dc   :  { %v5366_v34 = vmax.f32 %v5078_v31, %v5222_v32 }
 0x4dd   :  { %v3990_v35 = vpop.f32.mrf.mxu2  ;;  %v4350_v37 = vpop.f32.mrf.mxu3 }
 0x4de   :  { %v7746_v38 = vpack.c.bf16 %v5366_v34, %v5365_v33  ;;  %v3272_v39 = vpop.f32.mrf.mxu0  ;;  %v3632_v41 = vpop.f32.mrf.mxu1  ;;  %v3991_v44 = vadd.f32 %v9773_v57, %v3990_v35  ;;  %v4351_v45 = vadd.f32 %v9773_v57, %v4350_v37 }
 0x4df   :  { %v3273_v46 = vadd.f32 %v9773_v57, %v3272_v39  ;;  %v3633_v47 = vadd.f32 %v9773_v57, %v3632_v41 }
 0x4e0   :  { %7830 = vst [vmem:[%s9849_s3 + $0x220] sm:$0xff] %v7746_v38   ;;  %v4791_v50 = vmax.f32 %v3991_v44, 0.0  ;;  %v4935_v40 = vmax.f32 %v4351_v45, 0.0 }
 0x4e1   :  { %v4504_v53 = vmax.f32 %v3273_v46, 0.0  ;;  %v4648_v54 = vmax.f32 %v3633_v47, 0.0 }
 0x4e2   :  { %v5223_v62 = vmax.f32 %v4791_v50, %v4935_v40 }
 0x4e3   :  { %v5080_v0 = vmax.f32 %v4504_v53, %v4648_v54 }
 0x4e4   :  { %v5367_v1 = vmax.f32 %v5079_v61, %v5223_v62 }
 0x4e5   :  { %v3992_v51 = vpop.f32.mrf.mxu2  ;;  %v4352_v52 = vpop.f32.mrf.mxu3 }
 0x4e6   :  { %v3993_v55 = vadd.f32 %v9773_v57, %v3992_v51  ;;  %v4353_v56 = vadd.f32 %v9773_v57, %v4352_v52  ;;  %v3275_v59 = vpop.f32.mrf.mxu0  ;;  %v3635_v60 = vpop.f32.mrf.mxu1 }
 0x4e7   :  { %v3276_v9 = vadd.f32 %v9773_v57, %v3275_v59  ;;  %v3636_v10 = vadd.f32 %v9773_v57, %v3635_v60 }
 0x4e8   :  { %v4792_v36 = vmax.f32 %v3993_v55, 0.0  ;;  %v4936_v63 = vmax.f32 %v4353_v56, 0.0 }
 0x4e9   :  { %v4505_v8 = vmax.f32 %v3276_v9, 0.0  ;;  %v4649_v15 = vmax.f32 %v3636_v10, 0.0 }
 0x4ea   :  { %v5224_v58 = vmax.f32 %v4792_v36, %v4936_v63 }
 0x4eb   :  { %v5081_v27 = vmax.f32 %v4505_v8, %v4649_v15 }
 0x4ec   :  { %v5368_v2 = vmax.f32 %v5080_v0, %v5224_v58 }
 0x4ed   :  { %v3995_v3 = vpop.f32.mrf.mxu2  ;;  %v4355_v4 = vpop.f32.mrf.mxu3 }
 0x4ee   :  { %v7751_v5 = vpack.c.bf16 %v5368_v2, %v5367_v1  ;;  %v3277_v6 = vpop.f32.mrf.mxu0  ;;  %v3637_v7 = vpop.f32.mrf.mxu1  ;;  %v3996_v11 = vadd.f32 %v9773_v57, %v3995_v3  ;;  %v4356_v12 = vadd.f32 %v9773_v57, %v4355_v4 }
 0x4ef   :  { %v3278_v13 = vadd.f32 %v9773_v57, %v3277_v6  ;;  %v3638_v14 = vadd.f32 %v9773_v57, %v3637_v7 }
 0x4f0   :  { %7831 = vst [vmem:[%s9849_s3 + $0x228] sm:$0xff] %v7751_v5   ;;  %v4793_v16 = vmax.f32 %v3996_v11, 0.0  ;;  %v4937_v17 = vmax.f32 %v4356_v12, 0.0 }
 0x4f1   :  { %v4506_v20 = vmax.f32 %v3278_v13, 0.0  ;;  %v4650_v21 = vmax.f32 %v3638_v14, 0.0 }
 0x4f2   :  { %v5225_v28 = vmax.f32 %v4793_v16, %v4937_v17 }
 0x4f3   :  { %v5082_v30 = vmax.f32 %v4506_v20, %v4650_v21 }
 0x4f4   :  { %v5369_v32 = vmax.f32 %v5081_v27, %v5225_v28 }
 0x4f5   :  { %v3997_v18 = vpop.f32.mrf.mxu2  ;;  %v4357_v19 = vpop.f32.mrf.mxu3 }
 0x4f6   :  { %v3998_v23 = vadd.f32 %v9773_v57, %v3997_v18  ;;  %v4358_v24 = vadd.f32 %v9773_v57, %v4357_v19  ;;  %v3280_v25 = vpop.f32.mrf.mxu0  ;;  %v3640_v26 = vpop.f32.mrf.mxu1 }
 0x4f7   :  { %v3281_v41 = vadd.f32 %v9773_v57, %v3280_v25  ;;  %v3641_v42 = vadd.f32 %v9773_v57, %v3640_v26 }
 0x4f8   :  { %v4794_v22 = vmax.f32 %v3998_v23, 0.0  ;;  %v4938_v29 = vmax.f32 %v4358_v24, 0.0 }
 0x4f9   :  { %v4507_v47 = vmax.f32 %v3281_v41, 0.0  ;;  %v4651_v48 = vmax.f32 %v3641_v42, 0.0 }
 0x4fa   :  { %v5226_v31 = vmax.f32 %v4794_v22, %v4938_v29 }
 0x4fb   :  { %v5083_v56 = vmax.f32 %v4507_v47, %v4651_v48 }
 0x4fc   :  { %v5370_v33 = vmax.f32 %v5082_v30, %v5226_v31 }
 0x4fd   :  { %v4000_v34 = vpop.f32.mrf.mxu2  ;;  %v4360_v35 = vpop.f32.mrf.mxu3 }
 0x4fe   :  { %v7756_v37 = vpack.c.bf16 %v5370_v33, %v5369_v32  ;;  %v3282_v38 = vpop.f32.mrf.mxu0  ;;  %v3642_v39 = vpop.f32.mrf.mxu1  ;;  %v4001_v43 = vadd.f32 %v9773_v57, %v4000_v34  ;;  %v4361_v44 = vadd.f32 %v9773_v57, %v4360_v35 }
 0x4ff   :  { %v3283_v45 = vadd.f32 %v9773_v57, %v3282_v38  ;;  %v3643_v46 = vadd.f32 %v9773_v57, %v3642_v39 }
 0x500   :  { %7832 = vst [vmem:[%s9849_s3 + $0x230] sm:$0xff] %v7756_v37   ;;  %v4795_v49 = vmax.f32 %v4001_v43, 0.0  ;;  %v4939_v50 = vmax.f32 %v4361_v44, 0.0 }
 0x501   :  { %v4508_v52 = vmax.f32 %v3283_v45, 0.0  ;;  %v4652_v53 = vmax.f32 %v3643_v46, 0.0 }
 0x502   :  { %v5227_v59 = vmax.f32 %v4795_v49, %v4939_v50 }
 0x503   :  { %v5084_v62 = vmax.f32 %v4508_v52, %v4652_v53 }
 0x504   :  { %v5371_v63 = vmax.f32 %v5083_v56, %v5227_v59 }
 0x505   :  { %v4002_v40 = vpop.f32.mrf.mxu2  ;;  %v4362_v51 = vpop.f32.mrf.mxu3 }
 0x506   :  { %v4003_v54 = vadd.f32 %v9773_v57, %v4002_v40  ;;  %v4363_v55 = vadd.f32 %v9773_v57, %v4362_v51 }
 0x508   :  { %v4796_v60 = vmax.f32 %v4003_v54, 0.0  ;;  %v4940_v61 = vmax.f32 %v4363_v55, 0.0 }
 0x50a   :  { %v5228_v36 = vmax.f32 %v4796_v60, %v4940_v61 }
 0x50c   :  { %v5372_v0 = vmax.f32 %v5084_v62, %v5228_v36 }
 0x50e   :  { %v7761_v58 = vpack.c.bf16 %v5372_v0, %v5371_v63 }
 0x510   :  { %7833 = vst [vmem:[%s9849_s3 + $0x238] sm:$0xff] %v7761_v58  }

// kernel: net_forward.3
= control target key start
LH: loop header
LB: loop body
LE: loop exit
PB: predicated region body
PF: predicated region fallthrough
CT: control target
= control target key end

     0   :  { %s4796_s1 = inlined_call_operand.vmem [shape: bf16[256,128], index: 1, kind: input, shape index: {}]   ;;  %s4797_s2 = inlined_call_operand.vmem [shape: f32[1,128], index: 2, kind: input, shape index: {}]   ;;  %s4798_s0 = inlined_call_operand.vmem [shape: bf16[512,256], index: 0, kind: input, shape index: {}]   ;;  %s4799_s3 = inlined_call_operand.vmem [shape: bf16[16,128,128], index: 3, kind: input, shape index: {}]   ;;  %s4800_s4 = inlined_call_operand.vmem [shape: f32[1,128], index: 4, kind: input, shape index: {}]   ;;  %s4801_s6 = inlined_call_operand.vmem [shape: f32[1,128], index: 6, kind: input, shape index: {}]   ;;  %s4802_s5 = inlined_call_operand.vmem [shape: bf16[128,128], index: 5, kind: input, shape index: {}]   ;;  %s4803_s7 = inlined_call_operand.vmem [shape: f32[8,128], index: 7, kind: output, shape index: {}]  }
   0x1   :  { %v3544_v0 = vld [vmem:[%s4796_s1 + $0x38] sm:$0xff]  ;;  %v3543_v2 = vld [vmem:[%s4796_s1 + $0x30] sm:$0xff]  ;;  %v3542_v4 = vld [vmem:[%s4796_s1 + $0x28] sm:$0xff] }
   0x2   :  { %v3552_v1 = vld [vmem:[%s4796_s1 + $0x78] sm:$0xff]  ;;  %542 = vmatpush.bf16.msra.mxu0 %v3544_v0  ;;  %v3551_v3 = vld [vmem:[%s4796_s1 + $0x70] sm:$0xff]  ;;  %3689 = vmatpush.bf16.msra.mxu3 %v3544_v0  ;;  %v3550_v5 = vld [vmem:[%s4796_s1 + $0x68] sm:$0xff] }
   0x3   :  { %711 = vmatpush.bf16.msra.mxu1 %v3552_v1  ;;  %3697 = vmatpush.bf16.msra.mxu2 %v3552_v1  ;;  %v3541_v6 = vld [vmem:[%s4796_s1 + $0x20] sm:$0xff]  ;;  %v3540_v8 = vld [vmem:[%s4796_s1 + $0x18] sm:$0xff]  ;;  %v3539_v10 = vld [vmem:[%s4796_s1 + $0x10] sm:$0xff] }
   0x4   :  { %v3549_v7 = vld [vmem:[%s4796_s1 + $0x60] sm:$0xff]  ;;  %v3548_v9 = vld [vmem:[%s4796_s1 + $0x58] sm:$0xff]  ;;  %v3547_v11 = vld [vmem:[%s4796_s1 + $0x50] sm:$0xff] }
   0x5   :  { %v3538_v12 = vld [vmem:[%s4796_s1 + $0x8] sm:$0xff]  ;;  %v3537_v14 = vld [vmem:[%s4796_s1] sm:$0xff]  ;;  %v2379_v22 = vld [vmem:[%s4798_s0 + $0x10] sm:$0xf] }
   0x6   :  { %543 = vmatpush.bf16.msra.mxu0 %v3543_v2  ;;  %3690 = vmatpush.bf16.msra.mxu3 %v3543_v2  ;;  %v3546_v13 = vld [vmem:[%s4796_s1 + $0x48] sm:$0xff]  ;;  %v3545_v15 = vld [vmem:[%s4796_s1 + $0x40] sm:$0xff]  ;;  %v3476_v23 = vld [vmem:[%s4798_s0 + $0x14] sm:$0xf0] }
   0x7   :  { %712 = vmatpush.bf16.msra.mxu1 %v3551_v3  ;;  %3698 = vmatpush.bf16.msra.mxu2 %v3551_v3  ;;  %v2371_v16 = vld [vmem:[%s4798_s0] sm:$0xf]  ;;  %v3474_v17 = vld [vmem:[%s4798_s0 + $0x4] sm:$0xf0]  ;;  %v3473_v18 = vld [vmem:[%s4798_s0 + $0x4] sm:$0xf]  ;;  %v2380_v26 = vor.u32 %v3476_v23, %v2379_v22 }
   0x8   :  { %v2373_v19 = vld [vmem:[%s4798_s0 + $0x8] sm:$0xf0]  ;;  %v2372_v20 = vor.u32 %v3474_v17, %v2371_v16  ;;  %v3475_v24 = vld [vmem:[%s4798_s0 + $0x14] sm:$0xf]  ;;  %v2381_v25 = vld [vmem:[%s4798_s0 + $0x18] sm:$0xf0] }
   0x9   :  { %v2376_v21 = vor.u32 %v3473_v18, %v2373_v19  ;;  %v2384_v27 = vor.u32 %v3475_v24, %v2381_v25  ;;  %v2387_v28 = vld [vmem:[%s4798_s0 + $0x20] sm:$0xf]  ;;  %v3478_v29 = vld [vmem:[%s4798_s0 + $0x24] sm:$0xf0]  ;;  %v3477_v30 = vld [vmem:[%s4798_s0 + $0x24] sm:$0xf] }
   0xa   :  { %544 = vmatpush.bf16.msra.mxu0 %v3542_v4  ;;  %3691 = vmatpush.bf16.msra.mxu3 %v3542_v4  ;;  %v2389_v31 = vld [vmem:[%s4798_s0 + $0x28] sm:$0xf0]  ;;  %v2388_v32 = vor.u32 %v3478_v29, %v2387_v28  ;;  %v2395_v34 = vld [vmem:[%s4798_s0 + $0x30] sm:$0xf]  ;;  %v3480_v35 = vld [vmem:[%s4798_s0 + $0x34] sm:$0xf0] }
   0xb   :  { %713 = vmatpush.bf16.msra.mxu1 %v3550_v5  ;;  %3699 = vmatpush.bf16.msra.mxu2 %v3550_v5  ;;  %v2392_v33 = vor.u32 %v3477_v30, %v2389_v31  ;;  %v3479_v36 = vld [vmem:[%s4798_s0 + $0x34] sm:$0xf]  ;;  %v2397_v37 = vld [vmem:[%s4798_s0 + $0x38] sm:$0xf0]  ;;  %v2396_v38 = vor.u32 %v3480_v35, %v2395_v34  ;;  %v2403_v40 = vld [vmem:[%s4798_s0 + $0x40] sm:$0xf] }
   0xc   :  { %v2400_v39 = vor.u32 %v3479_v36, %v2397_v37  ;;  %v3482_v41 = vld [vmem:[%s4798_s0 + $0x44] sm:$0xf0]  ;;  %v3481_v42 = vld [vmem:[%s4798_s0 + $0x44] sm:$0xf]  ;;  %v2405_v43 = vld [vmem:[%s4798_s0 + $0x48] sm:$0xf0] }
   0xd   :  { %v2404_v44 = vor.u32 %v3482_v41, %v2403_v40  ;;  %v2408_v45 = vor.u32 %v3481_v42, %v2405_v43  ;;  %v2411_v46 = vld [vmem:[%s4798_s0 + $0x50] sm:$0xf]  ;;  %v3484_v47 = vld [vmem:[%s4798_s0 + $0x54] sm:$0xf0]  ;;  %v3483_v48 = vld [vmem:[%s4798_s0 + $0x54] sm:$0xf] }
   0xe   :  { %545 = vmatpush.bf16.msra.mxu0 %v3541_v6  ;;  %3692 = vmatpush.bf16.msra.mxu3 %v3541_v6  ;;  %v2413_v49 = vld [vmem:[%s4798_s0 + $0x58] sm:$0xf0]  ;;  %v2412_v50 = vor.u32 %v3484_v47, %v2411_v46  ;;  %v2419_v52 = vld [vmem:[%s4798_s0 + $0x60] sm:$0xf]  ;;  %v3486_v53 = vld [vmem:[%s4798_s0 + $0x64] sm:$0xf0] }
   0xf   :  { %714 = vmatpush.bf16.msra.mxu1 %v3549_v7  ;;  %3700 = vmatpush.bf16.msra.mxu2 %v3549_v7  ;;  %v2416_v51 = vor.u32 %v3483_v48, %v2413_v49  ;;  %v3485_v54 = vld [vmem:[%s4798_s0 + $0x64] sm:$0xf]  ;;  %v2421_v55 = vld [vmem:[%s4798_s0 + $0x68] sm:$0xf0]  ;;  %v2420_v56 = vor.u32 %v3486_v53, %v2419_v52  ;;  %v2427_v58 = vld [vmem:[%s4798_s0 + $0x70] sm:$0xf] }
  0x10   :  { %v2424_v57 = vor.u32 %v3485_v54, %v2421_v55  ;;  %v3488_v59 = vld [vmem:[%s4798_s0 + $0x74] sm:$0xf0]  ;;  %v3487_v60 = vld [vmem:[%s4798_s0 + $0x74] sm:$0xf]  ;;  %v2429_v61 = vld [vmem:[%s4798_s0 + $0x78] sm:$0xf0] }
  0x11   :  { %v2428_v62 = vor.u32 %v3488_v59, %v2427_v58  ;;  %v2432_v63 = vor.u32 %v3487_v60, %v2429_v61  ;;  %v2435_v0 = vld [vmem:[%s4798_s0 + $0x80] sm:$0xf]  ;;  %v3490_v1 = vld [vmem:[%s4798_s0 + $0x84] sm:$0xf0]  ;;  %v3489_v2 = vld [vmem:[%s4798_s0 + $0x84] sm:$0xf] }
  0x12   :  { %546 = vmatpush.bf16.msra.mxu0 %v3540_v8  ;;  %3693 = vmatpush.bf16.msra.mxu3 %v3540_v8  ;;  %v2437_v3 = vld [vmem:[%s4798_s0 + $0x88] sm:$0xf0]  ;;  %v3912_v4 = vld [vmem:[%s4797_s2] ss:$0 sm:$0xff]  ;;  %v2436_v5 = vor.u32 %v3490_v1, %v2435_v0  ;;  %v3492_v16 = vld [vmem:[%s4798_s0 + $0x94] sm:$0xf0] }
  0x13   :  { %715 = vmatpush.bf16.msra.mxu1 %v3548_v9  ;;  %3701 = vmatpush.bf16.msra.mxu2 %v3548_v9  ;;  %v2440_v6 = vor.u32 %v3489_v2, %v2437_v3  ;;  %v3491_v17 = vld [vmem:[%s4798_s0 + $0x94] sm:$0xf]  ;;  %v2445_v18 = vld [vmem:[%s4798_s0 + $0x98] sm:$0xf0]  ;;  %v2451_v29 = vld [vmem:[%s4798_s0 + $0xa0] sm:$0xf] }
  0x14   :  { %v3494_v30 = vld [vmem:[%s4798_s0 + $0xa4] sm:$0xf0]  ;;  %v3493_v31 = vld [vmem:[%s4798_s0 + $0xa4] sm:$0xf]  ;;  %v2459_v43 = vld [vmem:[%s4798_s0 + $0xb0] sm:$0xf] }
  0x15   :  { %v2461_v46 = vld [vmem:[%s4798_s0 + $0xb8] sm:$0xf0]  ;;  %v3498_v58 = vld [vmem:[%s4798_s0 + $0xc4] sm:$0xf0]  ;;  %v3497_v59 = vld [vmem:[%s4798_s0 + $0xc4] sm:$0xf] }
  0x16   :  { %547 = vmatpush.bf16.msra.mxu0 %v3539_v10  ;;  %3694 = vmatpush.bf16.msra.mxu3 %v3539_v10  ;;  %v2469_v60 = vld [vmem:[%s4798_s0 + $0xc8] sm:$0xf0] }
  0x17   :  { %716 = vmatpush.bf16.msra.mxu1 %v3547_v11  ;;  %3702 = vmatpush.bf16.msra.mxu2 %v3547_v11 }
  0x1a   :  { %548 = vmatpush.bf16.msra.mxu0 %v3538_v12  ;;  %3695 = vmatpush.bf16.msra.mxu3 %v3538_v12 }
  0x1b   :  { %717 = vmatpush.bf16.msra.mxu1 %v3546_v13  ;;  %3703 = vmatpush.bf16.msra.mxu2 %v3546_v13 }
  0x1e   :  { %549 = vmatpush.bf16.msra.mxu0 %v3537_v14  ;;  %3696 = vmatpush.bf16.msra.mxu3 %v3537_v14 }
  0x1f   :  { %718 = vmatpush.bf16.msra.mxu1 %v3545_v15  ;;  %3704 = vmatpush.bf16.msra.mxu2 %v3545_v15  ;;  %v2443_v15 = vld [vmem:[%s4798_s0 + $0x90] sm:$0xf] }
  0x20   :  { %v2444_v19 = vor.u32 %v3492_v16, %v2443_v15 }
  0x21   :  { %550 = vmatmul.bf16.vlgmr.msra.gmra.mxu0 %v2372_v20  ;;  %v2448_v20 = vor.u32 %v3491_v17, %v2445_v18 }
  0x22   :  { %719 = vmatmul.bf16.vlgmr.msra.gmra.mxu1 %v2376_v21 }
  0x31   :  { %555 = vmatmul.bf16.gmra.mxu0 %v2380_v26 }
  0x32   :  { %724 = vmatmul.bf16.gmra.mxu1 %v2384_v27 }
  0x41   :  { %560 = vmatmul.bf16.gmra.mxu0 %v2388_v32  ;;  %v2453_v32 = vld [vmem:[%s4798_s0 + $0xa8] sm:$0xf0] }
  0x42   :  { %729 = vmatmul.bf16.gmra.mxu1 %v2392_v33  ;;  %v2452_v33 = vor.u32 %v3494_v30, %v2451_v29  ;;  %v2456_v34 = vor.u32 %v3493_v31, %v2453_v32  ;;  %v2483_v32 = vld [vmem:[%s4798_s0 + $0xe0] sm:$0xf] }
  0x51   :  { %565 = vmatmul.bf16.gmra.mxu0 %v2396_v38 }
  0x52   :  { %734 = vmatmul.bf16.gmra.mxu1 %v2400_v39 }
  0x61   :  { %570 = vmatmul.bf16.gmra.mxu0 %v2404_v44  ;;  %v3496_v44 = vld [vmem:[%s4798_s0 + $0xb4] sm:$0xf0] }
  0x62   :  { %739 = vmatmul.bf16.gmra.mxu1 %v2408_v45  ;;  %v3495_v45 = vld [vmem:[%s4798_s0 + $0xb4] sm:$0xf]  ;;  %v2460_v47 = vor.u32 %v3496_v44, %v2459_v43 }
  0x63   :  { %v2464_v48 = vor.u32 %v3495_v45, %v2461_v46 }
  0x71   :  { %575 = vmatmul.bf16.gmra.mxu0 %v2412_v50 }
  0x72   :  { %744 = vmatmul.bf16.gmra.mxu1 %v2416_v51 }
  0x81   :  { %580 = vmatmul.bf16.gmra.mxu0 %v2420_v56 }
  0x82   :  { %749 = vmatmul.bf16.gmra.mxu1 %v2424_v57  ;;  %v2467_v57 = vld [vmem:[%s4798_s0 + $0xc0] sm:$0xf] }
  0x83   :  { %v2468_v61 = vor.u32 %v3498_v58, %v2467_v57  ;;  %v3523_v57 = vld [vmem:[%s4798_s0 + $0x194] sm:$0xf]  ;;  %v2573_v58 = vld [vmem:[%s4798_s0 + $0x198] sm:$0xf0] }
  0x91   :  { %585 = vmatmul.bf16.gmra.mxu0 %v2428_v62  ;;  %v2472_v62 = vor.u32 %v3497_v59, %v2469_v60  ;;  %v2576_v59 = vor.u32 %v3523_v57, %v2573_v58 }
  0x92   :  { %754 = vmatmul.bf16.gmra.mxu1 %v2432_v63 }
  0x9e   :  { %v551_v7 = vpop.f32.mrf.mxu0 }
  0x9f   :  { %v720_v8 = vpop.f32.mrf.mxu1  ;;  %v552_v9 = vadd.f32 %v3912_v4, %v551_v7 }
  0xa1   :  { %v3915_v10 = vadd.f32 %v720_v8, %v552_v9  ;;  %590 = vmatmul.bf16.gmra.mxu0 %v2436_v5  ;;  %v2475_v8 = vld [vmem:[%s4798_s0 + $0xd0] sm:$0xf]  ;;  %v3500_v9 = vld [vmem:[%s4798_s0 + $0xd4] sm:$0xf0] }
  0xa2   :  { %759 = vmatmul.bf16.gmra.mxu1 %v2440_v6 }
  0xa6   :  { %v553_v11 = vpop.f32.mrf.mxu0 }
  0xa7   :  { %v722_v12 = vpop.f32.mrf.mxu1  ;;  %v554_v13 = vadd.f32 %v3912_v4, %v553_v11  ;;  %v3499_v11 = vld [vmem:[%s4798_s0 + $0xd4] sm:$0xf] }
  0xa9   :  { %v3918_v14 = vadd.f32 %v722_v12, %v554_v13  ;;  %v2477_v12 = vld [vmem:[%s4798_s0 + $0xd8] sm:$0xf0]  ;;  %v2476_v13 = vor.u32 %v3500_v9, %v2475_v8  ;;  %v2579_v8 = vld [vmem:[%s4798_s0 + $0x1a0] sm:$0xf]  ;;  %v3526_v9 = vld [vmem:[%s4798_s0 + $0x1a4] sm:$0xf0] }
  0xaa   :  { %v2480_v15 = vor.u32 %v3499_v11, %v2477_v12  ;;  %v2499_v12 = vld [vmem:[%s4798_s0 + $0x100] sm:$0xf] }
  0xae   :  { %v556_v21 = vpop.f32.mrf.mxu0 }
  0xaf   :  { %v725_v22 = vpop.f32.mrf.mxu1  ;;  %v557_v23 = vadd.f32 %v3912_v4, %v556_v21 }
  0xb1   :  { %v3933_v24 = vadd.f32 %v725_v22, %v557_v23  ;;  %595 = vmatmul.bf16.gmra.mxu0 %v2444_v19  ;;  %v2563_v19 = vld [vmem:[%s4798_s0 + $0x180] sm:$0xf]  ;;  %v3521_v23 = vld [vmem:[%s4798_s0 + $0x184] sm:$0xf] }
  0xb2   :  { %764 = vmatmul.bf16.gmra.mxu1 %v2448_v20  ;;  %v3522_v20 = vld [vmem:[%s4798_s0 + $0x184] sm:$0xf0] }
  0xb3   :  { %v2564_v22 = vor.u32 %v3522_v20, %v2563_v19  ;;  %v2581_v19 = vld [vmem:[%s4798_s0 + $0x1a8] sm:$0xf0] }
  0xb5   :  { %670 = vmatmul.bf16.vlgmr.msra.gmra.mxu3 %v2564_v22 }
  0xb6   :  { %v558_v25 = vpop.f32.mrf.mxu0 }
  0xb7   :  { %v727_v26 = vpop.f32.mrf.mxu1  ;;  %v559_v27 = vadd.f32 %v3912_v4, %v558_v25  ;;  %v2565_v25 = vld [vmem:[%s4798_s0 + $0x188] sm:$0xf0] }
  0xb9   :  { %v3936_v28 = vadd.f32 %v727_v26, %v559_v27  ;;  %v2568_v26 = vor.u32 %v3521_v23, %v2565_v25 }
  0xbb   :  { %839 = vmatmul.bf16.vlgmr.msra.gmra.mxu2 %v2568_v26 }
  0xbe   :  { %v561_v35 = vpop.f32.mrf.mxu0 }
  0xbf   :  { %v730_v36 = vpop.f32.mrf.mxu1  ;;  %v562_v37 = vadd.f32 %v3912_v4, %v561_v35  ;;  %v2485_v35 = vld [vmem:[%s4798_s0 + $0xe8] sm:$0xf0] }
  0xc1   :  { %v3951_v38 = vadd.f32 %v730_v36, %v562_v37  ;;  %600 = vmatmul.bf16.gmra.mxu0 %v2452_v33  ;;  %v3502_v33 = vld [vmem:[%s4798_s0 + $0xe4] sm:$0xf0] }
  0xc2   :  { %769 = vmatmul.bf16.gmra.mxu1 %v2456_v34  ;;  %v3501_v34 = vld [vmem:[%s4798_s0 + $0xe4] sm:$0xf]  ;;  %v2484_v36 = vor.u32 %v3502_v33, %v2483_v32 }
  0xc3   :  { %v2488_v37 = vor.u32 %v3501_v34, %v2485_v35 }
  0xc6   :  { %v563_v39 = vpop.f32.mrf.mxu0 }
  0xc7   :  { %v732_v40 = vpop.f32.mrf.mxu1  ;;  %v564_v41 = vadd.f32 %v3912_v4, %v563_v39 }
  0xc9   :  { %v3954_v42 = vadd.f32 %v732_v40, %v564_v41 }
  0xcb   :  { %844 = vmatmul.bf16.gmra.mxu2 %v2576_v59 }
  0xce   :  { %v566_v49 = vpop.f32.mrf.mxu0 }
  0xcf   :  { %v735_v50 = vpop.f32.mrf.mxu1  ;;  %v567_v51 = vadd.f32 %v3912_v4, %v566_v49 }
  0xd1   :  { %v3969_v52 = vadd.f32 %v735_v50, %v567_v51  ;;  %605 = vmatmul.bf16.gmra.mxu0 %v2460_v47  ;;  %v2571_v47 = vld [vmem:[%s4798_s0 + $0x190] sm:$0xf]  ;;  %v3504_v51 = vld [vmem:[%s4798_s0 + $0xf4] sm:$0xf0] }
  0xd2   :  { %774 = vmatmul.bf16.gmra.mxu1 %v2464_v48  ;;  %v3524_v48 = vld [vmem:[%s4798_s0 + $0x194] sm:$0xf0]  ;;  %v2491_v50 = vld [vmem:[%s4798_s0 + $0xf0] sm:$0xf] }
  0xd3   :  { %v2492_v60 = vor.u32 %v3504_v51, %v2491_v50  ;;  %v881_v50 = vmax.f32 %v3918_v14, 0.0 }
  0xd6   :  { %v568_v53 = vpop.f32.mrf.mxu0 }
  0xd7   :  { %v737_v54 = vpop.f32.mrf.mxu1  ;;  %v569_v55 = vadd.f32 %v3912_v4, %v568_v53  ;;  %v3503_v53 = vld [vmem:[%s4798_s0 + $0xf4] sm:$0xf] }
  0xd9   :  { %v3972_v56 = vadd.f32 %v737_v54, %v569_v55  ;;  %v2572_v54 = vor.u32 %v3524_v48, %v2571_v47  ;;  %v2493_v55 = vld [vmem:[%s4798_s0 + $0xf8] sm:$0xf0]  ;;  %v3527_v47 = vld [vmem:[%s4798_s0 + $0x1b4] sm:$0xf] }
  0xda   :  { %v2589_v48 = vld [vmem:[%s4798_s0 + $0x1b8] sm:$0xf0] }
  0xdb   :  { %675 = vmatmul.bf16.gmra.mxu3 %v2572_v54 }
  0xde   :  { %v571_v63 = vpop.f32.mrf.mxu0 }
  0xdf   :  { %v740_v0 = vpop.f32.mrf.mxu1  ;;  %v572_v1 = vadd.f32 %v3912_v4, %v571_v63 }
  0xe1   :  { %v3987_v2 = vadd.f32 %v740_v0, %v572_v1  ;;  %610 = vmatmul.bf16.gmra.mxu0 %v2468_v61  ;;  %v2496_v61 = vor.u32 %v3503_v53, %v2493_v55  ;;  %v2592_v53 = vor.u32 %v3527_v47, %v2589_v48  ;;  %v2525_v47 = vld [vmem:[%s4798_s0 + $0x138] sm:$0xf0]  ;;  %v3531_v48 = vld [vmem:[%s4798_s0 + $0x1d4] sm:$0xf] }
  0xe2   :  { %779 = vmatmul.bf16.gmra.mxu1 %v2472_v62 }
  0xe6   :  { %v573_v3 = vpop.f32.mrf.mxu0 }
  0xe7   :  { %v742_v5 = vpop.f32.mrf.mxu1  ;;  %v574_v6 = vadd.f32 %v3912_v4, %v573_v3 }
  0xe9   :  { %v3990_v7 = vadd.f32 %v742_v5, %v574_v6 }
  0xee   :  { %v576_v16 = vpop.f32.mrf.mxu0 }
  0xef   :  { %v745_v17 = vpop.f32.mrf.mxu1  ;;  %v577_v18 = vadd.f32 %v3912_v4, %v576_v16  ;;  %v2580_v16 = vor.u32 %v3526_v9, %v2579_v8  ;;  %v3530_v8 = vld [vmem:[%s4798_s0 + $0x1c4] sm:$0xf0] }
  0xf1   :  { %v4011_v21 = vadd.f32 %v745_v17, %v577_v18  ;;  %615 = vmatmul.bf16.gmra.mxu0 %v2476_v13  ;;  %v3506_v13 = vld [vmem:[%s4798_s0 + $0x104] sm:$0xf0]  ;;  %v2501_v17 = vld [vmem:[%s4798_s0 + $0x108] sm:$0xf0]  ;;  %v3525_v18 = vld [vmem:[%s4798_s0 + $0x1a4] sm:$0xf]  ;;  %680 = vmatmul.bf16.gmra.mxu3 %v2580_v16 }
  0xf2   :  { %784 = vmatmul.bf16.gmra.mxu1 %v2480_v15  ;;  %v3505_v15 = vld [vmem:[%s4798_s0 + $0x104] sm:$0xf]  ;;  %v2584_v20 = vor.u32 %v3525_v18, %v2581_v19  ;;  %v2500_v22 = vor.u32 %v3506_v13, %v2499_v12  ;;  %v3510_v12 = vld [vmem:[%s4798_s0 + $0x124] sm:$0xf0]  ;;  %v2517_v16 = vld [vmem:[%s4798_s0 + $0x128] sm:$0xf0] }
  0xf3   :  { %v2504_v23 = vor.u32 %v3505_v15, %v2501_v17  ;;  %v3509_v13 = vld [vmem:[%s4798_s0 + $0x124] sm:$0xf]  ;;  %v2597_v18 = vld [vmem:[%s4798_s0 + $0x1c8] sm:$0xf0]  ;;  %v883_v19 = vmax.f32 %v3936_v28, 0.0 }
  0xf4   :  { %849 = vmatmul.bf16.gmra.mxu2 %v2584_v20  ;;  %v3529_v17 = vld [vmem:[%s4798_s0 + $0x1c4] sm:$0xf] }
  0xf6   :  { %v578_v27 = vpop.f32.mrf.mxu0 }
  0xf7   :  { %v747_v29 = vpop.f32.mrf.mxu1  ;;  %v579_v30 = vadd.f32 %v3912_v4, %v578_v27 }
  0xf9   :  { %v4020_v31 = vadd.f32 %v747_v29, %v579_v30  ;;  %v880_v30 = vmax.f32 %v3915_v10, 0.0  ;;  %v2507_v10 = vld [vmem:[%s4798_s0 + $0x110] sm:$0xf] }
  0xfe   :  { %v581_v39 = vpop.f32.mrf.mxu0 }
  0xff   :  { %v750_v40 = vpop.f32.mrf.mxu1  ;;  %v582_v41 = vadd.f32 %v3912_v4, %v581_v39  ;;  %v3528_v39 = vld [vmem:[%s4798_s0 + $0x1b4] sm:$0xf0] }
 0x101   :  { %v4035_v43 = vadd.f32 %v750_v40, %v582_v41  ;;  %620 = vmatmul.bf16.gmra.mxu0 %v2484_v36  ;;  %v3508_v41 = vld [vmem:[%s4798_s0 + $0x114] sm:$0xf0] }
 0x102   :  { %789 = vmatmul.bf16.gmra.mxu1 %v2488_v37  ;;  %v2587_v37 = vld [vmem:[%s4798_s0 + $0x1b0] sm:$0xf]  ;;  %v2508_v55 = vor.u32 %v3508_v41, %v2507_v10  ;;  %v3532_v10 = vld [vmem:[%s4798_s0 + $0x1d4] sm:$0xf0] }
 0x104   :  { %854 = vmatmul.bf16.gmra.mxu2 %v2592_v53 }
 0x106   :  { %v583_v44 = vpop.f32.mrf.mxu0 }
 0x107   :  { %v752_v45 = vpop.f32.mrf.mxu1  ;;  %v584_v46 = vadd.f32 %v3912_v4, %v583_v44  ;;  %v3507_v44 = vld [vmem:[%s4798_s0 + $0x114] sm:$0xf] }
 0x109   :  { %v4044_v49 = vadd.f32 %v752_v45, %v584_v46  ;;  %v2588_v45 = vor.u32 %v3528_v39, %v2587_v37  ;;  %v2509_v46 = vld [vmem:[%s4798_s0 + $0x118] sm:$0xf0] }
 0x10a   :  { %v2512_v57 = vor.u32 %v3507_v44, %v2509_v46  ;;  %v3512_v44 = vld [vmem:[%s4798_s0 + $0x134] sm:$0xf0] }
 0x10b   :  { %685 = vmatmul.bf16.gmra.mxu3 %v2588_v45  ;;  %v3511_v45 = vld [vmem:[%s4798_s0 + $0x134] sm:$0xf] }
 0x10e   :  { %v586_v62 = vpop.f32.mrf.mxu0 }
 0x10f   :  { %v755_v63 = vpop.f32.mrf.mxu1  ;;  %v587_v0 = vadd.f32 %v3912_v4, %v586_v62  ;;  %v882_v62 = vmax.f32 %v3933_v24, 0.0  ;;  %v2515_v24 = vld [vmem:[%s4798_s0 + $0x120] sm:$0xf] }
 0x111   :  { %v4065_v1 = vadd.f32 %v755_v63, %v587_v0  ;;  %625 = vmatmul.bf16.gmra.mxu0 %v2492_v60 }
 0x112   :  { %794 = vmatmul.bf16.gmra.mxu1 %v2496_v61 }
 0x116   :  { %v588_v3 = vpop.f32.mrf.mxu0 }
 0x117   :  { %v757_v5 = vpop.f32.mrf.mxu1  ;;  %v589_v6 = vadd.f32 %v3912_v4, %v588_v3 }
 0x119   :  { %v4074_v11 = vadd.f32 %v757_v5, %v589_v6  ;;  %v2595_v6 = vld [vmem:[%s4798_s0 + $0x1c0] sm:$0xf] }
 0x11a   :  { %v2596_v15 = vor.u32 %v3530_v8, %v2595_v6  ;;  %v3568_v8 = vld [vmem:[%s4799_s3 + $0x78] sm:$0xff] }
 0x11b   :  { %1075 = vmatpush.bf16.msrb.mxu2 %v3568_v8  ;;  %v889_v8 = vmax.f32 %v3990_v7, 0.0 }
 0x11c   :  { %690 = vmatmul.bf16.gmra.mxu3 %v2596_v15  ;;  %v3534_v15 = vld [vmem:[%s4798_s0 + $0x1e4] sm:$0xf0] }
 0x11e   :  { %v591_v25 = vpop.f32.mrf.mxu0 }
 0x11f   :  { %v760_v26 = vpop.f32.mrf.mxu1  ;;  %v592_v27 = vadd.f32 %v3912_v4, %v591_v25  ;;  %v2516_v25 = vor.u32 %v3510_v12, %v2515_v24 }
 0x121   :  { %v761_v29 = vadd.f32 %v760_v26, %v592_v27  ;;  %630 = vmatmul.bf16.gmra.mxu0 %v2500_v22  ;;  %v2600_v22 = vor.u32 %v3529_v17, %v2597_v18  ;;  %v2520_v26 = vor.u32 %v3509_v13, %v2517_v16  ;;  %v2611_v13 = vld [vmem:[%s4798_s0 + $0x1e0] sm:$0xf]  ;;  %v3514_v18 = vld [vmem:[%s4798_s0 + $0x144] sm:$0xf0] }
 0x122   :  { %799 = vmatmul.bf16.gmra.mxu1 %v2504_v23  ;;  %v2531_v17 = vld [vmem:[%s4798_s0 + $0x140] sm:$0xf] }
 0x123   :  { %v896_v32 = vmax.f32 %v761_v29, 0.0  ;;  %859 = vmatmul.bf16.gmra.mxu2 %v2600_v22  ;;  %v2533_v22 = vld [vmem:[%s4798_s0 + $0x148] sm:$0xf0] }
 0x125   :  { %v4096_v33 = vmax.f32 %v880_v30, %v896_v32 }
 0x126   :  { %v593_v34 = vpop.f32.mrf.mxu0 }
 0x127   :  { %v762_v35 = vpop.f32.mrf.mxu1  ;;  %v594_v36 = vadd.f32 %v3912_v4, %v593_v34  ;;  %v884_v34 = vmax.f32 %v3951_v38, 0.0  ;;  %v2523_v38 = vld [vmem:[%s4798_s0 + $0x130] sm:$0xf] }
 0x129   :  { %v763_v40 = vadd.f32 %v762_v35, %v594_v36 }
 0x12b   :  { %v897_v51 = vmax.f32 %v763_v40, 0.0  ;;  %v2603_v40 = vld [vmem:[%s4798_s0 + $0x1d0] sm:$0xf] }
 0x12c   :  { %v2604_v46 = vor.u32 %v3532_v10, %v2603_v40  ;;  %v3566_v10 = vld [vmem:[%s4799_s3 + $0x68] sm:$0xff] }
 0x12d   :  { %v4124_v54 = vmax.f32 %v881_v50, %v897_v51  ;;  %v2605_v50 = vld [vmem:[%s4798_s0 + $0x1d8] sm:$0xf0]  ;;  %v885_v51 = vmax.f32 %v3954_v42, 0.0  ;;  %v886_v42 = vmax.f32 %v3969_v52, 0.0  ;;  %v3558_v52 = vld [vmem:[%s4799_s3 + $0x28] sm:$0xff] }
 0x12e   :  { %v596_v58 = vpop.f32.mrf.mxu0  ;;  %695 = vmatmul.bf16.gmra.mxu3 %v2604_v46  ;;  %v3565_v46 = vld [vmem:[%s4799_s3 + $0x60] sm:$0xff] }
 0x12f   :  { %v765_v59 = vpop.f32.mrf.mxu1  ;;  %v597_v60 = vadd.f32 %v3912_v4, %v596_v58  ;;  %v2524_v58 = vor.u32 %v3512_v44, %v2523_v38  ;;  %v888_v44 = vmax.f32 %v3987_v2, 0.0  ;;  %v3564_v2 = vld [vmem:[%s4799_s3 + $0x58] sm:$0xff] }
 0x131   :  { %v766_v61 = vadd.f32 %v765_v59, %v597_v60  ;;  %635 = vmatmul.bf16.gmra.mxu0 %v2508_v55  ;;  %v2608_v55 = vor.u32 %v3531_v48, %v2605_v50  ;;  %v2528_v59 = vor.u32 %v3511_v45, %v2525_v47  ;;  %v3555_v47 = vld [vmem:[%s4799_s3 + $0x10] sm:$0xff] }
 0x132   :  { %804 = vmatmul.bf16.gmra.mxu1 %v2512_v57 }
 0x133   :  { %v898_v63 = vmax.f32 %v766_v61, 0.0  ;;  %864 = vmatmul.bf16.gmra.mxu2 %v2608_v55  ;;  %v3554_v55 = vld [vmem:[%s4799_s3 + $0x8] sm:$0xff] }
 0x135   :  { %v4128_v0 = vmax.f32 %v882_v62, %v898_v63  ;;  %v3560_v63 = vld [vmem:[%s4799_s3 + $0x38] sm:$0xff] }
 0x136   :  { %v598_v14 = vpop.f32.mrf.mxu0  ;;  %1136 = vmatpush.bf16.msrb.mxu3 %v3560_v63  ;;  %v3515_v63 = vld [vmem:[%s4798_s0 + $0x154] sm:$0xf] }
 0x137   :  { %v767_v3 = vpop.f32.mrf.mxu1  ;;  %v599_v5 = vadd.f32 %v3912_v4, %v598_v14 }
 0x139   :  { %v768_v9 = vadd.f32 %v767_v3, %v599_v5  ;;  %v3559_v5 = vld [vmem:[%s4799_s3 + $0x30] sm:$0xff] }
 0x13a   :  { %1137 = vmatpush.bf16.msrb.mxu3 %v3559_v5  ;;  %v2621_v5 = vld [vmem:[%s4798_s0 + $0x1f8] sm:$0xf0] }
 0x13b   :  { %v899_v20 = vmax.f32 %v768_v9, 0.0 }
 0x13d   :  { %v4156_v23 = vmax.f32 %v883_v19, %v899_v20  ;;  %v3513_v19 = vld [vmem:[%s4798_s0 + $0x144] sm:$0xf]  ;;  %v2612_v20 = vor.u32 %v3534_v15, %v2611_v13  ;;  %v3584_v13 = vld [vmem:[%s4799_s3 + $0xf8] sm:$0xff] }
 0x13e   :  { %v601_v27 = vpop.f32.mrf.mxu0  ;;  %1138 = vmatpush.bf16.msrb.mxu3 %v3558_v52  ;;  %v3553_v52 = vld [vmem:[%s4799_s3] sm:$0xff] }
 0x13f   :  { %v770_v29 = vpop.f32.mrf.mxu1  ;;  %v602_v30 = vadd.f32 %v3912_v4, %v601_v27  ;;  %v887_v27 = vmax.f32 %v3972_v56, 0.0  ;;  %700 = vmatmul.bf16.gmra.mxu3 %v2612_v20  ;;  %v3562_v20 = vld [vmem:[%s4799_s3 + $0x48] sm:$0xff] }
 0x141   :  { %v771_v32 = vadd.f32 %v770_v29, %v602_v30  ;;  %640 = vmatmul.bf16.gmra.mxu0 %v2516_v25  ;;  %v3533_v25 = vld [vmem:[%s4798_s0 + $0x1e4] sm:$0xf] }
 0x142   :  { %809 = vmatmul.bf16.gmra.mxu1 %v2520_v26  ;;  %v2613_v26 = vld [vmem:[%s4798_s0 + $0x1e8] sm:$0xf0] }
 0x143   :  { %v900_v35 = vmax.f32 %v771_v32, 0.0  ;;  %v2616_v30 = vor.u32 %v3533_v25, %v2613_v26  ;;  %v3567_v32 = vld [vmem:[%s4799_s3 + $0x70] sm:$0xff]  ;;  %v890_v26 = vmax.f32 %v4011_v21, 0.0 }
 0x144   :  { %1076 = vmatpush.bf16.msrb.mxu2 %v3567_v32  ;;  %v3582_v32 = vld [vmem:[%s4799_s3 + $0xe8] sm:$0xff] }
 0x145   :  { %v4160_v36 = vmax.f32 %v884_v34, %v900_v35  ;;  %v3557_v34 = vld [vmem:[%s4799_s3 + $0x20] sm:$0xff]  ;;  %869 = vmatmul.bf16.gmra.mxu2 %v2616_v30  ;;  %v3576_v30 = vld [vmem:[%s4799_s3 + $0xb8] sm:$0xff] }
 0x146   :  { %v603_v28 = vpop.f32.mrf.mxu0  ;;  %1139 = vmatpush.bf16.msrb.mxu3 %v3557_v34 }
 0x147   :  { %v772_v37 = vpop.f32.mrf.mxu1  ;;  %v604_v39 = vadd.f32 %v3912_v4, %v603_v28  ;;  %v2532_v28 = vor.u32 %v3514_v18, %v2531_v17 }
 0x148   :  { %1077 = vmatpush.bf16.msrb.mxu2 %v3566_v10  ;;  %v2547_v10 = vld [vmem:[%s4798_s0 + $0x160] sm:$0xf] }
 0x149   :  { %v773_v41 = vadd.f32 %v772_v37, %v604_v39  ;;  %v2536_v37 = vor.u32 %v3513_v19, %v2533_v22  ;;  %v3583_v22 = vld [vmem:[%s4799_s3 + $0xf0] sm:$0xff] }
 0x14b   :  { %v901_v53 = vmax.f32 %v773_v41, 0.0  ;;  %v3556_v41 = vld [vmem:[%s4799_s3 + $0x18] sm:$0xff] }
 0x14c   :  { %1140 = vmatpush.bf16.msrb.mxu3 %v3556_v41  ;;  %1078 = vmatpush.bf16.msrb.mxu2 %v3565_v46  ;;  %v3518_v41 = vld [vmem:[%s4798_s0 + $0x164] sm:$0xf0] }
 0x14d   :  { %v4188_v57 = vmax.f32 %v885_v51, %v901_v53 }
 0x14e   :  { %v606_v60 = vpop.f32.mrf.mxu0 }
 0x14f   :  { %v775_v61 = vpop.f32.mrf.mxu1  ;;  %v607_v62 = vadd.f32 %v3912_v4, %v606_v60 }
 0x150   :  { %1141 = vmatpush.bf16.msrb.mxu3 %v3555_v47  ;;  %1079 = vmatpush.bf16.msrb.mxu2 %v3564_v2  ;;  %v3574_v47 = vld [vmem:[%s4799_s3 + $0xa8] sm:$0xff] }
 0x151   :  { %v776_v14 = vadd.f32 %v775_v61, %v607_v62  ;;  %645 = vmatmul.bf16.gmra.mxu0 %v2524_v58  ;;  %v2619_v58 = vld [vmem:[%s4798_s0 + $0x1f0] sm:$0xf]  ;;  %v3516_v62 = vld [vmem:[%s4798_s0 + $0x154] sm:$0xf0] }
 0x152   :  { %814 = vmatmul.bf16.gmra.mxu1 %v2528_v59  ;;  %v3536_v59 = vld [vmem:[%s4798_s0 + $0x1f4] sm:$0xf0]  ;;  %v2539_v61 = vld [vmem:[%s4798_s0 + $0x150] sm:$0xf] }
 0x153   :  { %v902_v3 = vmax.f32 %v776_v14, 0.0  ;;  %v2620_v14 = vor.u32 %v3536_v59, %v2619_v58 }
 0x154   :  { %1142 = vmatpush.bf16.msrb.mxu3 %v3554_v55 }
 0x155   :  { %v4198_v6 = vmax.f32 %v886_v42, %v902_v3  ;;  %v2541_v42 = vld [vmem:[%s4798_s0 + $0x158] sm:$0xf0]  ;;  %v3535_v3 = vld [vmem:[%s4798_s0 + $0x1f4] sm:$0xf]  ;;  %705 = vmatmul.bf16.gmra.mxu3 %v2620_v14 }
 0x156   :  { %v608_v9 = vpop.f32.mrf.mxu0  ;;  %v2544_v17 = vor.u32 %v3515_v63, %v2541_v42  ;;  %v3572_v14 = vld [vmem:[%s4799_s3 + $0x98] sm:$0xff]  ;;  %v3578_v42 = vld [vmem:[%s4799_s3 + $0xc8] sm:$0xff] }
 0x157   :  { %v777_v24 = vpop.f32.mrf.mxu1  ;;  %v609_v12 = vadd.f32 %v3912_v4, %v608_v9 }
 0x158   :  { %1143 = vmatpush.bf16.msrb.mxu3 %v3553_v52  ;;  %v2555_v52 = vld [vmem:[%s4798_s0 + $0x170] sm:$0xf] }
 0x159   :  { %v778_v16 = vadd.f32 %v777_v24, %v609_v12  ;;  %v2624_v24 = vor.u32 %v3535_v3, %v2621_v5  ;;  %v3563_v12 = vld [vmem:[%s4799_s3 + $0x50] sm:$0xff] }
 0x15a   :  { %1080 = vmatpush.bf16.msrb.mxu2 %v3563_v12 }
 0x15b   :  { %v903_v29 = vmax.f32 %v778_v16, 0.0  ;;  %v2540_v16 = vor.u32 %v3516_v62, %v2539_v61  ;;  %874 = vmatmul.bf16.gmra.mxu2 %v2624_v24  ;;  %v892_v62 = vmax.f32 %v4035_v43, 0.0  ;;  %v3571_v43 = vld [vmem:[%s4799_s3 + $0x90] sm:$0xff]  ;;  %v3577_v24 = vld [vmem:[%s4799_s3 + $0xc0] sm:$0xff] }
 0x15c   :  { %1295 = vmatpush.bf16.msra.mxu3 %v3584_v13  ;;  %v3520_v13 = vld [vmem:[%s4798_s0 + $0x174] sm:$0xf0] }
 0x15d   :  { %v4238_v35 = vmax.f32 %v887_v27, %v903_v29  ;;  %v3561_v29 = vld [vmem:[%s4799_s3 + $0x40] sm:$0xff] }
 0x15e   :  { %v611_v39 = vpop.f32.mrf.mxu0  ;;  %1081 = vmatpush.bf16.msrb.mxu2 %v3562_v20 }
 0x15f   :  { %v780_v40 = vpop.f32.mrf.mxu1  ;;  %v612_v56 = vadd.f32 %v3912_v4, %v611_v39  ;;  %v3575_v39 = vld [vmem:[%s4799_s3 + $0xb0] sm:$0xff] }
 0x160   :  { %1296 = vmatpush.bf16.msra.mxu3 %v3583_v22  ;;  %v2556_v22 = vor.u32 %v3520_v13, %v2555_v52 }
 0x161   :  { %v781_v38 = vadd.f32 %v780_v40, %v612_v56  ;;  %650 = vmatmul.bf16.gmra.mxu0 %v2532_v28  ;;  %v3581_v40 = vld [vmem:[%s4799_s3 + $0xe0] sm:$0xff] }
 0x162   :  { %819 = vmatmul.bf16.gmra.mxu1 %v2536_v37  ;;  %1082 = vmatpush.bf16.msrb.mxu2 %v3561_v29 }
 0x163   :  { %v904_v45 = vmax.f32 %v781_v38, 0.0  ;;  %v3517_v38 = vld [vmem:[%s4798_s0 + $0x164] sm:$0xf] }
 0x164   :  { %1297 = vmatpush.bf16.msra.mxu3 %v3582_v32  ;;  %v840_v32 = vpop.f32.mrf.mxu2 }
 0x165   :  { %v4254_v48 = vmax.f32 %v888_v44, %v904_v45  ;;  %v2549_v44 = vld [vmem:[%s4798_s0 + $0x168] sm:$0xf0]  ;;  %v891_v45 = vmax.f32 %v4020_v31, 0.0  ;;  %v3573_v31 = vld [vmem:[%s4799_s3 + $0xa0] sm:$0xff] }
 0x166   :  { %v613_v50 = vpop.f32.mrf.mxu0  ;;  %1215 = vmatpush.bf16.msra.mxu2 %v3576_v30  ;;  %v2552_v2 = vor.u32 %v3517_v38, %v2549_v44 }
 0x167   :  { %v782_v51 = vpop.f32.mrf.mxu1  ;;  %v614_v53 = vadd.f32 %v3912_v4, %v613_v50  ;;  %v3580_v50 = vld [vmem:[%s4799_s3 + $0xd8] sm:$0xff] }
 0x168   :  { %1298 = vmatpush.bf16.msra.mxu3 %v3581_v40 }
 0x169   :  { %v783_v60 = vadd.f32 %v782_v51, %v614_v53  ;;  %v2548_v53 = vor.u32 %v3518_v41, %v2547_v10 }
 0x16a   :  { %1216 = vmatpush.bf16.msra.mxu2 %v3575_v39 }
 0x16b   :  { %v905_v9 = vmax.f32 %v783_v60, 0.0  ;;  %v3579_v60 = vld [vmem:[%s4799_s3 + $0xd0] sm:$0xff] }
 0x16c   :  { %1299 = vmatpush.bf16.msra.mxu3 %v3580_v50 }
 0x16d   :  { %v4297_v15 = vmax.f32 %v889_v8, %v905_v9 }
 0x16e   :  { %v616_v7 = vpop.f32.mrf.mxu0  ;;  %1217 = vmatpush.bf16.msra.mxu2 %v3574_v47 }
 0x16f   :  { %v785_v18 = vpop.f32.mrf.mxu1  ;;  %v617_v19 = vadd.f32 %v3912_v4, %v616_v7  ;;  %v893_v7 = vmax.f32 %v4044_v49, 0.0  ;;  %v3569_v49 = vld [vmem:[%s4799_s3 + $0x80] sm:$0xff] }
 0x170   :  { %1300 = vmatpush.bf16.msra.mxu3 %v3579_v60 }
 0x171   :  { %v786_v25 = vadd.f32 %v785_v18, %v617_v19  ;;  %655 = vmatmul.bf16.gmra.mxu0 %v2540_v16  ;;  %v3519_v16 = vld [vmem:[%s4798_s0 + $0x174] sm:$0xf]  ;;  %v671_v19 = vpop.f32.mrf.mxu3 }
 0x172   :  { %824 = vmatmul.bf16.gmra.mxu1 %v2544_v17  ;;  %1218 = vmatpush.bf16.msra.mxu2 %v3573_v31  ;;  %v2557_v17 = vld [vmem:[%s4798_s0 + $0x178] sm:$0xf0]  ;;  %v672_v38 = vadd.f32 %v3912_v4, %v671_v19 }
 0x173   :  { %v906_v27 = vmax.f32 %v786_v25, 0.0  ;;  %v2560_v25 = vor.u32 %v3519_v16, %v2557_v17  ;;  %v3591_v17 = vld [vmem:[%s4799_s3 + $0x130] sm:$0xff] }
 0x174   :  { %1301 = vmatpush.bf16.msra.mxu3 %v3578_v42 }
 0x175   :  { %v4316_v34 = vmax.f32 %v890_v26, %v906_v27  ;;  %v3570_v26 = vld [vmem:[%s4799_s3 + $0x88] sm:$0xff] }
 0x176   :  { %v618_v28 = vpop.f32.mrf.mxu0  ;;  %1219 = vmatpush.bf16.msra.mxu2 %v3572_v14 }
 0x177   :  { %v787_v37 = vpop.f32.mrf.mxu1  ;;  %v619_v21 = vadd.f32 %v3912_v4, %v618_v28 }
 0x178   :  { %1302 = vmatpush.bf16.msra.mxu3 %v3577_v24 }
 0x179   :  { %v788_v56 = vadd.f32 %v787_v37, %v619_v21  ;;  %v894_v37 = vmax.f32 %v4065_v1, 0.0  ;;  %v673_v40 = vpop.f32.mrf.mxu3 }
 0x17a   :  { %1220 = vmatpush.bf16.msra.mxu2 %v3571_v43  ;;  %v3592_v43 = vld [vmem:[%s4799_s3 + $0x138] sm:$0xff] }
 0x17b   :  { %v907_v46 = vmax.f32 %v788_v56, 0.0 }
 0x17d   :  { %v4344_v51 = vmax.f32 %v891_v45, %v907_v46  ;;  %v842_v45 = vpop.f32.mrf.mxu2  ;;  %v895_v46 = vmax.f32 %v4074_v11, 0.0 }
 0x17e   :  { %v621_v55 = vpop.f32.mrf.mxu0  ;;  %1221 = vmatpush.bf16.msra.mxu2 %v3570_v26  ;;  %v3600_v26 = vld [vmem:[%s4799_s3 + $0x178] sm:$0xff] }
 0x17f   :  { %v790_v58 = vpop.f32.mrf.mxu1  ;;  %v622_v59 = vadd.f32 %v3912_v4, %v621_v55 }
 0x181   :  { %v791_v61 = vadd.f32 %v790_v58, %v622_v59  ;;  %660 = vmatmul.bf16.gmra.mxu0 %v2548_v53  ;;  %v841_v53 = vadd.f32 %v840_v32, %v672_v38  ;;  %v676_v1 = vpop.f32.mrf.mxu3 }
 0x182   :  { %829 = vmatmul.bf16.gmra.mxu1 %v2552_v2  ;;  %1222 = vmatpush.bf16.msra.mxu2 %v3569_v49 }
 0x183   :  { %v908_v63 = vmax.f32 %v791_v61, 0.0  ;;  %v928_v59 = vmax.f32 %v841_v53, 0.0  ;;  %v674_v61 = vadd.f32 %v3912_v4, %v673_v40 }
 0x185   :  { %v4360_v3 = vmax.f32 %v892_v62, %v908_v63  ;;  %v845_v60 = vpop.f32.mrf.mxu2 }
 0x186   :  { %v623_v5 = vpop.f32.mrf.mxu0 }
 0x187   :  { %v792_v8 = vpop.f32.mrf.mxu1  ;;  %v624_v9 = vadd.f32 %v3912_v4, %v623_v5  ;;  %v843_v5 = vadd.f32 %v842_v45, %v674_v61  ;;  %v3598_v45 = vld [vmem:[%s4799_s3 + $0x168] sm:$0xff] }
 0x189   :  { %v793_v12 = vadd.f32 %v792_v8, %v624_v9  ;;  %v678_v9 = vpop.f32.mrf.mxu3  ;;  %v929_v52 = vmax.f32 %v843_v5, 0.0 }
 0x18b   :  { %v909_v18 = vmax.f32 %v793_v12, 0.0 }
 0x18d   :  { %v4382_v20 = vmax.f32 %v893_v7, %v909_v18  ;;  %v847_v16 = vpop.f32.mrf.mxu2  ;;  %v677_v18 = vadd.f32 %v3912_v4, %v676_v1 }
 0x18e   :  { %v626_v27 = vpop.f32.mrf.mxu0 }
 0x18f   :  { %v795_v29 = vpop.f32.mrf.mxu1  ;;  %v627_v30 = vadd.f32 %v3912_v4, %v626_v27  ;;  %v3590_v27 = vld [vmem:[%s4799_s3 + $0x128] sm:$0xff] }
 0x191   :  { %v796_v28 = vadd.f32 %v795_v29, %v627_v30  ;;  %665 = vmatmul.bf16.gmra.mxu0 %v2556_v22  ;;  %v846_v30 = vadd.f32 %v845_v60, %v677_v18  ;;  %v681_v49 = vpop.f32.mrf.mxu3 }
 0x192   :  { %834 = vmatmul.bf16.gmra.mxu1 %v2560_v25 }
 0x193   :  { %v910_v21 = vmax.f32 %v796_v28, 0.0  ;;  %v679_v28 = vadd.f32 %v3912_v4, %v678_v9  ;;  %v930_v40 = vmax.f32 %v846_v30, 0.0  ;;  %v3586_v9 = vld [vmem:[%s4799_s3 + $0x108] sm:$0xff]  ;;  %v3615_v30 = vld [vmem:[%s4799_s3 + $0x1f0] sm:$0xff] }
 0x195   :  { %v4392_v39 = vmax.f32 %v894_v37, %v910_v21  ;;  %v3589_v37 = vld [vmem:[%s4799_s3 + $0x120] sm:$0xff] }
 0x196   :  { %v628_v56 = vpop.f32.mrf.mxu0 }
 0x197   :  { %v797_v10 = vpop.f32.mrf.mxu1  ;;  %v629_v41 = vadd.f32 %v3912_v4, %v628_v56  ;;  %v848_v56 = vadd.f32 %v847_v16, %v679_v28 }
 0x199   :  { %v798_v44 = vadd.f32 %v797_v10, %v629_v41  ;;  %v850_v10 = vpop.f32.mrf.mxu2  ;;  %v931_v1 = vmax.f32 %v848_v56, 0.0 }
 0x19b   :  { %v911_v47 = vmax.f32 %v798_v44, 0.0 }
 0x19d   :  { %v4397_v50 = vmax.f32 %v895_v46, %v911_v47  ;;  %v3588_v46 = vld [vmem:[%s4799_s3 + $0x118] sm:$0xff] }
 0x19e   :  { %v631_v2 = vpop.f32.mrf.mxu0 }
 0x19f   :  { %v800_v55 = vpop.f32.mrf.mxu1  ;;  %v632_v58 = vadd.f32 %v3912_v4, %v631_v2 }
 0x1a1   :  { %v801_v31 = vadd.f32 %v800_v55, %v632_v58  ;;  %v683_v55 = vpop.f32.mrf.mxu3  ;;  %v682_v58 = vadd.f32 %v3912_v4, %v681_v49  ;;  %v852_v5 = vpop.f32.mrf.mxu2  ;;  %v3593_v49 = vld [vmem:[%s4799_s3 + $0x140] sm:$0xff] }
 0x1a3   :  { %v912_v62 = vmax.f32 %v801_v31, 0.0  ;;  %v3587_v31 = vld [vmem:[%s4799_s3 + $0x110] sm:$0xff] }
 0x1a5   :  { %v960_v63 = vmax.f32 %v912_v62, %v928_v59  ;;  %v3597_v59 = vld [vmem:[%s4799_s3 + $0x160] sm:$0xff] }
 0x1a6   :  { %v633_v14 = vpop.f32.mrf.mxu0 }
 0x1a7   :  { %v802_v42 = vpop.f32.mrf.mxu1  ;;  %v634_v11 = vadd.f32 %v3912_v4, %v633_v14  ;;  %v976_v8 = vmax.f32 %v4096_v33, %v960_v63 }
 0x1a9   :  { %v803_v24 = vadd.f32 %v802_v42, %v634_v11  ;;  %v992_v12 = vpack.c.bf16 %v976_v8, %v976_v8  ;;  %v851_v11 = vadd.f32 %v850_v10, %v682_v58  ;;  %v3596_v8 = vld [vmem:[%s4799_s3 + $0x158] sm:$0xff]  ;;  %v686_v18 = vpop.f32.mrf.mxu3 }
 0x1ab   :  { %v913_v13 = vmax.f32 %v803_v24, 0.0  ;;  %1144 = vmatmul.bf16.vlgmr.msrb.gmra.mxu3 %v992_v12  ;;  %v3595_v12 = vld [vmem:[%s4799_s3 + $0x150] sm:$0xff]  ;;  %v932_v16 = vmax.f32 %v851_v11, 0.0  ;;  %v3610_v11 = vld [vmem:[%s4799_s3 + $0x1c8] sm:$0xff] }
 0x1ac   :  { %1454 = vmatpush.bf16.msrb.mxu3 %v3592_v43 }
 0x1ad   :  { %v961_v7 = vmax.f32 %v913_v13, %v929_v52  ;;  %v3585_v52 = vld [vmem:[%s4799_s3 + $0x100] sm:$0xff] }
 0x1ae   :  { %v636_v33 = vpop.f32.mrf.mxu0 }
 0x1af   :  { %v805_v19 = vpop.f32.mrf.mxu1  ;;  %v637_v22 = vadd.f32 %v3912_v4, %v636_v33  ;;  %v977_v25 = vmax.f32 %v4124_v54, %v961_v7  ;;  %v3599_v54 = vld [vmem:[%s4799_s3 + $0x170] sm:$0xff]  ;;  %v3616_v7 = vld [vmem:[%s4799_s3 + $0x1f8] sm:$0xff] }
 0x1b0   :  { %1455 = vmatpush.bf16.msrb.mxu3 %v3591_v17 }
 0x1b1   :  { %v806_v29 = vadd.f32 %v805_v19, %v637_v22  ;;  %v1009_v32 = vpack.c.bf16 %v977_v25, %v977_v25  ;;  %v3594_v25 = vld [vmem:[%s4799_s3 + $0x148] sm:$0xff] }
 0x1b3   :  { %1083 = vmatmul.bf16.vlgmr.msrb.gmra.mxu2 %v1009_v32  ;;  %v914_v21 = vmax.f32 %v806_v29, 0.0  ;;  %v855_v32 = vpop.f32.mrf.mxu2 }
 0x1b4   :  { %1393 = vmatpush.bf16.msrb.mxu2 %v3600_v26  ;;  %1456 = vmatpush.bf16.msrb.mxu3 %v3590_v27 }
 0x1b5   :  { %v962_v47 = vmax.f32 %v914_v21, %v930_v40  ;;  %v3608_v21 = vld [vmem:[%s4799_s3 + $0x1b8] sm:$0xff]  ;;  %v3614_v40 = vld [vmem:[%s4799_s3 + $0x1e8] sm:$0xff] }
 0x1b6   :  { %v638_v41 = vpop.f32.mrf.mxu0 }
 0x1b7   :  { %v807_v38 = vpop.f32.mrf.mxu1  ;;  %v639_v44 = vadd.f32 %v3912_v4, %v638_v41  ;;  %v978_v60 = vmax.f32 %v4128_v0, %v962_v47 }
 0x1b8   :  { %1394 = vmatpush.bf16.msrb.mxu2 %v3599_v54  ;;  %1457 = vmatpush.bf16.msrb.mxu3 %v3589_v37 }
 0x1b9   :  { %v808_v53 = vadd.f32 %v807_v38, %v639_v44  ;;  %v1149_v0 = vpack.c.bf16 %v978_v60, %v978_v60  ;;  %v688_v38 = vpop.f32.mrf.mxu3  ;;  %v3605_v60 = vld [vmem:[%s4799_s3 + $0x1a0] sm:$0xff] }
 0x1bb   :  { %v915_v2 = vmax.f32 %v808_v53, 0.0  ;;  %v857_v53 = vpop.f32.mrf.mxu2 }
 0x1bc   :  { %1395 = vmatpush.bf16.msrb.mxu2 %v3598_v45  ;;  %1458 = vmatpush.bf16.msrb.mxu3 %v3588_v46  ;;  %v3613_v46 = vld [vmem:[%s4799_s3 + $0x1e0] sm:$0xff] }
 0x1bd   :  { %v963_v61 = vmax.f32 %v915_v2, %v931_v1  ;;  %v3612_v1 = vld [vmem:[%s4799_s3 + $0x1d8] sm:$0xff] }
 0x1be   :  { %v641_v62 = vpop.f32.mrf.mxu0 }
 0x1bf   :  { %v810_v63 = vpop.f32.mrf.mxu1  ;;  %v979_v14 = vmax.f32 %v4156_v23, %v963_v61  ;;  %v642_v42 = vadd.f32 %v3912_v4, %v641_v62  ;;  %v4451_v23 = vld [vmem:[%s4797_s2] ss:$0 sm:$0xff]  ;;  %v3611_v61 = vld [vmem:[%s4799_s3 + $0x1d0] sm:$0xff] }
 0x1c0   :  { %1396 = vmatpush.bf16.msrb.mxu2 %v3597_v59  ;;  %1459 = vmatpush.bf16.msrb.mxu3 %v3587_v31  ;;  %v684_v4 = vadd.f32 %v4451_v23, %v683_v55  ;;  %v689_v47 = vadd.f32 %v4451_v23, %v688_v38 }
 0x1c1   :  { %v1229_v43 = vpack.c.bf16 %v979_v14, %v979_v14  ;;  %v811_v24 = vadd.f32 %v810_v63, %v642_v42  ;;  %v687_v63 = vadd.f32 %v4451_v23, %v686_v18 }
 0x1c2   :  { %v853_v17 = vadd.f32 %v852_v5, %v684_v4  ;;  %v858_v58 = vadd.f32 %v857_v53, %v689_v47  ;;  %v3604_v5 = vld [vmem:[%s4799_s3 + $0x198] sm:$0xff]  ;;  %v3609_v4 = vld [vmem:[%s4799_s3 + $0x1c0] sm:$0xff] }
 0x1c3   :  { %1223 = vmatmul.bf16.vlgmr.msra.gmra.mxu2 %v1149_v0  ;;  %1303 = vmatmul.bf16.vlgmr.msra.gmra.mxu3 %v1229_v43  ;;  %v916_v13 = vmax.f32 %v811_v24, 0.0  ;;  %v691_v43 = vpop.f32.mrf.mxu3  ;;  %v3603_v24 = vld [vmem:[%s4799_s3 + $0x190] sm:$0xff] }
 0x1c4   :  { %1397 = vmatpush.bf16.msrb.mxu2 %v3596_v8  ;;  %1460 = vmatpush.bf16.msrb.mxu3 %v3586_v9  ;;  %v933_v29 = vmax.f32 %v853_v17, 0.0  ;;  %v935_v14 = vmax.f32 %v858_v58, 0.0  ;;  %v856_v9 = vadd.f32 %v855_v32, %v687_v63  ;;  %v3602_v17 = vld [vmem:[%s4799_s3 + $0x188] sm:$0xff] }
 0x1c5   :  { %v964_v26 = vmax.f32 %v916_v13, %v932_v16  ;;  %v3624_v16 = vld [vmem:[%s4799_s3 + $0x238] sm:$0xff] }
 0x1c6   :  { %v643_v33 = vpop.f32.mrf.mxu0 }
 0x1c7   :  { %v812_v19 = vpop.f32.mrf.mxu1  ;;  %v644_v22 = vadd.f32 %v4451_v23, %v643_v33  ;;  %v980_v54 = vmax.f32 %v4160_v36, %v964_v26  ;;  %v3607_v36 = vld [vmem:[%s4799_s3 + $0x1b0] sm:$0xff] }
 0x1c8   :  { %1398 = vmatpush.bf16.msrb.mxu2 %v3595_v12  ;;  %1461 = vmatpush.bf16.msrb.mxu3 %v3585_v52  ;;  %v934_v52 = vmax.f32 %v856_v9, 0.0  ;;  %v3623_v33 = vld [vmem:[%s4799_s3 + $0x230] sm:$0xff] }
 0x1c9   :  { %v813_v27 = vadd.f32 %v812_v19, %v644_v22  ;;  %v1309_v44 = vpack.c.bf16 %v980_v54, %v980_v54  ;;  %v860_v19 = vpop.f32.mrf.mxu2  ;;  %v692_v54 = vadd.f32 %v4451_v23, %v691_v43 }
 0x1cb   :  { %v917_v28 = vmax.f32 %v813_v27, 0.0  ;;  %v693_v26 = vpop.f32.mrf.mxu3  ;;  %v3632_v27 = vld [vmem:[%s4799_s3 + $0x278] sm:$0xff] }
 0x1cc   :  { %1613 = vmatpush.bf16.msra.mxu3 %v3616_v7  ;;  %1399 = vmatpush.bf16.msrb.mxu2 %v3594_v25  ;;  %v694_v53 = vadd.f32 %v4451_v23, %v693_v26  ;;  %v3644_v26 = vld [vmem:[%s4799_s3 + $0x2d8] sm:$0xff] }
 0x1cd   :  { %v965_v37 = vmax.f32 %v917_v28, %v933_v29  ;;  %v3622_v29 = vld [vmem:[%s4799_s3 + $0x228] sm:$0xff]  ;;  %v3621_v28 = vld [vmem:[%s4799_s3 + $0x220] sm:$0xff] }
 0x1ce   :  { %v646_v56 = vpop.f32.mrf.mxu0 }
 0x1cf   :  { %v815_v10 = vpop.f32.mrf.mxu1  ;;  %v981_v41 = vmax.f32 %v4188_v57, %v965_v37  ;;  %v3606_v57 = vld [vmem:[%s4799_s3 + $0x1a8] sm:$0xff]  ;;  %v647_v62 = vadd.f32 %v4451_v23, %v646_v56 }
 0x1d0   :  { %1614 = vmatpush.bf16.msra.mxu3 %v3615_v30  ;;  %1400 = vmatpush.bf16.msrb.mxu2 %v3593_v49 }
 0x1d1   :  { %v1327_v45 = vpack.c.bf16 %v981_v41, %v981_v41  ;;  %v816_v8 = vadd.f32 %v815_v10, %v647_v62  ;;  %v862_v37 = vpop.f32.mrf.mxu2  ;;  %v861_v10 = vadd.f32 %v860_v19, %v692_v54  ;;  %v3617_v62 = vld [vmem:[%s4799_s3 + $0x200] sm:$0xff] }
 0x1d3   :  { %1401 = vmatmul.bf16.vlgmr.msrb.gmra.mxu2 %v1327_v45  ;;  %1462 = vmatmul.bf16.vlgmr.msrb.gmra.mxu3 %v1309_v44  ;;  %v918_v12 = vmax.f32 %v816_v8, 0.0  ;;  %v4549_v38 = vpop.f32.mrf.mxu3  ;;  %v3629_v44 = vld [vmem:[%s4799_s3 + $0x260] sm:$0xff]  ;;  %v3619_v45 = vld [vmem:[%s4799_s3 + $0x210] sm:$0xff]  ;;  %v3626_v8 = vld [vmem:[%s4799_s3 + $0x248] sm:$0xff] }
 0x1d4   :  { %1533 = vmatpush.bf16.msra.mxu2 %v3608_v21  ;;  %1615 = vmatpush.bf16.msra.mxu3 %v3614_v40  ;;  %v3630_v21 = vld [vmem:[%s4799_s3 + $0x268] sm:$0xff]  ;;  %v3620_v40 = vld [vmem:[%s4799_s3 + $0x218] sm:$0xff] }
 0x1d5   :  { %v966_v7 = vmax.f32 %v918_v12, %v934_v52  ;;  %v3640_v52 = vld [vmem:[%s4799_s3 + $0x2b8] sm:$0xff] }
 0x1d6   :  { %v648_v2 = vpop.f32.mrf.mxu0 }
 0x1d7   :  { %v817_v55 = vpop.f32.mrf.mxu1  ;;  %v649_v59 = vadd.f32 %v4451_v23, %v648_v2  ;;  %v982_v22 = vmax.f32 %v4198_v6, %v966_v7  ;;  %v3631_v6 = vld [vmem:[%s4799_s3 + $0x270] sm:$0xff]  ;;  %v3618_v2 = vld [vmem:[%s4799_s3 + $0x208] sm:$0xff] }
 0x1d8   :  { %1534 = vmatpush.bf16.msra.mxu2 %v3607_v36  ;;  %1616 = vmatpush.bf16.msra.mxu3 %v3613_v46  ;;  %v936_v46 = vmax.f32 %v861_v10, 0.0 }
 0x1d9   :  { %v818_v31 = vadd.f32 %v817_v55, %v649_v59  ;;  %v1467_v30 = vpack.c.bf16 %v982_v22, %v982_v22  ;;  %v863_v59 = vadd.f32 %v862_v37, %v694_v53 }
 0x1db   :  { %v919_v42 = vmax.f32 %v818_v31, 0.0  ;;  %v865_v31 = vpop.f32.mrf.mxu2 }
 0x1dc   :  { %1535 = vmatpush.bf16.msra.mxu2 %v3606_v57  ;;  %1617 = vmatpush.bf16.msra.mxu3 %v3612_v1  ;;  %v3628_v1 = vld [vmem:[%s4799_s3 + $0x258] sm:$0xff] }
 0x1dd   :  { %v967_v0 = vmax.f32 %v919_v42, %v935_v14  ;;  %v937_v42 = vmax.f32 %v863_v59, 0.0  ;;  %v3633_v59 = vld [vmem:[%s4799_s3 + $0x280] sm:$0xff] }
 0x1de   :  { %v651_v25 = vpop.f32.mrf.mxu0 }
 0x1df   :  { %v983_v13 = vmax.f32 %v4238_v35, %v967_v0  ;;  %v3601_v35 = vld [vmem:[%s4799_s3 + $0x180] sm:$0xff]  ;;  %v820_v32 = vpop.f32.mrf.mxu1  ;;  %v652_v49 = vadd.f32 %v4451_v23, %v651_v25  ;;  %v3638_v25 = vld [vmem:[%s4799_s3 + $0x2a8] sm:$0xff] }
 0x1e0   :  { %1536 = vmatpush.bf16.msra.mxu2 %v3605_v60  ;;  %1618 = vmatpush.bf16.msra.mxu3 %v3611_v61  ;;  %v698_v60 = vpop.f32.mrf.mxu3  ;;  %v3627_v61 = vld [vmem:[%s4799_s3 + $0x250] sm:$0xff] }
 0x1e1   :  { %v1547_v18 = vpack.c.bf16 %v983_v13, %v983_v13  ;;  %v821_v56 = vadd.f32 %v820_v32, %v652_v49  ;;  %v3646_v13 = vld [vmem:[%s4799_s3 + $0x2e8] sm:$0xff]  ;;  %v699_v19 = vadd.f32 %v4451_v23, %v698_v60  ;;  %v3637_v32 = vld [vmem:[%s4799_s3 + $0x2a0] sm:$0xff]  ;;  %v697_v49 = vadd.f32 %v4451_v23, %v4549_v38  ;;  %v3635_v38 = vld [vmem:[%s4799_s3 + $0x290] sm:$0xff] }
 0x1e3   :  { %v920_v36 = vmax.f32 %v821_v56, 0.0  ;;  %v866_v10 = vadd.f32 %v865_v31, %v697_v49 }
 0x1e4   :  { %1537 = vmatpush.bf16.msra.mxu2 %v3604_v5  ;;  %1619 = vmatpush.bf16.msra.mxu3 %v3610_v11  ;;  %v3648_v11 = vld [vmem:[%s4799_s3 + $0x2f8] sm:$0xff] }
 0x1e5   :  { %v968_v55 = vmax.f32 %v920_v36, %v936_v46  ;;  %v938_v46 = vmax.f32 %v866_v10, 0.0 }
 0x1e6   :  { %v653_v41 = vpop.f32.mrf.mxu0 }
 0x1e7   :  { %v654_v47 = vadd.f32 %v4451_v23, %v653_v41  ;;  %v822_v57 = vpop.f32.mrf.mxu1  ;;  %v984_v63 = vmax.f32 %v4254_v48, %v968_v55  ;;  %v3647_v48 = vld [vmem:[%s4799_s3 + $0x2f0] sm:$0xff] }
 0x1e8   :  { %1538 = vmatpush.bf16.msra.mxu2 %v3603_v24  ;;  %1620 = vmatpush.bf16.msra.mxu3 %v3609_v4  ;;  %v867_v24 = vpop.f32.mrf.mxu2  ;;  %v3625_v4 = vld [vmem:[%s4799_s3 + $0x240] sm:$0xff] }
 0x1e9   :  { %v823_v58 = vadd.f32 %v822_v57, %v654_v47  ;;  %v1628_v9 = vpack.c.bf16 %v984_v63, %v984_v63  ;;  %v3656_v57 = vld [vmem:[%s4799_s3 + $0x338] sm:$0xff] }
 0x1eb   :  { %1621 = vmatmul.bf16.vlgmr.msra.gmra.mxu3 %v1547_v18  ;;  %v921_v14 = vmax.f32 %v823_v58, 0.0  ;;  %v3645_v18 = vld [vmem:[%s4799_s3 + $0x2e0] sm:$0xff]  ;;  %v3655_v58 = vld [vmem:[%s4799_s3 + $0x330] sm:$0xff] }
 0x1ec   :  { %1773 = vmatpush.bf16.msrb.mxu3 %v3624_v16  ;;  %1539 = vmatpush.bf16.msra.mxu2 %v3602_v17  ;;  %v4591_v16 = vpop.f32.mrf.mxu3 }
 0x1ed   :  { %v969_v0 = vmax.f32 %v921_v14, %v937_v42 }
 0x1ee   :  { %v656_v5 = vpop.f32.mrf.mxu0 }
 0x1ef   :  { %v825_v43 = vpop.f32.mrf.mxu1  ;;  %v985_v12 = vmax.f32 %v4297_v15, %v969_v0  ;;  %v3639_v15 = vld [vmem:[%s4799_s3 + $0x2b0] sm:$0xff]  ;;  %v3652_v0 = vld [vmem:[%s4799_s3 + $0x318] sm:$0xff] }
 0x1f0   :  { %1774 = vmatpush.bf16.msrb.mxu3 %v3623_v33  ;;  %1540 = vmatpush.bf16.msra.mxu2 %v3601_v35  ;;  %v4601_v22 = vpop.f32.mrf.mxu2 }
 0x1f1   :  { %v1646_v7 = vpack.c.bf16 %v985_v12, %v985_v12 }
 0x1f3   :  { %1541 = vmatmul.bf16.vlgmr.msra.gmra.mxu2 %v1467_v30 }
 0x1f4   :  { %1712 = vmatpush.bf16.msrb.mxu2 %v3632_v27  ;;  %1775 = vmatpush.bf16.msrb.mxu3 %v3622_v29  ;;  %v868_v29 = vadd.f32 %v867_v24, %v699_v19  ;;  %v4609_v30 = vpop.f32.mrf.mxu3  ;;  %v3650_v19 = vld [vmem:[%s4799_s3 + $0x308] sm:$0xff] }
 0x1f6   :  { %v658_v17 = vpop.f32.mrf.mxu0  ;;  %v939_v37 = vmax.f32 %v868_v29, 0.0 }
 0x1f7   :  { %v659_v33 = vadd.f32 %v4451_v23, %v658_v17  ;;  %v827_v35 = vpop.f32.mrf.mxu1 }
 0x1f8   :  { %1713 = vmatpush.bf16.msrb.mxu2 %v3631_v6  ;;  %1776 = vmatpush.bf16.msrb.mxu3 %v3621_v28  ;;  %v3643_v6 = vld [vmem:[%s4799_s3 + $0x2d0] sm:$0xff]  ;;  %v657_v28 = vadd.f32 %v4451_v23, %v656_v5  ;;  %v3653_v5 = vld [vmem:[%s4799_s3 + $0x320] sm:$0xff] }
 0x1f9   :  { %v828_v27 = vadd.f32 %v827_v35, %v659_v33  ;;  %v3660_v33 = vld [vmem:[%s4799_s3 + $0x358] sm:$0xff] }
 0x1fa   :  { %v826_v56 = vadd.f32 %v825_v43, %v657_v28 }
 0x1fb   :  { %v923_v54 = vmax.f32 %v828_v27, 0.0 }
 0x1fc   :  { %1714 = vmatpush.bf16.msrb.mxu2 %v3630_v21  ;;  %1777 = vmatpush.bf16.msrb.mxu3 %v3620_v40  ;;  %v3636_v21 = vld [vmem:[%s4799_s3 + $0x298] sm:$0xff]  ;;  %v3642_v40 = vld [vmem:[%s4799_s3 + $0x2c8] sm:$0xff]  ;;  %v922_v36 = vmax.f32 %v826_v56, 0.0  ;;  %v4633_v53 = vpop.f32.mrf.mxu3 }
 0x1fd   :  { %v971_v41 = vmax.f32 %v923_v54, %v939_v37  ;;  %v3680_v37 = vld [vmem:[%s4799_s3 + $0x3f8] sm:$0xff] }
 0x1fe   :  { %v661_v60 = vpop.f32.mrf.mxu0 }
 0x1ff   :  { %v987_v47 = vmax.f32 %v4344_v51, %v971_v41  ;;  %v830_v42 = vpop.f32.mrf.mxu1 }
 0x200   :  { %1715 = vmatpush.bf16.msrb.mxu2 %v3629_v44  ;;  %1778 = vmatpush.bf16.msrb.mxu3 %v3619_v45  ;;  %v872_v44 = vpop.f32.mrf.mxu2  ;;  %v3641_v45 = vld [vmem:[%s4799_s3 + $0x2c0] sm:$0xff] }
 0x201   :  { %v1866_v55 = vpack.c.bf16 %v987_v47, %v987_v47 }
 0x204   :  { %1716 = vmatpush.bf16.msrb.mxu2 %v3628_v1  ;;  %1779 = vmatpush.bf16.msrb.mxu3 %v3618_v2  ;;  %v3634_v1 = vld [vmem:[%s4799_s3 + $0x288] sm:$0xff]  ;;  %v970_v2 = vmax.f32 %v922_v36, %v938_v46  ;;  %v4656_v63 = vpop.f32.mrf.mxu3 }
 0x205   :  { %v3678_v36 = vld [vmem:[%s4799_s3 + $0x3e8] sm:$0xff] }
 0x206   :  { %v986_v31 = vmax.f32 %v4316_v34, %v970_v2  ;;  %v3663_v34 = vld [vmem:[%s4799_s3 + $0x370] sm:$0xff]  ;;  %v709_v2 = vadd.f32 %v4451_v23, %v4656_v63  ;;  %v3669_v63 = vld [vmem:[%s4799_s3 + $0x3a0] sm:$0xff] }
 0x208   :  { %1717 = vmatpush.bf16.msrb.mxu2 %v3627_v61  ;;  %1780 = vmatpush.bf16.msrb.mxu3 %v3617_v62  ;;  %v4644_v51 = vpop.f32.mrf.mxu2  ;;  %v3664_v61 = vld [vmem:[%s4799_s3 + $0x378] sm:$0xff]  ;;  %v3654_v62 = vld [vmem:[%s4799_s3 + $0x328] sm:$0xff]  ;;  %v1786_v14 = vpack.c.bf16 %v986_v31, %v986_v31 }
 0x20b   :  { %1781 = vmatmul.bf16.vlgmr.msrb.gmra.mxu3 %v1628_v9  ;;  %v3662_v9 = vld [vmem:[%s4799_s3 + $0x368] sm:$0xff] }
 0x20c   :  { %1932 = vmatpush.bf16.msra.mxu3 %v3648_v11  ;;  %1718 = vmatpush.bf16.msrb.mxu2 %v3626_v8  ;;  %v662_v11 = vadd.f32 %v4451_v23, %v661_v60  ;;  %v702_v8 = vadd.f32 %v4451_v23, %v4591_v16 }
 0x20e   :  { %v831_v43 = vadd.f32 %v830_v42, %v662_v11  ;;  %v707_v11 = vadd.f32 %v4451_v23, %v4633_v53  ;;  %v3673_v53 = vld [vmem:[%s4799_s3 + $0x3c0] sm:$0xff] }
 0x210   :  { %1933 = vmatpush.bf16.msra.mxu3 %v3647_v48  ;;  %1719 = vmatpush.bf16.msrb.mxu2 %v3625_v4  ;;  %v871_v48 = vadd.f32 %v4601_v22, %v702_v8  ;;  %v4674_v24 = vpop.f32.mrf.mxu2  ;;  %v663_v4 = vpop.f32.mrf.mxu0  ;;  %v924_v16 = vmax.f32 %v831_v43, 0.0 }
 0x211   :  { %v878_v42 = vadd.f32 %v4674_v24, %v709_v2  ;;  %v3674_v24 = vld [vmem:[%s4799_s3 + $0x3c8] sm:$0xff] }
 0x212   :  { %v940_v17 = vmax.f32 %v871_v48, 0.0  ;;  %v3668_v48 = vld [vmem:[%s4799_s3 + $0x398] sm:$0xff] }
 0x213   :  { %1720 = vmatmul.bf16.vlgmr.msrb.gmra.mxu2 %v1646_v7  ;;  %v664_v7 = vadd.f32 %v4451_v23, %v663_v4 }
 0x214   :  { %1852 = vmatpush.bf16.msra.mxu2 %v3640_v52  ;;  %1934 = vmatpush.bf16.msra.mxu3 %v3646_v13  ;;  %v3661_v52 = vld [vmem:[%s4799_s3 + $0x360] sm:$0xff]  ;;  %v3651_v13 = vld [vmem:[%s4799_s3 + $0x310] sm:$0xff]  ;;  %v972_v35 = vmax.f32 %v924_v16, %v940_v17 }
 0x218   :  { %1853 = vmatpush.bf16.msra.mxu2 %v3639_v15  ;;  %1935 = vmatpush.bf16.msra.mxu3 %v3645_v18  ;;  %v704_v15 = vadd.f32 %v4451_v23, %v4609_v30  ;;  %v832_v18 = vpop.f32.mrf.mxu1  ;;  %v3659_v30 = vld [vmem:[%s4799_s3 + $0x350] sm:$0xff]  ;;  %v666_v54 = vpop.f32.mrf.mxu0 }
 0x219   :  { %v833_v22 = vadd.f32 %v832_v18, %v664_v7 }
 0x21b   :  { %v925_v28 = vmax.f32 %v833_v22, 0.0 }
 0x21c   :  { %1854 = vmatpush.bf16.msra.mxu2 %v3638_v25  ;;  %1936 = vmatpush.bf16.msra.mxu3 %v3644_v26  ;;  %v873_v25 = vadd.f32 %v872_v44, %v704_v15  ;;  %v3657_v44 = vld [vmem:[%s4799_s3 + $0x340] sm:$0xff] }
 0x21e   :  { %v941_v49 = vmax.f32 %v873_v25, 0.0 }
 0x220   :  { %1855 = vmatpush.bf16.msra.mxu2 %v3637_v32  ;;  %1937 = vmatpush.bf16.msra.mxu3 %v3643_v6  ;;  %v3649_v32 = vld [vmem:[%s4799_s3 + $0x300] sm:$0xff]  ;;  %v988_v6 = vmax.f32 %v4360_v3, %v972_v35  ;;  %v973_v56 = vmax.f32 %v925_v28, %v941_v49  ;;  %v835_v10 = vpop.f32.mrf.mxu1  ;;  %v3679_v3 = vld [vmem:[%s4799_s3 + $0x3f0] sm:$0xff]  ;;  %v668_v46 = vpop.f32.mrf.mxu0 }
 0x221   :  { %v3665_v35 = vld [vmem:[%s4799_s3 + $0x380] sm:$0xff] }
 0x224   :  { %1856 = vmatpush.bf16.msra.mxu2 %v3636_v21  ;;  %1938 = vmatpush.bf16.msra.mxu3 %v3642_v40  ;;  %v3658_v21 = vld [vmem:[%s4799_s3 + $0x348] sm:$0xff]  ;;  %v1946_v40 = vpack.c.bf16 %v988_v6, %v988_v6 }
 0x228   :  { %1857 = vmatpush.bf16.msra.mxu2 %v3635_v38  ;;  %1939 = vmatpush.bf16.msra.mxu3 %v3641_v45  ;;  %v989_v38 = vmax.f32 %v4382_v20, %v973_v56  ;;  %v3672_v45 = vld [vmem:[%s4799_s3 + $0x3b8] sm:$0xff]  ;;  %v3677_v20 = vld [vmem:[%s4799_s3 + $0x3e0] sm:$0xff] }
 0x22a   :  { %v1964_v47 = vpack.c.bf16 %v989_v38, %v989_v38  ;;  %v3688_v38 = vld [vmem:[%s4802_s5 + $0x38] sm:$0xff] }
 0x22b   :  { %1940 = vmatmul.bf16.vlgmr.msra.gmra.mxu3 %v1866_v55 }
 0x22c   :  { %2091 = vmatpush.bf16.msrb.mxu3 %v3656_v57  ;;  %1858 = vmatpush.bf16.msra.mxu2 %v3634_v1  ;;  %v3671_v57 = vld [vmem:[%s4799_s3 + $0x3b0] sm:$0xff]  ;;  %v669_v1 = vadd.f32 %v4451_v23, %v668_v46  ;;  %v3686_v46 = vld [vmem:[%s4802_s5 + $0x28] sm:$0xff] }
 0x22e   :  { %v1145_v12 = vpop.f32.mrf.mxu3 }
 0x230   :  { %2092 = vmatpush.bf16.msrb.mxu3 %v3655_v58  ;;  %1859 = vmatpush.bf16.msra.mxu2 %v3633_v59  ;;  %v837_v59 = vpop.f32.mrf.mxu1 }
 0x233   :  { %1860 = vmatmul.bf16.vlgmr.msra.gmra.mxu2 %v1786_v14  ;;  %v838_v14 = vadd.f32 %v837_v59, %v669_v1  ;;  %v3683_v1 = vld [vmem:[%s4802_s5 + $0x10] sm:$0xff]  ;;  %v3681_v59 = vld [vmem:[%s4802_s5] sm:$0xff] }
 0x234   :  { %2030 = vmatpush.bf16.msrb.mxu2 %v3664_v61  ;;  %2093 = vmatpush.bf16.msrb.mxu3 %v3654_v62  ;;  %v3670_v61 = vld [vmem:[%s4799_s3 + $0x3a8] sm:$0xff]  ;;  %v3676_v62 = vld [vmem:[%s4799_s3 + $0x3d8] sm:$0xff] }
 0x235   :  { %v927_v8 = vmax.f32 %v838_v14, 0.0 }
 0x236   :  { %v1084_v26 = vpop.f32.mrf.mxu2  ;;  %v1147_v27 = vpop.f32.mrf.mxu3 }
 0x237   :  { %v1146_v29 = vadd.f32 %v1145_v12, %v1084_v26  ;;  %v876_v12 = vadd.f32 %v4644_v51, %v707_v11  ;;  %v3666_v51 = vld [vmem:[%s4799_s3 + $0x388] sm:$0xff] }
 0x238   :  { %2031 = vmatpush.bf16.msrb.mxu2 %v3663_v34  ;;  %2094 = vmatpush.bf16.msrb.mxu3 %v3653_v5  ;;  %v3675_v34 = vld [vmem:[%s4799_s3 + $0x3d0] sm:$0xff]  ;;  %v667_v5 = vadd.f32 %v4451_v23, %v666_v54 }
 0x239   :  { %v3667_v23 = vld [vmem:[%s4799_s3 + $0x390] sm:$0xff]  ;;  %v942_v16 = vmax.f32 %v876_v12, 0.0 }
 0x23a   :  { %v836_v4 = vadd.f32 %v835_v10, %v667_v5  ;;  %v3706_v5 = vld [vmem:[%s4800_s4] ss:$0 sm:$0xff] }
 0x23c   :  { %2032 = vmatpush.bf16.msrb.mxu2 %v3662_v9  ;;  %2095 = vmatpush.bf16.msrb.mxu3 %v3652_v0  ;;  %v943_v9 = vmax.f32 %v878_v42, 0.0 }
 0x23e   :  { %v1086_v41 = vpop.f32.mrf.mxu2 }
 0x240   :  { %2033 = vmatpush.bf16.msrb.mxu2 %v3661_v52  ;;  %2096 = vmatpush.bf16.msrb.mxu3 %v3651_v13  ;;  %v975_v52 = vmax.f32 %v927_v8, %v943_v9  ;;  %v926_v13 = vmax.f32 %v836_v4, 0.0 }
 0x242   :  { %v991_v17 = vmax.f32 %v4397_v50, %v975_v52 }
 0x244   :  { %2034 = vmatpush.bf16.msrb.mxu2 %v3660_v33  ;;  %2097 = vmatpush.bf16.msrb.mxu3 %v3650_v19  ;;  %v974_v33 = vmax.f32 %v926_v13, %v942_v16  ;;  %v2184_v19 = vpack.c.bf16 %v991_v17, %v991_v17 }
 0x246   :  { %v1224_v55 = vpop.f32.mrf.mxu2  ;;  %v1304_v58 = vpop.f32.mrf.mxu3  ;;  %v990_v22 = vmax.f32 %v4392_v39, %v974_v33 }
 0x247   :  { %v1228_v31 = vadd.f32 %v1224_v55, %v1146_v29 }
 0x248   :  { %2035 = vmatpush.bf16.msrb.mxu2 %v3659_v30  ;;  %2098 = vmatpush.bf16.msrb.mxu3 %v3649_v32  ;;  %v2104_v26 = vpack.c.bf16 %v990_v22, %v990_v22 }
 0x249   :  { %v1308_v60 = vadd.f32 %v1304_v58, %v1228_v31  ;;  %v3682_v58 = vld [vmem:[%s4802_s5 + $0x8] sm:$0xff] }
 0x24b   :  { %2099 = vmatmul.bf16.vlgmr.msrb.gmra.mxu3 %v1946_v40 }
 0x24c   :  { %2250 = vmatpush.bf16.msra.mxu3 %v3680_v37  ;;  %2036 = vmatpush.bf16.msrb.mxu2 %v3658_v21 }
 0x24e   :  { %v1226_v0 = vpop.f32.mrf.mxu2  ;;  %v1306_v43 = vpop.f32.mrf.mxu3 }
 0x250   :  { %2251 = vmatpush.bf16.msra.mxu3 %v3679_v3  ;;  %2037 = vmatpush.bf16.msrb.mxu2 %v3657_v44 }
 0x253   :  { %2038 = vmatmul.bf16.vlgmr.msrb.gmra.mxu2 %v1964_v47  ;;  %v3685_v47 = vld [vmem:[%s4802_s5 + $0x20] sm:$0xff] }
 0x254   :  { %2170 = vmatpush.bf16.msra.mxu2 %v3672_v45  ;;  %2252 = vmatpush.bf16.msra.mxu3 %v3678_v36  ;;  %v3687_v45 = vld [vmem:[%s4802_s5 + $0x30] sm:$0xff] }
 0x256   :  { %v1402_v7 = vpop.f32.mrf.mxu2  ;;  %v1463_v15 = vpop.f32.mrf.mxu3 }
 0x257   :  { %v1464_v18 = vadd.f32 %v1463_v15, %v1402_v7 }
 0x258   :  { %2171 = vmatpush.bf16.msra.mxu2 %v3671_v57  ;;  %2253 = vmatpush.bf16.msra.mxu3 %v3677_v20  ;;  %v3684_v20 = vld [vmem:[%s4802_s5 + $0x18] sm:$0xff] }
 0x25c   :  { %2172 = vmatpush.bf16.msra.mxu2 %v3670_v61  ;;  %2254 = vmatpush.bf16.msra.mxu3 %v3676_v62 }
 0x25e   :  { %v1404_v50 = vpop.f32.mrf.mxu2  ;;  %v1465_v25 = vpop.f32.mrf.mxu3 }
 0x260   :  { %2173 = vmatpush.bf16.msra.mxu2 %v3669_v63  ;;  %2255 = vmatpush.bf16.msra.mxu3 %v3675_v34 }
 0x264   :  { %2174 = vmatpush.bf16.msra.mxu2 %v3668_v48  ;;  %2256 = vmatpush.bf16.msra.mxu3 %v3674_v24  ;;  %v3707_v48 = vld [vmem:[%s4801_s6] ss:$0 sm:$0xff] }
 0x268   :  { %2175 = vmatpush.bf16.msra.mxu2 %v3667_v23  ;;  %2257 = vmatpush.bf16.msra.mxu3 %v3673_v53 }
 0x26b   :  { %2258 = vmatmul.bf16.vlgmr.msra.gmra.mxu3 %v2184_v19 }
 0x26c   :  { %2176 = vmatpush.bf16.msra.mxu2 %v3666_v51 }
 0x26e   :  { %v1622_v27 = vpop.f32.mrf.mxu3 }
 0x270   :  { %2177 = vmatpush.bf16.msra.mxu2 %v3665_v35 }
 0x273   :  { %2178 = vmatmul.bf16.vlgmr.msra.gmra.mxu2 %v2104_v26 }
 0x274   :  { %2341 = vmatpush.bf16.msrb.mxu2 %v3688_v38 }
 0x276   :  { %v1542_v29 = vpop.f32.mrf.mxu2  ;;  %v1624_v30 = vpop.f32.mrf.mxu3 }
 0x277   :  { %v1546_v32 = vadd.f32 %v1542_v29, %v1464_v18 }
 0x278   :  { %2342 = vmatpush.bf16.msrb.mxu2 %v3687_v45 }
 0x279   :  { %v1626_v6 = vadd.f32 %v1622_v27, %v1546_v32 }
 0x27b   :  { %v1627_v28 = vadd.f32 %v1626_v6, %v1308_v60 }
 0x27c   :  { %2343 = vmatpush.bf16.msrb.mxu2 %v3686_v46 }
 0x27e   :  { %v1544_v49 = vpop.f32.mrf.mxu2 }
 0x280   :  { %2344 = vmatpush.bf16.msrb.mxu2 %v3685_v47 }
 0x284   :  { %2345 = vmatpush.bf16.msrb.mxu2 %v3684_v20 }
 0x288   :  { %2346 = vmatpush.bf16.msrb.mxu2 %v3683_v1 }
 0x28c   :  { %2347 = vmatpush.bf16.msrb.mxu2 %v3682_v58 }
 0x28e   :  { %v1782_v54 = vpop.f32.mrf.mxu3 }
 0x290   :  { %2348 = vmatpush.bf16.msrb.mxu2 %v3681_v59 }
 0x296   :  { %v1721_v37 = vpop.f32.mrf.mxu2  ;;  %v1784_v21 = vpop.f32.mrf.mxu3 }
 0x297   :  { %v1783_v40 = vadd.f32 %v1782_v54, %v1721_v37 }
 0x29e   :  { %v1723_v56 = vpop.f32.mrf.mxu2 }
 0x2ae   :  { %v1941_v10 = vpop.f32.mrf.mxu3 }
 0x2b6   :  { %v1861_v3 = vpop.f32.mrf.mxu2  ;;  %v1943_v39 = vpop.f32.mrf.mxu3 }
 0x2b7   :  { %v1865_v41 = vadd.f32 %v1861_v3, %v1783_v40 }
 0x2b9   :  { %v1945_v44 = vadd.f32 %v1941_v10, %v1865_v41 }
 0x2be   :  { %v1863_v36 = vpop.f32.mrf.mxu2 }
 0x2ce   :  { %v2100_v57 = vpop.f32.mrf.mxu3 }
 0x2d6   :  { %v2039_v2 = vpop.f32.mrf.mxu2  ;;  %v2102_v55 = vpop.f32.mrf.mxu3 }
 0x2d7   :  { %v2101_v61 = vadd.f32 %v2100_v57, %v2039_v2 }
 0x2de   :  { %v2041_v31 = vpop.f32.mrf.mxu2 }
 0x2ee   :  { %v2259_v60 = vpop.f32.mrf.mxu3 }
 0x2f6   :  { %v2179_v62 = vpop.f32.mrf.mxu2  ;;  %v2261_v14 = vpop.f32.mrf.mxu3 }
 0x2f7   :  { %v2183_v42 = vadd.f32 %v2179_v62, %v2101_v61 }
 0x2f9   :  { %v2263_v63 = vadd.f32 %v2259_v60, %v2183_v42 }
 0x2fb   :  { %v2264_v34 = vadd.f32 %v2263_v63, %v1945_v44 }
 0x2fd   :  { %v2265_v11 = vadd.f32 %v2264_v34, %v1627_v28 }
 0x2fe   :  { %v2181_v8 = vpop.f32.mrf.mxu2 }
 0x2ff   :  { %v2270_v9 = vadd.f32 %v3706_v5, %v2265_v11 }
 0x301   :  { %v2271_v0 = vmax.f32 %v2270_v9, 0.0 }
 0x303   :  { %v2272_v43 = vpack.c.bf16 %v2271_v0, %v2271_v0 }
 0x305   :  { %2349 = vmatmul.bf16.vlgmr.msrb.gmra.mxu2 %v2272_v43 }
 0x388   :  { %v2350_v24 = vpop.f32.mrf.mxu2 }
 0x389   :  { %v2351_v4 = vadd.f32 %v3707_v48, %v2350_v24 }
 0x38b   :  { %2354 = vmax.xlane.f32.xlu0 %v2351_v4 }
 0x390   :  { %v2352_v12 = vpop.f32.mrf.mxu2 }
 0x3fe   :  { %v2355_v52 = vpop.xlane.xlu0 %2354 }
 0x3ff   :  { %v2356_v23 = vsub.f32 %v2351_v4, %v2355_v52 }
 0x401   :  { %v2357_v53 = vmul.f32 1.442695, %v2356_v23 }
 0x403   :  { %3708 = vpow2.f32 %v2357_v53 }
 0x409   :  { %v3709_v13 = vpop.eup %3708 }
 0x40a   :  { %2359 = vadd.xlane.f32.xlu0 %v3709_v13 }
 0x47d   :  { %v2360_v16 = vpop.xlane.xlu0 %2359 }
 0x47e   :  { %3710 = vlog2.f32 %v2360_v16 }
 0x484   :  { %v3711_v17 = vpop.eup %3710 }
 0x485   :  { %v2362_v7 = vmul.f32 0.6931472, %v3711_v17 }
 0x487   :  { %v2363_v15 = vsub.f32 %v2356_v23, %v2362_v7 }
 0x489   :  { %2364 = vst [vmem:[%s4803_s7] sm:$0xff] %v2363_v15 }

</bundles_post_ra>
